<compile_context>
chip_gen: v7x
topology: tpu7x:2x2x1
jax: 0.10.0
libtpu: 0.0.40
codegen_flags: <defaults>
</compile_context>

<pallas_src>
import functools
import math

import jax
import jax.numpy as jnp
from jax.experimental import pallas as pl
from jax.experimental.pallas import tpu as pltpu


def _round_up(x, m):
    return (x + m - 1) // m * m


def make_siren_kernel(num_linear, do_skip):
    """Builds the kernel body.

    num_linear = hidden_num + 1 total nn.Linear layers.
    Weights arrive pre-transposed to (in, out) with w0 already folded in for the
    non-last layers; biases arrive as (1, out) rows (w0-folded likewise).
    """

    def kernel(x_ref, *refs):
        wb_refs, out_ref = refs[:-1], refs[-1]
        h = x_ref[...]                                   # (TILE, in_dim) f32
        for li in range(num_linear):
            w = wb_refs[2 * li][...]                     # (in_f, out_f)
            b = wb_refs[2 * li + 1][...]                 # (1, out_f)
            z = jnp.dot(h, w, preferred_element_type=jnp.float32) + b
            if li == num_linear - 1:
                # is_last layer: linear only; SIREN.forward then applies tanh.
                # tanh(squeeze(z)) == squeeze(tanh(z)), so tanh fuses here.
                out_ref[...] = jnp.tanh(z).astype(out_ref.dtype)
            else:
                a = jnp.sin(z)                           # w0 already folded into w, b
                # mirrors the do_skip branch of SIREN.forward:
                #   middle layer at enumerate index i gets identity skip iff i % 2 == 1
                if do_skip and 0 < li < num_linear - 1 and (li % 2 == 1):
                    h = a + h
                else:
                    h = a

    return kernel


def make_siren_params(key, in_dim, out_dim, hidden_num, hidden_dim, scale):
    """PyTorch-layout params mimicking SirenLayer.init_weights."""
    dims = [in_dim] + hidden_num * [hidden_dim] + [out_dim]
    n_layers = len(dims) - 1                             # hidden_num + 1
    keys = jax.random.split(key, n_layers)
    layers = []
    for li in range(n_layers):
        in_f, out_f = dims[li], dims[li + 1]
        is_first = li == 0
        w0 = float(scale) if is_first else 30.0
        bound = (1.0 / in_f) if is_first else (math.sqrt(6.0 / in_f) / w0)
        kw, kb = jax.random.split(keys[li])
        w = jax.random.uniform(kw, (out_f, in_f), jnp.float32, -bound, bound)  # torch (out, in)
        b = jax.random.uniform(kb, (out_f,), jnp.float32, -3.0, 3.0)
        layers.append(dict(w=w, b=b, w0=w0))
    return layers


@functools.partial(jax.jit, static_argnames=("do_skip", "tile_n"))
def siren_forward(x, layers, *, do_skip=True, tile_n=1024):
    """x: (N, in_dim) float32.  Returns tanh(squeeze(final_linear)) like SIREN.forward."""
    N, in_dim = x.shape
    n_layers = len(layers)
    out_dim = layers[-1]["w"].shape[0]

    # --- glue: fold w0 into non-last weights/biases, transpose to (in, out) ---
    flat = []
    for li, lyr in enumerate(layers):
        w = lyr["w"].T                                   # (in_f, out_f)
        b = lyr["b"][None, :]                            # (1, out_f)
        if li != n_layers - 1:
            w = lyr["w0"] * w
            b = lyr["w0"] * b
        flat += [w, b]

    # --- batch tiling ---
    tile = min(tile_n, _round_up(N, 8))
    tile = _round_up(tile, 8)
    n_pad = _round_up(N, tile)
    x_p = x if n_pad == N else jnp.pad(x, ((0, n_pad - N), (0, 0)))
    grid = (n_pad // tile,)

    in_specs = [pl.BlockSpec((tile, in_dim), lambda i: (i, 0))]
    for arr in flat:
        # full-array block, constant index map -> weight stays resident in VMEM
        in_specs.append(pl.BlockSpec(arr.shape, lambda i: (0, 0)))
    out_spec = pl.BlockSpec((tile, out_dim), lambda i: (i, 0))

    # --- advisory cost estimate ---
    flops = 0
    transcendentals = 0
    for lyr in layers:
        out_f, in_f = lyr["w"].shape
        flops += 2 * n_pad * in_f * out_f
        transcendentals += n_pad * out_f                 # sin per hidden layer, tanh on final
    weight_elems = sum(int(a.size) for a in flat)
    bytes_accessed = 4 * (n_pad * in_dim + n_pad * out_dim + weight_elems)

    out = pl.pallas_call(
        make_siren_kernel(n_layers, do_skip),
        out_shape=jax.ShapeDtypeStruct((n_pad, out_dim), jnp.float32),
        grid=grid,
        in_specs=in_specs,
        out_specs=out_spec,
        compiler_params=pltpu.CompilerParams(dimension_semantics=("parallel",)),
        cost_estimate=pl.CostEstimate(
            flops=int(flops),
            transcendentals=int(transcendentals),
            bytes_accessed=int(bytes_accessed),
        ),
    )(x_p, *flat)

    out = out[:N]
    # torch.squeeze: drop all size-1 dims (out_dim == 1 -> shape (N,))
    return jnp.squeeze(out)


def siren_reference(x, layers, do_skip):
    """Pure-JAX reference replicating the PyTorch SIREN.forward exactly."""
    n_layers = len(layers)
    h = x
    out = None
    for i, lyr in enumerate(layers):
        z = h @ lyr["w"].T + lyr["b"]
        is_last = i == n_layers - 1
        if is_last:
            out = z
        else:
            a = jnp.sin(lyr["w0"] * z)
            if do_skip and i > 0:
                h = a + h if i % 2 == 1 else a
            else:
                h = a
    return jnp.tanh(jnp.squeeze(out))


if __name__ == "__main__":
    key = jax.random.PRNGKey(0)
    k_param, k_x = jax.random.split(key)

    # small SIREN: 2-D coords -> scalar field
    in_dim, out_dim = 2, 1
    hidden_num, hidden_dim = 3, 64
    scale = 30.0          # args.scale (w0 of the first layer)
    do_skip = True        # args.siren_skip

    layers = make_siren_params(k_param, in_dim, out_dim, hidden_num, hidden_dim, scale)

    batch = 256           # e.g. a 16x16 coordinate grid
    x = jax.random.uniform(k_x, (batch, in_dim), jnp.float32, -1.0, 1.0)

    out = siren_forward(x, layers, do_skip=do_skip, tile_n=128)  # grid = (2,)
    jax.block_until_ready(out)

    ref = siren_reference(x, layers, do_skip)
    assert out.shape == (batch,), out.shape
    assert jnp.allclose(out, ref, atol=5e-4, rtol=5e-4), float(jnp.max(jnp.abs(out - ref)))

    # also exercise the non-skip path and default tile size
    out2 = siren_forward(x, layers, do_skip=False)
    jax.block_until_ready(out2)
    ref2 = siren_reference(x, layers, False)
    assert jnp.allclose(out2, ref2, atol=5e-4, rtol=5e-4), float(jnp.max(jnp.abs(out2 - ref2)))

    print("KERNEL_OK")
</pallas_src>

<mosaic_0001>
module attributes {stable_mosaic.version = 11 : i64} {
  func.func @kernel(%arg0: i32, %arg1: memref<128x2xf32, #tpu.memory_space<vmem>>, %arg2: memref<2x64xf32, #tpu.memory_space<vmem>>, %arg3: memref<1x64xf32, #tpu.memory_space<vmem>>, %arg4: memref<64x64xf32, #tpu.memory_space<vmem>>, %arg5: memref<1x64xf32, #tpu.memory_space<vmem>>, %arg6: memref<64x64xf32, #tpu.memory_space<vmem>>, %arg7: memref<1x64xf32, #tpu.memory_space<vmem>>, %arg8: memref<64x1xf32, #tpu.memory_space<vmem>>, %arg9: memref<1x1xf32, #tpu.memory_space<vmem>>, %arg10: memref<128x1xf32, #tpu.memory_space<vmem>>) attributes {dimension_semantics = [#tpu.dimension_semantics<parallel>], iteration_bounds = array<i64: 2>, scalar_prefetch = 0 : i64, scratch_operands = 0 : i64, tpu.core_type = #tpu.core_type<tc>, window_params = [{transform_indices = @transform_0, window_bounds = array<i64: 128, 2>}, {pipeline_mode = #tpu.pipeline_mode<synchronous>, transform_indices = @transform_1, window_bounds = array<i64: 2, 64>}, {pipeline_mode = #tpu.pipeline_mode<synchronous>, transform_indices = @transform_2, window_bounds = array<i64: 1, 64>}, {pipeline_mode = #tpu.pipeline_mode<synchronous>, transform_indices = @transform_3, window_bounds = array<i64: 64, 64>}, {pipeline_mode = #tpu.pipeline_mode<synchronous>, transform_indices = @transform_4, window_bounds = array<i64: 1, 64>}, {pipeline_mode = #tpu.pipeline_mode<synchronous>, transform_indices = @transform_5, window_bounds = array<i64: 64, 64>}, {pipeline_mode = #tpu.pipeline_mode<synchronous>, transform_indices = @transform_6, window_bounds = array<i64: 1, 64>}, {pipeline_mode = #tpu.pipeline_mode<synchronous>, transform_indices = @transform_7, window_bounds = array<i64: 64, 1>}, {pipeline_mode = #tpu.pipeline_mode<synchronous>, transform_indices = @transform_8, window_bounds = array<i64: 1, 1>}, {transform_indices = @transform_9, window_bounds = array<i64: 128, 1>}]} {
    %c0 = arith.constant 0 : index
    %c0_0 = arith.constant 0 : index
    %0 = vector.load %arg1[%c0, %c0_0] : memref<128x2xf32, #tpu.memory_space<vmem>>, vector<128x2xf32>
    %c0_1 = arith.constant 0 : index
    %c0_2 = arith.constant 0 : index
    %1 = vector.load %arg2[%c0_1, %c0_2] : memref<2x64xf32, #tpu.memory_space<vmem>>, vector<2x64xf32>
    %c0_3 = arith.constant 0 : index
    %c0_4 = arith.constant 0 : index
    %2 = vector.load %arg3[%c0_3, %c0_4] : memref<1x64xf32, #tpu.memory_space<vmem>>, vector<1x64xf32>
    %cst = arith.constant dense<0.000000e+00> : vector<128x64xf32>
    %3 = tpu.matmul %0, %1, %cst {dimension_numbers = #tpu.dot_dimension_numbers<[1], [0], [0], [1], [0, 0, 1, 1], [], []>} : vector<128x2xf32>, vector<2x64xf32>, vector<128x64xf32> -> vector<128x64xf32>
    %4 = vector.broadcast %2 : vector<1x64xf32> to vector<128x64xf32>
    %5 = arith.addf %3, %4 : vector<128x64xf32>
    %6 = math.sin %5 : vector<128x64xf32>
    %c0_5 = arith.constant 0 : index
    %c0_6 = arith.constant 0 : index
    %7 = vector.load %arg4[%c0_5, %c0_6] : memref<64x64xf32, #tpu.memory_space<vmem>>, vector<64x64xf32>
    %c0_7 = arith.constant 0 : index
    %c0_8 = arith.constant 0 : index
    %8 = vector.load %arg5[%c0_7, %c0_8] : memref<1x64xf32, #tpu.memory_space<vmem>>, vector<1x64xf32>
    %cst_9 = arith.constant dense<0.000000e+00> : vector<128x64xf32>
    %9 = tpu.matmul %6, %7, %cst_9 {dimension_numbers = #tpu.dot_dimension_numbers<[1], [0], [0], [1], [0, 0, 1, 1], [], []>} : vector<128x64xf32>, vector<64x64xf32>, vector<128x64xf32> -> vector<128x64xf32>
    %10 = vector.broadcast %8 : vector<1x64xf32> to vector<128x64xf32>
    %11 = arith.addf %9, %10 : vector<128x64xf32>
    %12 = math.sin %11 : vector<128x64xf32>
    %13 = arith.addf %12, %6 : vector<128x64xf32>
    %c0_10 = arith.constant 0 : index
    %c0_11 = arith.constant 0 : index
    %14 = vector.load %arg6[%c0_10, %c0_11] : memref<64x64xf32, #tpu.memory_space<vmem>>, vector<64x64xf32>
    %c0_12 = arith.constant 0 : index
    %c0_13 = arith.constant 0 : index
    %15 = vector.load %arg7[%c0_12, %c0_13] : memref<1x64xf32, #tpu.memory_space<vmem>>, vector<1x64xf32>
    %cst_14 = arith.constant dense<0.000000e+00> : vector<128x64xf32>
    %16 = tpu.matmul %13, %14, %cst_14 {dimension_numbers = #tpu.dot_dimension_numbers<[1], [0], [0], [1], [0, 0, 1, 1], [], []>} : vector<128x64xf32>, vector<64x64xf32>, vector<128x64xf32> -> vector<128x64xf32>
    %17 = vector.broadcast %15 : vector<1x64xf32> to vector<128x64xf32>
    %18 = arith.addf %16, %17 : vector<128x64xf32>
    %19 = math.sin %18 : vector<128x64xf32>
    %c0_15 = arith.constant 0 : index
    %c0_16 = arith.constant 0 : index
    %20 = vector.load %arg8[%c0_15, %c0_16] : memref<64x1xf32, #tpu.memory_space<vmem>>, vector<64x1xf32>
    %c0_17 = arith.constant 0 : index
    %c0_18 = arith.constant 0 : index
    %21 = vector.load %arg9[%c0_17, %c0_18] : memref<1x1xf32, #tpu.memory_space<vmem>>, vector<1x1xf32>
    %cst_19 = arith.constant dense<0.000000e+00> : vector<128x1xf32>
    %22 = tpu.matmul %19, %20, %cst_19 {dimension_numbers = #tpu.dot_dimension_numbers<[1], [0], [0], [1], [0, 0, 1, 1], [], []>} : vector<128x64xf32>, vector<64x1xf32>, vector<128x1xf32> -> vector<128x1xf32>
    %23 = vector.broadcast %21 : vector<1x1xf32> to vector<128x1xf32>
    %24 = arith.addf %22, %23 : vector<128x1xf32>
    %25 = math.tanh %24 : vector<128x1xf32>
    %c0_20 = arith.constant 0 : index
    %c0_21 = arith.constant 0 : index
    %26 = vector.load %arg10[%c0_20, %c0_21] : memref<128x1xf32, #tpu.memory_space<vmem>>, vector<128x1xf32>
    tpu.vector_store %arg10[%c0_20, %c0_21], %25 {strides = array<i32>} : memref<128x1xf32, #tpu.memory_space<vmem>>, vector<128x1xf32>,
    return
  }
  func.func @transform_0(%arg0: i32) -> (i32, i32) {
    %c0_i32 = arith.constant 0 : i32
    %c0_i32_0 = arith.constant 0 : i32
    return %arg0, %c0_i32 : i32, i32
  }
  func.func @transform_1(%arg0: i32) -> (i32, i32) {
    %c0_i32 = arith.constant 0 : i32
    %c0_i32_0 = arith.constant 0 : i32
    %c0_i32_1 = arith.constant 0 : i32
    return %c0_i32, %c0_i32_0 : i32, i32
  }
  func.func @transform_2(%arg0: i32) -> (i32, i32) {
    %c0_i32 = arith.constant 0 : i32
    %c0_i32_0 = arith.constant 0 : i32
    %c0_i32_1 = arith.constant 0 : i32
    return %c0_i32, %c0_i32_0 : i32, i32
  }
  func.func @transform_3(%arg0: i32) -> (i32, i32) {
    %c0_i32 = arith.constant 0 : i32
    %c0_i32_0 = arith.constant 0 : i32
    %c0_i32_1 = arith.constant 0 : i32
    return %c0_i32, %c0_i32_0 : i32, i32
  }
  func.func @transform_4(%arg0: i32) -> (i32, i32) {
    %c0_i32 = arith.constant 0 : i32
    %c0_i32_0 = arith.constant 0 : i32
    %c0_i32_1 = arith.constant 0 : i32
    return %c0_i32, %c0_i32_0 : i32, i32
  }
  func.func @transform_5(%arg0: i32) -> (i32, i32) {
    %c0_i32 = arith.constant 0 : i32
    %c0_i32_0 = arith.constant 0 : i32
    %c0_i32_1 = arith.constant 0 : i32
    return %c0_i32, %c0_i32_0 : i32, i32
  }
  func.func @transform_6(%arg0: i32) -> (i32, i32) {
    %c0_i32 = arith.constant 0 : i32
    %c0_i32_0 = arith.constant 0 : i32
    %c0_i32_1 = arith.constant 0 : i32
    return %c0_i32, %c0_i32_0 : i32, i32
  }
  func.func @transform_7(%arg0: i32) -> (i32, i32) {
    %c0_i32 = arith.constant 0 : i32
    %c0_i32_0 = arith.constant 0 : i32
    %c0_i32_1 = arith.constant 0 : i32
    return %c0_i32, %c0_i32_0 : i32, i32
  }
  func.func @transform_8(%arg0: i32) -> (i32, i32) {
    %c0_i32 = arith.constant 0 : i32
    %c0_i32_0 = arith.constant 0 : i32
    %c0_i32_1 = arith.constant 0 : i32
    return %c0_i32, %c0_i32_0 : i32, i32
  }
  func.func @transform_9(%arg0: i32) -> (i32, i32) {
    %c0_i32 = arith.constant 0 : i32
    %c0_i32_0 = arith.constant 0 : i32
    return %arg0, %c0_i32 : i32, i32
  }
}

</mosaic_0001>

<bundles_post_ra>
// kernel: siren_forward.1
= control target key start
LH: loop header
LB: loop body
LE: loop exit
PB: predicated region body
PF: predicated region fallthrough
CT: control target
= control target key end

     0   :  { %s7346_s11 = smov 0   ;;  %s12119_s0 = inlined_call_operand.vmem [shape: f32[256,2], index: 0, kind: input, shape index: {}]   ;;  %s12120_s1 = inlined_call_operand.vmem [shape: f32[2,64], index: 1, kind: input, shape index: {}]   ;;  %s12121_s2 = inlined_call_operand.vmem [shape: f32[1,64], index: 2, kind: input, shape index: {}]   ;;  %s12122_s3 = inlined_call_operand.vmem [shape: f32[64,64], index: 3, kind: input, shape index: {}]   ;;  %s12123_s4 = inlined_call_operand.vmem [shape: f32[1,64], index: 4, kind: input, shape index: {}]   ;;  %s12124_s5 = inlined_call_operand.vmem [shape: f32[64,64], index: 5, kind: input, shape index: {}]   ;;  %s12125_s6 = inlined_call_operand.vmem [shape: f32[1,64], index: 6, kind: input, shape index: {}]   ;;  %s12126_s7 = inlined_call_operand.vmem [shape: f32[64,1], index: 7, kind: input, shape index: {}]   ;;  %s12127_s8 = inlined_call_operand.<no memory space> [shape: f32[1,1], index: 8, kind: input, shape index: {}]   ;;  %s12128_s9 = inlined_call_operand.vmem [shape: f32[256,1], index: 9, kind: output, shape index: {}]  }
   0x1   :  { %v14_v0 = vstv %s12127_s8 }
   0x2   :  { %15 = vst [vmem:[#allocation2] sm:$0x1] %v14_v0 }
   0x3 LB: > { %s6282_s12 = sadd.s32 4294967295, %s7285_s11   ;;  %p6286_p0 = scmp.ge.s32.totalorder %s7285_s11, 1  ;;  %s7285_s11 = sphi %s7346_s11, %s21_s11  }
   0x4   : > { %p290_p1 = scmp.lt.s32.totalorder %s7285_s11, 3 }
   0x6   : > { %p291_p2 = pnand %p6286_p0, %p290_p1 }
   0x8   : > { %294 = sbr.rel (%p291_p2) target bundleno = 2063 (0x80f), region = 56 }
   0xf   : > { %v354_v1 = vld [vmem:[%s12120_s1] sm:$0x3]  ;;  %vm411_vm0 = vcmask 1041408   ;;  %s6287_s8 = sshll.u32 %s6282_s12, 4  ;;  %vm362_vm1 = vcmask 15360  }
  0x10   : > { %6643 = vmatprep.subr.msk.mxu0 %vm411_vm0, %v354_v1  ;;  %p327_p3 = scmp.lt.s32.totalorder %s6287_s8, 31  ;;  %v7402_v18 = vld [vmem:[%s12121_s2] ss:$0 sm:$0xff]  ;;  %v12146_v49 = vmov 683565275  }
  0x11   : > { %6644 = vmatpush3.msk.msra.mxu0 %vm411_vm0, %v354_v1  ;;  %v12140_v51 = vmov 2475754826   ;;  %v12135_v56 = vmov 2131351028   ;;  %v12137_v59 = vmov 2102212464  }
  0x12   : > { %s12904_s8 = smov (!%p327_p3, %s6287_s8), 31  ;;  %v12144_v62 = vmov 920167782   ;;  %v12142_v1 = vmov 1326507024  }
  0x13   : > { %s6288_s15 = sshll.u32 %s12904_s8, 3 }
  0x14   : > { %s7365_s18 = scalar_lea.vmem %s12119_s0, %s6288_s15  ;;  %s12070_s26 = scalar_lea.vmem %s12128_s9, %s6288_s15 }
  0x15   : > { %v338_v2 = vld [vmem:[%s7365_s18] sm:$0xff]  ;;  %v339_v3 = vld [vmem:[%s7365_s18 + $0x8] sm:$0xff]  ;;  %v340_v4 = vld [vmem:[%s7365_s18 + $0x10] sm:$0xff] }
  0x16   : > { %6645 = vmatprep.mubr.msk.f32.mxu0 %vm362_vm1, %v338_v2  ;;  %v341_v5 = vld [vmem:[%s7365_s18 + $0x18] sm:$0xff]  ;;  %v342_v6 = vld [vmem:[%s7365_s18 + $0x20] sm:$0xff]  ;;  %v343_v7 = vld [vmem:[%s7365_s18 + $0x28] sm:$0xff] }
  0x17   : > { %6646 = vmatmul.mubr.msk.f32.vlgmr.msra.gmra.mrb[0].mxu0 %vm362_vm1, %v339_v3  ;;  %v344_v8 = vld [vmem:[%s7365_s18 + $0x30] sm:$0xff]  ;;  %v345_v9 = vld [vmem:[%s7365_s18 + $0x38] sm:$0xff]  ;;  %v346_v10 = vld [vmem:[%s7365_s18 + $0x40] sm:$0xff] }
  0x18   : > { %6648 = vmatprep.mubr.msk.f32.mxu0 %vm362_vm1, %v340_v4  ;;  %v347_v11 = vld [vmem:[%s7365_s18 + $0x48] sm:$0xff]  ;;  %v348_v12 = vld [vmem:[%s7365_s18 + $0x50] sm:$0xff]  ;;  %v349_v13 = vld [vmem:[%s7365_s18 + $0x58] sm:$0xff] }
  0x19   : > { %v350_v14 = vld [vmem:[%s7365_s18 + $0x60] sm:$0xff]  ;;  %v351_v15 = vld [vmem:[%s7365_s18 + $0x68] sm:$0xff]  ;;  %v352_v16 = vld [vmem:[%s7365_s18 + $0x70] sm:$0xff] }
  0x1a   : > { %v353_v17 = vld [vmem:[%s7365_s18 + $0x78] sm:$0xff] }
  0x1b   : > { %6649 = vmatmul.mubr.msk.f32.gmra.mrb[2].mxu0 %vm362_vm1, %v341_v5 }
  0x1c   : > { %6651 = vmatprep.mubr.msk.f32.mxu0 %vm362_vm1, %v342_v6 }
  0x1f   : > { %6652 = vmatmul.mubr.msk.f32.gmra.mrb[4].mxu0 %vm362_vm1, %v343_v7 }
  0x20   : > { %6654 = vmatprep.mubr.msk.f32.mxu0 %vm362_vm1, %v344_v8 }
  0x23   : > { %6655 = vmatmul.mubr.msk.f32.gmra.mrb[6].mxu0 %vm362_vm1, %v345_v9 }
  0x24   : > { %6657 = vmatprep.mubr.msk.f32.mxu0 %vm362_vm1, %v346_v10 }
  0x27   : > { %6658 = vmatmul.mubr.msk.f32.gmra.mrb[8].mxu0 %vm362_vm1, %v347_v11 }
  0x28   : > { %6660 = vmatprep.mubr.msk.f32.mxu0 %vm362_vm1, %v348_v12 }
  0x2b   : > { %6661 = vmatmul.mubr.msk.f32.gmra.mrb[10].mxu0 %vm362_vm1, %v349_v13 }
  0x2c   : > { %6663 = vmatprep.mubr.msk.f32.mxu0 %vm362_vm1, %v350_v14 }
  0x2f   : > { %6664 = vmatmul.mubr.msk.f32.gmra.mrb[12].mxu0 %vm362_vm1, %v351_v15 }
  0x30   : > { %6666 = vmatprep.mubr.msk.f32.mxu0 %vm362_vm1, %v352_v16 }
  0x33   : > { %6667 = vmatmul.mubr.msk.f32.gmra.mrb[14].mxu0 %vm362_vm1, %v353_v17 }
  0xea   : > { %v6647_v19 = vpop.f32.mrb[0].mxu0 }
  0xeb   : > { %v7405_v20 = vadd.f32 %v6647_v19, %v7402_v18  ;;  %v7407_v21 = vpop.f32.mrb[1].mxu0 }
  0xed   : > { %12382 = vst [vmem:[#allocation3_spill] sm:$0xff] %v7405_v20  ;;  %v12133_v22 = vand.u32 2147483647, %v7405_v20  ;;  %v667_v23 = vand.u32 2139095040, %v7405_v20 }
  0xee   : > { %v6650_v24 = vpop.f32.mrb[2].mxu0 }
  0xef   : > { %v668_v25 = vshrl.u32 %v667_v23, 23  ;;  %v7412_v26 = vadd.f32 %v6650_v24, %v7402_v18  ;;  %v491_v27 = vpop.f32.mrb[3].mxu0  ;;  %v671_v29 = vand.u32 8388607, %v12133_v22 }
  0xf0   : > { %v7417_v30 = vadd.f32 %v7402_v18, %v491_v27 }
  0xf1   : > { %12383 = vst [vmem:[#allocation4_spill] sm:$0xff] %v7412_v26  ;;  %v6313_v28 = vadd.s32 4294967169, %v668_v25  ;;  %v875_v31 = vand.u32 2139095040, %v7412_v26  ;;  %v672_v36 = vor.u32 8388608, %v671_v29  ;;  %v12132_v37 = vand.u32 2147483647, %v7412_v26 }
  0xf2   : > { %12384 = vst [vmem:[#allocation5_spill] sm:$0xff] %v7417_v30  ;;  %v7420_v32 = vpop.f32.mrb[4].mxu0  ;;  %v771_v38 = vand.u32 2139095040, %v7417_v30 }
  0xf3   : > { %v674_v33 = vadd.s32 1, %v6313_v28  ;;  %v876_v34 = vshrl.u32 %v875_v31, 23  ;;  %v7422_v35 = vpop.f32.mrb[5].mxu0  ;;  %v7430_v45 = vshll.u32 %v672_v36, 8  ;;  %v879_v46 = vand.u32 8388607, %v12132_v37 }
  0xf4   : > { %v772_v47 = vshrl.u32 %v771_v38, 23 }
  0xf5   : > { %vm675_vm2 = vcmp.gt.s32.totalorder %v674_v33, 0  ;;  %v6321_v40 = vadd.s32 4294967169, %v876_v34  ;;  %v880_v27 = vor.u32 8388608, %v879_v46 }
  0xf6   : > { %v676_v39 = vsel %vm675_vm2, %v674_v33, 0  ;;  %v7426_v41 = vpop.f32.mrb[6].mxu0  ;;  %v6317_v6 = vadd.s32 4294967169, %v772_v47 }
  0xf7   : > { %v678_v42 = vand.u32 31, %v676_v39  ;;  %v7428_v43 = vpop.f32.mrb[7].mxu0  ;;  %v677_v48 = vshrl.u32 %v676_v39, 5  ;;  %v882_v53 = vadd.s32 1, %v6321_v40  ;;  %v7462_v46 = vshll.u32 %v880_v27, 8 }
  0xf8   : > { %v778_v38 = vadd.s32 1, %v6317_v6 }
  0xf9   : > { %v679_v44 = vsub.s32 32, %v678_v42  ;;  %v681_v50 = vshll.u32 %v12146_v49, %v678_v42  ;;  %v684_v52 = vshll.u32 %v12140_v51, %v678_v42  ;;  %v687_v58 = vshll.u32 %v12135_v56, %v678_v42 }
  0xfa   : > { %v7436_v54 = vpop.f32.mrb[8].mxu0  ;;  %v690_v61 = vshll.u32 %v12137_v59, %v678_v42  ;;  %v693_v0 = vshll.u32 %v12144_v62, %v678_v42  ;;  %vm696_vm3 = vcmp.lt.s32.totalorder %v677_v48, 1  ;;  %vm699_vm4 = vcmp.lt.s32.totalorder %v677_v48, 4 }
  0xfb   : > { %v682_v55 = vshrl.u32 %v12140_v51, %v679_v44  ;;  %v685_v57 = vshrl.u32 %v12135_v56, %v679_v44  ;;  %v688_v60 = vshrl.u32 %v12137_v59, %v679_v44  ;;  %v691_v63 = vshrl.u32 %v12144_v62, %v679_v44  ;;  %v7446_v9 = vpop.f32.mrb[9].mxu0 }
  0xfc   : > { %v694_v2 = vshrl.u32 %v12142_v1, %v679_v44  ;;  %v680_v10 = vshrl.u32 %v12146_v49, %v679_v44  ;;  %vm697_vm5 = vcmp.lt.s32.totalorder %v677_v48, 2  ;;  %vm698_vm6 = vcmp.lt.s32.totalorder %v677_v48, 3 }
  0xfd   : > { %v683_v3 = vor.u32 %v682_v55, %v681_v50  ;;  %v686_v4 = vor.u32 %v685_v57, %v684_v52  ;;  %v689_v5 = vor.u32 %v688_v60, %v687_v58  ;;  %v692_v7 = vor.u32 %v691_v63, %v690_v61 }
  0xfe   : > { %v695_v8 = vor.u32 %v694_v2, %v693_v0  ;;  %vm883_vm7 = vcmp.gt.s32.totalorder %v882_v53, 0  ;;  %vm779_vm9 = vcmp.gt.s32.totalorder %v778_v38, 0 }
  0xff   : > { %v701_v11 = vsel %vm699_vm4, %v689_v5, 2102212464  ;;  %v704_v12 = vsel %vm696_vm3, %v683_v3, %v686_v4  ;;  %v708_v13 = vsel %vm696_vm3, %v686_v4, %v689_v5  ;;  %v705_v14 = vsel %vm699_vm4, %v692_v7, 920167782 }
 0x100   : > { %v709_v15 = vsel %vm699_vm4, %v695_v8, 1326507024  ;;  %v700_v16 = vsel %vm696_vm3, %v680_v10, %v683_v3  ;;  %v702_v17 = vsel %vm698_vm6, %v686_v4, %v701_v11  ;;  %v706_v19 = vsel %vm698_vm6, %v689_v5, %v705_v14 }
 0x101   : > { %v710_v23 = vsel %vm698_vm6, %v692_v7, %v709_v15  ;;  %v707_v24 = vsel %vm697_vm5, %v704_v12, %v706_v19  ;;  %v703_v34 = vsel %vm697_vm5, %v700_v16, %v702_v17  ;;  %v884_v36 = vsel %vm883_vm7, %v882_v53, 0 }
 0x102   : > { %v711_v25 = vsel %vm697_vm5, %v708_v13, %v710_v23  ;;  %v7454_v31 = vmul.u32.u64.low %v7430_v45, %v707_v24  ;;  %v7455_v33 = vmul.u32.u64.high %v7430_v45, %v707_v24, %v7454_v31  ;;  %v885_v39 = vshrl.u32 %v884_v36, 5 }
 0x103   : > { %v7450_v28 = vmul.u32.u64.low %v7430_v45, %v711_v25  ;;  %v7451_v29 = vmul.u32.u64.high %v7430_v45, %v711_v25, %v7450_v28  ;;  %v886_v40 = vand.u32 31, %v884_v36  ;;  %v719_v42 = vmul.u32 %v7430_v45, %v703_v34  ;;  %v7482_v25 = vpop.f32.mrb[10].mxu0 }
 0x104   : > { %v722_v44 = vadd.s32 1, %v7455_v33  ;;  %vm904_vm10 = vcmp.lt.s32.totalorder %v885_v39, 1  ;;  %vm905_vm11 = vcmp.lt.s32.totalorder %v885_v39, 2  ;;  %vm906_vm12 = vcmp.lt.s32.totalorder %v885_v39, 3 }
 0x105   : > { %vm721_vm8 = vc.u32 %v7451_v29, %v7454_v31  ;;  %v887_v47 = vsub.s32 32, %v886_v40  ;;  %v889_v48 = vshll.u32 %v12146_v49, %v886_v40  ;;  %v892_v50 = vshll.u32 %v12140_v51, %v886_v40 }
 0x106   : > { %v723_v52 = vsel %vm721_vm8, %v722_v44, %v7455_v33  ;;  %v895_v53 = vshll.u32 %v12135_v56, %v886_v40  ;;  %v898_v55 = vshll.u32 %v12137_v59, %v886_v40  ;;  %v901_v45 = vshll.u32 %v12144_v62, %v886_v40 }
 0x107   : > { %v724_v57 = vadd.s32 %v723_v52, %v719_v42  ;;  %v890_v58 = vshrl.u32 %v12140_v51, %v887_v47  ;;  %v893_v60 = vshrl.u32 %v12135_v56, %v887_v47  ;;  %v888_v61 = vshrl.u32 %v12146_v49, %v887_v47 }
 0x108   : > { %v896_v63 = vshrl.u32 %v12137_v59, %v887_v47  ;;  %v899_v0 = vshrl.u32 %v12144_v62, %v887_v47  ;;  %v902_v2 = vshrl.u32 %v12142_v1, %v887_v47  ;;  %vm907_vm13 = vcmp.lt.s32.totalorder %v885_v39, 4 }
 0x109   : > { %v725_v3 = vadd.s32 536870912, %v724_v57  ;;  %v891_v4 = vor.u32 %v890_v58, %v889_v48  ;;  %v894_v5 = vor.u32 %v893_v60, %v892_v50  ;;  %v780_v24 = vsel %vm779_vm9, %v778_v38, 0 }
 0x10a   : > { %v897_v6 = vor.u32 %v896_v63, %v895_v53  ;;  %v900_v7 = vor.u32 %v899_v0, %v898_v55  ;;  %v903_v8 = vor.u32 %v902_v2, %v901_v45  ;;  %v12131_v34 = vand.u32 2147483647, %v7417_v30 }
 0x10b   : > { %v7476_v10 = vshrl.u32 %v725_v3, 30  ;;  %v908_v11 = vsel %vm904_vm10, %v888_v61, %v891_v4  ;;  %v912_v12 = vsel %vm904_vm10, %v891_v4, %v894_v5  ;;  %v782_v38 = vand.u32 31, %v780_v24 }
 0x10c   : > { %v909_v13 = vsel %vm907_vm13, %v897_v6, 2102212464  ;;  %v913_v14 = vsel %vm907_vm13, %v900_v7, 920167782  ;;  %v916_v15 = vsel %vm904_vm10, %v894_v5, %v897_v6  ;;  %v917_v16 = vsel %vm907_vm13, %v903_v8, 1326507024 }
 0x10d   : > { %12385 = vst [vmem:[#allocation6_spill] sm:$0xff] %v7476_v10  ;;  %v910_v17 = vsel %vm906_vm12, %v894_v5, %v909_v13  ;;  %v914_v19 = vsel %vm906_vm12, %v897_v6, %v913_v14  ;;  %v918_v23 = vsel %vm906_vm12, %v900_v7, %v917_v16  ;;  %v727_v27 = vshll.u32 %v7476_v10, 30 }
 0x10e   : > { %v915_v28 = vsel %vm905_vm11, %v912_v12, %v914_v19  ;;  %v919_v33 = vsel %vm905_vm11, %v916_v15, %v918_v23  ;;  %v911_v42 = vsel %vm905_vm11, %v908_v11, %v910_v17  ;;  %v775_v50 = vand.u32 8388607, %v12131_v34 }
 0x10f   : > { %v7489_v36 = vmul.u32.u64.low %v7462_v46, %v919_v33  ;;  %v7490_v40 = vmul.u32.u64.high %v7462_v46, %v919_v33, %v7489_v36  ;;  %v7494_v44 = vmul.u32.u64.low %v7462_v46, %v915_v28  ;;  %v7495_v47 = vmul.u32.u64.high %v7462_v46, %v915_v28, %v7494_v44 }
 0x110   : > { %v7498_v48 = vsub.s32 %v724_v57, %v727_v27  ;;  %v781_v52 = vshrl.u32 %v780_v24, 5  ;;  %v783_v53 = vsub.s32 32, %v782_v38  ;;  %v927_v55 = vmul.u32 %v7462_v46, %v911_v42 }
 0x111   : > { %vm929_vm14 = vc.u32 %v7490_v40, %v7494_v44  ;;  %v785_v39 = vshll.u32 %v12146_v49, %v782_v38  ;;  %v788_v45 = vshll.u32 %v12140_v51, %v782_v38  ;;  %v930_v58 = vadd.s32 1, %v7495_v47 }
 0x112   : > { %v786_v60 = vshrl.u32 %v12140_v51, %v783_v53  ;;  %v789_v57 = vshrl.u32 %v12135_v56, %v783_v53  ;;  %v791_v61 = vshll.u32 %v12135_v56, %v782_v38  ;;  %v792_v63 = vshrl.u32 %v12137_v59, %v783_v53 }
 0x113   : > { %v794_v0 = vshll.u32 %v12137_v59, %v782_v38  ;;  %v795_v46 = vshrl.u32 %v12144_v62, %v783_v53  ;;  %v797_v2 = vshll.u32 %v12144_v62, %v782_v38  ;;  %v931_v3 = vsel %vm929_vm14, %v930_v58, %v7495_v47 }
 0x114   : > { %v787_v4 = vor.u32 %v786_v60, %v785_v39  ;;  %v790_v5 = vor.u32 %v789_v57, %v788_v45  ;;  %v798_v6 = vshrl.u32 %v12142_v1, %v783_v53  ;;  %v932_v7 = vadd.s32 %v931_v3, %v927_v55 }
 0x115   : > { %v776_v8 = vor.u32 8388608, %v775_v50  ;;  %v793_v11 = vor.u32 %v792_v63, %v791_v61  ;;  %v796_v12 = vor.u32 %v795_v46, %v794_v0  ;;  %v730_v13 = vsub.s32 0, %v7498_v48 }
 0x116   : > { %v799_v14 = vor.u32 %v798_v6, %v797_v2  ;;  %vm800_vm15 = vcmp.lt.s32.totalorder %v781_v52, 1  ;;  %vm803_vm0 = vcmp.lt.s32.totalorder %v781_v52, 4  ;;  %v933_v15 = vadd.s32 536870912, %v932_v7 }
 0x117   : > { %vm802_vm1 = vcmp.lt.s32.totalorder %v781_v52, 3  ;;  %v808_v16 = vsel %vm800_vm15, %v787_v4, %v790_v5  ;;  %v809_v17 = vsel %vm803_vm0, %v796_v12, 920167782  ;;  %vm801_vm2 = vcmp.lt.s32.totalorder %v781_v52, 2 }
 0x118   : > { %v810_v19 = vsel %vm802_vm1, %v793_v11, %v809_v17  ;;  %v7522_v23 = vadd.f32 %v7420_v32, %v7402_v18  ;;  %v7524_v24 = vshrl.u32 %v933_v15, 30  ;;  %v784_v27 = vshrl.u32 %v12146_v49, %v783_v53 }
 0x119   : > { %v805_v28 = vsel %vm803_vm0, %v793_v11, 2102212464  ;;  %v812_v33 = vsel %vm800_vm15, %v790_v5, %v793_v11  ;;  %v811_v36 = vsel %vm801_vm2, %v808_v16, %v810_v19  ;;  %v813_v42 = vsel %vm803_vm0, %v799_v14, 1326507024 }
 0x11a   : > { %12386 = vst [vmem:[#allocation7_spill] sm:$0xff] %v7524_v24  ;;  %v816_v47 = vshll.u32 %v776_v8, 8  ;;  %v6314_v38 = vmin.u32 %v730_v13, %v7498_v48  ;;  %v935_v50 = vshll.u32 %v7524_v24, 30  ;;  %v804_v55 = vsel %vm800_vm15, %v784_v27, %v787_v4 }
 0x11b   : > { %v814_v32 = vsel %vm802_vm1, %v796_v12, %v813_v42  ;;  %v806_v39 = vsel %vm802_vm1, %v790_v5, %v805_v28  ;;  %v1083_v57 = vand.u32 2139095040, %v7522_v23  ;;  %v7547_v0 = vadd.f32 %v7402_v18, %v7407_v21 }
 0x11c   : > { %v815_v45 = vsel %vm801_vm2, %v812_v33, %v814_v32  ;;  %v7535_v53 = vmul.u32.u64.low %v816_v47, %v811_v36  ;;  %v7536_v58 = vmul.u32.u64.high %v816_v47, %v811_v36, %v7535_v53  ;;  %v7539_v60 = vsub.s32 %v932_v7, %v935_v50  ;;  %v7552_v7 = vpop.f32.mrb[11].mxu0 }
 0x11d   : > { %v7542_v61 = vmul.u32.u64.low %v816_v47, %v815_v45  ;;  %v7543_v63 = vmul.u32.u64.high %v816_v47, %v815_v45, %v7542_v61  ;;  %12387 = vst [vmem:[#allocation8_spill] sm:$0xff] %v7547_v0  ;;  %v807_v46 = vsel %vm801_vm2, %v804_v55, %v806_v39  ;;  %v1084_v2 = vshrl.u32 %v1083_v57, 23 }
 0x11e   : > { %v732_v3 = vclz %v6314_v38  ;;  %v938_v4 = vsub.s32 0, %v7539_v60  ;;  %v826_v5 = vadd.s32 1, %v7536_v58  ;;  %v823_v8 = vmul.u32 %v816_v47, %v807_v46 }
 0x11f   : > { %v6329_v6 = vadd.s32 4294967169, %v1084_v2  ;;  %vm825_vm3 = vc.u32 %v7543_v63, %v7535_v53  ;;  %v563_v11 = vand.u32 2139095040, %v7547_v0  ;;  %v7560_v52 = vadd.f32 %v7402_v18, %v7422_v35 }
 0x120   : > { %v827_v21 = vsel %vm825_vm3, %v826_v5, %v7536_v58  ;;  %v6315_v13 = vadd.s32 4294967294, %v732_v3  ;;  %v6322_v14 = vmin.u32 %v938_v4, %v7539_v60  ;;  %v12130_v16 = vand.u32 2147483647, %v7522_v23 }
 0x121   : > { %v1090_v12 = vadd.s32 1, %v6329_v6  ;;  %v828_v15 = vadd.s32 %v827_v21, %v823_v8  ;;  %v564_v27 = vshrl.u32 %v563_v11, 23  ;;  %v979_v33 = vand.u32 2139095040, %v7560_v52 }
 0x122   : > { %vm6316_vm5 = vcmp.lt.s32.totalorder %v6315_v13, 0  ;;  %v940_v36 = vclz %v6322_v14  ;;  %v1087_v35 = vand.u32 8388607, %v12130_v16  ;;  %v720_v11 = vadd.s32 %v7454_v31, %v7451_v29 }
 0x123   : > { %vm1091_vm4 = vcmp.gt.s32.totalorder %v1090_v12, 0  ;;  %v829_v17 = vadd.s32 536870912, %v828_v15  ;;  %v7570_v50 = vsel %vm6316_vm5, 0, %v6315_v13  ;;  %v6309_v55 = vadd.s32 4294967169, %v564_v27 }
 0x124   : > { %v1092_v19 = vsel %vm1091_vm4, %v1090_v12, 0  ;;  %v980_v32 = vshrl.u32 %v979_v33, 23  ;;  %v6323_v39 = vadd.s32 4294967294, %v940_v36  ;;  %v1088_v45 = vor.u32 8388608, %v1087_v35 }
 0x125   : > { %v1094_v28 = vand.u32 31, %v1092_v19  ;;  %v7565_v42 = vshrl.u32 %v829_v17, 30  ;;  %v1093_v61 = vshrl.u32 %v1092_v19, 5  ;;  %v740_v33 = vsub.s32 4294967266, %v7570_v50 }
 0x126   : > { %v6325_v13 = vadd.s32 4294967169, %v980_v32  ;;  %vm6324_vm6 = vcmp.lt.s32.totalorder %v6323_v39, 0  ;;  %v1128_v36 = vshll.u32 %v1088_v45, 8 }
 0x127   : > { %12388 = vst [vmem:[#allocation9_spill] sm:$0xff] %v7565_v42  ;;  %v831_v47 = vshll.u32 %v7565_v42, 30  ;;  %v1095_v38 = vsub.s32 32, %v1094_v28  ;;  %v1097_v46 = vshll.u32 %v12146_v49, %v1094_v28  ;;  %v1100_v2 = vshll.u32 %v12140_v51, %v1094_v28 }
 0x128   : > { %v1103_v5 = vshll.u32 %v12135_v56, %v1094_v28  ;;  %v1106_v6 = vshll.u32 %v12137_v59, %v1094_v28  ;;  %v1109_v19 = vshll.u32 %v12144_v62, %v1094_v28  ;;  %vm1112_vm7 = vcmp.lt.s32.totalorder %v1093_v61, 1 }
 0x129   : > { %v1098_v58 = vshrl.u32 %v12140_v51, %v1095_v38  ;;  %v1101_v57 = vshrl.u32 %v12135_v56, %v1095_v38  ;;  %v1104_v3 = vshrl.u32 %v12137_v59, %v1095_v38  ;;  %v7577_v4 = vsub.s32 %v828_v15, %v831_v47 }
 0x12a   : > { %v1107_v8 = vshrl.u32 %v12144_v62, %v1095_v38  ;;  %v1110_v27 = vshrl.u32 %v12142_v1, %v1095_v38  ;;  %v736_v15 = vsub.s32 32, %v7570_v50  ;;  %vm1115_vm8 = vcmp.lt.s32.totalorder %v1093_v61, 4 }
 0x12b   : > { %v1099_v21 = vor.u32 %v1098_v58, %v1097_v46  ;;  %v1102_v12 = vor.u32 %v1101_v57, %v1100_v2  ;;  %v1105_v14 = vor.u32 %v1104_v3, %v1103_v5  ;;  %v834_v35 = vsub.s32 0, %v7577_v4 }
 0x12c   : > { %v1108_v17 = vor.u32 %v1107_v8, %v1106_v6  ;;  %v1111_v47 = vor.u32 %v1110_v27, %v1109_v19  ;;  %vm1114_vm9 = vcmp.lt.s32.totalorder %v1093_v61, 3  ;;  %v986_v32 = vadd.s32 1, %v6325_v13  ;;  %v7602_v13 = vpop.f32.mrb[12].mxu0 }
 0x12d   : > { %v1120_v29 = vsel %vm1112_vm7, %v1099_v21, %v1102_v12  ;;  %vm1113_vm10 = vcmp.lt.s32.totalorder %v1093_v61, 2  ;;  %v1117_v28 = vsel %vm1115_vm8, %v1105_v14, 2102212464  ;;  %v1124_v57 = vsel %vm1112_vm7, %v1102_v12, %v1105_v14 }
 0x12e   : > { %v1121_v31 = vsel %vm1115_vm8, %v1108_v17, 920167782  ;;  %v7592_v46 = vsel %vm6324_vm6, 0, %v6323_v39  ;;  %v1096_v45 = vshrl.u32 %v12146_v49, %v1095_v38  ;;  %v1125_v3 = vsel %vm1115_vm8, %v1111_v47, 1326507024 }
 0x12f   : > { %v1122_v58 = vsel %vm1114_vm9, %v1105_v14, %v1121_v31  ;;  %v6318_v5 = vmin.u32 %v834_v35, %v7577_v4  ;;  %v1126_v6 = vsel %vm1114_vm9, %v1108_v17, %v1125_v3  ;;  %v1118_v39 = vsel %vm1114_vm9, %v1102_v12, %v1117_v28 }
 0x130   : > { %v1123_v2 = vsel %vm1113_vm10, %v1120_v29, %v1122_v58  ;;  %v1116_v27 = vsel %vm1112_vm7, %v1096_v45, %v1099_v21  ;;  %v1127_v14 = vsel %vm1113_vm10, %v1124_v57, %v1126_v6  ;;  %vm987_vm11 = vcmp.gt.s32.totalorder %v986_v32, 0 }
 0x131   : > { %v7598_v8 = vmul.u32.u64.low %v1128_v36, %v1123_v2  ;;  %v7599_v19 = vmul.u32.u64.high %v1128_v36, %v1123_v2, %v7598_v8  ;;  %v738_v38 = vshrl.u32 %v720_v11, %v736_v15  ;;  %v741_v29 = vadd.s32 127, %v740_v33 }
 0x132   : > { %v12129_v47 = vand.u32 2147483647, %v7560_v52  ;;  %v737_v17 = vshll.u32 %v7498_v48, %v7570_v50  ;;  %v7610_v35 = vmul.u32.u64.low %v1128_v36, %v1127_v14  ;;  %v7611_v31 = vmul.u32.u64.high %v1128_v36, %v1127_v14, %v7610_v35 }
 0x133   : > { %v988_v58 = vsel %vm987_vm11, %v986_v32, 0  ;;  %v948_v2 = vsub.s32 4294967266, %v7592_v46  ;;  %v836_v3 = vclz %v6318_v5  ;;  %v1119_v21 = vsel %vm1113_vm10, %v1116_v27, %v1118_v39 }
 0x134   : > { %v1138_v12 = vadd.s32 1, %v7599_v19  ;;  %v7616_v28 = vadd.s32 1, %v6309_v55  ;;  %v928_v11 = vadd.s32 %v7494_v44, %v7490_v40  ;;  %v990_v15 = vand.u32 31, %v988_v58 }
 0x135   : > { %v7620_v33 = vor.u32 %v738_v38, %v737_v17  ;;  %v742_v48 = vshll.u32 %v741_v29, 23  ;;  %v983_v50 = vand.u32 8388607, %v12129_v47  ;;  %v7626_v32 = vadd.f32 %v7426_v41, %v7402_v18 }
 0x136   : > { %v944_v61 = vsub.s32 32, %v7592_v46  ;;  %v1135_v57 = vmul.u32 %v1128_v36, %v1119_v21  ;;  %vm1137_vm12 = vc.u32 %v7611_v31, %v7598_v8  ;;  %v991_v55 = vsub.s32 32, %v990_v15 }
 0x137   : > { %12389 = vst [vmem:[#allocation10_spill] sm:$0xff] %v7626_v32  ;;  %v7631_v45 = vadd.s32 127, %v948_v2  ;;  %v6319_v40 = vadd.s32 4294967294, %v836_v3  ;;  %v1139_v44 = vsel %vm1137_vm12, %v1138_v12, %v7599_v19  ;;  %v993_v5 = vshll.u32 %v12146_v49, %v990_v15 }
 0x138   : > { %v1140_v6 = vadd.s32 %v1139_v44, %v1135_v57  ;;  %v994_v27 = vshrl.u32 %v12140_v51, %v991_v55  ;;  %v996_v41 = vshll.u32 %v12140_v51, %v990_v15  ;;  %v997_v39 = vshrl.u32 %v12135_v56, %v991_v55 }
 0x139   : > { %v989_v14 = vshrl.u32 %v988_v58, 5  ;;  %v999_v36 = vshll.u32 %v12135_v56, %v990_v15  ;;  %v1000_v38 = vshrl.u32 %v12137_v59, %v991_v55  ;;  %v1002_v29 = vshll.u32 %v12137_v59, %v990_v15 }
 0x13a   : > { %v1141_v17 = vadd.s32 536870912, %v1140_v6  ;;  %v995_v35 = vor.u32 %v994_v27, %v993_v5  ;;  %v998_v2 = vor.u32 %v997_v39, %v996_v41  ;;  %v1003_v19 = vshrl.u32 %v12144_v62, %v991_v55 }
 0x13b   : > { %v7642_v3 = vor.u32 4788187, %v742_v48  ;;  %vm571_vm13 = vcmp.gt.s32.totalorder %v7616_v28, 0  ;;  %v1001_v21 = vor.u32 %v1000_v38, %v999_v36  ;;  %v1005_v12 = vshll.u32 %v12144_v62, %v990_v15 }
 0x13c   : > { %v1006_v58 = vshrl.u32 %v12142_v1, %v991_v55  ;;  %v946_v57 = vshrl.u32 %v928_v11, %v944_v61  ;;  %v7647_v44 = vshrl.u32 %v1141_v17, 30  ;;  %v984_v47 = vor.u32 8388608, %v983_v50 }
 0x13d   : > { %v1004_v16 = vor.u32 %v1003_v19, %v1002_v29  ;;  %v950_v34 = vshll.u32 %v7631_v45, 23  ;;  %vm6320_vm14 = vcmp.lt.s32.totalorder %v6319_v40, 0  ;;  %vm1008_vm15 = vcmp.lt.s32.totalorder %v989_v14, 1 }
 0x13e   : > { %12390 = vst [vmem:[#allocation11_spill] sm:$0xff] %v7647_v44  ;;  %v1007_v5 = vor.u32 %v1006_v58, %v1005_v12  ;;  %v1143_v48 = vshll.u32 %v7647_v44, 30  ;;  %vm1011_vm0 = vcmp.lt.s32.totalorder %v989_v14, 4  ;;  %v1016_v27 = vsel %vm1008_vm15, %v995_v35, %v998_v2 }
 0x13f   : > { %v1291_v41 = vand.u32 2139095040, %v7626_v32  ;;  %v992_v15 = vshrl.u32 %v12146_v49, %v991_v55  ;;  %vm1010_vm1 = vcmp.lt.s32.totalorder %v989_v14, 3  ;;  %v1013_v11 = vsel %vm1011_vm0, %v1001_v21, 2102212464 }
 0x140   : > { %v1017_v61 = vsel %vm1011_vm0, %v1004_v16, 920167782  ;;  %v7654_v39 = vsub.s32 %v1140_v6, %v1143_v48  ;;  %vm1009_vm2 = vcmp.lt.s32.totalorder %v989_v14, 2  ;;  %v1020_v45 = vsel %vm1008_vm15, %v998_v2, %v1001_v21 }
 0x141   : > { %v1018_v50 = vsel %vm1010_vm1, %v1001_v21, %v1017_v61  ;;  %v839_v36 = vsel %vm6320_vm14, 0, %v6319_v40  ;;  %v1021_v29 = vsel %vm1011_vm0, %v1007_v5, 1326507024  ;;  %v1024_v17 = vshll.u32 %v984_v47, 8 }
 0x142   : > { %v1019_v38 = vsel %vm1009_vm2, %v1016_v27, %v1018_v50  ;;  %v1146_v19 = vsub.s32 0, %v7654_v39  ;;  %v1012_v12 = vsel %vm1008_vm15, %v992_v15, %v995_v35  ;;  %v1014_v58 = vsel %vm1010_vm1, %v998_v2, %v1013_v11  ;;  %v7683_v11 = vpop.f32.mrb[13].mxu0 }
 0x143   : > { %v1022_v55 = vsel %vm1010_vm1, %v1004_v16, %v1021_v29  ;;  %v7661_v22 = vmul.u32.u64.low %v1024_v17, %v1019_v38  ;;  %v7662_v6 = vmul.u32.u64.high %v1024_v17, %v1019_v38, %v7661_v22  ;;  %v1292_v48 = vshrl.u32 %v1291_v41, 23 }
 0x144   : > { %v1023_v37 = vsel %vm1009_vm2, %v1020_v45, %v1022_v55  ;;  %v844_v61 = vsub.s32 4294967266, %v839_v36  ;;  %v6330_v40 = vmin.u32 %v1146_v19, %v7654_v39  ;;  %v945_v47 = vshll.u32 %v7539_v60, %v7592_v46 }
 0x145   : > { %v7666_v21 = vmul.u32.u64.low %v1024_v17, %v1023_v37  ;;  %v7667_v27 = vmul.u32.u64.high %v1024_v17, %v1023_v37, %v7666_v21  ;;  %v1015_v35 = vsel %vm1009_vm2, %v1012_v12, %v1014_v58  ;;  %v6337_v2 = vadd.s32 4294967169, %v1292_v48 }
 0x146   : > { %v7674_v16 = vadd.f32 %v7402_v18, %v7428_v43  ;;  %v744_v5 = vand.u32 2147483647, %v7642_v3  ;;  %v746_v41 = vcvt.s32.f32 %v7620_v33  ;;  %v7681_v15 = vsel %vm571_vm13, %v7616_v28, 0 }
 0x147   : > { %v1148_v37 = vclz %v6330_v40  ;;  %v7685_v60 = vor.u32 %v946_v57, %v945_v47  ;;  %v7687_v46 = vor.u32 4788187, %v950_v34  ;;  %v1034_v14 = vadd.s32 1, %v7662_v6 }
 0x148   : > { %12391 = vst [vmem:[#allocation12_spill] sm:$0xff] %v7674_v16  ;;  %v1298_v43 = vadd.s32 1, %v6337_v2  ;;  %v840_v50 = vsub.s32 32, %v839_v36  ;;  %v845_v45 = vadd.s32 127, %v844_v61  ;;  %v1031_v3 = vmul.u32 %v1024_v17, %v1015_v35 }
 0x149   : > { %vm1033_vm3 = vc.u32 %v7667_v27, %v7661_v22  ;;  %v12134_v28 = vand.u32 2147483647, %v7626_v32  ;;  %v1187_v38 = vand.u32 2139095040, %v7674_v16  ;;  %v824_v34 = vadd.s32 %v7535_v53, %v7543_v63 }
 0x14a   : > { %v1035_v33 = vsel %vm1033_vm3, %v1034_v14, %v7662_v6  ;;  %vm1299_vm4 = vcmp.gt.s32.totalorder %v1298_v43, 0  ;;  %v6331_v57 = vadd.s32 4294967294, %v1148_v37  ;;  %v7697_v12 = vmul.f32 %v746_v41, %v744_v5 }
 0x14b   : > { %v1036_v29 = vadd.s32 %v1035_v33, %v1031_v3  ;;  %v1300_v19 = vsel %vm1299_vm4, %v1298_v43, 0  ;;  %v7700_v17 = vand.u32 31, %v7681_v15  ;;  %v954_v58 = vcvt.s32.f32 %v7685_v60 }
 0x14c   : > { %v1302_v55 = vand.u32 31, %v1300_v19  ;;  %v952_v6 = vand.u32 2147483647, %v7687_v46  ;;  %v841_v48 = vshll.u32 %v7577_v4, %v839_v36  ;;  %v842_v61 = vshrl.u32 %v824_v34, %v840_v50 }
 0x14d   : > { %12392 = vst [vmem:[#allocation13_spill] sm:$0xff] %v7700_v17  ;;  %v1037_v40 = vadd.s32 536870912, %v1036_v29  ;;  %v846_v21 = vshll.u32 %v845_v45, 23  ;;  %v1295_v53 = vand.u32 8388607, %v12134_v28  ;;  %v1188_v47 = vshrl.u32 %v1187_v38, 23 }
 0x14e   : > { %v1303_v63 = vsub.s32 32, %v1302_v55  ;;  %vm6332_vm5 = vcmp.lt.s32.totalorder %v6331_v57, 0  ;;  %v1305_v2 = vshll.u32 %v12146_v49, %v1302_v55  ;;  %v1308_v5 = vshll.u32 %v12140_v51, %v1302_v55 }
 0x14f   : > { %v7707_v35 = vshrl.u32 %v1037_v40, 30  ;;  %v1311_v4 = vshll.u32 %v12135_v56, %v1302_v55  ;;  %v7715_v60 = vor.u32 %v842_v61, %v841_v48  ;;  %v1301_v46 = vshrl.u32 %v1300_v19, 5 }
 0x150   : > { %v1306_v41 = vshrl.u32 %v12140_v51, %v1303_v63  ;;  %v1309_v37 = vshrl.u32 %v12135_v56, %v1303_v63  ;;  %v1312_v36 = vshrl.u32 %v12137_v59, %v1303_v63  ;;  %v1314_v14 = vshll.u32 %v12137_v59, %v1302_v55 }
 0x151   : > { %12393 = vst [vmem:[#allocation14_spill] sm:$0xff] %v7707_v35  ;;  %v1315_v43 = vshrl.u32 %v12144_v62, %v1303_v63  ;;  %v7719_v50 = vsel %vm6332_vm5, 0, %v6331_v57  ;;  %v847_v38 = vor.u32 4788187, %v846_v21  ;;  %v1039_v34 = vshll.u32 %v7707_v35, 30 }
 0x152   : > { %v1307_v45 = vor.u32 %v1306_v41, %v1305_v2  ;;  %v1310_v3 = vor.u32 %v1309_v37, %v1308_v5  ;;  %v1313_v33 = vor.u32 %v1312_v36, %v1311_v4  ;;  %v12139_v28 = vand.u32 2147483647, %v7674_v16 }
 0x153   : > { %v1316_v40 = vor.u32 %v1315_v43, %v1314_v14  ;;  %v1296_v56 = vor.u32 8388608, %v1295_v53  ;;  %v1317_v48 = vshll.u32 %v12144_v62, %v1302_v55  ;;  %v1318_v19 = vshrl.u32 %v12142_v1, %v1303_v63 }
 0x154   : > { %v6333_v61 = vadd.s32 4294967169, %v1188_v47  ;;  %v1156_v59 = vsub.s32 4294967266, %v7719_v50  ;;  %vm1320_vm6 = vcmp.lt.s32.totalorder %v1301_v46, 1  ;;  %vm1322_vm7 = vcmp.lt.s32.totalorder %v1301_v46, 3 }
 0x155   : > { %vm1323_vm8 = vcmp.lt.s32.totalorder %v1301_v46, 4  ;;  %v1319_v57 = vor.u32 %v1318_v19, %v1317_v48  ;;  %v1328_v21 = vsel %vm1320_vm6, %v1307_v45, %v1310_v3  ;;  %v7727_v41 = vsub.s32 %v1036_v29, %v1039_v34 }
 0x156   : > { %v1325_v2 = vsel %vm1323_vm8, %v1313_v33, 2102212464  ;;  %v1329_v5 = vsel %vm1323_vm8, %v1316_v40, 920167782  ;;  %v1304_v37 = vshrl.u32 %v12146_v49, %v1303_v63  ;;  %vm1321_vm9 = vcmp.lt.s32.totalorder %v1301_v46, 2 }
 0x157   : > { %v1330_v55 = vsel %vm1322_vm7, %v1313_v33, %v1329_v5  ;;  %v1332_v47 = vsel %vm1320_vm6, %v1310_v3, %v1313_v33  ;;  %v1333_v4 = vsel %vm1323_vm8, %v1319_v57, 1326507024  ;;  %v1336_v36 = vshll.u32 %v1296_v56, 8 }
 0x158   : > { %v1331_v53 = vsel %vm1321_vm9, %v1328_v21, %v1330_v55  ;;  %v1152_v14 = vsub.s32 32, %v7719_v50  ;;  %v1324_v43 = vsel %vm1320_vm6, %v1304_v37, %v1307_v45  ;;  %v1326_v48 = vsel %vm1322_vm7, %v1310_v3, %v1325_v2  ;;  %v7746_v55 = vpop.f32.mrb[14].mxu0 }
 0x159   : > { %v1334_v29 = vsel %vm1322_vm7, %v1316_v40, %v1333_v4  ;;  %v7738_v63 = vmul.u32.u64.low %v1336_v36, %v1331_v53  ;;  %v7739_v19 = vmul.u32.u64.high %v1336_v36, %v1331_v53, %v7738_v63  ;;  %v1194_v5 = vadd.s32 1, %v6333_v61 }
 0x15a   : > { %v1335_v34 = vsel %vm1321_vm9, %v1332_v47, %v1334_v29  ;;  %v1157_v21 = vadd.s32 127, %v1156_v59  ;;  %v1042_v33 = vsub.s32 0, %v7727_v41  ;;  %v7749_v45 = vshrl.u32 %v7681_v15, 5 }
 0x15b   : > { %v7743_v57 = vmul.u32.u64.low %v1336_v36, %v1335_v34  ;;  %v7744_v56 = vmul.u32.u64.high %v1336_v36, %v1335_v34, %v7743_v57  ;;  %v7751_v3 = vmul.f32 %v954_v58, %v952_v6  ;;  %vm1195_vm10 = vcmp.gt.s32.totalorder %v1194_v5, 0 }
 0x15c   : > { %v848_v40 = vand.u32 2147483647, %v847_v38  ;;  %v1136_v2 = vadd.s32 %v7598_v8, %v7611_v31  ;;  %v1327_v61 = vsel %vm1321_vm9, %v1324_v43, %v1326_v48  ;;  %v1196_v59 = vsel %vm1195_vm10, %v1194_v5, 0 }
 0x15d   : > { %v748_v37 = vxor.u32 2147483648, %v7697_v12  ;;  %v7758_v53 = vsub.s32 32, %v7700_v17  ;;  %v1346_v47 = vadd.s32 1, %v7739_v19  ;;  %v1191_v15 = vand.u32 8388607, %v12139_v28 }
 0x15e   : > { %v850_v58 = vcvt.s32.f32 %v7715_v60  ;;  %v1154_v6 = vshrl.u32 %v1136_v2, %v1152_v14  ;;  %v1158_v38 = vshll.u32 %v1157_v21, 23  ;;  %v7765_v4 = vmin.u32 %v1042_v33, %v7727_v41 }
 0x15f   : > { %12394 = vst [vmem:[#allocation15_spill] sm:$0xff] %v7758_v53  ;;  %v1343_v31 = vmul.u32 %v1336_v36, %v1327_v61  ;;  %vm1345_vm11 = vc.u32 %v7744_v56, %v7738_v63  ;;  %v1198_v46 = vand.u32 31, %v1196_v59  ;;  %v1153_v48 = vshll.u32 %v7654_v39, %v7719_v50 }
 0x160   : > { %v7770_v43 = vmul.f32 %v850_v58, %v848_v40  ;;  %v1347_v29 = vsel %vm1345_vm11, %v1346_v47, %v7739_v19  ;;  %v7777_v60 = vadd.f32 %v7436_v54, %v7402_v18  ;;  %v1192_v34 = vor.u32 8388608, %v1191_v15 }
 0x161   : > { %v1348_v14 = vadd.s32 %v1347_v29, %v1343_v31  ;;  %v1197_v5 = vshrl.u32 %v1196_v59, 5  ;;  %v1199_v21 = vsub.s32 32, %v1198_v46  ;;  %v7779_v36 = vor.u32 %v1154_v6, %v1153_v48 }
 0x162   : > { %12395 = vst [vmem:[#allocation16_spill] sm:$0xff] %v7777_v60  ;;  %v7781_v33 = vor.u32 4788187, %v1158_v38  ;;  %v1044_v57 = vclz %v7765_v4  ;;  %v1201_v40 = vshll.u32 %v12146_v49, %v1198_v46  ;;  %vm12227_vm12 = vcmp.lt.s32.totalorder %v7405_v20, 0 }
 0x163   : > { %v1349_v39 = vadd.s32 536870912, %v1348_v14  ;;  %v1202_v50 = vshrl.u32 %v12140_v51, %v1199_v21  ;;  %v1204_v18 = vshll.u32 %v12140_v51, %v1198_v46  ;;  %v12396_v54 = vmov 2131351028  }
 0x164   : > { %v1205_v19 = vshrl.u32 %v12396_v54, %v1199_v21  ;;  %vm12215_vm13 = vcmp.lt.s32.totalorder %v7412_v26, 0  ;;  %v1207_v2 = vshll.u32 %v12396_v54, %v1198_v46  ;;  %v12397_v61 = vmov 2102212464  }
 0x165   : > { %v1208_v59 = vshrl.u32 %v12397_v61, %v1199_v21  ;;  %v1210_v47 = vshll.u32 %v12397_v61, %v1198_v46  ;;  %v1211_v15 = vshrl.u32 %v12144_v62, %v1199_v21  ;;  %v7794_v58 = vshrl.u32 %v1349_v39, 30 }
 0x166   : > { %v1203_v6 = vor.u32 %v1202_v50, %v1201_v40  ;;  %v1206_v38 = vor.u32 %v1205_v19, %v1204_v18  ;;  %vm1216_vm14 = vcmp.lt.s32.totalorder %v1197_v5, 1  ;;  %v1213_v48 = vshll.u32 %v12144_v62, %v1198_v46 }
 0x167   : > { %12398 = vst [vmem:[#allocation17_spill] sm:$0xff] %v7794_v58  ;;  %v1209_v4 = vor.u32 %v1208_v59, %v1207_v2  ;;  %v1212_v31 = vor.u32 %v1211_v15, %v1210_v47  ;;  %v1214_v29 = vshrl.u32 %v12142_v1, %v1199_v21  ;;  %v12399_v28 = vand.u32 2147483647, %v7405_v20 }
 0x168   : > { %v12400_v51 = vmov 0  ;;  %v1351_v8 = vshll.u32 %v7794_v58, 30  ;;  %vm1218_vm0 = vcmp.lt.s32.totalorder %v1197_v5, 3  ;;  %vm1219_vm1 = vcmp.lt.s32.totalorder %v1197_v5, 4 }
 0x169   : > { %vm7800_vm15 = vcmp.le.f32.partialorder %v12399_v28, 0.7853982  ;;  %v1224_v40 = vsel %vm1216_vm14, %v1203_v6, %v1206_v38  ;;  %v12403_v39 = vand.u32 2147483647, %v7412_v26  ;;  %v12404_v50 = vmov 0 }
 0x16a   : > { %v12401_v51 = vsel %vm7800_vm15, 4294967295, %v12400_v51  ;;  %v1200_v46 = vshrl.u32 %v12146_v49, %v1199_v21  ;;  %v1215_v18 = vor.u32 %v1214_v29, %v1213_v48  ;;  %v1221_v19 = vsel %vm1219_vm1, %v1209_v4, 2102212464 }
 0x16b   : > { %12402 = vst [vmem:[#allocation18_spill] sm:$0xff] %v12401_v51  ;;  %vm7808_vm2 = vcmp.le.f32.partialorder %v12403_v39, 0.7853982  ;;  %v1225_v28 = vsel %vm1219_vm1, %v1212_v31, 920167782  ;;  %vm12216_vm3 = vcmp.lt.s32.totalorder %v7417_v30, 0  ;;  %v1228_v59 = vsel %vm1216_vm14, %v1206_v38, %v1209_v4 }
 0x16c   : > { %v12405_v50 = vsel %vm7808_vm2, 4294967295, %v12404_v50  ;;  %vm1217_vm4 = vcmp.lt.s32.totalorder %v1197_v5, 2  ;;  %v1226_v2 = vsel %vm1218_vm0, %v1209_v4, %v1225_v28  ;;  %v1232_v47 = vshll.u32 %v1192_v34, 8 }
 0x16d   : > { %12406 = vst [vmem:[#allocation19_spill] sm:$0xff] %v12405_v50  ;;  %v7816_v15 = vsub.s32 %v1348_v14, %v1351_v8  ;;  %v1220_v39 = vsel %vm1216_vm14, %v1200_v46, %v1203_v6  ;;  %v1227_v1 = vsel %vm1217_vm4, %v1224_v40, %v1226_v2  ;;  %v1229_v62 = vsel %vm1219_vm1, %v1215_v18, 1326507024 }
 0x16e   : > { %v1222_v21 = vsel %vm1218_vm0, %v1206_v38, %v1221_v19  ;;  %v1230_v48 = vsel %vm1218_vm0, %v1212_v31, %v1229_v62  ;;  %v7822_v29 = vmul.u32.u64.low %v1232_v47, %v1227_v1  ;;  %v7823_v49 = vmul.u32.u64.high %v1232_v47, %v1227_v1, %v7822_v29  ;;  %v7842_v1 = vld [vmem:[%s12121_s2] ss:$0 sm:$0xff] }
 0x16f   : > { %v749_v8 = vsel %vm12227_vm12, %v748_v37, %v7697_v12  ;;  %v12407_v14 = vand.u32 2147483647, %v7417_v30  ;;  %v12408_v34 = vmov 0  ;;  %v1231_v6 = vsel %vm1217_vm4, %v1228_v59, %v1230_v48  ;;  %v7848_v12 = vpop.f32.mrb[15].mxu0 }
 0x170   : > { %v1499_v62 = vand.u32 2139095040, %v7777_v60  ;;  %v7846_v38 = vadd.f32 %v7842_v1, %v7446_v9  ;;  %12411 = vst [vmem:[#allocation21_spill] sm:$0xff] %v7848_v12  ;;  %v12412_v37 = vxor.u32 2147483648, %v7751_v3  ;;  %v1160_v31 = vand.u32 2147483647, %v7781_v33 }
 0x171   : > { %vm7833_vm5 = vcmp.le.f32.partialorder %v12407_v14, 0.7853982  ;;  %v7856_v40 = vmul.u32.u64.low %v1232_v47, %v1231_v6  ;;  %v7857_v46 = vmul.u32.u64.high %v1232_v47, %v1231_v6, %v7856_v40  ;;  %v852_v18 = vxor.u32 2147483648, %v7770_v43 }
 0x172   : > { %v12409_v34 = vsel %vm7833_vm5, 4294967295, %v12408_v34  ;;  %v957_v4 = vsel %vm12215_vm13, %v12412_v37, %v7751_v3  ;;  %v1354_v19 = vsub.s32 0, %v7816_v15  ;;  %v1223_v9 = vsel %vm1217_vm4, %v1220_v39, %v1222_v21 }
 0x173   : > { %12410 = vst [vmem:[#allocation20_spill] sm:$0xff] %v12409_v34  ;;  %v1500_v28 = vshrl.u32 %v1499_v62, 23  ;;  %v586_v2 = vshll.u32 %v12397_v61, %v7700_v17  ;;  %v1162_v59 = vcvt.s32.f32 %v7779_v36  ;;  %v6327_v48 = vadd.s32 4294967294, %v1044_v57 }
 0x174   : > { %v1242_v3 = vadd.s32 1, %v7823_v49  ;;  %v752_v33 = vsel %vm7800_vm15, %v7405_v20, %v749_v8  ;;  %v12413_v14 = vmov 920167782   ;;  %v1395_v5 = vand.u32 2139095040, %v7846_v38 }
 0x175   : > { %v587_v6 = vshrl.u32 %v12413_v14, %v7758_v53  ;;  %v6345_v37 = vadd.s32 4294967169, %v1500_v28  ;;  %v960_v39 = vsel %vm7808_vm2, %v7412_v26, %v957_v4  ;;  %v1163_v21 = vmul.f32 %v1162_v59, %v1160_v31 }
 0x176   : > { %v1239_v62 = vmul.u32 %v1232_v47, %v1223_v9  ;;  %vm1241_vm6 = vc.u32 %v7857_v46, %v7822_v29  ;;  %v853_v36 = vsel %vm12216_vm3, %v852_v18, %v7770_v43  ;;  %v6338_v57 = vmin.u32 %v1354_v19, %v7816_v15 }
 0x177   : > { %v1243_v8 = vsel %vm1241_vm6, %v1242_v3, %v7823_v49  ;;  %v1506_v40 = vadd.s32 1, %v6345_v37  ;;  %7051 = vcosq.f32 %v752_v33  ;;  %vm6328_vm7 = vcmp.lt.s32.totalorder %v6327_v48, 0 }
 0x178   : > { %v1244_v28 = vadd.s32 %v1243_v8, %v1239_v62  ;;  %v1396_v58 = vshrl.u32 %v1395_v5, 23  ;;  %7053 = vsinq.f32 %v752_v33  ;;  %v7884_v47 = vshll.u32 %v12413_v14, %v7700_v17 }
 0x179   : > { %v12414_v4 = vmov 1326507024   ;;  %vm1507_vm8 = vcmp.gt.s32.totalorder %v1506_v40, 0  ;;  %7055 = vcosq.f32 %v960_v39  ;;  %v7893_v49 = vsel %vm7833_vm5, %v7417_v30, %v853_v36 }
 0x17a   : > { %v7888_v31 = vshrl.u32 %v12414_v4, %v7758_v53  ;;  %v1164_v43 = vxor.u32 2147483648, %v1163_v21  ;;  %v1245_v18 = vadd.s32 536870912, %v1244_v28  ;;  %v7895_v19 = vsel %vm6328_vm7, 0, %v6327_v48 }
 0x17b   : > { %v1356_v9 = vclz %v6338_v57  ;;  %v12157_v59 = vand.u32 2147483647, %v7777_v60  ;;  %v1508_v3 = vsel %vm1507_vm8, %v1506_v40, 0  ;;  %v7898_v33 = vor.u32 %v587_v6, %v586_v2 }
 0x17c   : > { %7057 = vsinq.f32 %v960_v39  ;;  %v7900_v37 = vshrl.u32 %v1245_v18, 30  ;;  %v6341_v5 = vadd.s32 4294967169, %v1396_v58  ;;  %vm12192_vm9 = vcmp.lt.s32.totalorder %v7522_v23, 0 }
 0x17d   : > { %7059 = vcosq.f32 %v7893_v49  ;;  %v1032_v62 = vadd.s32 %v7661_v22, %v7667_v27  ;;  %v1510_v36 = vand.u32 31, %v1508_v3  ;;  %v7908_v48 = vsel %vm12192_vm9, %v1164_v43, %v1163_v21 }
 0x17e   : > { %12415 = vst [vmem:[#allocation22_spill] sm:$0xff] %v7900_v37  ;;  %v1048_v57 = vsub.s32 32, %v7895_v19  ;;  %v1052_v6 = vsub.s32 4294967266, %v7895_v19  ;;  %v6339_v58 = vadd.s32 4294967294, %v1356_v9  ;;  %v1503_v39 = vand.u32 8388607, %v12157_v59 }
 0x17f   : > { %v1511_v8 = vsub.s32 32, %v1510_v36  ;;  %v1247_v22 = vshll.u32 %v7900_v37, 30  ;;  %v12416_v27 = vmov 683565275   ;;  %v12417_v21 = vmov 2475754826  }
 0x180   : > { %v1513_v18 = vshll.u32 %v12416_v27, %v1510_v36  ;;  %v1516_v43 = vshll.u32 %v12417_v21, %v1510_v36  ;;  %v1402_v44 = vadd.s32 1, %v6341_v5  ;;  %v1519_v50 = vshll.u32 %v12396_v54, %v1510_v36 }
 0x181   : > { %v1514_v35 = vshrl.u32 %v12417_v21, %v1511_v8  ;;  %v1517_v2 = vshrl.u32 %v12396_v54, %v1511_v8  ;;  %v1520_v9 = vshrl.u32 %v12397_v61, %v1511_v8  ;;  %v7924_v26 = vpop.eup %7051  ;;  %v1509_v59 = vshrl.u32 %v1508_v3, 5 }
 0x182   : > { %12418 = vst [vmem:[#allocation23_spill] sm:$0xff] %v7924_v26  ;;  %v1522_v40 = vshll.u32 %v12397_v61, %v1510_v36  ;;  %v1523_v37 = vshrl.u32 %v12413_v14, %v1511_v8  ;;  %v1525_v34 = vshll.u32 %v12413_v14, %v1510_v36  ;;  %v7929_v24 = vpop.eup %7053  ;;  %v1526_v42 = vshrl.u32 %v12414_v4, %v1511_v8 }
 0x183   : > { %12419 = vst [vmem:[#allocation24_spill] sm:$0xff] %v7929_v24  ;;  %v1515_v5 = vor.u32 %v1514_v35, %v1513_v18  ;;  %v1518_v30 = vor.u32 %v1517_v2, %v1516_v43  ;;  %v1521_v51 = vor.u32 %v1520_v9, %v1519_v50  ;;  %v7932_v20 = vpop.eup %7055  ;;  %v1050_v10 = vshrl.u32 %v1032_v62, %v1048_v57 }
 0x184   : > { %12420 = vst [vmem:[#allocation25_spill] sm:$0xff] %v7932_v20  ;;  %v1053_v17 = vadd.s32 127, %v1052_v6  ;;  %v7934_v53 = vsub.s32 %v1244_v28, %v1247_v22  ;;  %v1524_v3 = vor.u32 %v1523_v37, %v1522_v40  ;;  %vm6340_vm10 = vcmp.lt.s32.totalorder %v6339_v58, 0 }
 0x185   : > { %v1504_v26 = vor.u32 8388608, %v1503_v39  ;;  %v1527_v0 = vor.u32 %v1526_v42, %v1525_v34  ;;  %v12421_v60 = vand.u32 2147483647, %v7846_v38  ;;  %vm1528_vm11 = vcmp.lt.s32.totalorder %v1509_v59, 1 }
 0x186   : > { %v7938_v12 = vpop.eup %7057  ;;  %vm1530_vm14 = vcmp.lt.s32.totalorder %v1509_v59, 3  ;;  %vm1531_vm0 = vcmp.lt.s32.totalorder %v1509_v59, 4  ;;  %vm1403_vm1 = vcmp.gt.s32.totalorder %v1402_v44, 0  ;;  %v1536_v50 = vsel %vm1528_vm11, %v1515_v5, %v1518_v30 }
 0x187   : > { %v1399_v36 = vand.u32 8388607, %v12421_v60  ;;  %12422 = vst [vmem:[#allocation26_spill] sm:$0xff] %v7938_v12  ;;  %v7940_v35 = vpop.eup %7059  ;;  %v1537_v62 = vsel %vm1531_vm0, %v1524_v3, 920167782  ;;  %v1540_v28 = vsel %vm1528_vm11, %v1518_v30, %v1521_v51  ;;  %v1054_v57 = vshll.u32 %v1053_v17, 23 }
 0x188   : > { %12423 = vst [vmem:[#allocation27_spill] sm:$0xff] %v7940_v35  ;;  %v1541_v37 = vsel %vm1531_vm0, %v1527_v0, 1326507024  ;;  %v7944_v2 = vsel %vm6340_vm10, 0, %v6339_v58  ;;  %v1250_v42 = vsub.s32 0, %v7934_v53  ;;  %v1538_v60 = vsel %vm1530_vm14, %v1521_v51, %v1537_v62 }
 0x189   : > { %vm1529_vm4 = vcmp.lt.s32.totalorder %v1509_v59, 2  ;;  %v1533_v34 = vsel %vm1531_vm0, %v1521_v51, 2102212464  ;;  %v1542_v6 = vsel %vm1530_vm14, %v1524_v3, %v1541_v37  ;;  %v1544_v39 = vshll.u32 %v1504_v26, 8 }
 0x18a   : > { %v1512_v40 = vshrl.u32 %v12416_v27, %v1511_v8  ;;  %v1539_v22 = vsel %vm1529_vm4, %v1536_v50, %v1538_v60  ;;  %v1543_v18 = vsel %vm1529_vm4, %v1540_v28, %v1542_v6  ;;  %v1404_v0 = vsel %vm1403_vm1, %v1402_v44, 0 }
 0x18b   : > { %v1364_v17 = vsub.s32 4294967266, %v7944_v2  ;;  %v7954_v58 = vmul.u32.u64.low %v1544_v39, %v1543_v18  ;;  %v7955_v43 = vmul.u32.u64.high %v1544_v39, %v1543_v18, %v7954_v58  ;;  %v1400_v9 = vor.u32 8388608, %v1399_v36 }
 0x18c   : > { %v7959_v51 = vadd.s32 %v7738_v63, %v7744_v56  ;;  %v6334_v26 = vmin.u32 %v1250_v42, %v7934_v53  ;;  %v1532_v8 = vsel %vm1528_vm11, %v1512_v40, %v1515_v5  ;;  %v1534_v3 = vsel %vm1530_vm14, %v1518_v30, %v1533_v34 }
 0x18d   : > { %v12424_v50 = vshll.u32 %v7727_v41, %v7895_v19  ;;  %v7969_v62 = vmul.u32.u64.low %v1544_v39, %v1539_v22  ;;  %v7970_v28 = vmul.u32.u64.high %v1544_v39, %v1539_v22, %v7969_v62  ;;  %v1406_v36 = vand.u32 31, %v1404_v0 }
 0x18e   : > { %v7973_v37 = vor.u32 4788187, %v1054_v57  ;;  %v1360_v63 = vsub.s32 32, %v7944_v2  ;;  %v7978_v56 = vadd.f32 %v7842_v1, %v7482_v25  ;;  %v7982_v30 = vadd.f32 %v7842_v1, %v7552_v7 }
 0x18f   : > { %v7967_v44 = vor.u32 %v1050_v10, %v12424_v50  ;;  %v7984_v41 = vadd.s32 127, %v1364_v17  ;;  %v1535_v10 = vsel %vm1529_vm4, %v1532_v8, %v1534_v3  ;;  %v1407_v19 = vsub.s32 32, %v1406_v36 }
 0x190   : > { %v7987_v5 = vshll.u32 %v1400_v9, 8  ;;  %v1252_v42 = vclz %v6334_v26  ;;  %vm1553_vm6 = vc.u32 %v7955_v43, %v7969_v62  ;;  %v1405_v57 = vshrl.u32 %v1404_v0, 5 }
 0x191   : > { %v1409_v60 = vshll.u32 %v12416_v27, %v1406_v36  ;;  %v1554_v25 = vadd.s32 1, %v7970_v28  ;;  %v1410_v34 = vshrl.u32 %v12417_v21, %v1407_v19  ;;  %v1412_v7 = vshll.u32 %v12417_v21, %v1406_v36 }
 0x192   : > { %v1413_v6 = vshrl.u32 %v12396_v54, %v1407_v19  ;;  %v1551_v59 = vmul.u32 %v1544_v39, %v1535_v10  ;;  %v1415_v40 = vshll.u32 %v12396_v54, %v1406_v36  ;;  %v1416_v22 = vshrl.u32 %v12397_v61, %v1407_v19 }
 0x193   : > { %v1418_v18 = vshll.u32 %v12397_v61, %v1406_v36  ;;  %v1555_v17 = vsel %vm1553_vm6, %v1554_v25, %v7970_v28  ;;  %v1411_v0 = vor.u32 %v1410_v34, %v1409_v60  ;;  %v1419_v9 = vshrl.u32 %v12413_v14, %v1407_v19 }
 0x194   : > { %v1414_v58 = vor.u32 %v1413_v6, %v1412_v7  ;;  %v12425_v26 = vand.u32 2147483647, %v7522_v23  ;;  %v12426_v8 = vmov 0  ;;  %v6335_v3 = vadd.s32 4294967294, %v1252_v42 }
 0x195   : > { %v1556_v39 = vadd.s32 %v1555_v17, %v1551_v59  ;;  %v1417_v50 = vor.u32 %v1416_v22, %v1415_v40  ;;  %v1707_v10 = vand.u32 2139095040, %v7978_v56  ;;  %v1420_v20 = vor.u32 %v1419_v9, %v1418_v18 }
 0x196   : > { %vm8003_vm7 = vcmp.le.f32.partialorder %v12425_v26, 0.7853982  ;;  %v1421_v12 = vshll.u32 %v12413_v14, %v1406_v36  ;;  %v1422_v28 = vshrl.u32 %v12414_v4, %v1407_v19  ;;  %vm1424_vm8 = vcmp.lt.s32.totalorder %v1405_v57, 1 }
 0x197   : > { %v12427_v8 = vsel %vm8003_vm7, 4294967295, %v12426_v8  ;;  %v1557_v60 = vadd.s32 536870912, %v1556_v39  ;;  %v1408_v25 = vshrl.u32 %v12416_v27, %v1407_v19  ;;  %vm1426_vm10 = vcmp.lt.s32.totalorder %v1405_v57, 3 }
 0x198   : > { %12428 = vst [vmem:[#allocation28_spill] sm:$0xff] %v12427_v8  ;;  %vm1427_vm11 = vcmp.lt.s32.totalorder %v1405_v57, 4  ;;  %v1423_v34 = vor.u32 %v1422_v28, %v1421_v12  ;;  %v1432_v6 = vsel %vm1424_vm8, %v1411_v0, %v1414_v58  ;;  %vm6336_vm14 = vcmp.lt.s32.totalorder %v6335_v3, 0 }
 0x199   : > { %v1429_v7 = vsel %vm1427_vm11, %v1417_v50, 2102212464  ;;  %v1433_v26 = vsel %vm1427_vm11, %v1420_v20, 920167782  ;;  %v8011_v42 = vshrl.u32 %v1557_v60, 30  ;;  %vm1425_vm0 = vcmp.lt.s32.totalorder %v1405_v57, 2 }
 0x19a   : > { %v1434_v59 = vsel %vm1426_vm10, %v1417_v50, %v1433_v26  ;;  %v1428_v40 = vsel %vm1424_vm8, %v1408_v25, %v1411_v0  ;;  %v1436_v22 = vsel %vm1424_vm8, %v1414_v58, %v1417_v50  ;;  %v1437_v18 = vsel %vm1427_vm11, %v1423_v34, 1326507024 }
 0x19b   : > { %12429 = vst [vmem:[#allocation29_spill] sm:$0xff] %v8011_v42  ;;  %v1435_v36 = vsel %vm1425_vm0, %v1432_v6, %v1434_v59  ;;  %v1559_v17 = vshll.u32 %v8011_v42, 30  ;;  %v1430_v19 = vsel %vm1426_vm10, %v1414_v58, %v1429_v7  ;;  %v1438_v12 = vsel %vm1426_vm10, %v1420_v20, %v1437_v18 }
 0x19c   : > { %v1708_v9 = vshrl.u32 %v1707_v10, 23  ;;  %v8018_v28 = vsel %vm6336_vm14, 0, %v6335_v3  ;;  %v1439_v60 = vsel %vm1425_vm0, %v1436_v22, %v1438_v12  ;;  %v1362_v0 = vshrl.u32 %v7959_v51, %v1360_v63 }
 0x19d   : > { %v8022_v35 = vmul.u32.u64.low %v7987_v5, %v1435_v36  ;;  %v8023_v24 = vmul.u32.u64.high %v7987_v5, %v1435_v36, %v8022_v35  ;;  %v8027_v50 = vsub.s32 %v1556_v39, %v1559_v17  ;;  %v8037_v20 = vsel %vm8003_vm7, %v7522_v23, %v7908_v48 }
 0x19e   : > { %v8030_v25 = vmul.u32.u64.low %v7987_v5, %v1439_v60  ;;  %v8031_v34 = vmul.u32.u64.high %v7987_v5, %v1439_v60, %v8030_v25  ;;  %v1366_v58 = vshll.u32 %v7984_v41, 23  ;;  %v1431_v3 = vsel %vm1425_vm0, %v1428_v40, %v1430_v19 }
 0x19f   : > { %v6353_v10 = vadd.s32 4294967169, %v1708_v9  ;;  %v1058_v7 = vcvt.s32.f32 %v7967_v44  ;;  %v1361_v51 = vshll.u32 %v7816_v15, %v7944_v2  ;;  %v1260_v63 = vsub.s32 4294967266, %v8018_v28 }
 0x1a0   : > { %v1562_v39 = vsub.s32 0, %v8027_v50  ;;  %v1056_v6 = vand.u32 2147483647, %v7973_v37  ;;  %v1450_v26 = vadd.s32 1, %v8023_v24  ;;  %v1603_v59 = vand.u32 2139095040, %v7982_v30 }
 0x1a1   : > { %v1714_v48 = vadd.s32 1, %v6353_v10  ;;  %v1363_v41 = vor.u32 %v1362_v0, %v1361_v51  ;;  %v1447_v57 = vmul.u32 %v7987_v5, %v1431_v3  ;;  %vm1449_vm1 = vc.u32 %v8031_v34, %v8022_v35 }
 0x1a2   : > { %v12185_v44 = vand.u32 2147483647, %v7978_v56  ;;  %v1367_v15 = vor.u32 4788187, %v1366_v58  ;;  %v1256_v2 = vsub.s32 32, %v8018_v28  ;;  %v1451_v40 = vsel %vm1449_vm1, %v1450_v26, %v8023_v24 }
 0x1a3   : > { %vm1715_vm4 = vcmp.gt.s32.totalorder %v1714_v48, 0  ;;  %v1261_v37 = vadd.s32 127, %v1260_v63  ;;  %v6346_v36 = vmin.u32 %v1562_v39, %v8027_v50  ;;  %v1452_v22 = vadd.s32 %v1451_v40, %v1447_v57 }
 0x1a4   : > { %v1716_v18 = vsel %vm1715_vm4, %v1714_v48, 0  ;;  %7061 = vsinq.f32 %v7893_v49  ;;  %v1240_v5 = vadd.s32 %v7822_v29, %v7857_v46  ;;  %v1604_v19 = vshrl.u32 %v1603_v59, 23 }
 0x1a5   : > { %v1718_v17 = vand.u32 31, %v1716_v18  ;;  %7063 = vcosq.f32 %v8037_v20  ;;  %v8060_v12 = vmul.f32 %v1058_v7, %v1056_v6  ;;  %v1370_v9 = vcvt.s32.f32 %v1363_v41 }
 0x1a6   : > { %v1453_v60 = vadd.s32 536870912, %v1452_v22  ;;  %v1368_v24 = vand.u32 2147483647, %v1367_v15  ;;  %v1257_v0 = vshll.u32 %v7934_v53, %v8018_v28  ;;  %v1258_v25 = vshrl.u32 %v1240_v5, %v1256_v2 }
 0x1a7   : > { %v1719_v58 = vsub.s32 32, %v1718_v17  ;;  %v1262_v3 = vshll.u32 %v1261_v37, 23  ;;  %v1564_v10 = vclz %v6346_v36  ;;  %v1711_v29 = vand.u32 8388607, %v12185_v44 }
 0x1a8   : > { %v8064_v49 = vshrl.u32 %v1453_v60, 30  ;;  %v1717_v46 = vshrl.u32 %v1716_v18, 5  ;;  %v6349_v63 = vadd.s32 4294967169, %v1604_v19  ;;  %v1721_v6 = vshll.u32 %v12416_v27, %v1718_v17 }
 0x1a9   : > { %v1722_v51 = vshrl.u32 %v12417_v21, %v1719_v58  ;;  %v1725_v7 = vshrl.u32 %v12396_v54, %v1719_v58  ;;  %v1724_v53 = vshll.u32 %v12417_v21, %v1718_v17  ;;  %v1727_v28 = vshll.u32 %v12396_v54, %v1718_v17 }
 0x1aa   : > { %12430 = vst [vmem:[#allocation30_spill] sm:$0xff] %v8064_v49  ;;  %v1455_v39 = vshll.u32 %v8064_v49, 30  ;;  %v1728_v26 = vshrl.u32 %v12397_v61, %v1719_v58  ;;  %v1730_v48 = vshll.u32 %v12397_v61, %v1718_v17  ;;  %v1731_v59 = vshrl.u32 %v12413_v14, %v1719_v58 }
 0x1ab   : > { %v1733_v41 = vshll.u32 %v12413_v14, %v1718_v17  ;;  %v1723_v15 = vor.u32 %v1722_v51, %v1721_v6  ;;  %v1726_v2 = vor.u32 %v1725_v7, %v1724_v53  ;;  %v1734_v40 = vshrl.u32 %v12414_v4, %v1719_v58 }
 0x1ac   : > { %v8078_v57 = vsub.s32 %v1452_v22, %v1455_v39  ;;  %vm12203_vm6 = vcmp.lt.s32.totalorder %v7560_v52, 0  ;;  %v1060_v37 = vxor.u32 2147483648, %v8060_v12  ;;  %v1371_v36 = vmul.f32 %v1370_v9, %v1368_v24 }
 0x1ad   : > { %v1729_v18 = vor.u32 %v1728_v26, %v1727_v28  ;;  %v1732_v5 = vor.u32 %v1731_v59, %v1730_v48  ;;  %v1259_v19 = vor.u32 %v1258_v25, %v1257_v0  ;;  %v1263_v60 = vor.u32 4788187, %v1262_v3 }
 0x1ae   : > { %v1458_v44 = vsub.s32 0, %v8078_v57  ;;  %v1735_v42 = vor.u32 %v1734_v40, %v1733_v41  ;;  %v8084_v49 = vpop.eup %7061  ;;  %v1712_v22 = vor.u32 8388608, %v1711_v29  ;;  %vm1736_vm8 = vcmp.lt.s32.totalorder %v1717_v46, 1 }
 0x1af   : > { %v12191_v17 = vand.u32 2147483647, %v7982_v30  ;;  %v1610_v51 = vadd.s32 1, %v6349_v63  ;;  %v8087_v7 = vpop.eup %7063  ;;  %v6347_v39 = vadd.s32 4294967294, %v1564_v10  ;;  %vm1738_vm10 = vcmp.lt.s32.totalorder %v1717_v46, 3 }
 0x1b0   : > { %12431 = vst [vmem:[#allocation31_spill] sm:$0xff] %v8087_v7  ;;  %vm1739_vm11 = vcmp.lt.s32.totalorder %v1717_v46, 4  ;;  %v1744_v9 = vsel %vm1736_vm8, %v1723_v15, %v1726_v2  ;;  %v1748_v25 = vsel %vm1736_vm8, %v1726_v2, %v1729_v18  ;;  %v6342_v6 = vmin.u32 %v1458_v44, %v8078_v57 }
 0x1b1   : > { %v1741_v24 = vsel %vm1739_vm11, %v1729_v18, 2102212464  ;;  %v1745_v0 = vsel %vm1739_vm11, %v1732_v5, 920167782  ;;  %v1749_v3 = vsel %vm1739_vm11, %v1735_v42, 1326507024  ;;  %v1720_v29 = vshrl.u32 %v12416_v27, %v1719_v58 }
 0x1b2   : > { %vm1737_vm14 = vcmp.lt.s32.totalorder %v1717_v46, 2  ;;  %v1746_v53 = vsel %vm1738_vm10, %v1729_v18, %v1745_v0  ;;  %v1750_v10 = vsel %vm1738_vm10, %v1732_v5, %v1749_v3  ;;  %v1752_v28 = vshll.u32 %v1712_v22, 8 }
 0x1b3   : > { %v1747_v63 = vsel %vm1737_vm14, %v1744_v9, %v1746_v53  ;;  %vm1611_vm0 = vcmp.gt.s32.totalorder %v1610_v51, 0  ;;  %v1740_v26 = vsel %vm1736_vm8, %v1720_v29, %v1723_v15  ;;  %v1742_v48 = vsel %vm1738_vm10, %v1726_v2, %v1741_v24 }
 0x1b4   : > { %v1751_v59 = vsel %vm1737_vm14, %v1748_v25, %v1750_v10  ;;  %v1612_v42 = vsel %vm1611_vm0, %v1610_v51, 0  ;;  %v8102_v58 = vmul.u32.u64.low %v1752_v28, %v1747_v63  ;;  %v8103_v40 = vmul.u32.u64.high %v1752_v28, %v1747_v63, %v8102_v58 }
 0x1b5   : > { %v8099_v41 = vmul.u32.u64.low %v1752_v28, %v1751_v59  ;;  %v8100_v44 = vmul.u32.u64.high %v1752_v28, %v1751_v59, %v8099_v41  ;;  %v1061_v18 = vsel %vm12203_vm6, %v1060_v37, %v8060_v12  ;;  %vm6348_vm1 = vcmp.lt.s32.totalorder %v6347_v39, 0 }
 0x1b6   : > { %v1460_v5 = vclz %v6342_v6  ;;  %v1614_v22 = vand.u32 31, %v1612_v42  ;;  %v1372_v15 = vxor.u32 2147483648, %v1371_v36  ;;  %v1264_v9 = vand.u32 2147483647, %v1263_v60 }
 0x1b7   : > { %v1743_v2 = vsel %vm1737_vm14, %v1740_v26, %v1742_v48  ;;  %v1607_v51 = vand.u32 8388607, %v12191_v17  ;;  %7065 = vsinq.f32 %v8037_v20  ;;  %v12432_v0 = vand.u32 2147483647, %v7560_v52 }
 0x1b8   : > { %vm12190_vm8 = vcmp.lt.s32.totalorder %v7626_v32, 0  ;;  %v1266_v12 = vcvt.s32.f32 %v1259_v19  ;;  %v8122_v37 = vsel %vm6348_vm1, 0, %v6347_v39  ;;  %vm1761_vm10 = vc.u32 %v8100_v44, %v8102_v58 }
 0x1b9   : > { %vm8117_vm4 = vcmp.le.f32.partialorder %v12432_v0, 0.7853982  ;;  %v1762_v46 = vadd.s32 1, %v8103_v40  ;;  %v6343_v60 = vadd.s32 4294967294, %v1460_v5  ;;  %v1759_v3 = vmul.u32 %v1752_v28, %v1743_v2 }
 0x1ba   : > { %v8130_v20 = vsel %vm8117_vm4, %v7560_v52, %v1061_v18  ;;  %v1615_v6 = vsub.s32 32, %v1614_v22  ;;  %v8134_v29 = vsel %vm12190_vm8, %v1372_v15, %v1371_v36  ;;  %v8136_v19 = vmul.f32 %v1266_v12, %v1264_v9 }
 0x1bb   : > { %v1763_v39 = vsel %vm1761_vm10, %v1762_v46, %v8103_v40  ;;  %v1608_v53 = vor.u32 8388608, %v1607_v51  ;;  %v1572_v63 = vsub.s32 4294967266, %v8122_v37  ;;  %v1617_v26 = vshll.u32 %v12416_v27, %v1614_v22 }
 0x1bc   : > { %v1764_v10 = vadd.s32 %v1763_v39, %v1759_v3  ;;  %v1620_v48 = vshll.u32 %v12417_v21, %v1614_v22  ;;  %v1618_v59 = vshrl.u32 %v12417_v21, %v1615_v6  ;;  %v1621_v28 = vshrl.u32 %v12396_v54, %v1615_v6 }
 0x1bd   : > { %v1623_v41 = vshll.u32 %v12396_v54, %v1614_v22  ;;  %v1624_v36 = vshrl.u32 %v12397_v61, %v1615_v6  ;;  %vm6344_vm11 = vcmp.lt.s32.totalorder %v6343_v60, 0  ;;  %v1613_v5 = vshrl.u32 %v1612_v42, 5 }
 0x1be   : > { %v1765_v18 = vadd.s32 536870912, %v1764_v10  ;;  %v1626_v40 = vshll.u32 %v12397_v61, %v1614_v22  ;;  %v1619_v15 = vor.u32 %v1618_v59, %v1617_v26  ;;  %v1622_v9 = vor.u32 %v1621_v28, %v1620_v48 }
 0x1bf   : > { %v1625_v2 = vor.u32 %v1624_v36, %v1623_v41  ;;  %v1627_v51 = vshrl.u32 %v12413_v14, %v1615_v6  ;;  %v1268_v0 = vxor.u32 2147483648, %v8136_v19  ;;  %v1629_v12 = vshll.u32 %v12413_v14, %v1614_v22 }
 0x1c0   : > { %v1630_v46 = vshrl.u32 %v12414_v4, %v1615_v6  ;;  %v8153_v3 = vadd.f32 %v7842_v1, %v7602_v13  ;;  %v12435_v39 = vand.u32 2147483647, %v7626_v32  ;;  %v12436_v42 = vmov 0 }
 0x1c1   : > { %vm12202_vm0 = vcmp.lt.s32.totalorder %v7674_v16, 0  ;;  %v1573_v26 = vadd.s32 127, %v1572_v63  ;;  %v8162_v48 = vsel %vm6344_vm11, 0, %v6343_v60  ;;  %v8164_v59 = vshrl.u32 %v1765_v18, 30  ;;  %v8166_v28 = vpop.eup %7065 }
 0x1c2   : > { %vm8157_vm14 = vcmp.le.f32.partialorder %v12435_v39, 0.7853982  ;;  %v1628_v22 = vor.u32 %v1627_v51, %v1626_v40  ;;  %12440 = vst [vmem:[#allocation34_spill] sm:$0xff] %v8166_v28  ;;  %v1631_v41 = vor.u32 %v1630_v46, %v1629_v12  ;;  %vm1632_vm1 = vcmp.lt.s32.totalorder %v1613_v5, 1 }
 0x1c3   : > { %v12437_v42 = vsel %vm8157_vm14, 4294967295, %v12436_v42  ;;  %12439 = vst [vmem:[#allocation33_spill] sm:$0xff] %v8164_v59  ;;  %vm1635_vm10 = vcmp.lt.s32.totalorder %v1613_v5, 4  ;;  %v1648_v13 = vshll.u32 %v1608_v53, 8  ;;  %vm1634_vm8 = vcmp.lt.s32.totalorder %v1613_v5, 3 }
 0x1c4   : > { %12438 = vst [vmem:[#allocation32_spill] sm:$0xff] %v12437_v42  ;;  %v1637_v36 = vsel %vm1635_vm10, %v1625_v2, 2102212464  ;;  %v1640_v39 = vsel %vm1632_vm1, %v1619_v15, %v1622_v9  ;;  %v1641_v17 = vsel %vm1635_vm10, %v1628_v22, 920167782  ;;  %v1616_v24 = vshrl.u32 %v12416_v27, %v1615_v6 }
 0x1c5   : > { %vm1633_vm9 = vcmp.lt.s32.totalorder %v1613_v5, 2  ;;  %v1642_v60 = vsel %vm1634_vm8, %v1625_v2, %v1641_v17  ;;  %v1915_v63 = vand.u32 2139095040, %v8153_v3  ;;  %v1767_v18 = vshll.u32 %v8164_v59, 30 }
 0x1c6   : > { %v1643_v40 = vsel %vm1633_vm9, %v1640_v39, %v1642_v60  ;;  %v1644_v51 = vsel %vm1632_vm1, %v1622_v9, %v1625_v2  ;;  %v1645_v12 = vsel %vm1635_vm10, %v1631_v41, 1326507024  ;;  %v12441_v53 = vand.u32 2147483647, %v7674_v16  ;;  %v2224_v41 = vld [vmem:[%s12122_s3] sm:$0xff] }
 0x1c7   : > { %v12442_v46 = vmov 0  ;;  %v1568_v6 = vsub.s32 32, %v8122_v37  ;;  %v1636_v7 = vsel %vm1632_vm1, %v1616_v24, %v1619_v15  ;;  %v1638_v17 = vsel %vm1634_vm8, %v1622_v9, %v1637_v36 }
 0x1c8   : > { %vm8177_vm11 = vcmp.le.f32.partialorder %v12441_v53, 0.7853982  ;;  %v1646_v28 = vsel %vm1634_vm8, %v1628_v22, %v1645_v12  ;;  %v1574_v59 = vshll.u32 %v1573_v26, 23  ;;  %v2225_v53 = vld [vmem:[%s12122_s3 + $0x8] sm:$0xff]  ;;  %v1552_v24 = vadd.s32 %v7969_v62, %v7955_v43 }
 0x1c9   : > { %v12443_v46 = vsel %vm8177_vm11, 4294967295, %v12442_v46  ;;  %v1647_v39 = vsel %vm1633_vm9, %v1644_v51, %v1646_v28  ;;  %v8186_v60 = vmul.u32.u64.low %v1648_v13, %v1643_v40  ;;  %v8187_v2 = vmul.u32.u64.high %v1648_v13, %v1643_v40, %v8186_v60 }
 0x1ca   : > { %12444 = vst [vmem:[#allocation35_spill] sm:$0xff] %v12443_v46  ;;  %v1468_v15 = vsub.s32 4294967266, %v8162_v48  ;;  %v8199_v9 = vmul.u32.u64.low %v1648_v13, %v1647_v39  ;;  %v8200_v26 = vmul.u32.u64.high %v1648_v13, %v1647_v39, %v8199_v9  ;;  %7067 = vcosq.f32 %v8130_v20 }
 0x1cb   : > { %v8203_v22 = vsub.s32 %v1764_v10, %v1767_v18  ;;  %v1639_v28 = vsel %vm1633_vm9, %v1636_v7, %v1638_v17  ;;  %v1916_v36 = vshrl.u32 %v1915_v63, 23  ;;  %v1376_v40 = vsel %vm8157_vm14, %v7626_v32, %v8134_v29 }
 0x1cc   : > { %v1269_v43 = vsel %vm12202_vm0, %v1268_v0, %v8136_v19  ;;  %v1570_v62 = vshrl.u32 %v1552_v24, %v1568_v6  ;;  %v6789_v51 = vpack.c.bf16 %v2225_v53, %v2224_v41  ;;  %v1569_v12 = vshll.u32 %v8027_v50, %v8122_v37 }
 0x1cd   : > { %v1575_v39 = vor.u32 4788187, %v1574_v59  ;;  %v1658_v10 = vadd.s32 1, %v8187_v2  ;;  %v6361_v5 = vadd.s32 4294967169, %v1916_v36  ;;  %v1464_v7 = vsub.s32 32, %v8162_v48 }
 0x1ce   : > { %v1469_v63 = vadd.s32 127, %v1468_v15  ;;  %v1655_v18 = vmul.u32 %v1648_v13, %v1639_v28  ;;  %vm1657_vm9 = vc.u32 %v8200_v26, %v8186_v60  ;;  %6790 = vmatprep.subr.bf16.mxu1 %v6789_v51  ;;  %v1770_v29 = vsub.s32 0, %v8203_v22 }
 0x1cf   : > { %v1659_v19 = vsel %vm1657_vm9, %v1658_v10, %v8187_v2  ;;  %v1922_v0 = vadd.s32 1, %v6361_v5  ;;  %v8223_v50 = vadd.f32 %v7842_v1, %v7683_v11  ;;  %6792 = vmatpush3.bf16.msra.mxu1 %v6789_v51  ;;  %7069 = vsinq.f32 %v8130_v20 }
 0x1d0   : > { %v1571_v37 = vor.u32 %v1570_v62, %v1569_v12  ;;  %v1448_v59 = vadd.s32 %v8022_v35, %v8031_v34  ;;  %v1660_v13 = vadd.s32 %v1659_v19, %v1655_v18  ;;  %vm595_vm8 = vcmp.lt.s32.totalorder %v7749_v45, 4 }
 0x1d1   : > { %7071 = vcosq.f32 %v1376_v40  ;;  %v8232_v6 = vsel %vm8177_vm11, %v7674_v16, %v1269_v43  ;;  %vm1923_vm1 = vcmp.gt.s32.totalorder %v1922_v0, 0  ;;  %v1576_v17 = vand.u32 2147483647, %v1575_v39 }
 0x1d2   : > { %v1466_v11 = vshrl.u32 %v1448_v59, %v1464_v7  ;;  %v1470_v2 = vshll.u32 %v1469_v63, 23  ;;  %v1661_v41 = vadd.s32 536870912, %v1660_v13  ;;  %v6354_v20 = vmin.u32 %v1770_v29, %v8203_v22 }
 0x1d3   : > { %v12197_v53 = vand.u32 2147483647, %v8153_v3  ;;  %v1924_v24 = vsel %vm1923_vm1, %v1922_v0, 0  ;;  %v1811_v35 = vand.u32 2139095040, %v8223_v50  ;;  %7073 = vsinq.f32 %v1376_v40 }
 0x1d4   : > { %v1578_v34 = vcvt.s32.f32 %v1571_v37  ;;  %v1465_v15 = vshll.u32 %v8078_v57, %v8162_v48  ;;  %v8239_v9 = vshrl.u32 %v1661_v41, 30  ;;  %v8241_v28 = vpop.eup %7067  ;;  %v8246_v36 = vsel %vm595_vm8, %v7898_v33, 920167782 }
 0x1d5   : > { %12446 = vst [vmem:[#allocation37_spill] sm:$0xff] %v8241_v28  ;;  %v12447_v43 = vor.u32 %v7888_v31, %v7884_v47  ;;  %7075 = vcosq.f32 %v8232_v6  ;;  %v1926_v40 = vand.u32 31, %v1924_v24  ;;  %v8260_v51 = vor.u32 4788187, %v1470_v2 }
 0x1d6   : > { %12445 = vst [vmem:[#allocation36_spill] sm:$0xff] %v8239_v9  ;;  %v8256_v57 = vmul.f32 %v1578_v34, %v1576_v17  ;;  %v8258_v48 = vor.u32 %v1466_v11, %v1465_v15  ;;  %v1663_v12 = vshll.u32 %v8239_v9, 30  ;;  %v1772_v39 = vclz %v6354_v20 }
 0x1d7   : > { %v8253_v62 = vsel %vm595_vm8, %v12447_v43, 1326507024  ;;  %v1919_v10 = vand.u32 8388607, %v12197_v53  ;;  %v1927_v47 = vsub.s32 32, %v1926_v40  ;;  %v1812_v31 = vshrl.u32 %v1811_v35, 23 }
 0x1d8   : > { %v8265_v5 = vsub.s32 %v1660_v13, %v1663_v12  ;;  %v1925_v7 = vshrl.u32 %v1924_v24, 5  ;;  %v1929_v63 = vshll.u32 %v12416_v27, %v1926_v40  ;;  %v1932_v18 = vshll.u32 %v12417_v21, %v1926_v40 }
 0x1d9   : > { %v1930_v29 = vshrl.u32 %v12417_v21, %v1927_v47  ;;  %v1933_v19 = vshrl.u32 %v12396_v54, %v1927_v47  ;;  %v1935_v0 = vshll.u32 %v12396_v54, %v1926_v40  ;;  %v1936_v37 = vshrl.u32 %v12397_v61, %v1927_v47  ;;  %v8273_v59 = vpop.eup %7069 }
 0x1da   : > { %12448 = vst [vmem:[#allocation38_spill] sm:$0xff] %v8273_v59  ;;  %v1472_v17 = vand.u32 2147483647, %v8260_v51  ;;  %v1938_v13 = vshll.u32 %v12397_v61, %v1926_v40  ;;  %v1939_v11 = vshrl.u32 %v12413_v14, %v1927_v47  ;;  %v1941_v2 = vshll.u32 %v12413_v14, %v1926_v40 }
 0x1db   : > { %v8279_v41 = vpop.eup %7071  ;;  %v1931_v20 = vor.u32 %v1930_v29, %v1929_v63  ;;  %v1934_v24 = vor.u32 %v1933_v19, %v1932_v18  ;;  %v1937_v35 = vor.u32 %v1936_v37, %v1935_v0  ;;  %v1942_v34 = vshrl.u32 %v12414_v4, %v1927_v47 }
 0x1dc   : > { %12449 = vst [vmem:[#allocation39_spill] sm:$0xff] %v8279_v41  ;;  %v1666_v15 = vsub.s32 0, %v8265_v5  ;;  %v1920_v43 = vor.u32 8388608, %v1919_v10  ;;  %v1940_v12 = vor.u32 %v1939_v11, %v1938_v13  ;;  %v6355_v51 = vadd.s32 4294967294, %v1772_v39 }
 0x1dd   : > { %v1943_v9 = vor.u32 %v1942_v34, %v1941_v2  ;;  %vm1947_vm10 = vcmp.lt.s32.totalorder %v1925_v7, 4  ;;  %v6357_v28 = vadd.s32 4294967169, %v1812_v31  ;;  %v8284_v59 = vpop.eup %7073  ;;  %v1928_v40 = vshrl.u32 %v12416_v27, %v1927_v47 }
 0x1de   : > { %12450 = vst [vmem:[#allocation40_spill] sm:$0xff] %v8284_v59  ;;  %vm1944_vm9 = vcmp.lt.s32.totalorder %v1925_v7, 1  ;;  %vm1946_vm1 = vcmp.lt.s32.totalorder %v1925_v7, 3  ;;  %v1949_v63 = vsel %vm1947_vm10, %v1937_v35, 2102212464  ;;  %v6350_v37 = vmin.u32 %v1666_v15, %v8265_v5 }
 0x1df   : > { %v8287_v18 = vpop.eup %7075  ;;  %v1952_v29 = vsel %vm1944_vm9, %v1931_v20, %v1934_v24  ;;  %v1953_v19 = vsel %vm1947_vm10, %v1940_v12, 920167782  ;;  %v1956_v0 = vsel %vm1944_vm9, %v1934_v24, %v1937_v35  ;;  %v1957_v10 = vsel %vm1947_vm10, %v1943_v9, 1326507024 }
 0x1e0   : > { %12451 = vst [vmem:[#allocation41_spill] sm:$0xff] %v8287_v18  ;;  %v1954_v13 = vsel %vm1946_vm1, %v1937_v35, %v1953_v19  ;;  %v1960_v39 = vshll.u32 %v1920_v43, 8  ;;  %v8292_v31 = vadd.f32 %v7842_v1, %v7746_v55  ;;  %vm6356_vm0 = vcmp.lt.s32.totalorder %v6355_v51, 0 }
 0x1e1   : > { %vm1945_vm6 = vcmp.lt.s32.totalorder %v1925_v7, 2  ;;  %v1948_v47 = vsel %vm1944_vm9, %v1928_v40, %v1931_v20  ;;  %v1958_v11 = vsel %vm1946_vm1, %v1940_v12, %v1957_v10  ;;  %v1950_v2 = vsel %vm1946_vm1, %v1934_v24, %v1949_v63 }
 0x1e2   : > { %12452 = vst [vmem:[#allocation42_spill] sm:$0xff] %v8292_v31  ;;  %v1955_v34 = vsel %vm1945_vm6, %v1952_v29, %v1954_v13  ;;  %v1959_v53 = vsel %vm1945_vm6, %v1956_v0, %v1958_v11  ;;  %v1818_v41 = vadd.s32 1, %v6357_v28  ;;  %v1474_v59 = vcvt.s32.f32 %v8258_v48 }
 0x1e3   : > { %v8295_v18 = vmul.u32.u64.low %v1960_v39, %v1959_v53  ;;  %v8296_v9 = vmul.u32.u64.high %v1960_v39, %v1959_v53, %v8295_v18  ;;  %v12453_v35 = vand.u32 2147483647, %v8223_v50  ;;  %v1775_v43 = vsel %vm6356_vm0, 0, %v6355_v51 }
 0x1e4   : > { %v1668_v19 = vclz %v6350_v37  ;;  %vm1819_vm10 = vcmp.gt.s32.totalorder %v1818_v41, 0  ;;  %v2123_v55 = vand.u32 2139095040, %v8292_v31  ;;  %v1951_v1 = vsel %vm1945_vm6, %v1948_v47, %v1950_v2 }
 0x1e5   : > { %v1815_v15 = vand.u32 8388607, %v12453_v35  ;;  %v8301_v7 = vmul.u32.u64.low %v1960_v39, %v1955_v34  ;;  %v8302_v20 = vmul.u32.u64.high %v1960_v39, %v1955_v34, %v8301_v7  ;;  %v1820_v24 = vsel %vm1819_vm10, %v1818_v41, 0 }
 0x1e6   : > { %v8306_v48 = vmul.f32 %v1474_v59, %v1472_v17  ;;  %v1760_v53 = vadd.s32 %v8102_v58, %v8100_v44  ;;  %v1822_v12 = vand.u32 31, %v1820_v24  ;;  %v1776_v40 = vsub.s32 32, %v1775_v43 }
 0x1e7   : > { %v1780_v51 = vsub.s32 4294967266, %v1775_v43  ;;  %v8312_v63 = vadd.s32 %v8186_v60, %v8200_v26  ;;  %v1816_v18 = vor.u32 8388608, %v1815_v15  ;;  %v6351_v29 = vadd.s32 4294967294, %v1668_v19 }
 0x1e8   : > { %v1967_v0 = vmul.u32 %v1960_v39, %v1951_v1  ;;  %vm1969_vm6 = vc.u32 %v8296_v9, %v8301_v7  ;;  %v1823_v41 = vsub.s32 32, %v1822_v12  ;;  %v1970_v59 = vadd.s32 1, %v8302_v20 }
 0x1e9   : > { %v1821_v17 = vshrl.u32 %v1820_v24, 5  ;;  %v1825_v10 = vshll.u32 %v12416_v27, %v1822_v12  ;;  %v2124_v44 = vshrl.u32 %v2123_v55, 23  ;;  %v1828_v37 = vshll.u32 %v12417_v21, %v1822_v12 }
 0x1ea   : > { %v1826_v58 = vshrl.u32 %v12417_v21, %v1823_v41  ;;  %v1831_v60 = vshll.u32 %v12396_v54, %v1822_v12  ;;  %v1834_v26 = vshll.u32 %v12397_v61, %v1822_v12  ;;  %v1971_v13 = vsel %vm1969_vm6, %v1970_v59, %v8302_v20 }
 0x1eb   : > { %v1829_v39 = vshrl.u32 %v12396_v54, %v1823_v41  ;;  %v1832_v47 = vshrl.u32 %v12397_v61, %v1823_v41  ;;  %v1835_v11 = vshrl.u32 %v12413_v14, %v1823_v41  ;;  %v1777_v2 = vshll.u32 %v8203_v22, %v1775_v43 }
 0x1ec   : > { %v1972_v34 = vadd.s32 %v1971_v13, %v1967_v0  ;;  %v1827_v35 = vor.u32 %v1826_v58, %v1825_v10  ;;  %v1837_v15 = vshll.u32 %v12413_v14, %v1822_v12  ;;  %v1838_v24 = vshrl.u32 %v12414_v4, %v1823_v41 }
 0x1ed   : > { %v1830_v19 = vor.u32 %v1829_v39, %v1828_v37  ;;  %v1833_v55 = vor.u32 %v1832_v47, %v1831_v60  ;;  %v1836_v1 = vor.u32 %v1835_v11, %v1834_v26  ;;  %v1778_v28 = vshrl.u32 %v1760_v53, %v1776_v40  ;;  %v2227_v11 = vld [vmem:[%s12122_s3 + $0x18] sm:$0xff] }
 0x1ee   : > { %v1781_v42 = vadd.s32 127, %v1780_v51  ;;  %v1973_v20 = vadd.s32 536870912, %v1972_v34  ;;  %v8329_v59 = vshll.u32 %v1816_v18, 8  ;;  %vm6352_vm0 = vcmp.lt.s32.totalorder %v6351_v29, 0 }
 0x1ef   : > { %v1839_v46 = vor.u32 %v1838_v24, %v1837_v15  ;;  %vm1840_vm9 = vcmp.lt.s32.totalorder %v1821_v17, 1  ;;  %v6369_v32 = vadd.s32 4294967169, %v2124_v44  ;;  %vm1842_vm1 = vcmp.lt.s32.totalorder %v1821_v17, 3 }
 0x1f0   : > { %v8331_v8 = vshrl.u32 %v1973_v20, 30  ;;  %vm1843_vm10 = vcmp.lt.s32.totalorder %v1821_v17, 4  ;;  %v1848_v22 = vsel %vm1840_vm9, %v1827_v35, %v1830_v19  ;;  %v1852_v0 = vsel %vm1840_vm9, %v1830_v19, %v1833_v55 }
 0x1f1   : > { %v1845_v43 = vsel %vm1843_vm10, %v1833_v55, 2102212464  ;;  %v1849_v12 = vsel %vm1843_vm10, %v1836_v1, 920167782  ;;  %v1853_v10 = vsel %vm1843_vm10, %v1839_v46, 1326507024  ;;  %v1824_v40 = vshrl.u32 %v12416_v27, %v1823_v41 }
 0x1f2   : > { %12454 = vst [vmem:[#allocation43_spill] sm:$0xff] %v8331_v8  ;;  %v1975_v53 = vshll.u32 %v8331_v8, 30  ;;  %vm1841_vm6 = vcmp.lt.s32.totalorder %v1821_v17, 2  ;;  %v1850_v51 = vsel %vm1842_vm1, %v1833_v55, %v1849_v12  ;;  %v8338_v18 = vor.u32 %v1778_v28, %v1777_v2  ;;  %v2226_v28 = vld [vmem:[%s12122_s3 + $0x10] sm:$0xff]  ;;  %v2228_v2 = vld [vmem:[%s12122_s3 + $0x20] sm:$0xff] }
 0x1f3   : > { %v8341_v44 = vsel %vm6352_vm0, 0, %v6351_v29  ;;  %v1851_v58 = vsel %vm1841_vm6, %v1848_v22, %v1850_v51  ;;  %v1854_v37 = vsel %vm1842_vm1, %v1836_v1, %v1853_v10  ;;  %v1844_v46 = vsel %vm1840_vm9, %v1824_v40, %v1827_v35  ;;  %v7276_v10 = vld [vmem:[%s12121_s2] ss:$0 sm:$0xff]  ;;  %v12455_v17 = vld [vmem:[#allocation21_spill] sm:$0xff] }
 0x1f4   : > { %v8345_v60 = vsub.s32 %v1972_v34, %v1975_v53  ;;  %v1846_v26 = vsel %vm1842_vm1, %v1830_v19, %v1845_v43  ;;  %v1855_v41 = vsel %vm1841_vm6, %v1852_v0, %v1854_v37  ;;  %v1782_v13 = vshll.u32 %v1781_v42, 23  ;;  %v2229_v34 = vld [vmem:[%s12122_s3 + $0x28] sm:$0xff] }
 0x1f5   : > { %v8354_v29 = vmul.u32.u64.low %v8329_v59, %v1855_v41  ;;  %v8355_v39 = vmul.u32.u64.high %v8329_v59, %v1855_v41, %v8354_v29  ;;  %v2130_v47 = vadd.s32 1, %v6369_v32  ;;  %v1672_v35 = vsub.s32 32, %v8341_v44 }
 0x1f6   : > { %v1978_v42 = vsub.s32 0, %v8345_v60  ;;  %v8369_v15 = vmul.u32.u64.low %v8329_v59, %v1851_v58  ;;  %v8370_v19 = vmul.u32.u64.high %v8329_v59, %v1851_v58, %v8369_v15  ;;  %v1676_v32 = vsub.s32 4294967266, %v8341_v44 }
 0x1f7   : > { %v1847_v55 = vsel %vm1841_vm6, %v1844_v46, %v1846_v26  ;;  %v12212_v1 = vand.u32 2147483647, %v8292_v31  ;;  %vm2131_vm0 = vcmp.gt.s32.totalorder %v2130_v47, 0  ;;  %v6793_v22 = vpack.c.bf16 %v2227_v11, %v2226_v28 }
 0x1f8   : > { %v6362_v24 = vmin.u32 %v1978_v42, %v8345_v60  ;;  %v2132_v20 = vsel %vm2131_vm0, %v2130_v47, 0  ;;  %v6797_v43 = vpack.c.bf16 %v2229_v34, %v2228_v2  ;;  %v8377_v12 = vor.u32 4788187, %v1782_v13 }
 0x1f9   : > { %vm1865_vm9 = vc.u32 %v8355_v39, %v8369_v15  ;;  %v2134_v0 = vand.u32 31, %v2132_v20  ;;  %v8385_v53 = vadd.f32 %v7276_v10, %v12455_v17  ;;  %v1674_v51 = vshrl.u32 %v8312_v63, %v1672_v35  ;;  %6794 = vmatprep.subr.bf16.mxu1 %v6793_v22 }
 0x1fa   : > { %v1980_v58 = vclz %v6362_v24  ;;  %v1866_v37 = vadd.s32 1, %v8370_v19  ;;  %v8390_v46 = vadd.s32 127, %v1676_v32  ;;  %v1863_v26 = vmul.u32 %v8329_v59, %v1847_v55  ;;  %6796 = vmatpush3.bf16.msra.mxu1 %v6793_v22 }
 0x1fb   : > { %v2127_v41 = vand.u32 8388607, %v12212_v1  ;;  %v2135_v28 = vsub.s32 32, %v2134_v0  ;;  %v8396_v29 = vshrl.u32 %v2132_v20, 5  ;;  %v2137_v47 = vshll.u32 %v12416_v27, %v2134_v0  ;;  %6798 = vmatprep.subr.bf16.mxu1 %v6797_v43 }
 0x1fc   : > { %v1867_v13 = vsel %vm1865_vm9, %v1866_v37, %v8370_v19  ;;  %v2140_v63 = vshll.u32 %v12417_v21, %v2134_v0  ;;  %v2143_v59 = vshll.u32 %v12396_v54, %v2134_v0  ;;  %v6363_v35 = vadd.s32 4294967294, %v1980_v58 }
 0x1fd   : > { %v1868_v11 = vadd.s32 %v1867_v13, %v1863_v26  ;;  %v2138_v2 = vshrl.u32 %v12417_v21, %v2135_v28  ;;  %v2141_v34 = vshrl.u32 %v12396_v54, %v2135_v28  ;;  %v2144_v42 = vshrl.u32 %v12397_v61, %v2135_v28 }
 0x1fe   : > { %v2146_v32 = vshll.u32 %v12397_v61, %v2134_v0  ;;  %v2147_v19 = vshrl.u32 %v12413_v14, %v2135_v28  ;;  %v2150_v22 = vshrl.u32 %v12414_v4, %v2135_v28  ;;  %6800 = vmatpush3.bf16.msra.mxu1 %v6797_v43  ;;  %v1784_v10 = vand.u32 2147483647, %v8377_v12  ;;  %v12457_v43 = vld [vmem:[#allocation16_spill] sm:$0xff] }
 0x1ff   : > { %v1869_v55 = vadd.s32 536870912, %v1868_v11  ;;  %v2139_v24 = vor.u32 %v2138_v2, %v2137_v47  ;;  %v2142_v20 = vor.u32 %v2141_v34, %v2140_v63  ;;  %v1673_v17 = vshll.u32 %v8265_v5, %v8341_v44 }
 0x200   : > { %v2128_v37 = vor.u32 8388608, %v2127_v41  ;;  %v2019_v58 = vand.u32 2139095040, %v8385_v53  ;;  %v2145_v13 = vor.u32 %v2144_v42, %v2143_v59  ;;  %v2148_v1 = vor.u32 %v2147_v19, %v2146_v32  ;;  %v2231_v32 = vld [vmem:[%s12122_s3 + $0x38] sm:$0xff] }
 0x201   : > { %v8411_v26 = vshrl.u32 %v1869_v55, 30  ;;  %v2149_v40 = vshll.u32 %v12413_v14, %v2134_v0  ;;  %v8414_v8 = vor.u32 %v1674_v51, %v1673_v17  ;;  %v1678_v47 = vshll.u32 %v8390_v46, 23 }
 0x202   : > { %vm6364_vm1 = vcmp.lt.s32.totalorder %v6363_v35, 0  ;;  %vm2152_vm10 = vcmp.lt.s32.totalorder %v8396_v29, 1  ;;  %vm12225_vm6 = vcmp.lt.s32.totalorder %v12457_v43, 0  ;;  %vm2155_vm0 = vcmp.lt.s32.totalorder %v8396_v29, 4 }
 0x203   : > { %12456 = vst [vmem:[#allocation21_spill] sm:$0xff] %v8411_v26  ;;  %v1871_v5 = vshll.u32 %v8411_v26, 30  ;;  %v2151_v44 = vor.u32 %v2150_v22, %v2149_v40  ;;  %v2160_v12 = vsel %vm2152_vm10, %v2139_v24, %v2142_v20  ;;  %vm2154_vm9 = vcmp.lt.s32.totalorder %v8396_v29, 3 }
 0x204   : > { %v2161_v0 = vsel %vm2155_vm0, %v2148_v1, 920167782  ;;  %v2168_v51 = vshll.u32 %v2128_v37, 8  ;;  %v2020_v46 = vshrl.u32 %v2019_v58, 23  ;;  %vm2153_vm13 = vcmp.lt.s32.totalorder %v8396_v29, 2 }
 0x205   : > { %v8426_v41 = vsub.s32 %v1868_v11, %v1871_v5  ;;  %v2157_v63 = vsel %vm2155_vm0, %v2145_v13, 2102212464  ;;  %v2162_v40 = vsel %vm2154_vm9, %v2145_v13, %v2161_v0  ;;  %v1983_v2 = vsel %vm6364_vm1, 0, %v6363_v35  ;;  %v2230_v11 = vld [vmem:[%s12122_s3 + $0x30] sm:$0xff] }
 0x206   : > { %v2136_v34 = vshrl.u32 %v12416_v27, %v2135_v28  ;;  %v2163_v59 = vsel %vm2153_vm13, %v2160_v12, %v2162_v40  ;;  %v2164_v42 = vsel %vm2152_vm10, %v2142_v20, %v2145_v13  ;;  %v2165_v35 = vsel %vm2155_vm0, %v2151_v44, 1326507024 }
 0x207   : > { %v1874_v19 = vsub.s32 0, %v8426_v41  ;;  %v8447_v28 = vmul.u32.u64.low %v2168_v51, %v2163_v59  ;;  %v8448_v55 = vmul.u32.u64.high %v2168_v51, %v2163_v59, %v8447_v28  ;;  %v12458_v22 = vand.u32 2147483647, %v12457_v43 }
 0x208   : > { %vm12226_vm3 = vcmp.lt.s32.totalorder %v7846_v38, 0  ;;  %v2156_v37 = vsel %vm2152_vm10, %v2136_v34, %v2139_v24  ;;  %v2158_v58 = vsel %vm2154_vm9, %v2142_v20, %v2157_v63  ;;  %v2166_v13 = vsel %vm2154_vm9, %v2148_v1, %v2165_v35 }
 0x209   : > { %vm8453_vm1 = vcmp.le.f32.partialorder %v12458_v22, 0.7853982  ;;  %v6365_v5 = vadd.s32 4294967169, %v2020_v46  ;;  %v1679_v44 = vor.u32 4788187, %v1678_v47  ;;  %v6358_v12 = vmin.u32 %v1874_v19, %v8426_v41 }
 0x20a   : > { %v2167_v0 = vsel %vm2153_vm13, %v2164_v42, %v2166_v13  ;;  %v6801_v40 = vpack.c.bf16 %v2231_v32, %v2230_v11  ;;  %v1984_v59 = vsub.s32 32, %v1983_v2  ;;  %v2159_v20 = vsel %vm2153_vm13, %v2156_v37, %v2158_v58 }
 0x20b   : > { %v8467_v22 = vmul.u32.u64.low %v2168_v51, %v2167_v0  ;;  %v8468_v26 = vmul.u32.u64.high %v2168_v51, %v2167_v0, %v8467_v22  ;;  %v2026_v16 = vadd.s32 1, %v6365_v5  ;;  %v1876_v24 = vclz %v6358_v12 }
 0x20c   : > { %v2178_v63 = vadd.s32 1, %v8448_v55  ;;  %v12221_v1 = vand.u32 2147483647, %v8385_v53  ;;  %6802 = vmatprep.subr.bf16.mxu1 %v6801_v40  ;;  %v12461_v47 = vxor.u32 2147483648, %v8256_v57  ;;  %v1476_v34 = vxor.u32 2147483648, %v8306_v48 }
 0x20d   : > { %v1968_v42 = vadd.s32 %v8301_v7, %v8296_v9  ;;  %vm2027_vm10 = vcmp.gt.s32.totalorder %v2026_v16, 0  ;;  %6804 = vmatpush3.bf16.msra.mxu1 %v6801_v40  ;;  %v12462_v29 = vcvt.s32.f32 %v8338_v18  ;;  %v1680_v32 = vand.u32 2147483647, %v1679_v44 }
 0x20e   : > { %v1581_v46 = vsel %vm12225_vm6, %v12461_v47, %v8256_v57  ;;  %v6359_v19 = vadd.s32 4294967294, %v1876_v24  ;;  %v2028_v35 = vsel %vm2027_vm10, %v2026_v16, 0  ;;  %v1988_v58 = vsub.s32 4294967266, %v1983_v2 }
 0x20f   : > { %v8484_v11 = vmul.f32 %v12462_v29, %v1784_v10  ;;  %v1986_v37 = vshrl.u32 %v1968_v42, %v1984_v59  ;;  %v2175_v13 = vmul.u32 %v2168_v51, %v2159_v20  ;;  %vm2177_vm13 = vc.u32 %v8468_v26, %v8447_v28 }
 0x210   : > { %v1682_v57 = vcvt.s32.f32 %v8414_v8  ;;  %v2179_v5 = vsel %vm2177_vm13, %v2178_v63, %v8448_v55  ;;  %v2023_v9 = vand.u32 8388607, %v12221_v1  ;;  %v2030_v7 = vand.u32 31, %v2028_v35 }
 0x211   : > { %7077 = vsinq.f32 %v8232_v6  ;;  %v1985_v18 = vshll.u32 %v8345_v60, %v1983_v2  ;;  %vm6360_vm0 = vcmp.lt.s32.totalorder %v6359_v19, 0  ;;  %v2180_v16 = vadd.s32 %v2179_v5, %v2175_v13 }
 0x212   : > { %v8497_v10 = vsel %vm8453_vm1, %v12457_v43, %v1581_v46  ;;  %v8502_v8 = vsel %vm12226_vm3, %v1476_v34, %v8306_v48  ;;  %v8505_v55 = vmul.f32 %v1682_v57, %v1680_v32  ;;  %v1989_v6 = vadd.s32 127, %v1988_v58 }
 0x213   : > { %v8507_v44 = vor.u32 %v1986_v37, %v1985_v18  ;;  %v2181_v60 = vadd.s32 536870912, %v2180_v16  ;;  %v2031_v2 = vsub.s32 32, %v2030_v7  ;;  %v8509_v12 = vsel %vm6360_vm0, 0, %v6359_v19 }
 0x214   : > { %v2024_v0 = vor.u32 8388608, %v2023_v9  ;;  %v2029_v40 = vshrl.u32 %v2028_v35, 5  ;;  %v2033_v59 = vshll.u32 %v12416_v27, %v2030_v7  ;;  %v2036_v24 = vshll.u32 %v12417_v21, %v2030_v7 }
 0x215   : > { %v8512_v22 = vshrl.u32 %v2181_v60, 30  ;;  %v2034_v48 = vshrl.u32 %v12417_v21, %v2031_v2  ;;  %v2037_v20 = vshrl.u32 %v12396_v54, %v2031_v2  ;;  %v2039_v63 = vshll.u32 %v12396_v54, %v2030_v7 }
 0x216   : > { %v2040_v47 = vshrl.u32 %v12397_v61, %v2031_v2  ;;  %v2042_v46 = vshll.u32 %v12397_v61, %v2030_v7  ;;  %v2043_v34 = vshrl.u32 %v12413_v14, %v2031_v2  ;;  %v1990_v42 = vshll.u32 %v1989_v6, 23 }
 0x217   : > { %v2183_v29 = vshll.u32 %v8512_v22, 30  ;;  %v2035_v32 = vor.u32 %v2034_v48, %v2033_v59  ;;  %v2038_v19 = vor.u32 %v2037_v20, %v2036_v24  ;;  %vm2048_vm9 = vcmp.lt.s32.totalorder %v2029_v40, 1 }
 0x218   : > { %v2041_v35 = vor.u32 %v2040_v47, %v2039_v63  ;;  %v2044_v37 = vor.u32 %v2043_v34, %v2042_v46  ;;  %v2064_v58 = vshll.u32 %v2024_v0, 8  ;;  %v1884_v13 = vsub.s32 4294967266, %v8509_v12 }
 0x219   : > { %v8523_v57 = vsub.s32 %v2180_v16, %v2183_v29  ;;  %v2045_v5 = vshll.u32 %v12413_v14, %v2030_v7  ;;  %v2046_v9 = vshrl.u32 %v12414_v4, %v2031_v2  ;;  %v2032_v18 = vshrl.u32 %v12416_v27, %v2031_v2 }
 0x21a   : > { %vm2050_vm10 = vcmp.lt.s32.totalorder %v2029_v40, 3  ;;  %vm2051_vm13 = vcmp.lt.s32.totalorder %v2029_v40, 4  ;;  %v2056_v6 = vsel %vm2048_vm9, %v2035_v32, %v2038_v19  ;;  %vm2049_vm0 = vcmp.lt.s32.totalorder %v2029_v40, 2 }
 0x21b   : > { %v8529_v60 = vpop.eup %7077  ;;  %v2186_v59 = vsub.s32 0, %v8523_v57  ;;  %v2047_v48 = vor.u32 %v2046_v9, %v2045_v5  ;;  %v2053_v0 = vsel %vm2051_vm13, %v2041_v35, 2102212464  ;;  %v2057_v24 = vsel %vm2051_vm13, %v2044_v37, 920167782 }
 0x21c   : > { %v2052_v16 = vsel %vm2048_vm9, %v2032_v18, %v2035_v32  ;;  %v2058_v7 = vsel %vm2050_vm10, %v2041_v35, %v2057_v24  ;;  %v2060_v20 = vsel %vm2048_vm9, %v2038_v19, %v2041_v35  ;;  %v2054_v63 = vsel %vm2050_vm10, %v2038_v19, %v2053_v0 }
 0x21d   : > { %v6370_v2 = vmin.u32 %v2186_v59, %v8523_v57  ;;  %v2059_v47 = vsel %vm2049_vm0, %v2056_v6, %v2058_v7  ;;  %v2061_v46 = vsel %vm2051_vm13, %v2047_v48, 1326507024  ;;  %v1864_v34 = vadd.s32 %v8369_v15, %v8355_v39  ;;  %v12463_v59 = vld [vmem:[#allocation8_spill] sm:$0xff]  ;;  %v12464_v7 = vld [vmem:[#allocation15_spill] sm:$0xff] }
 0x21e   : > { %v2062_v29 = vsel %vm2050_vm10, %v2044_v37, %v2061_v46  ;;  %v8541_v5 = vmul.u32.u64.low %v2064_v58, %v2059_v47  ;;  %v8542_v9 = vmul.u32.u64.high %v2064_v58, %v2059_v47, %v8541_v5  ;;  %v8545_v32 = vor.u32 4788187, %v1990_v42  ;;  %v12465_v47 = vld [vmem:[#allocation13_spill] sm:$0xff] }
 0x21f   : > { %v2188_v18 = vclz %v6370_v2  ;;  %v2063_v35 = vsel %vm2049_vm0, %v2060_v20, %v2062_v29  ;;  %v12223_v24 = vand.u32 2147483647, %v12463_v59  ;;  %v2055_v6 = vsel %vm2049_vm0, %v2052_v16, %v2054_v63 }
 0x220   : > { %v8551_v48 = vmul.u32.u64.low %v2064_v58, %v2063_v35  ;;  %v8552_v0 = vmul.u32.u64.high %v2064_v58, %v2063_v35, %v8551_v48  ;;  %v1880_v39 = vsub.s32 32, %v8509_v12  ;;  %v1885_v15 = vadd.s32 127, %v1884_v13 }
 0x221   : > { %v6371_v37 = vadd.s32 4294967294, %v2188_v18  ;;  %v578_v42 = vshrl.u32 %v12417_v21, %v12464_v7  ;;  %v2074_v2 = vadd.s32 1, %v8542_v9  ;;  %v577_v20 = vshll.u32 %v12416_v27, %v12465_v47 }
 0x222   : > { %v580_v46 = vshll.u32 %v12417_v21, %v12465_v47  ;;  %v581_v40 = vshrl.u32 %v12396_v54, %v12464_v7  ;;  %v1992_v16 = vand.u32 2147483647, %v8545_v32  ;;  %v2071_v63 = vmul.u32 %v2064_v58, %v2055_v6 }
 0x223   : > { %vm6372_vm9 = vcmp.lt.s32.totalorder %v6371_v37, 0  ;;  %v567_v13 = vand.u32 8388607, %v12223_v24  ;;  %vm2073_vm10 = vc.u32 %v8552_v0, %v8541_v5  ;;  %v579_v18 = vor.u32 %v578_v42, %v577_v20 }
 0x224   : > { %v2191_v29 = vsel %vm6372_vm9, 0, %v6371_v37  ;;  %v582_v35 = vor.u32 %v581_v40, %v580_v46  ;;  %v1882_v48 = vshrl.u32 %v1864_v34, %v1880_v39  ;;  %v2075_v51 = vsel %vm2073_vm10, %v2074_v2, %v8542_v9 }
 0x225   : > { %v2196_v1 = vsub.s32 4294967266, %v2191_v29  ;;  %v576_v19 = vshrl.u32 %v12416_v27, %v12464_v7  ;;  %v1886_v4 = vshll.u32 %v1885_v15, 23  ;;  %v2076_v32 = vadd.s32 %v2075_v51, %v2071_v63 }
 0x226   : > { %v583_v58 = vshll.u32 %v12396_v54, %v12465_v47  ;;  %v584_v6 = vshrl.u32 %v12397_v61, %v12464_v7  ;;  %v2192_v37 = vsub.s32 32, %v2191_v29  ;;  %v568_v14 = vor.u32 8388608, %v567_v13 }
 0x227   : > { %v2197_v24 = vadd.s32 127, %v2196_v1  ;;  %vm592_vm13 = vcmp.lt.s32.totalorder %v7749_v45, 1  ;;  %v12466_v34 = vand.u32 2147483647, %v7846_v38  ;;  %v2077_v39 = vadd.s32 536870912, %v2076_v32 }
 0x228   : > { %v585_v15 = vor.u32 %v584_v6, %v583_v58  ;;  %vm594_vm9 = vcmp.lt.s32.totalorder %v7749_v45, 3  ;;  %v600_v51 = vsel %vm592_vm13, %v579_v18, %v582_v35  ;;  %vm12228_vm10 = vcmp.lt.s32.totalorder %v7978_v56, 0 }
 0x229   : > { %vm8579_vm0 = vcmp.le.f32.partialorder %v12466_v34, 0.7853982  ;;  %vm12232_vm6 = vcmp.lt.s32.totalorder %v7982_v30, 0  ;;  %v1881_v1 = vshll.u32 %v8426_v41, %v8509_v12  ;;  %v2176_v7 = vadd.s32 %v8447_v28, %v8468_v26 }
 0x22a   : > { %vm593_vm3 = vcmp.lt.s32.totalorder %v7749_v45, 2  ;;  %v606_v42 = vsel %vm594_vm9, %v7898_v33, %v8253_v62  ;;  %v8597_v2 = vshrl.u32 %v2077_v39, 30  ;;  %v597_v47 = vsel %vm595_vm8, %v585_v15, 2102212464 }
 0x22b   : > { %v602_v20 = vsel %vm594_vm9, %v585_v15, %v8246_v36  ;;  %v604_v41 = vsel %vm592_vm13, %v582_v35, %v585_v15  ;;  %v1887_v26 = vor.u32 4788187, %v1886_v4  ;;  %v2198_v28 = vshll.u32 %v2197_v24, 23 }
 0x22c   : > { %v603_v12 = vsel %vm593_vm3, %v600_v51, %v602_v20  ;;  %v608_v46 = vshll.u32 %v568_v14, 8  ;;  %v12469_v33 = vand.u32 2147483647, %v7978_v56  ;;  %v1883_v40 = vor.u32 %v1882_v48, %v1881_v1 }
 0x22d   : > { %v2194_v63 = vshrl.u32 %v2176_v7, %v2192_v37  ;;  %v2079_v13 = vshll.u32 %v8597_v2, 30  ;;  %v607_v36 = vsel %vm593_vm3, %v604_v41, %v606_v42  ;;  %v596_v4 = vsel %vm592_vm13, %v576_v19, %v579_v18 }
 0x22e   : > { %vm8610_vm12 = vcmp.le.f32.partialorder %v12469_v33, 0.7853982  ;;  %v598_v24 = vsel %vm594_vm9, %v582_v35, %v597_v47  ;;  %v8621_v14 = vmul.u32.u64.low %v608_v46, %v607_v36  ;;  %v8622_v58 = vmul.u32.u64.high %v608_v46, %v607_v36, %v8621_v14 }
 0x22f   : > { %v1684_v6 = vxor.u32 2147483648, %v8505_v55  ;;  %v8625_v34 = vsub.s32 %v2076_v32, %v2079_v13  ;;  %v8627_v48 = vmul.u32.u64.low %v608_v46, %v603_v12  ;;  %v8628_v37 = vmul.u32.u64.high %v608_v46, %v603_v12, %v8627_v48 }
 0x230   : > { %v12472_v39 = vcvt.s32.f32 %v8507_v44  ;;  %v1888_v51 = vand.u32 2147483647, %v1887_v26  ;;  %v2193_v19 = vshll.u32 %v8523_v57, %v2191_v29  ;;  %v2199_v18 = vor.u32 4788187, %v2198_v28 }
 0x231   : > { %7079 = vcosq.f32 %v8497_v10  ;;  %v12473_v35 = vand.u32 2147483647, %v7982_v30  ;;  %v2082_v32 = vsub.s32 0, %v8625_v34  ;;  %v599_v7 = vsel %vm593_vm3, %v596_v4, %v598_v24 }
 0x232   : > { %v1995_v15 = vmul.f32 %v12472_v39, %v1992_v16  ;;  %v1480_v44 = vsel %vm8579_vm0, %v7846_v38, %v8502_v8  ;;  %v1890_v57 = vcvt.s32.f32 %v1883_v40  ;;  %v2195_v16 = vor.u32 %v2194_v63, %v2193_v19  ;;  %v12477_v40 = vld [vmem:[#allocation6_spill] sm:$0xff]  ;;  %v12480_v39 = vld [vmem:[#allocation9_spill] sm:$0xff] }
 0x233   : > { %vm8637_vm8 = vcmp.le.f32.partialorder %v12473_v35, 0.7853982  ;;  %vm617_vm13 = vc.u32 %v8622_v58, %v8627_v48  ;;  %v12476_v29 = vxor.u32 2147483648, %v8484_v11  ;;  %v1685_v45 = vsel %vm12232_vm6, %v1684_v6, %v8505_v55  ;;  %v12478_v6 = vld [vmem:[#allocation3_spill] sm:$0xff] }
 0x234   : > { %v6366_v47 = vmin.u32 %v2082_v32, %v8625_v34  ;;  %v618_v20 = vadd.s32 1, %v8628_v37  ;;  %v1996_v8 = vxor.u32 2147483648, %v1995_v15  ;;  %v1891_v41 = vmul.f32 %v1890_v57, %v1888_v51 }
 0x235   : > { %v1789_v42 = vsel %vm12228_vm10, %v12476_v29, %v8484_v11  ;;  %v2200_v26 = vand.u32 2147483647, %v2199_v18  ;;  %v615_v28 = vmul.u32 %v608_v46, %v599_v7  ;;  %7081 = vsinq.f32 %v8497_v10 }
 0x236   : > { %v2084_v12 = vclz %v6366_v47  ;;  %v619_v33 = vsel %vm617_vm13, %v618_v20, %v8628_v37  ;;  %v750_v63 = vsub.s32 4, %v12477_v40  ;;  %7083 = vcosq.f32 %v1480_v44 }
 0x237   : > { %v1792_v11 = vsel %vm8610_vm12, %v7978_v56, %v1789_v42  ;;  %v2202_v55 = vcvt.s32.f32 %v2195_v16  ;;  %v620_v13 = vadd.s32 %v619_v33, %v615_v28  ;;  %7085 = vsinq.f32 %v1480_v44  ;;  %v12487_v28 = vld [vmem:[#allocation7_spill] sm:$0xff] }
 0x238   : > { %v1688_v36 = vsel %vm8637_vm8, %v7982_v30, %v1685_v45  ;;  %vm12229_vm3 = vcmp.lt.s32.totalorder %v8153_v3, 0  ;;  %v6367_v10 = vadd.s32 4294967294, %v2084_v12  ;;  %v1892_v4 = vxor.u32 2147483648, %v1891_v41 }
 0x239   : > { %v1997_v46 = vsel %vm12229_vm3, %v1996_v8, %v1995_v15  ;;  %v2203_v24 = vmul.f32 %v2202_v55, %v2200_v26  ;;  %v621_v14 = vadd.s32 536870912, %v620_v13  ;;  %7087 = vcosq.f32 %v1792_v11  ;;  %v12485_v8 = vld [vmem:[#allocation5_spill] sm:$0xff] }
 0x23a   : > { %vm6368_vm9 = vcmp.lt.s32.totalorder %v6367_v10, 0  ;;  %vm12479_vm13 = vcmp.lt.s32.totalorder %v12478_v6, 0  ;;  %v854_v51 = vsub.s32 4, %v12480_v39  ;;  %7089 = vsinq.f32 %v1792_v11 }
 0x23b   : > { %v751_v37 = vsel %vm12479_vm13, %v750_v63, %v12477_v40  ;;  %v12481_v19 = vand.u32 2147483647, %v8153_v3  ;;  %v12482_v18 = vmov 0  ;;  %v2087_v35 = vsel %vm6368_vm9, 0, %v6367_v10  ;;  %v8684_v32 = vpop.eup %7079 }
 0x23c   : > { %v8682_v15 = vshrl.u32 %v621_v14, 30  ;;  %7091 = vcosq.f32 %v1688_v36  ;;  %vm12230_vm13 = vcmp.lt.s32.totalorder %v8223_v50, 0  ;;  %v2092_v44 = vsub.s32 4294967266, %v2087_v35  ;;  %v12501_v14 = vld [vmem:[#allocation27_spill] sm:$0xff] }
 0x23d   : > { %vm8678_vm10 = vcmp.le.f32.partialorder %v12481_v19, 0.7853982  ;;  %v1893_v57 = vsel %vm12230_vm13, %v1892_v4, %v1891_v41  ;;  %v2204_v16 = vxor.u32 2147483648, %v2203_v24  ;;  %v753_v45 = vsel %vm7800_vm15, 0, %v751_v37  ;;  %v12492_v19 = vld [vmem:[#allocation4_spill] sm:$0xff] }
 0x23e   : > { %v12483_v18 = vsel %vm8678_vm10, 4294967295, %v12482_v18  ;;  %v2000_v7 = vsel %vm8678_vm10, %v8153_v3, %v1997_v46  ;;  %v623_v29 = vshll.u32 %v8682_v15, 30  ;;  %v2088_v47 = vsub.s32 32, %v2087_v35 }
 0x23f   : > { %v2093_v20 = vadd.s32 127, %v2092_v44  ;;  %vm12486_vm9 = vcmp.lt.s32.totalorder %v12485_v8, 0  ;;  %v958_v12 = vsub.s32 4, %v12487_v28  ;;  %7093 = vsinq.f32 %v1688_v36  ;;  %v8708_v63 = vpop.eup %7081 }
 0x240   : > { %v855_v26 = vsel %vm12486_vm9, %v854_v51, %v12480_v39  ;;  %v12488_v33 = vand.u32 2147483647, %v8223_v50  ;;  %vm12231_vm13 = vcmp.lt.s32.totalorder %v8292_v31, 0  ;;  %v8706_v41 = vsub.s32 %v620_v13, %v623_v29  ;;  %v8715_v10 = vpop.eup %7083 }
 0x241   : > { %7095 = vcosq.f32 %v2000_v7  ;;  %v2072_v55 = vadd.s32 %v8541_v5, %v8552_v0  ;;  %v2094_v36 = vshll.u32 %v2093_v20, 23  ;;  %v2205_v46 = vsel %vm12231_vm13, %v2204_v16, %v2203_v24  ;;  %v8722_v39 = vpop.eup %7085 }
 0x242   : > { %vm8701_vm3 = vcmp.le.f32.partialorder %v12488_v33, 0.7853982  ;;  %v626_v4 = vsub.s32 0, %v8706_v41  ;;  %v757_v13 = vadd.s32 3, %v753_v45  ;;  %v857_v37 = vsel %vm7833_vm5, 0, %v855_v26 }
 0x243   : > { %v1896_v11 = vsel %vm8701_vm3, %v8223_v50, %v1893_v57  ;;  %7097 = vsinq.f32 %v2000_v7  ;;  %v2090_v51 = vshrl.u32 %v2072_v55, %v2088_v47  ;;  %vm12493_vm15 = vcmp.lt.s32.totalorder %v12492_v19, 0  ;;  %v8734_v57 = vpop.eup %7087 }
 0x244   : > { %v959_v5 = vsel %vm12493_vm15, %v958_v12, %v12487_v28  ;;  %7099 = vcosq.f32 %v1896_v11  ;;  %v12494_v0 = vand.u32 2147483647, %v8292_v31  ;;  %v12495_v44 = vmov 0  ;;  %v8740_v45 = vpop.eup %7089 }
 0x245   : > { %v6310_v24 = vmin.u32 %v626_v4, %v8706_v41  ;;  %v2089_v16 = vshll.u32 %v8625_v34, %v2087_v35  ;;  %v2095_v29 = vor.u32 4788187, %v2094_v36  ;;  %v861_v42 = vadd.s32 3, %v857_v37  ;;  %v12500_v35 = vld [vmem:[#allocation23_spill] sm:$0xff] }
 0x246   : > { %vm8729_vm9 = vcmp.le.f32.partialorder %v12494_v0, 0.7853982  ;;  %7101 = vsinq.f32 %v1896_v11  ;;  %v758_v20 = vand.u32 3, %v757_v13  ;;  %v961_v28 = vsel %vm7808_vm2, 0, %v959_v5  ;;  %v8745_v12 = vpop.eup %7091  ;;  %v12542_v5 = vld [vmem:[#allocation31_spill] sm:$0xff] }
 0x247   : > { %v12496_v44 = vsel %vm8729_vm9, 4294967295, %v12495_v44  ;;  %v2208_v7 = vsel %vm8729_vm9, %v8292_v31, %v2205_v46  ;;  %v628_v47 = vclz %v6310_v24  ;;  %v2091_v33 = vor.u32 %v2090_v51, %v2089_v16  ;;  %v12499_v46 = vld [vmem:[#allocation24_spill] sm:$0xff] }
 0x248   : > { %12497 = vst [vmem:[#allocation16_spill] sm:$0xff] %v12496_v44  ;;  %v616_v55 = vadd.s32 %v8627_v48, %v8622_v58  ;;  %v761_v34 = vxor.u32 2147483648, %v12499_v46  ;;  %v764_v36 = vxor.u32 2147483648, %v12500_v35  ;;  %7103 = vcosq.f32 %v2208_v7  ;;  %v12505_v48 = vld [vmem:[#allocation14_spill] sm:$0xff] }
 0x249   : > { %v6311_v4 = vadd.s32 4294967294, %v628_v47  ;;  %v865_v11 = vxor.u32 2147483648, %v8084_v49  ;;  %v868_v37 = vxor.u32 2147483648, %v12501_v14  ;;  %v2096_v13 = vand.u32 2147483647, %v2095_v29  ;;  %v8762_v16 = vpop.eup %7093 }
 0x24a   : > { %v12502_v0 = vand.u32 2147483647, %v12463_v59  ;;  %v8759_v51 = vand.u32 3, %v861_v42  ;;  %v965_v58 = vadd.s32 3, %v961_v28  ;;  %v1062_v24 = vsub.s32 4, %v12505_v48 }
 0x24b   : > { %7105 = vsinq.f32 %v2208_v7  ;;  %vm6312_vm15 = vcmp.lt.s32.totalorder %v6311_v4, 0  ;;  %vm760_vm6 = vcmp.eq.s32.totalorder %v758_v20, 0  ;;  %v8764_v47 = vpop.eup %7095  ;;  %v2098_v29 = vcvt.s32.f32 %v2091_v33 }
 0x24c   : > { %vm8755_vm2 = vcmp.le.f32.partialorder %v12502_v0, 0.7853982  ;;  %12506 = vst [vmem:[#allocation8_spill] sm:$0xff] %v8764_v47  ;;  %v631_v26 = vsel %vm6312_vm15, 0, %v6311_v4  ;;  %v646_v0 = vsub.s32 4, %v8682_v15  ;;  %vm763_vm5 = vcmp.eq.s32.totalorder %v758_v20, 2 }
 0x24d   : > { %v632_v42 = vsub.s32 32, %v631_v26  ;;  %v636_v61 = vsub.s32 4294967266, %v631_v26  ;;  %v762_v28 = vsel %vm760_vm6, %v12500_v35, %v761_v34  ;;  %v765_v54 = vsel %vm763_vm5, %v764_v36, %v12499_v46  ;;  %v8770_v21 = vpop.eup %7097  ;;  %v12510_v34 = vld [vmem:[#allocation11_spill] sm:$0xff] }
 0x24e   : > { %12507 = vst [vmem:[#allocation15_spill] sm:$0xff] %v8770_v21  ;;  %v2099_v7 = vmul.f32 %v2098_v29, %v2096_v13  ;;  %v966_v27 = vand.u32 3, %v965_v58  ;;  %vm12508_vm15 = vcmp.lt.s32.totalorder %v7560_v52, 0  ;;  %v8776_v4 = vpop.eup %7099  ;;  %v633_v47 = vshll.u32 %v8706_v41, %v631_v26  ;;  %v12515_v58 = vld [vmem:[#allocation26_spill] sm:$0xff] }
 0x24f   : > { %v1063_v33 = vsel %vm12508_vm15, %v1062_v24, %v12505_v48  ;;  %12509 = vst [vmem:[#allocation13_spill] sm:$0xff] %v8776_v4  ;;  %v634_v44 = vshrl.u32 %v616_v55, %v632_v42  ;;  %v637_v31 = vadd.s32 127, %v636_v61  ;;  %v1166_v46 = vsub.s32 4, %v12510_v34  ;;  %v12516_v55 = vld [vmem:[#allocation25_spill] sm:$0xff]  ;;  %v12517_v42 = vld [vmem:[#allocation22_spill] sm:$0xff] }
 0x250   : > { %v12511_v35 = vand.u32 2147483647, %v8385_v53  ;;  %vm12514_vm9 = vcmp.lt.s32.totalorder %v12463_v59, 0  ;;  %vm867_vm15 = vcmp.eq.s32.totalorder %v8759_v51, 2  ;;  %v969_v41 = vxor.u32 2147483648, %v12515_v58  ;;  %v8793_v48 = vpop.eup %7101 }
 0x251   : > { %v647_v13 = vsel %vm12514_vm9, %v646_v0, %v8682_v15  ;;  %v972_v61 = vxor.u32 2147483648, %v12516_v55  ;;  %v635_v24 = vor.u32 %v634_v44, %v633_v47  ;;  %v638_v29 = vshll.u32 %v637_v31, 23 }
 0x252   : > { %vm8783_vm5 = vcmp.le.f32.partialorder %v12511_v35, 0.7853982  ;;  %v1065_v26 = vsel %vm8117_vm4, 0, %v1063_v33  ;;  %v1270_v35 = vsub.s32 4, %v12517_v42  ;;  %v2100_v21 = vxor.u32 2147483648, %v2099_v7  ;;  %v8805_v44 = vpop.eup %7103 }
 0x253   : > { %vm12518_vm13 = vcmp.lt.s32.totalorder %v758_v20, 2  ;;  %vm12519_vm9 = vcmp.eq.s32.totalorder %v8759_v51, 0  ;;  %v869_v4 = vsel %vm867_vm15, %v868_v37, %v8084_v49  ;;  %12520 = vst [vmem:[#allocation6_spill] sm:$0xff] %v8805_v44  ;;  %v639_v31 = vor.u32 4788187, %v638_v29  ;;  %v12523_v29 = vld [vmem:[#allocation12_spill] sm:$0xff] }
 0x254   : > { %v766_v15 = vsel %vm12518_vm13, %v762_v28, %v765_v54  ;;  %v866_v0 = vsel %vm12519_vm9, %v12501_v14, %v865_v11  ;;  %v649_v25 = vsel %vm8755_vm2, 0, %v647_v13  ;;  %vm968_vm4 = vcmp.eq.s32.totalorder %v966_v27, 0  ;;  %v12522_v11 = vld [vmem:[#allocation17_spill] sm:$0xff] }
 0x255   : > { %vm12521_vm6 = vcmp.lt.s32.totalorder %v7522_v23, 0  ;;  %v970_v54 = vsel %vm968_vm4, %v12516_v55, %v969_v41  ;;  %vm971_vm13 = vcmp.eq.s32.totalorder %v966_v27, 2  ;;  %v1069_v47 = vadd.s32 3, %v1065_v26  ;;  %v8814_v49 = vpop.eup %7105  ;;  %v12527_v41 = vld [vmem:[#allocation10_spill] sm:$0xff] }
 0x256   : > { %v1167_v20 = vsel %vm12521_vm6, %v1166_v46, %v12510_v34  ;;  %v1374_v14 = vsub.s32 4, %v12522_v11  ;;  %v640_v37 = vand.u32 2147483647, %v639_v31  ;;  %v642_v28 = vcvt.s32.f32 %v635_v24 }
 0x257   : > { %v973_v33 = vsel %vm971_vm13, %v972_v61, %v12515_v58  ;;  %vm12524_vm15 = vcmp.lt.s32.totalorder %v12523_v29, 0  ;;  %vm12525_vm9 = vcmp.lt.s32.totalorder %v8385_v53, 0  ;;  %vm863_vm6 = vcmp.lt.s32.totalorder %v8759_v51, 2 }
 0x258   : > { %v1271_v13 = vsel %vm12524_vm15, %v1270_v35, %v12517_v42  ;;  %v2101_v44 = vsel %vm12525_vm9, %v2100_v21, %v2099_v7  ;;  %v1169_v46 = vsel %vm8003_vm7, 0, %v1167_v20  ;;  %vm12528_vm4 = vcmp.lt.s32.totalorder %v12527_v41, 0 }
 0x259   : > { %v1375_v55 = vsel %vm12528_vm4, %v1374_v14, %v12522_v11  ;;  %v643_v26 = vmul.f32 %v642_v28, %v640_v37  ;;  %v653_v24 = vadd.s32 3, %v649_v25  ;;  %v870_v31 = vsel %vm863_vm6, %v866_v0, %v869_v4 }
 0x25a   : > { %vm967_vm13 = vcmp.lt.s32.totalorder %v966_v27, 2  ;;  %vm12529_vm10 = vweird.f32 %v12478_v6  ;;  %v1070_v42 = vand.u32 3, %v1069_v47  ;;  %v1273_v51 = vsel %vm8177_vm11, 0, %v1271_v13  ;;  %v12534_v6 = vld [vmem:[#allocation38_spill] sm:$0xff] }
 0x25b   : > { %v8830_v58 = vsel %vm12529_vm10, nan, %v766_v15  ;;  %v974_v61 = vsel %vm967_vm13, %v970_v54, %v973_v33  ;;  %v2104_v7 = vsel %vm8783_vm5, %v8385_v53, %v2101_v44  ;;  %v644_v35 = vxor.u32 2147483648, %v643_v26  ;;  %v12535_v15 = vld [vmem:[#allocation37_spill] sm:$0xff]  ;;  %v12536_v54 = vld [vmem:[#allocation30_spill] sm:$0xff] }
 0x25c   : > { %v1173_v20 = vadd.s32 3, %v1169_v46  ;;  %v1377_v25 = vsel %vm8157_vm14, 0, %v1375_v55  ;;  %vm12532_vm7 = vweird.f32 %v12485_v8  ;;  %v1073_v4 = vxor.u32 2147483648, %v12534_v6  ;;  %v12540_v33 = vld [vmem:[#allocation34_spill] sm:$0xff] }
 0x25d   : > { %v8841_v27 = vsel %vm12532_vm7, nan, %v870_v31  ;;  %v1076_v0 = vxor.u32 2147483648, %v12535_v15  ;;  %v1478_v47 = vsub.s32 4, %v12536_v54  ;;  %vm12537_vm11 = vcmp.lt.s32.totalorder %v12463_v59, 0 }
 0x25e   : > { %12533 = vst [vmem:[#allocation3_spill] sm:$0xff] %v8841_v27  ;;  %v645_v14 = vsel %vm12537_vm11, %v644_v35, %v643_v26  ;;  %v8848_v37 = vand.u32 3, %v653_v24  ;;  %vm12538_vm10 = vweird.f32 %v12492_v19  ;;  %v1277_v28 = vadd.s32 3, %v1273_v51  ;;  %v12544_v35 = vld [vmem:[#allocation41_spill] sm:$0xff] }
 0x25f   : > { %v8852_v44 = vsel %vm12538_vm10, nan, %v974_v61  ;;  %7107 = vcosq.f32 %v2104_v7  ;;  %v648_v8 = vsel %vm8755_vm2, %v12463_v59, %v645_v14  ;;  %v1177_v13 = vxor.u32 2147483648, %v12540_v33  ;;  %v12543_v61 = vld [vmem:[#allocation29_spill] sm:$0xff] }
 0x260   : > { %12539 = vst [vmem:[#allocation9_spill] sm:$0xff] %v8852_v44  ;;  %v1381_v34 = vadd.s32 3, %v1377_v25  ;;  %7109 = vcosq.f32 %v648_v8  ;;  %vm1072_vm14 = vcmp.eq.s32.totalorder %v1070_v42, 0  ;;  %vm1075_vm15 = vcmp.eq.s32.totalorder %v1070_v42, 2 }
 0x261   : > { %v1174_v46 = vand.u32 3, %v1173_v20  ;;  %7111 = vsinq.f32 %v648_v8  ;;  %vm1068_vm9 = vweird.f32 %v7560_v52  ;;  %v1074_v19 = vsel %vm1072_vm14, %v12535_v15, %v1073_v4  ;;  %v12546_v15 = vld [vmem:[#allocation39_spill] sm:$0xff] }
 0x262   : > { %v1077_v55 = vsel %vm1075_vm15, %v1076_v0, %v12534_v6  ;;  %vm12541_vm6 = vcmp.lt.s32.totalorder %v7846_v38, 0  ;;  %vm1071_vm4 = vcmp.lt.s32.totalorder %v1070_v42, 2  ;;  %v1180_v24 = vxor.u32 2147483648, %v12542_v5  ;;  %v12545_v6 = vld [vmem:[#allocation40_spill] sm:$0xff] }
 0x263   : > { %v1479_v26 = vsel %vm12541_vm6, %v1478_v47, %v12536_v54  ;;  %v1278_v31 = vand.u32 3, %v1277_v28  ;;  %v1582_v21 = vsub.s32 4, %v12543_v61  ;;  %7113 = vsinq.f32 %v2104_v7  ;;  %v12547_v54 = vld [vmem:[#allocation36_spill] sm:$0xff] }
 0x264   : > { %v1281_v51 = vxor.u32 2147483648, %v8529_v60  ;;  %v1284_v20 = vxor.u32 2147483648, %v12544_v35  ;;  %v1382_v11 = vand.u32 3, %v1381_v34  ;;  %v1078_v25 = vsel %vm1071_vm4, %v1074_v19, %v1077_v55 }
 0x265   : > { %vm1176_vm13 = vcmp.eq.s32.totalorder %v1174_v46, 0  ;;  %v1385_v4 = vxor.u32 2147483648, %v12545_v6  ;;  %v1481_v42 = vsel %vm8579_vm0, 0, %v1479_v26  ;;  %vm1179_vm10 = vcmp.eq.s32.totalorder %v1174_v46, 2 }
 0x266   : > { %v1178_v7 = vsel %vm1176_vm13, %v12542_v5, %v1177_v13  ;;  %v1388_v0 = vxor.u32 2147483648, %v12546_v15  ;;  %v1686_v47 = vsub.s32 4, %v12547_v54  ;;  %vm655_vm14 = vcmp.lt.s32.totalorder %v8848_v37, 2  ;;  %v12550_v5 = vld [vmem:[#allocation33_spill] sm:$0xff] }
 0x267   : > { %v1181_v14 = vsel %vm1179_vm10, %v1180_v24, %v12540_v33  ;;  %vm1280_vm6 = vcmp.eq.s32.totalorder %v1278_v31, 0  ;;  %vm1283_vm4 = vcmp.eq.s32.totalorder %v1278_v31, 2  ;;  %vm12548_vm0 = vcmp.lt.s32.totalorder %v12457_v43, 0 }
 0x268   : > { %v1583_v9 = vsel %vm12548_vm0, %v1582_v21, %v12543_v61  ;;  %vm652_vm11 = vweird.f32 %v12463_v59  ;;  %v1282_v28 = vsel %vm1280_vm6, %v12544_v35, %v1281_v51  ;;  %v1285_v8 = vsel %vm1283_vm4, %v1284_v20, %v8529_v60 }
 0x269   : > { %vm1384_vm13 = vcmp.eq.s32.totalorder %v1382_v11, 0  ;;  %v1485_v13 = vadd.s32 3, %v1481_v42  ;;  %vm1175_vm7 = vcmp.lt.s32.totalorder %v1174_v46, 2  ;;  %vm1279_vm2 = vcmp.lt.s32.totalorder %v1278_v31, 2  ;;  %v8886_v33 = vpop.eup %7107 }
 0x26a   : > { %v1386_v34 = vsel %vm1384_vm13, %v12546_v15, %v1385_v4  ;;  %vm1387_vm15 = vcmp.eq.s32.totalorder %v1382_v11, 2  ;;  %v1585_v55 = vsel %vm8453_vm1, 0, %v1583_v9  ;;  %vm12549_vm10 = vcmp.lt.s32.totalorder %v7982_v30, 0  ;;  %v7110_v24 = vpop.eup %7109 }
 0x26b   : > { %v1389_v19 = vsel %vm1387_vm15, %v1388_v0, %v12545_v6  ;;  %v1687_v26 = vsel %vm12549_vm10, %v1686_v47, %v12547_v54  ;;  %v1790_v60 = vsub.s32 4, %v12550_v5  ;;  %v8897_v46 = vsel %vm1068_vm9, nan, %v1078_v25  ;;  %v7112_v21 = vpop.eup %7111 }
 0x26c   : > { %12551 = vst [vmem:[#allocation18_spill] sm:$0xff] %v8897_v46  ;;  %v1182_v31 = vsel %vm1175_vm7, %v1178_v7, %v1181_v14  ;;  %vm1276_vm6 = vweird.f32 %v12523_v29  ;;  %v1286_v61 = vsel %vm1279_vm2, %v1282_v28, %v1285_v8  ;;  %v660_v51 = vxor.u32 2147483648, %v7110_v24  ;;  %v12554_v7 = vld [vmem:[#allocation21_spill] sm:$0xff] }
 0x26d   : > { %vm1383_vm15 = vcmp.lt.s32.totalorder %v1382_v11, 2  ;;  %v1486_v17 = vand.u32 3, %v1485_v13  ;;  %v1489_v35 = vxor.u32 2147483648, %v8722_v39  ;;  %v657_v20 = vxor.u32 2147483648, %v7112_v21  ;;  %v8903_v15 = vpop.eup %7113 }
 0x26e   : > { %v1390_v6 = vsel %vm1383_vm15, %v1386_v34, %v1389_v19  ;;  %v1589_v4 = vadd.s32 3, %v1585_v55  ;;  %v1689_v42 = vsel %vm8637_vm8, 0, %v1687_v26  ;;  %vm12552_vm1 = vcmp.eq.s32.totalorder %v8848_v37, 2  ;;  %v12563_v55 = vld [vmem:[#allocation43_spill] sm:$0xff] }
 0x26f   : > { %v661_v52 = vsel %vm12552_vm1, %v660_v51, %v7112_v21  ;;  %v1492_v25 = vxor.u32 2147483648, %v8715_v10  ;;  %vm12553_vm9 = vcmp.lt.s32.totalorder %v7978_v56, 0  ;;  %v1894_v0 = vsub.s32 4, %v12554_v7 }
 0x270   : > { %v1791_v11 = vsel %vm12553_vm9, %v1790_v60, %v12550_v5  ;;  %vm12555_vm2 = vcmp.eq.s32.totalorder %v8848_v37, 0  ;;  %vm12556_vm7 = vweird.f32 %v7522_v23  ;;  %v8920_v47 = vsel %vm1276_vm6, nan, %v1286_v61 }
 0x271   : > { %v658_v54 = vsel %vm12555_vm2, %v7110_v24, %v657_v20  ;;  %v8916_v1 = vsel %vm12556_vm7, nan, %v1182_v31  ;;  %12558 = vst [vmem:[#allocation7_spill] sm:$0xff] %v8920_v47  ;;  %vm1380_vm8 = vweird.f32 %v12527_v41  ;;  %vm1488_vm4 = vcmp.eq.s32.totalorder %v1486_v17, 0 }
 0x272   : > { %12557 = vst [vmem:[#allocation5_spill] sm:$0xff] %v8916_v1  ;;  %v662_v14 = vsel %vm655_vm14, %v658_v54, %v661_v52  ;;  %v8925_v9 = vsel %vm1380_vm8, nan, %v1390_v6  ;;  %v1693_v28 = vadd.s32 3, %v1689_v42  ;;  %vm1491_vm0 = vcmp.eq.s32.totalorder %v1486_v17, 2 }
 0x273   : > { %12559 = vst [vmem:[#allocation20_spill] sm:$0xff] %v8925_v9  ;;  %v8929_v8 = vsel %vm652_vm11, nan, %v662_v14  ;;  %v1590_v23 = vand.u32 3, %v1589_v4  ;;  %v1793_v29 = vsel %vm8610_vm12, 0, %v1791_v11  ;;  %vm12560_vm13 = vcmask 523264  }
 0x274   : > { %6685 = vmatprep.mubr.msk.f32.mxu1 %vm12560_vm13, %v8929_v8  ;;  %vm1484_vm10 = vweird.f32 %v7846_v38  ;;  %v1490_v41 = vsel %vm1488_vm4, %v8715_v10, %v1489_v35  ;;  %v1493_v37 = vsel %vm1491_vm0, %v1492_v25, %v8722_v39  ;;  %v1593_v13 = vxor.u32 2147483648, %v8708_v63  ;;  %vm12562_vm14 = vmmov %vm12560_vm13  ;;  %v12570_v25 = vld [vmem:[#allocation42_spill] sm:$0xff] }
 0x275   : > { %vm12561_vm11 = vcmp.lt.s32.totalorder %v8223_v50, 0  ;;  %6686 = vmatmul.mubr.msk.f32.vlgmr.msra.gmra.mrb[0].mxu1 %vm12562_vm14, %v8830_v58  ;;  %v1596_v62 = vxor.u32 2147483648, %v8684_v32  ;;  %v1697_v34 = vxor.u32 2147483648, %v8762_v16  ;;  %v1998_v10 = vsub.s32 4, %v12563_v55  ;;  %vm12564_vm12 = vmmov %vm12560_vm13 }
 0x276   : > { %v1895_v59 = vsel %vm12561_vm11, %v1894_v0, %v12554_v7  ;;  %6688 = vmatprep.mubr.msk.f32.mxu1 %vm12564_vm12, %v8841_v27  ;;  %vm1487_vm6 = vcmp.lt.s32.totalorder %v1486_v17, 2  ;;  %v1694_v39 = vand.u32 3, %v1693_v28  ;;  %v1700_v26 = vxor.u32 2147483648, %v8745_v12  ;;  %vm12566_vm2 = vmmov %vm12564_vm12  ;;  %v12574_v7 = vld [vmem:[#allocation13_spill] sm:$0xff] }
 0x277   : > { %v1897_v19 = vsel %vm8701_vm3, 0, %v1895_v59  ;;  %v1797_v5 = vadd.s32 3, %v1793_v29  ;;  %v1494_v60 = vsel %vm1487_vm6, %v1490_v41, %v1493_v37  ;;  %vm1591_vm15 = vcmp.lt.s32.totalorder %v1590_v23, 2  ;;  %vm12569_vm0 = vmmov %vm12566_vm2 }
 0x278   : > { %vm12565_vm1 = vcmp.lt.s32.totalorder %v8153_v3, 0  ;;  %v2102_v31 = vsub.s32 4, %v8597_v2  ;;  %vm1592_vm9 = vcmp.eq.s32.totalorder %v1590_v23, 0  ;;  %vm1595_vm3 = vcmp.eq.s32.totalorder %v1590_v23, 2  ;;  %vm12572_vm6 = vmmov %vm12569_vm0 }
 0x279   : > { %v1999_v24 = vsel %vm12565_vm1, %v1998_v10, %v12563_v55  ;;  %v1901_v40 = vadd.s32 3, %v1897_v19  ;;  %v2206_v61 = vsub.s32 4, %v8512_v22  ;;  %6689 = vmatmul.mubr.msk.f32.gmra.mrb[2].mxu1 %vm12566_vm2, %v8852_v44  ;;  %vm1588_vm7 = vweird.f32 %v12457_v43  ;;  %v12582_v19 = vld [vmem:[#allocation8_spill] sm:$0xff] }
 0x27a   : > { %v1594_v21 = vsel %vm1592_vm9, %v8684_v32, %v1593_v13  ;;  %v1597_v51 = vsel %vm1595_vm3, %v1596_v62, %v8708_v63  ;;  %vm12567_vm8 = vnez %v12483_v18  ;;  %vm12568_vm4 = vcmp.lt.s32.totalorder %v8385_v53, 0  ;;  %6691 = vmatprep.mubr.msk.f32.mxu1 %vm12569_vm0, %v8897_v46 }
 0x27b   : > { %v2001_v17 = vsel %vm12567_vm8, 0, %v1999_v24  ;;  %v2103_v35 = vsel %vm12568_vm4, %v2102_v31, %v8597_v2  ;;  %vm1692_vm13 = vweird.f32 %v7982_v30  ;;  %vm1696_vm11 = vcmp.eq.s32.totalorder %v1694_v39, 0  ;;  %vm12578_vm8 = vmmov %vm12569_vm0  ;;  %v12586_v31 = vld [vmem:[#allocation6_spill] sm:$0xff] }
 0x27c   : > { %vm1699_vm14 = vcmp.eq.s32.totalorder %v1694_v39, 2  ;;  %v1798_v20 = vand.u32 3, %v1797_v5  ;;  %v2105_v32 = vsel %vm8783_vm5, 0, %v2103_v35  ;;  %v1698_v63 = vsel %vm1696_vm11, %v8745_v12, %v1697_v34  ;;  %vm12575_vm5 = vmmov %vm12569_vm0 }
 0x27d   : > { %v1701_v18 = vsel %vm1699_vm14, %v1700_v26, %v8762_v16  ;;  %v1801_v6 = vxor.u32 2147483648, %v8740_v45  ;;  %v1804_v4 = vxor.u32 2147483648, %v8734_v57  ;;  %v1902_v2 = vand.u32 3, %v1901_v40  ;;  %6692 = vmatmul.mubr.msk.f32.gmra.mrb[4].mxu1 %vm12572_vm6, %v8916_v1  ;;  %vm12579_vm4 = vmmov %vm12569_vm0 }
 0x27e   : > { %v2005_v42 = vadd.s32 3, %v2001_v17  ;;  %v2109_v52 = vadd.s32 3, %v2105_v32  ;;  %vm12571_vm12 = vcmp.lt.s32.totalorder %v12570_v25, 0  ;;  %v8983_v36 = vsel %vm1484_vm10, nan, %v1494_v60  ;;  %6694 = vmatprep.mubr.msk.f32.mxu1 %vm12575_vm5, %v8920_v47 }
 0x27f   : > { %v2207_v11 = vsel %vm12571_vm12, %v2206_v61, %v8512_v22  ;;  %12573 = vst [vmem:[#allocation4_spill] sm:$0xff] %v8983_v36  ;;  %v1598_v12 = vsel %vm1591_vm15, %v1594_v21, %v1597_v51  ;;  %v1905_v16 = vxor.u32 2147483648, %v8793_v48  ;;  %v1908_v0 = vxor.u32 2147483648, %v12574_v7  ;;  %v12576_v22 = vld [vmem:[#allocation16_spill] sm:$0xff] }
 0x280   : > { %vm1695_vm1 = vcmp.lt.s32.totalorder %v1694_v39, 2  ;;  %vm1800_vm9 = vcmp.eq.s32.totalorder %v1798_v20, 0  ;;  %vm1803_vm3 = vcmp.eq.s32.totalorder %v1798_v20, 2  ;;  %vm12577_vm2 = vnez %v12576_v22 }
 0x281   : > { %v2209_v54 = vsel %vm12577_vm2, 0, %v2207_v11  ;;  %v1702_v14 = vsel %vm1695_vm1, %v1698_v63, %v1701_v18  ;;  %v1802_v38 = vsel %vm1800_vm9, %v8734_v57, %v1801_v6  ;;  %v1805_v28 = vsel %vm1803_vm3, %v1804_v4, %v8740_v45  ;;  %6695 = vmatmul.mubr.msk.f32.gmra.mrb[6].mxu1 %vm12578_vm8, %v8925_v9  ;;  %v12581_v45 = vld [vmem:[#allocation15_spill] sm:$0xff] }
 0x282   : > { %v2113_v23 = vxor.u32 2147483648, %v8903_v15  ;;  %vm1904_vm10 = vcmp.eq.s32.totalorder %v1902_v2, 0  ;;  %vm1907_vm15 = vcmp.eq.s32.totalorder %v1902_v2, 2  ;;  %v2006_v29 = vand.u32 3, %v2005_v42  ;;  %6697 = vmatprep.mubr.msk.f32.mxu1 %vm12579_vm4, %v8983_v36 }
 0x283   : > { %v2110_v41 = vand.u32 3, %v2109_v52  ;;  %v1906_v37 = vsel %vm1904_vm10, %v12574_v7, %v1905_v16  ;;  %v1909_v13 = vsel %vm1907_vm15, %v1908_v0, %v8793_v48  ;;  %v2116_v59 = vxor.u32 2147483648, %v8886_v33  ;;  %vm12589_vm10 = vmmov %vm12579_vm4 }
 0x284   : > { %v2213_v62 = vadd.s32 3, %v2209_v54  ;;  %v9004_v57 = vsel %vm1588_vm7, nan, %v1598_v12  ;;  %vm1799_vm0 = vcmp.lt.s32.totalorder %v1798_v20, 2  ;;  %v2009_v34 = vxor.u32 2147483648, %v12581_v45  ;;  %vm12584_vm7 = vmmov %vm12579_vm4 }
 0x285   : > { %12580 = vst [vmem:[#allocation19_spill] sm:$0xff] %v9004_v57  ;;  %v2012_v55 = vxor.u32 2147483648, %v12582_v19  ;;  %v9010_v10 = vsel %vm1692_vm13, nan, %v1702_v14  ;;  %v1806_v48 = vsel %vm1799_vm0, %v1802_v38, %v1805_v28  ;;  %vm1900_vm11 = vweird.f32 %v8223_v50  ;;  %6698 = vmatmul.mubr.msk.f32.gmra.mrb[8].mxu1 %vm12584_vm7, %v9004_v57  ;;  %vm12585_vm13 = vmmov %vm12579_vm4 }
 0x286   : > { %12583 = vst [vmem:[#allocation24_spill] sm:$0xff] %v9010_v10  ;;  %vm1903_vm14 = vcmp.lt.s32.totalorder %v1902_v2, 2  ;;  %vm2008_vm12 = vcmp.eq.s32.totalorder %v2006_v29, 0  ;;  %vm2112_vm6 = vcmp.eq.s32.totalorder %v2110_v41, 0  ;;  %vm2115_vm5 = vcmp.eq.s32.totalorder %v2110_v41, 2  ;;  %6700 = vmatprep.mubr.msk.f32.mxu1 %vm12585_vm13, %v9010_v10  ;;  %vm12595_vm7 = vmmov %vm12579_vm4 }
 0x287   : > { %v1910_v39 = vsel %vm1903_vm14, %v1906_v37, %v1909_v13  ;;  %vm2011_vm1 = vcmp.eq.s32.totalorder %v2006_v29, 2  ;;  %v2114_v43 = vsel %vm2112_vm6, %v8886_v33, %v2113_v23  ;;  %v2117_v26 = vsel %vm2115_vm5, %v2116_v59, %v8903_v15  ;;  %vm12593_vm6 = vmmov %vm12579_vm4 }
 0x288   : > { %v2214_v5 = vand.u32 3, %v2213_v62  ;;  %v2010_v30 = vsel %vm2008_vm12, %v12582_v19, %v2009_v34  ;;  %v2013_v60 = vsel %vm2011_vm1, %v2012_v55, %v12581_v45  ;;  %v2217_v24 = vxor.u32 2147483648, %v8814_v49  ;;  %vm12592_vm12 = vmmov %vm12579_vm4 }
 0x289   : > { %v2220_v40 = vxor.u32 2147483648, %v12586_v31  ;;  %vm1796_vm9 = vweird.f32 %v7978_v56  ;;  %v9026_v61 = vsel %vm1900_vm11, nan, %v1910_v39  ;;  %vm2111_vm3 = vcmp.lt.s32.totalorder %v2110_v41, 2 }
 0x28a   : > { %12587 = vst [vmem:[#allocation23_spill] sm:$0xff] %v9026_v61  ;;  %v9028_v33 = vsel %vm1796_vm9, nan, %v1806_v48  ;;  %vm2007_vm2 = vcmp.lt.s32.totalorder %v2006_v29, 2  ;;  %v2118_v15 = vsel %vm2111_vm3, %v2114_v43, %v2117_v26  ;;  %vm2216_vm15 = vcmp.eq.s32.totalorder %v2214_v5, 0 }
 0x28b   : > { %12588 = vst [vmem:[#allocation27_spill] sm:$0xff] %v9028_v33  ;;  %6701 = vmatmul.mubr.msk.f32.gmra.mrb[10].mxu1 %vm12589_vm10, %v9028_v33  ;;  %v2014_v21 = vsel %vm2007_vm2, %v2010_v30, %v2013_v60  ;;  %vm2219_vm8 = vcmp.eq.s32.totalorder %v2214_v5, 2  ;;  %vm2108_vm0 = vweird.f32 %v8385_v53  ;;  %v2218_v56 = vsel %vm2216_vm15, %v12586_v31, %v2217_v24 }
 0x28c   : > { %6703 = vmatprep.mubr.msk.f32.mxu1 %vm12579_vm4, %v9026_v61  ;;  %v2221_v50 = vsel %vm2219_vm8, %v2220_v40, %v8814_v49  ;;  %vm2004_vm11 = vweird.f32 %v8153_v3  ;;  %v9038_v51 = vsel %vm2108_vm0, nan, %v2118_v15  ;;  %vm2215_vm14 = vcmp.lt.s32.totalorder %v2214_v5, 2  ;;  %v9054_v3 = vld [vmem:[%s12123_s4] ss:$0 sm:$0xff] }
 0x28d   : > { %12590 = vst [vmem:[#allocation14_spill] sm:$0xff] %v9038_v51  ;;  %v9040_v17 = vsel %vm2004_vm11, nan, %v2014_v21  ;;  %v2222_v35 = vsel %vm2215_vm14, %v2218_v56, %v2221_v50  ;;  %vm2212_vm5 = vweird.f32 %v12570_v25  ;;  %v12597_v24 = vmov 683565275  }
 0x28e   : > { %12591 = vst [vmem:[#allocation11_spill] sm:$0xff] %v9040_v17  ;;  %v9047_v53 = vsel %vm2212_vm5, nan, %v2222_v35  ;;  %v12598_v21 = vmov 2475754826   ;;  %v12599_v50 = vmov 2131351028  }
 0x28f   : > { %6704 = vmatmul.mubr.msk.f32.gmra.mrb[12].mxu1 %vm12592_vm12, %v9040_v17  ;;  %12594 = vst [vmem:[#allocation26_spill] sm:$0xff] %v9047_v53 }
 0x290   : > { %6706 = vmatprep.mubr.msk.f32.mxu1 %vm12593_vm6, %v9038_v51 }
 0x293   : > { %6707 = vmatmul.mubr.msk.f32.gmra.mrb[14].mxu1 %vm12595_vm7, %v9047_v53 }
 0x348   : > { %v6687_v49 = vpop.f32.mrb[0].mxu1 }
 0x349   : > { %v9057_v20 = vadd.f32 %v6687_v49, %v9054_v3  ;;  %v2354_v32 = vpop.f32.mrb[1].mxu1  ;;  %v12600_v49 = vmov 2102212464  }
 0x34a   : > { %v9060_v63 = vadd.f32 %v9054_v3, %v2354_v32 }
 0x34b   : > { %v12248_v18 = vand.u32 2147483647, %v9057_v20  ;;  %v2540_v6 = vand.u32 2139095040, %v9057_v20  ;;  %vm2539_vm6 = vcmp.lt.s32.totalorder %v9057_v20, 0 }
 0x34c   : > { %v12247_v4 = vand.u32 2147483647, %v9060_v63  ;;  %v2436_v2 = vand.u32 2139095040, %v9060_v63  ;;  %v6690_v42 = vpop.f32.mrb[2].mxu1 }
 0x34d   : > { %v2541_v52 = vshrl.u32 %v2540_v6, 23  ;;  %v2544_v25 = vand.u32 8388607, %v12248_v18  ;;  %v9069_v11 = vadd.f32 %v6690_v42, %v9054_v3  ;;  %v2364_v12 = vpop.f32.mrb[3].mxu1  ;;  %v12601_v6 = vmov 920167782  }
 0x34e   : > { %v2437_v16 = vshrl.u32 %v2436_v2, 23  ;;  %v2440_v7 = vand.u32 8388607, %v12247_v4  ;;  %v9082_v48 = vadd.f32 %v9054_v3, %v2364_v12 }
 0x34f   : > { %12596 = vst [vmem:[#allocation25_spill] sm:$0xff] %v9069_v11  ;;  %v6394_v0 = vadd.s32 4294967169, %v2541_v52  ;;  %v2748_v54 = vand.u32 2139095040, %v9069_v11  ;;  %v2545_v38 = vor.u32 8388608, %v2544_v25  ;;  %v12246_v41 = vand.u32 2147483647, %v9069_v11 }
 0x350   : > { %v6390_v22 = vadd.s32 4294967169, %v2437_v16  ;;  %v9074_v14 = vpop.f32.mrb[4].mxu1  ;;  %v2441_v23 = vor.u32 8388608, %v2440_v7  ;;  %v12602_v7 = vmov 1326507024  }
 0x351   : > { %v2547_v28 = vadd.s32 1, %v6394_v0  ;;  %v2749_v37 = vshrl.u32 %v2748_v54, 23  ;;  %v9077_v13 = vpop.f32.mrb[5].mxu1  ;;  %v9086_v43 = vshll.u32 %v2545_v38, 8  ;;  %v9094_v30 = vand.u32 8388607, %v12246_v41 }
 0x352   : > { %v2443_v29 = vadd.s32 1, %v6390_v22  ;;  %v9090_v5 = vshll.u32 %v2441_v23, 8 }
 0x353   : > { %vm2548_vm1 = vcmp.gt.s32.totalorder %v2547_v28, 0  ;;  %v6402_v62 = vadd.s32 4294967169, %v2749_v37 }
 0x354   : > { %v2549_v59 = vsel %vm2548_vm1, %v2547_v28, 0  ;;  %vm2444_vm13 = vcmp.gt.s32.totalorder %v2443_v29, 0  ;;  %v9079_v45 = vpop.f32.mrb[6].mxu1 }
 0x355   : > { %v2550_v34 = vshrl.u32 %v2549_v59, 5  ;;  %v2551_v19 = vand.u32 31, %v2549_v59  ;;  %v2445_v55 = vsel %vm2444_vm13, %v2443_v29, 0  ;;  %v9084_v39 = vpop.f32.mrb[7].mxu1  ;;  %v9097_v15 = vadd.s32 1, %v6402_v62 }
 0x356   : > { %v9088_v26 = vshrl.u32 %v2445_v55, 5  ;;  %v2447_v40 = vand.u32 31, %v2445_v55 }
 0x357   : > { %v2552_v60 = vsub.s32 32, %v2551_v19  ;;  %v2554_v31 = vshll.u32 %v12597_v24, %v2551_v19  ;;  %v2557_v56 = vshll.u32 %v12598_v21, %v2551_v19  ;;  %v2560_v35 = vshll.u32 %v12599_v50, %v2551_v19 }
 0x358   : > { %v2563_v32 = vshll.u32 %v12600_v49, %v2551_v19  ;;  %v2566_v2 = vshll.u32 %v12601_v6, %v2551_v19  ;;  %vm2569_vm9 = vcmp.lt.s32.totalorder %v2550_v34, 1  ;;  %vm2570_vm3 = vcmp.lt.s32.totalorder %v2550_v34, 2 }
 0x359   : > { %v2555_v42 = vshrl.u32 %v12598_v21, %v2552_v60  ;;  %v2558_v52 = vshrl.u32 %v12599_v50, %v2552_v60  ;;  %v2561_v25 = vshrl.u32 %v12600_v49, %v2552_v60  ;;  %v2553_v12 = vshrl.u32 %v12597_v24, %v2552_v60 }
 0x35a   : > { %v2564_v16 = vshrl.u32 %v12601_v6, %v2552_v60  ;;  %v2567_v0 = vshrl.u32 %v12602_v7, %v2552_v60  ;;  %v2448_v28 = vsub.s32 32, %v2447_v40  ;;  %vm2571_vm2 = vcmp.lt.s32.totalorder %v2550_v34, 3 }
 0x35b   : > { %v2556_v22 = vor.u32 %v2555_v42, %v2554_v31  ;;  %v2559_v54 = vor.u32 %v2558_v52, %v2557_v56  ;;  %v2562_v38 = vor.u32 %v2561_v25, %v2560_v35  ;;  %vm2572_vm10 = vcmp.lt.s32.totalorder %v2550_v34, 4 }
 0x35c   : > { %v2565_v23 = vor.u32 %v2564_v16, %v2563_v32  ;;  %v2568_v29 = vor.u32 %v2567_v0, %v2566_v2  ;;  %v2450_v60 = vshll.u32 %v12597_v24, %v2447_v40  ;;  %v2451_v35 = vshrl.u32 %v12598_v21, %v2448_v28 }
 0x35d   : > { %v2573_v37 = vsel %vm2569_vm9, %v2553_v12, %v2556_v22  ;;  %v2574_v59 = vsel %vm2572_vm10, %v2562_v38, 2102212464  ;;  %v2577_v62 = vsel %vm2569_vm9, %v2556_v22, %v2559_v54  ;;  %v2581_v19 = vsel %vm2569_vm9, %v2559_v54, %v2562_v38 }
 0x35e   : > { %v2575_v55 = vsel %vm2571_vm2, %v2559_v54, %v2574_v59  ;;  %v2578_v41 = vsel %vm2572_vm10, %v2565_v23, 920167782  ;;  %v2582_v4 = vsel %vm2572_vm10, %v2568_v29, 1326507024  ;;  %v2453_v32 = vshll.u32 %v12598_v21, %v2447_v40 }
 0x35f   : > { %v2579_v31 = vsel %vm2571_vm2, %v2562_v38, %v2578_v41  ;;  %v2583_v56 = vsel %vm2571_vm2, %v2565_v23, %v2582_v4  ;;  %v2576_v2 = vsel %vm2570_vm3, %v2573_v37, %v2575_v55  ;;  %v2454_v25 = vshrl.u32 %v12599_v50, %v2448_v28  ;;  %v9127_v4 = vpop.f32.mrb[8].mxu1 }
 0x360   : > { %v2580_v42 = vsel %vm2570_vm3, %v2577_v62, %v2579_v31  ;;  %v2584_v52 = vsel %vm2570_vm3, %v2581_v19, %v2583_v56  ;;  %v2452_v22 = vor.u32 %v2451_v35, %v2450_v60  ;;  %v2456_v38 = vshll.u32 %v12599_v50, %v2447_v40 }
 0x361   : > { %v9120_v12 = vmul.u32.u64.low %v9086_v43, %v2584_v52  ;;  %v9121_v16 = vmul.u32.u64.high %v9086_v43, %v2584_v52, %v9120_v12  ;;  %v9124_v0 = vmul.u32.u64.low %v9086_v43, %v2580_v42  ;;  %v9125_v41 = vmul.u32.u64.high %v9086_v43, %v2580_v42, %v9124_v0 }
 0x362   : > { %v2455_v54 = vor.u32 %v2454_v25, %v2453_v32  ;;  %v2457_v23 = vshrl.u32 %v12600_v49, %v2448_v28  ;;  %v2449_v34 = vshrl.u32 %v12597_v24, %v2448_v28  ;;  %v2459_v29 = vshll.u32 %v12600_v49, %v2447_v40 }
 0x363   : > { %v2460_v37 = vshrl.u32 %v12601_v6, %v2448_v28  ;;  %v2463_v59 = vshrl.u32 %v12602_v7, %v2448_v28  ;;  %v2592_v62 = vmul.u32 %v9086_v43, %v2576_v2  ;;  %v2462_v55 = vshll.u32 %v12601_v6, %v2447_v40 }
 0x364   : > { %v2458_v19 = vor.u32 %v2457_v23, %v2456_v38  ;;  %vm2465_vm15 = vcmp.lt.s32.totalorder %v9088_v26, 1  ;;  %vm2594_vm8 = vc.u32 %v9121_v16, %v9124_v0  ;;  %v2595_v60 = vadd.s32 1, %v9125_v41 }
 0x365   : > { %v2461_v31 = vor.u32 %v2460_v37, %v2459_v29  ;;  %vm2466_vm4 = vcmp.lt.s32.totalorder %v9088_v26, 2  ;;  %v2464_v56 = vor.u32 %v2463_v59, %v2462_v55  ;;  %vm2467_vm0 = vcmp.lt.s32.totalorder %v9088_v26, 3 }
 0x366   : > { %vm2468_vm11 = vcmp.lt.s32.totalorder %v9088_v26, 4  ;;  %v2473_v28 = vsel %vm2465_vm15, %v2452_v22, %v2455_v54  ;;  %v2596_v43 = vsel %vm2594_vm8, %v2595_v60, %v9125_v41  ;;  %v2477_v40 = vsel %vm2465_vm15, %v2455_v54, %v2458_v19 }
 0x367   : > { %v2470_v35 = vsel %vm2468_vm11, %v2458_v19, 2102212464  ;;  %v2474_v32 = vsel %vm2468_vm11, %v2461_v31, 920167782  ;;  %v2597_v2 = vadd.s32 %v2596_v43, %v2592_v62  ;;  %v2469_v42 = vsel %vm2465_vm15, %v2449_v34, %v2452_v22 }
 0x368   : > { %v2475_v52 = vsel %vm2467_vm0, %v2458_v19, %v2474_v32  ;;  %v2478_v25 = vsel %vm2468_vm11, %v2464_v56, 1326507024  ;;  %v2471_v12 = vsel %vm2467_vm0, %v2455_v54, %v2470_v35  ;;  %vm2756_vm14 = vcmp.gt.s32.totalorder %v9097_v15, 0 }
 0x369   : > { %v2476_v38 = vsel %vm2466_vm4, %v2473_v28, %v2475_v52  ;;  %v2479_v23 = vsel %vm2467_vm0, %v2461_v31, %v2478_v25  ;;  %v2598_v29 = vadd.s32 536870912, %v2597_v2  ;;  %v2757_v54 = vsel %vm2756_vm14, %v9097_v15, 0  ;;  %v9174_v52 = vpop.f32.mrb[9].mxu1 }
 0x36a   : > { %v2480_v37 = vsel %vm2466_vm4, %v2477_v40, %v2479_v23  ;;  %v9150_v41 = vmul.u32.u64.low %v9090_v5, %v2476_v38  ;;  %v9151_v59 = vmul.u32.u64.high %v9090_v5, %v2476_v38, %v9150_v41  ;;  %v2472_v19 = vsel %vm2466_vm4, %v2469_v42, %v2471_v12 }
 0x36b   : > { %v9155_v22 = vmul.u32.u64.low %v9090_v5, %v2480_v37  ;;  %v9156_v34 = vmul.u32.u64.high %v9090_v5, %v2480_v37, %v9155_v22  ;;  %v2599_v62 = vshrl.u32 %v2598_v29, 30  ;;  %v2759_v55 = vand.u32 31, %v2757_v54 }
 0x36c   : > { %v2753_v60 = vor.u32 8388608, %v9094_v30  ;;  %v2644_v31 = vand.u32 2139095040, %v9082_v48  ;;  %v2491_v28 = vadd.s32 1, %v9151_v59  ;;  %v2488_v35 = vmul.u32 %v9090_v5, %v2472_v19 }
 0x36d   : > { %v2600_v56 = vshll.u32 %v2599_v62, 30  ;;  %v2760_v43 = vsub.s32 32, %v2759_v55  ;;  %vm2490_vm12 = vc.u32 %v9156_v34, %v9150_v41  ;;  %v2593_v25 = vadd.s32 %v9124_v0, %v9121_v16 }
 0x36e   : > { %v2492_v15 = vsel %vm2490_vm12, %v2491_v28, %v9151_v59  ;;  %v9172_v40 = vshll.u32 %v2753_v60, 8  ;;  %v2645_v42 = vshrl.u32 %v2644_v31, 23  ;;  %v2758_v23 = vshrl.u32 %v2757_v54, 5 }
 0x36f   : > { %v9167_v32 = vsub.s32 %v2597_v2, %v2600_v56  ;;  %v2493_v26 = vadd.s32 %v2492_v15, %v2488_v35  ;;  %v2763_v30 = vshrl.u32 %v12598_v21, %v2760_v43  ;;  %v2766_v12 = vshrl.u32 %v12599_v50, %v2760_v43 }
 0x370   : > { %v2769_v2 = vshrl.u32 %v12600_v49, %v2760_v43  ;;  %v2762_v29 = vshll.u32 %v12597_v24, %v2759_v55  ;;  %v2768_v37 = vshll.u32 %v12599_v50, %v2759_v55  ;;  %v2623_v22 = vsub.s32 4, %v2599_v62 }
 0x371   : > { %v2603_v5 = vsub.s32 0, %v9167_v32  ;;  %v2494_v38 = vadd.s32 536870912, %v2493_v26  ;;  %v2765_v19 = vshll.u32 %v12598_v21, %v2759_v55  ;;  %v2772_v60 = vshrl.u32 %v12601_v6, %v2760_v43 }
 0x372   : > { %v2764_v0 = vor.u32 %v2763_v30, %v2762_v29  ;;  %v2770_v31 = vor.u32 %v2769_v2, %v2768_v37  ;;  %v2775_v56 = vshrl.u32 %v12602_v7, %v2760_v43  ;;  %v2771_v54 = vshll.u32 %v12600_v49, %v2759_v55 }
 0x373   : > { %v6395_v59 = vmin.u32 %v2603_v5, %v9167_v32  ;;  %v9185_v16 = vshrl.u32 %v2494_v38, 30  ;;  %v2767_v35 = vor.u32 %v2766_v12, %v2765_v19  ;;  %v2774_v15 = vshll.u32 %v12601_v6, %v2759_v55 }
 0x374   : > { %v2761_v5 = vshrl.u32 %v12597_v24, %v2760_v43  ;;  %vm2777_vm5 = vcmp.lt.s32.totalorder %v2758_v23, 1  ;;  %v6398_v53 = vadd.s32 4294967169, %v2645_v42  ;;  %v2773_v17 = vor.u32 %v2772_v60, %v2771_v54 }
 0x375   : > { %v2605_v28 = vclz %v6395_v59  ;;  %v2496_v18 = vshll.u32 %v9185_v16, 30  ;;  %v2776_v38 = vor.u32 %v2775_v56, %v2774_v15  ;;  %vm2780_vm7 = vcmp.lt.s32.totalorder %v2758_v23, 4 }
 0x376   : > { %vm2779_vm1 = vcmp.lt.s32.totalorder %v2758_v23, 3  ;;  %v2781_v2 = vsel %vm2777_vm5, %v2761_v5, %v2764_v0  ;;  %v2782_v12 = vsel %vm2780_vm7, %v2770_v31, 2102212464  ;;  %v2624_v55 = vsel %vm2539_vm6, %v2623_v22, %v2599_v62 }
 0x377   : > { %v6396_v51 = vadd.s32 4294967294, %v2605_v28  ;;  %v9192_v30 = vsub.s32 %v2493_v26, %v2496_v18  ;;  %vm2778_vm9 = vcmp.lt.s32.totalorder %v2758_v23, 2  ;;  %v2783_v43 = vsel %vm2779_vm1, %v2767_v35, %v2782_v12 }
 0x378   : > { %v2784_v37 = vsel %vm2778_vm9, %v2781_v2, %v2783_v43  ;;  %v2785_v18 = vsel %vm2777_vm5, %v2764_v0, %v2767_v35  ;;  %v2786_v60 = vsel %vm2780_vm7, %v2773_v17, 920167782  ;;  %v2789_v22 = vsel %vm2777_vm5, %v2767_v35, %v2770_v31 }
 0x379   : > { %vm6397_vm13 = vcmp.lt.s32.totalorder %v6396_v51, 0  ;;  %v2499_v42 = vsub.s32 0, %v9192_v30  ;;  %v2787_v62 = vsel %vm2779_vm1, %v2770_v31, %v2786_v60  ;;  %v2651_v23 = vadd.s32 1, %v6398_v53 }
 0x37a   : > { %v2608_v29 = vsel %vm6397_vm13, 0, %v6396_v51  ;;  %v2790_v51 = vsel %vm2780_vm7, %v2776_v38, 1326507024  ;;  %v2788_v15 = vsel %vm2778_vm9, %v2785_v18, %v2787_v62  ;;  %vm2629_vm11 = vweird.f32 %v9057_v20 }
 0x37b   : > { %v2609_v26 = vsub.s32 32, %v2608_v29  ;;  %v2610_v59 = vshll.u32 %v9167_v32, %v2608_v29  ;;  %v2613_v19 = vsub.s32 4294967266, %v2608_v29  ;;  %v6391_v56 = vmin.u32 %v2499_v42, %v9192_v30 }
 0x37c   : > { %v2791_v0 = vsel %vm2779_vm1, %v2773_v17, %v2790_v51  ;;  %v9212_v2 = vmul.u32.u64.low %v9172_v40, %v2788_v15  ;;  %v9213_v12 = vmul.u32.u64.high %v9172_v40, %v2788_v15, %v9212_v2  ;;  %vm2652_vm10 = vcmp.gt.s32.totalorder %v2651_v23, 0 }
 0x37d   : > { %v2611_v28 = vshrl.u32 %v2593_v25, %v2609_v26  ;;  %v2614_v54 = vadd.s32 127, %v2613_v19  ;;  %v2501_v5 = vclz %v6391_v56  ;;  %v2792_v32 = vsel %vm2778_vm9, %v2789_v22, %v2791_v0 }
 0x37e   : > { %v9217_v31 = vmul.u32.u64.low %v9172_v40, %v2792_v32  ;;  %v9218_v35 = vmul.u32.u64.high %v9172_v40, %v2792_v32, %v9217_v31  ;;  %v12603_v25 = vand.u32 2147483647, %v9057_v20  ;;  %v2800_v26 = vmul.u32 %v9172_v40, %v2784_v37 }
 0x37f   : > { %v2612_v43 = vor.u32 %v2611_v28, %v2610_v59  ;;  %v2615_v29 = vshll.u32 %v2614_v54, 23  ;;  %v6392_v17 = vadd.s32 4294967294, %v2501_v5  ;;  %v2803_v59 = vadd.s32 1, %v9213_v12 }
 0x380   : > { %vm9222_vm3 = vcmp.le.f32.partialorder %v12603_v25, 0.7853982  ;;  %vm2802_vm15 = vc.u32 %v9218_v35, %v9212_v2  ;;  %v12252_v28 = vand.u32 2147483647, %v9082_v48  ;;  %v2489_v32 = vadd.s32 %v9150_v41, %v9156_v34 }
 0x381   : > { %v2616_v42 = vor.u32 4788187, %v2615_v29  ;;  %v2626_v18 = vsel %vm9222_vm3, 0, %v2624_v55  ;;  %vm6393_vm2 = vcmp.lt.s32.totalorder %v6392_v17, 0  ;;  %v2619_v60 = vcvt.s32.f32 %v2612_v43 }
 0x382   : > { %v2504_v56 = vsel %vm6393_vm2, 0, %v6392_v17  ;;  %v2804_v22 = vsel %vm2802_vm15, %v2803_v59, %v9213_v12  ;;  %v2653_v55 = vsel %vm2652_vm10, %v2651_v23, 0  ;;  %v2630_v54 = vadd.s32 3, %v2626_v18 }
 0x383   : > { %v2617_v19 = vand.u32 2147483647, %v2616_v42  ;;  %v2509_v62 = vsub.s32 4294967266, %v2504_v56  ;;  %v2805_v51 = vadd.s32 %v2804_v22, %v2800_v26  ;;  %v2505_v15 = vsub.s32 32, %v2504_v56 }
 0x384   : > { %v2655_v40 = vand.u32 31, %v2653_v55  ;;  %v2648_v12 = vand.u32 8388607, %v12252_v28  ;;  %v9244_v25 = vadd.f32 %v9074_v14, %v9054_v3  ;;  %v9249_v23 = vand.u32 3, %v2630_v54 }
 0x385   : > { %v2620_v53 = vmul.f32 %v2619_v60, %v2617_v19  ;;  %v2510_v0 = vadd.s32 127, %v2509_v62  ;;  %v2806_v5 = vadd.s32 536870912, %v2805_v51  ;;  %v2506_v41 = vshll.u32 %v9192_v30, %v2504_v56  ;;  %v9261_v56 = vpop.f32.mrb[10].mxu1 }
 0x386   : > { %v2656_v43 = vsub.s32 32, %v2655_v40  ;;  %12606 = vst [vmem:[#allocation22_spill] sm:$0xff] %v9244_v25  ;;  %v2507_v34 = vshrl.u32 %v2489_v32, %v2505_v15  ;;  %v2658_v59 = vshll.u32 %v12597_v24, %v2655_v40  ;;  %v2649_v60 = vor.u32 8388608, %v2648_v12 }
 0x387   : > { %v2621_v37 = vxor.u32 2147483648, %v2620_v53  ;;  %v9238_v31 = vshrl.u32 %v2806_v5, 30  ;;  %v2511_v42 = vshll.u32 %v2510_v0, 23  ;;  %v2661_v62 = vshll.u32 %v12598_v21, %v2655_v40 }
 0x388   : > { %v2659_v26 = vshrl.u32 %v12598_v21, %v2656_v43  ;;  %v2662_v14 = vshrl.u32 %v12599_v50, %v2656_v43  ;;  %v2665_v19 = vshrl.u32 %v12600_v49, %v2656_v43  ;;  %v2956_v30 = vand.u32 2139095040, %v9244_v25 }
 0x389   : > { %v2622_v29 = vsel %vm2539_vm6, %v2621_v37, %v2620_v53  ;;  %v2808_v18 = vshll.u32 %v9238_v31, 30  ;;  %v9263_v22 = vor.u32 %v2507_v34, %v2506_v41  ;;  %v9265_v53 = vshrl.u32 %v2653_v55, 5 }
 0x38a   : > { %v2625_v17 = vsel %vm9222_vm3, %v9057_v20, %v2622_v29  ;;  %v2660_v54 = vor.u32 %v2659_v26, %v2658_v59  ;;  %v2664_v15 = vshll.u32 %v12599_v50, %v2655_v40  ;;  %vm2636_vm8 = vcmp.eq.s32.totalorder %v9249_v23, 2 }
 0x38b   : > { %7115 = vcosq.f32 %v2625_v17  ;;  %v9257_v38 = vsub.s32 %v2805_v51, %v2808_v18  ;;  %v2663_v51 = vor.u32 %v2662_v14, %v2661_v62  ;;  %v2667_v0 = vshll.u32 %v12600_v49, %v2655_v40 }
 0x38c   : > { %7117 = vsinq.f32 %v2625_v17  ;;  %v2668_v5 = vshrl.u32 %v12601_v6, %v2656_v43  ;;  %vm2633_vm4 = vcmp.eq.s32.totalorder %v9249_v23, 0  ;;  %v2512_v32 = vor.u32 4788187, %v2511_v42 }
 0x38d   : > { %v2811_v37 = vsub.s32 0, %v9257_v38  ;;  %v2666_v29 = vor.u32 %v2665_v19, %v2664_v15  ;;  %v2670_v12 = vshll.u32 %v12601_v6, %v2655_v40  ;;  %v2671_v55 = vshrl.u32 %v12602_v7, %v2656_v43 }
 0x38e   : > { %vm2632_vm0 = vcmp.lt.s32.totalorder %v9249_v23, 2  ;;  %v2669_v41 = vor.u32 %v2668_v5, %v2667_v0  ;;  %v9277_v34 = vshll.u32 %v2649_v60, 8  ;;  %v2515_v26 = vcvt.s32.f32 %v9263_v22 }
 0x38f   : > { %v6403_v17 = vmin.u32 %v2811_v37, %v9257_v38  ;;  %v2672_v59 = vor.u32 %v2671_v55, %v2670_v12  ;;  %vm2673_vm14 = vcmp.lt.s32.totalorder %v9265_v53, 1  ;;  %v2957_v42 = vshrl.u32 %v2956_v30, 23 }
 0x390   : > { %v2657_v14 = vshrl.u32 %v12597_v24, %v2656_v43  ;;  %vm2676_vm12 = vcmp.lt.s32.totalorder %v9265_v53, 4  ;;  %v2681_v19 = vsel %vm2673_vm14, %v2660_v54, %v2663_v51  ;;  %v2513_v60 = vand.u32 2147483647, %v2512_v32 }
 0x391   : > { %v2813_v40 = vclz %v6403_v17  ;;  %vm2675_vm6 = vcmp.lt.s32.totalorder %v9265_v53, 3  ;;  %v2682_v62 = vsel %vm2676_vm12, %v2669_v41, 920167782  ;;  %v2685_v15 = vsel %vm2673_vm14, %v2663_v51, %v2666_v29 }
 0x392   : > { %vm2674_vm5 = vcmp.lt.s32.totalorder %v9265_v53, 2  ;;  %v2683_v30 = vsel %vm2675_vm6, %v2666_v29, %v2682_v62  ;;  %v2686_v43 = vsel %vm2676_vm12, %v2672_v59, 1326507024  ;;  %v2678_v12 = vsel %vm2676_vm12, %v2666_v29, 2102212464 }
 0x393   : > { %v6404_v37 = vadd.s32 4294967294, %v2813_v40  ;;  %v2684_v32 = vsel %vm2674_vm5, %v2681_v19, %v2683_v30  ;;  %v2687_v55 = vsel %vm2675_vm6, %v2669_v41, %v2686_v43  ;;  %v6410_v28 = vadd.s32 4294967169, %v2957_v42 }
 0x394   : > { %v2688_v40 = vsel %vm2674_vm5, %v2685_v15, %v2687_v55  ;;  %v2677_v41 = vsel %vm2673_vm14, %v2657_v14, %v2660_v54  ;;  %v2679_v30 = vsel %vm2675_vm6, %v2663_v51, %v2678_v12  ;;  %vm2435_vm1 = vcmp.lt.s32.totalorder %v9060_v63, 0 }
 0x395   : > { %v7116_v22 = vpop.eup %7115  ;;  %vm6405_vm7 = vcmp.lt.s32.totalorder %v6404_v37, 0  ;;  %v9302_v59 = vmul.u32.u64.low %v9277_v34, %v2688_v40  ;;  %v9303_v61 = vmul.u32.u64.high %v9277_v34, %v2688_v40, %v9302_v59  ;;  %v2963_v54 = vadd.s32 1, %v6410_v28 }
 0x396   : > { %v7118_v0 = vpop.eup %7117  ;;  %v2637_v5 = vxor.u32 2147483648, %v7116_v22  ;;  %v2816_v62 = vsel %vm6405_vm7, 0, %v6404_v37  ;;  %v9314_v37 = vmul.u32.u64.low %v9277_v34, %v2684_v32  ;;  %v9315_v43 = vmul.u32.u64.high %v9277_v34, %v2684_v32, %v9314_v37  ;;  %v9332_v32 = vpop.f32.mrb[11].mxu1 }
 0x397   : > { %v2634_v17 = vxor.u32 2147483648, %v7118_v0  ;;  %v2821_v19 = vsub.s32 4294967266, %v2816_v62  ;;  %v2817_v15 = vsub.s32 32, %v2816_v62  ;;  %v2516_v51 = vmul.f32 %v2515_v26, %v2513_v60 }
 0x398   : > { %v2638_v18 = vsel %vm2636_vm8, %v2637_v5, %v7118_v0  ;;  %v2801_v23 = vadd.s32 %v9212_v2, %v9218_v35  ;;  %vm2698_vm13 = vc.u32 %v9303_v61, %v9314_v37  ;;  %v12607_v20 = vand.u32 2147483647, %v9244_v25 }
 0x399   : > { %v2635_v29 = vsel %vm2633_vm4, %v7116_v22, %v2634_v17  ;;  %v2519_v22 = vsub.s32 4, %v9185_v16  ;;  %v2822_v5 = vadd.s32 127, %v2821_v19  ;;  %vm2964_vm9 = vcmp.gt.s32.totalorder %v2963_v54, 0 }
 0x39a   : > { %v2639_v42 = vsel %vm2632_vm0, %v2635_v29, %v2638_v18  ;;  %v2680_v18 = vsel %vm2674_vm5, %v2677_v41, %v2679_v30  ;;  %v2960_v12 = vand.u32 8388607, %v12607_v20  ;;  %v2819_v28 = vshrl.u32 %v2801_v23, %v2817_v15 }
 0x39b   : > { %v9320_v0 = vsel %vm2629_vm11, nan, %v2639_v42  ;;  %v2823_v14 = vshll.u32 %v2822_v5, 23  ;;  %v2699_v55 = vadd.s32 1, %v9315_v43  ;;  %v2965_v26 = vsel %vm2964_vm9, %v2963_v54, 0 }
 0x39c   : > { %v9337_v2 = vadd.f32 %v9054_v3, %v9077_v13  ;;  %v9342_v35 = vsel %vm2435_vm1, %v2519_v22, %v9185_v16  ;;  %vm2747_vm3 = vcmp.lt.s32.totalorder %v9069_v11, 0  ;;  %v2696_v53 = vmul.u32 %v9277_v34, %v2680_v18 }
 0x39d   : > { %v2967_v60 = vand.u32 31, %v2965_v26  ;;  %v2517_v17 = vxor.u32 2147483648, %v2516_v51  ;;  %v2818_v40 = vshll.u32 %v9257_v38, %v2816_v62  ;;  %v2831_v59 = vsub.s32 4, %v9238_v31 }
 0x39e   : > { %12608 = vst [vmem:[#allocation17_spill] sm:$0xff] %v9337_v2  ;;  %v2700_v29 = vsel %vm2698_vm13, %v2699_v55, %v9315_v43  ;;  %v2824_v19 = vor.u32 4788187, %v2823_v14  ;;  %v2961_v41 = vor.u32 8388608, %v2960_v12  ;;  %v2966_v15 = vshrl.u32 %v2965_v26, 5 }
 0x39f   : > { %v2701_v13 = vadd.s32 %v2700_v29, %v2696_v53  ;;  %v2968_v30 = vsub.s32 32, %v2967_v60  ;;  %v2820_v42 = vor.u32 %v2819_v28, %v2818_v40  ;;  %v2970_v16 = vshll.u32 %v12597_v24, %v2967_v60 }
 0x3a0   : > { %v2852_v22 = vand.u32 2139095040, %v9337_v2  ;;  %v2973_v54 = vshll.u32 %v12598_v21, %v2967_v60  ;;  %v2976_v38 = vshll.u32 %v12599_v50, %v2967_v60  ;;  %v2825_v14 = vand.u32 2147483647, %v2824_v19 }
 0x3a1   : > { %v2702_v5 = vadd.s32 536870912, %v2701_v13  ;;  %v2971_v34 = vshrl.u32 %v12598_v21, %v2968_v30  ;;  %v2974_v62 = vshrl.u32 %v12599_v50, %v2968_v30  ;;  %v2977_v43 = vshrl.u32 %v12600_v49, %v2968_v30 }
 0x3a2   : > { %v2980_v23 = vshrl.u32 %v12601_v6, %v2968_v30  ;;  %v2983_v18 = vshrl.u32 %v12602_v7, %v2968_v30  ;;  %v9361_v20 = vsel %vm2747_vm3, %v2831_v59, %v9238_v31  ;;  %v2979_v28 = vshll.u32 %v12600_v49, %v2967_v60 }
 0x3a3   : > { %v9363_v12 = vshrl.u32 %v2702_v5, 30  ;;  %v2972_v55 = vor.u32 %v2971_v34, %v2970_v16  ;;  %v2975_v26 = vor.u32 %v2974_v62, %v2973_v54  ;;  %v2978_v53 = vor.u32 %v2977_v43, %v2976_v38 }
 0x3a4   : > { %v2982_v40 = vshll.u32 %v12601_v6, %v2967_v60  ;;  %v2518_v29 = vsel %vm2435_vm1, %v2517_v17, %v2516_v51  ;;  %v2981_v19 = vor.u32 %v2980_v23, %v2979_v28  ;;  %v3001_v10 = vshll.u32 %v2961_v41, 8 }
 0x3a5   : > { %v2704_v33 = vshll.u32 %v9363_v12, 30  ;;  %v2827_v57 = vcvt.s32.f32 %v2820_v42  ;;  %vm2988_vm2 = vcmp.lt.s32.totalorder %v2966_v15, 4  ;;  %v2853_v31 = vshrl.u32 %v2852_v22, 23 }
 0x3a6   : > { %v2984_v36 = vor.u32 %v2983_v18, %v2982_v40  ;;  %v2969_v5 = vshrl.u32 %v12597_v24, %v2968_v30  ;;  %vm2985_vm10 = vcmp.lt.s32.totalorder %v2966_v15, 1  ;;  %v2990_v16 = vsel %vm2988_vm2, %v2978_v53, 2102212464 }
 0x3a7   : > { %v9370_v59 = vsub.s32 %v2701_v13, %v2704_v33  ;;  %v2828_v34 = vmul.f32 %v2827_v57, %v2825_v14  ;;  %vm2986_vm15 = vcmp.lt.s32.totalorder %v2966_v15, 2  ;;  %v2993_v60 = vsel %vm2985_vm10, %v2972_v55, %v2975_v26 }
 0x3a8   : > { %v12258_v51 = vand.u32 2147483647, %v9337_v2  ;;  %vm2987_vm8 = vcmp.lt.s32.totalorder %v2966_v15, 3  ;;  %v2989_v41 = vsel %vm2985_vm10, %v2969_v5, %v2972_v55  ;;  %v2994_v42 = vsel %vm2988_vm2, %v2981_v19, 920167782 }
 0x3a9   : > { %v2707_v17 = vsub.s32 0, %v9370_v59  ;;  %v2991_v54 = vsel %vm2987_vm8, %v2975_v26, %v2990_v16  ;;  %v2995_v22 = vsel %vm2987_vm8, %v2978_v53, %v2994_v42  ;;  %v2997_v33 = vsel %vm2985_vm10, %v2975_v26, %v2978_v53 }
 0x3aa   : > { %v2998_v13 = vsel %vm2988_vm2, %v2984_v36, 1326507024  ;;  %v2996_v38 = vsel %vm2986_vm15, %v2993_v60, %v2995_v22  ;;  %v6406_v62 = vadd.s32 4294967169, %v2853_v31  ;;  %v2829_v43 = vxor.u32 2147483648, %v2828_v34 }
 0x3ab   : > { %v6399_v30 = vmin.u32 %v2707_v17, %v9370_v59  ;;  %v2999_v57 = vsel %vm2987_vm8, %v2981_v19, %v2998_v13  ;;  %v9381_v18 = vmul.u32.u64.low %v3001_v10, %v2996_v38  ;;  %v9382_v14 = vmul.u32.u64.high %v3001_v10, %v2996_v38, %v9381_v18 }
 0x3ac   : > { %v3000_v23 = vsel %vm2986_vm15, %v2997_v33, %v2999_v57  ;;  %v2859_v26 = vadd.s32 1, %v6406_v62  ;;  %v12609_v36 = vand.u32 2147483647, %v9060_v63  ;;  %v2992_v19 = vsel %vm2986_vm15, %v2989_v41, %v2991_v54  ;;  %v9433_v62 = vpop.f32.mrb[12].mxu1 }
 0x3ad   : > { %v2709_v28 = vclz %v6399_v30  ;;  %v9385_v55 = vmul.u32.u64.low %v3001_v10, %v3000_v23  ;;  %v9386_v40 = vmul.u32.u64.high %v3001_v10, %v3000_v23, %v9385_v55  ;;  %v9397_v31 = vadd.f32 %v9079_v45, %v9054_v3 }
 0x3ae   : > { %vm9390_vm4 = vcmp.le.f32.partialorder %v12609_v36, 0.7853982  ;;  %v12613_v16 = vand.u32 2147483647, %v9069_v11  ;;  %vm2860_vm11 = vcmp.gt.s32.totalorder %v2859_v26, 0  ;;  %v3011_v41 = vadd.s32 1, %v9382_v14 }
 0x3af   : > { %12612 = vst [vmem:[#allocation12_spill] sm:$0xff] %v9397_v31  ;;  %v2522_v5 = vsel %vm9390_vm4, 0, %v9342_v35  ;;  %v6400_v17 = vadd.s32 4294967294, %v2709_v28  ;;  %v2521_v15 = vsel %vm9390_vm4, %v9060_v63, %v2518_v29  ;;  %v2861_v42 = vsel %vm2860_vm11, %v2859_v26, 0 }
 0x3b0   : > { %vm9404_vm0 = vcmp.le.f32.partialorder %v12613_v16, 0.7853982  ;;  %v2830_v35 = vsel %vm2747_vm3, %v2829_v43, %v2828_v34  ;;  %v3008_v54 = vmul.u32 %v3001_v10, %v2992_v19  ;;  %vm3010_vm14 = vc.u32 %v9386_v40, %v9381_v18 }
 0x3b1   : > { %v2834_v45 = vsel %vm9404_vm0, 0, %v9361_v20  ;;  %v2856_v22 = vand.u32 8388607, %v12258_v51  ;;  %vm6401_vm12 = vcmp.lt.s32.totalorder %v6400_v17, 0  ;;  %v3012_v29 = vsel %vm3010_vm14, %v3011_v41, %v9382_v14 }
 0x3b2   : > { %v2863_v33 = vand.u32 31, %v2861_v42  ;;  %v3164_v13 = vand.u32 2139095040, %v9397_v31  ;;  %7119 = vcosq.f32 %v2521_v15  ;;  %v9423_v20 = vadd.s32 3, %v2522_v5 }
 0x3b3   : > { %v9425_v30 = vadd.s32 3, %v2834_v45  ;;  %v3013_v38 = vadd.s32 %v3012_v29, %v3008_v54  ;;  %v9429_v10 = vadd.f32 %v9320_v0, %v8830_v58  ;;  %7121 = vsinq.f32 %v2521_v15 }
 0x3b4   : > { %v2697_v34 = vadd.s32 %v9314_v37, %v9303_v61  ;;  %v2864_v57 = vsub.s32 32, %v2863_v33  ;;  %v2833_v43 = vsel %vm9404_vm0, %v9069_v11, %v2830_v35  ;;  %v2712_v23 = vsel %vm6401_vm12, 0, %v6400_v17 }
 0x3b5   : > { %v2727_v14 = vsub.s32 4, %v9363_v12  ;;  %v3014_v28 = vadd.s32 536870912, %v3013_v38  ;;  %v2857_v55 = vor.u32 8388608, %v2856_v22  ;;  %v3165_v0 = vshrl.u32 %v3164_v13, 23 }
 0x3b6   : > { %v2867_v26 = vshrl.u32 %v12598_v21, %v2864_v57  ;;  %v2870_v58 = vshrl.u32 %v12599_v50, %v2864_v57  ;;  %v2866_v61 = vshll.u32 %v12597_v24, %v2863_v33  ;;  %v2873_v37 = vshrl.u32 %v12600_v49, %v2864_v57 }
 0x3b7   : > { %v9441_v36 = vshrl.u32 %v3014_v28, 30  ;;  %v2876_v53 = vshrl.u32 %v12601_v6, %v2864_v57  ;;  %v2713_v19 = vsub.s32 32, %v2712_v23  ;;  %v2717_v5 = vsub.s32 4294967266, %v2712_v23 }
 0x3b8   : > { %v2869_v16 = vshll.u32 %v12598_v21, %v2863_v33  ;;  %v2875_v60 = vshll.u32 %v12600_v49, %v2863_v33  ;;  %v2862_v15 = vshrl.u32 %v2861_v42, 5  ;;  %v2868_v45 = vor.u32 %v2867_v26, %v2866_v61 }
 0x3b9   : > { %v3016_v17 = vshll.u32 %v9441_v36, 30  ;;  %v2872_v41 = vshll.u32 %v12599_v50, %v2863_v33  ;;  %v2878_v22 = vshll.u32 %v12601_v6, %v2863_v33  ;;  %v2879_v29 = vshrl.u32 %v12602_v7, %v2864_v57 }
 0x3ba   : > { %v2871_v35 = vor.u32 %v2870_v58, %v2869_v16  ;;  %v2877_v54 = vor.u32 %v2876_v53, %v2875_v60  ;;  %7123 = vcosq.f32 %v2833_v43  ;;  %vm2643_vm6 = vcmp.lt.s32.totalorder %v9082_v48, 0 }
 0x3bb   : > { %v9453_v13 = vsub.s32 %v3013_v38, %v3016_v17  ;;  %v2874_v28 = vor.u32 %v2873_v37, %v2872_v41  ;;  %v9455_v51 = vshll.u32 %v2857_v55, 8  ;;  %v2715_v9 = vshrl.u32 %v2697_v34, %v2713_v19 }
 0x3bc   : > { %v2718_v47 = vadd.s32 127, %v2717_v5  ;;  %v2880_v42 = vor.u32 %v2879_v29, %v2878_v22  ;;  %v6418_v26 = vadd.s32 4294967169, %v3165_v0  ;;  %v9457_v61 = vpop.eup %7119  ;;  %v2865_v33 = vshrl.u32 %v12597_v24, %v2864_v57 }
 0x3bd   : > { %v3019_v58 = vsub.s32 0, %v9453_v13  ;;  %vm2881_vm5 = vcmp.lt.s32.totalorder %v2862_v15, 1  ;;  %vm2884_vm7 = vcmp.lt.s32.totalorder %v2862_v15, 4  ;;  %v9461_v53 = vpop.eup %7121  ;;  %vm2882_vm1 = vcmp.lt.s32.totalorder %v2862_v15, 2 }
 0x3be   : > { %vm2883_vm13 = vcmp.lt.s32.totalorder %v2862_v15, 3  ;;  %v2889_v38 = vsel %vm2881_vm5, %v2868_v45, %v2871_v35  ;;  %v2890_v55 = vsel %vm2884_vm7, %v2877_v54, 920167782  ;;  %v2886_v37 = vsel %vm2884_vm7, %v2874_v28, 2102212464 }
 0x3bf   : > { %v6411_v34 = vmin.u32 %v3019_v58, %v9453_v13  ;;  %v2891_v19 = vsel %vm2883_vm13, %v2874_v28, %v2890_v55  ;;  %v2893_v0 = vsel %vm2881_vm5, %v2871_v35, %v2874_v28  ;;  %v2714_v5 = vshll.u32 %v9370_v59, %v2712_v23 }
 0x3c0   : > { %v2719_v16 = vshll.u32 %v2718_v47, 23  ;;  %v2892_v57 = vsel %vm2882_vm1, %v2889_v38, %v2891_v19  ;;  %v2894_v60 = vsel %vm2884_vm7, %v2880_v42, 1326507024  ;;  %v2885_v41 = vsel %vm2881_vm5, %v2865_v33, %v2868_v45 }
 0x3c1   : > { %v3021_v17 = vclz %v6411_v34  ;;  %v2895_v22 = vsel %vm2883_vm13, %v2877_v54, %v2894_v60  ;;  %v3171_v29 = vadd.s32 1, %v6418_v26  ;;  %v2887_v1 = vsel %vm2883_vm13, %v2871_v35, %v2886_v37 }
 0x3c2   : > { %v2896_v46 = vsel %vm2882_vm1, %v2893_v0, %v2895_v22  ;;  %v9471_v58 = vmul.u32.u64.low %v9455_v51, %v2892_v57  ;;  %v9472_v44 = vmul.u32.u64.high %v9455_v51, %v2892_v57, %v9471_v58  ;;  %v2716_v28 = vor.u32 %v2715_v9, %v2714_v5 }
 0x3c3   : > { %v6412_v55 = vadd.s32 4294967294, %v3021_v17  ;;  %v9476_v47 = vmul.u32.u64.low %v9455_v51, %v2896_v46  ;;  %v9477_v59 = vmul.u32.u64.high %v9455_v51, %v2896_v46, %v9476_v47  ;;  %7125 = vsinq.f32 %v2833_v43 }
 0x3c4   : > { %v9482_v23 = vsel %vm2643_vm6, %v2727_v14, %v9363_v12  ;;  %v12264_v45 = vand.u32 2147483647, %v9397_v31  ;;  %vm3172_vm9 = vcmp.gt.s32.totalorder %v3171_v29, 0  ;;  %v9485_v35 = vpop.eup %7123  ;;  %v2720_v54 = vor.u32 4788187, %v2719_v16  ;;  %v9494_v14 = vpop.f32.mrb[13].mxu1 }
 0x3c5   : > { %12616 = vst [vmem:[#allocation28_spill] sm:$0xff] %v9485_v35  ;;  %vm6413_vm3 = vcmp.lt.s32.totalorder %v6412_v55, 0  ;;  %v2888_v9 = vsel %vm2882_vm1, %v2885_v41, %v2887_v1  ;;  %v3173_v42 = vsel %vm3172_vm9, %v3171_v29, 0  ;;  %vm2955_vm2 = vcmp.lt.s32.totalorder %v9244_v25, 0 }
 0x3c6   : > { %v3024_v46 = vsel %vm6413_vm3, 0, %v6412_v55  ;;  %v2907_v43 = vadd.s32 1, %v9472_v44  ;;  %v3175_v26 = vand.u32 31, %v3173_v42  ;;  %v9492_v12 = vadd.f32 %v9054_v3, %v9084_v39 }
 0x3c7   : > { %v2723_v33 = vcvt.s32.f32 %v2716_v28  ;;  %v3009_v38 = vadd.s32 %v9381_v18, %v9386_v40  ;;  %v3029_v34 = vsub.s32 4294967266, %v3024_v46  ;;  %v9500_v1 = vadd.f32 %v9127_v4, %v9054_v3 }
 0x3c8   : > { %12617 = vst [vmem:[#allocation10_spill] sm:$0xff] %v9492_v12  ;;  %v3039_v15 = vsub.s32 4, %v9441_v36  ;;  %v2904_v37 = vmul.u32 %v9455_v51, %v2888_v9  ;;  %vm2906_vm10 = vc.u32 %v9477_v59, %v9471_v58  ;;  %v3176_v39 = vsub.s32 32, %v3175_v26 }
 0x3c9   : > { %12618 = vst [vmem:[#allocation35_spill] sm:$0xff] %v9500_v1  ;;  %v2721_v19 = vand.u32 2147483647, %v2720_v54  ;;  %v3030_v0 = vadd.s32 127, %v3029_v34  ;;  %v2908_v5 = vsel %vm2906_vm10, %v2907_v43, %v9472_v44  ;;  %v3168_v18 = vand.u32 8388607, %v12264_v45 }
 0x3ca   : > { %v3025_v40 = vsub.s32 32, %v3024_v46  ;;  %v2909_v16 = vadd.s32 %v2908_v5, %v2904_v37  ;;  %v3179_v3 = vshrl.u32 %v12598_v21, %v3176_v39  ;;  %v3182_v4 = vshrl.u32 %v12599_v50, %v3176_v39 }
 0x3cb   : > { %v3178_v57 = vshll.u32 %v12597_v24, %v3175_v26  ;;  %v3181_v51 = vshll.u32 %v12598_v21, %v3175_v26  ;;  %v3184_v60 = vshll.u32 %v12599_v50, %v3175_v26  ;;  %v3185_v17 = vshrl.u32 %v12600_v49, %v3176_v39 }
 0x3cc   : > { %v2910_v41 = vadd.s32 536870912, %v2909_v16  ;;  %v9515_v22 = vshrl.u32 %v3173_v42, 5  ;;  %v3187_v44 = vshll.u32 %v12600_v49, %v3175_v26  ;;  %v3188_v29 = vshrl.u32 %v12601_v6, %v3176_v39 }
 0x3cd   : > { %v3031_v28 = vshll.u32 %v3030_v0, 23  ;;  %v3180_v55 = vor.u32 %v3179_v3, %v3178_v57  ;;  %v3183_v47 = vor.u32 %v3182_v4, %v3181_v51  ;;  %v3186_v54 = vor.u32 %v3185_v17, %v3184_v60  ;;  %v9519_v9 = vpop.eup %7125 }
 0x3ce   : > { %v2911_v43 = vshrl.u32 %v2910_v41, 30  ;;  %v3189_v34 = vor.u32 %v3188_v29, %v3187_v44  ;;  %v3190_v37 = vshll.u32 %v12601_v6, %v3175_v26  ;;  %v3191_v5 = vshrl.u32 %v12602_v7, %v3176_v39 }
 0x3cf   : > { %v2724_v45 = vmul.f32 %v2723_v33, %v2721_v19  ;;  %v3027_v11 = vshrl.u32 %v3009_v38, %v3025_v40  ;;  %v3040_v42 = vsel %vm2955_vm2, %v3039_v15, %v9441_v36  ;;  %v3169_v27 = vor.u32 8388608, %v3168_v18 }
 0x3d0   : > { %v12619_v0 = vand.u32 2147483647, %v9082_v48  ;;  %v12622_v4 = vand.u32 2147483647, %v9244_v25  ;;  %v3026_v26 = vshll.u32 %v9453_v13, %v3024_v46  ;;  %v2912_v33 = vshll.u32 %v2911_v43, 30 }
 0x3d1   : > { %v3192_v38 = vor.u32 %v3191_v5, %v3190_v37  ;;  %vm3196_vm4 = vcmp.lt.s32.totalorder %v9515_v22, 4  ;;  %v3032_v36 = vor.u32 4788187, %v3031_v28  ;;  %vm3193_vm0 = vcmp.lt.s32.totalorder %v9515_v22, 1 }
 0x3d2   : > { %vm9528_vm15 = vcmp.le.f32.partialorder %v12619_v0, 0.7853982  ;;  %vm9534_vm8 = vcmp.le.f32.partialorder %v12622_v4, 0.7853982  ;;  %vm3195_vm11 = vcmp.lt.s32.totalorder %v9515_v22, 3  ;;  %vm2851_vm14 = vcmp.lt.s32.totalorder %v9337_v2, 0 }
 0x3d3   : > { %v3202_v15 = vsel %vm3196_vm4, %v3189_v34, 920167782  ;;  %v9545_v19 = vsub.s32 %v2909_v16, %v2912_v33  ;;  %v3201_v18 = vsel %vm3193_vm0, %v3180_v55, %v3183_v47  ;;  %v3060_v46 = vand.u32 2139095040, %v9492_v12 }
 0x3d4   : > { %v3203_v13 = vsel %vm3195_vm11, %v3186_v54, %v3202_v15  ;;  %v2725_v40 = vxor.u32 2147483648, %v2724_v45  ;;  %v3028_v51 = vor.u32 %v3027_v11, %v3026_v26  ;;  %v3177_v60 = vshrl.u32 %v12597_v24, %v3176_v39 }
 0x3d5   : > { %vm3194_vm12 = vcmp.lt.s32.totalorder %v9515_v22, 2  ;;  %v2915_v17 = vsub.s32 0, %v9545_v19  ;;  %v3198_v16 = vsel %vm3196_vm4, %v3186_v54, 2102212464  ;;  %v3205_v41 = vsel %vm3193_vm0, %v3183_v47, %v3186_v54 }
 0x3d6   : > { %v3206_v44 = vsel %vm3196_vm4, %v3192_v38, 1326507024  ;;  %v3033_v29 = vand.u32 2147483647, %v3032_v36  ;;  %v12625_v28 = vand.u32 2147483647, %v9337_v2  ;;  %v3204_v39 = vsel %vm3194_vm12, %v3201_v18, %v3203_v13 }
 0x3d7   : > { %v3207_v37 = vsel %vm3195_vm11, %v3189_v34, %v3206_v44  ;;  %v3209_v5 = vshll.u32 %v3169_v27, 8  ;;  %v6407_v0 = vmin.u32 %v2915_v17, %v9545_v19  ;;  %v2935_v54 = vsub.s32 4, %v2911_v43 }
 0x3d8   : > { %vm9563_vm5 = vcmp.le.f32.partialorder %v12625_v28, 0.7853982  ;;  %v3208_v4 = vsel %vm3194_vm12, %v3205_v41, %v3207_v37  ;;  %v3061_v26 = vshrl.u32 %v3060_v46, 23  ;;  %v3197_v33 = vsel %vm3193_vm0, %v3177_v60, %v3180_v55 }
 0x3d9   : > { %v3199_v38 = vsel %vm3195_vm11, %v3183_v47, %v3198_v16  ;;  %v9578_v36 = vmul.u32.u64.low %v3209_v5, %v3208_v4  ;;  %v9579_v15 = vmul.u32.u64.high %v3209_v5, %v3208_v4, %v9578_v36  ;;  %v3035_v18 = vcvt.s32.f32 %v3028_v51 }
 0x3da   : > { %v2917_v13 = vclz %v6407_v0  ;;  %v9581_v34 = vmul.u32.u64.low %v3209_v5, %v3204_v39  ;;  %v9582_v27 = vmul.u32.u64.high %v3209_v5, %v3204_v39, %v9581_v34  ;;  %v2726_v17 = vsel %vm2643_vm6, %v2725_v40, %v2724_v45 }
 0x3db   : > { %v2730_v46 = vsel %vm9528_vm15, 0, %v9482_v23  ;;  %v3042_v55 = vsel %vm9534_vm8, 0, %v3040_v42  ;;  %v6414_v47 = vadd.s32 4294967169, %v3061_v26  ;;  %v3036_v60 = vmul.f32 %v3035_v18, %v3033_v29 }
 0x3dc   : > { %v6408_v16 = vadd.s32 4294967294, %v2917_v13  ;;  %v3200_v51 = vsel %vm3194_vm12, %v3197_v33, %v3199_v38  ;;  %v12268_v41 = vand.u32 2147483647, %v9492_v12  ;;  %v2936_v44 = vsel %vm2851_vm14, %v2935_v54, %v2911_v43 }
 0x3dd   : > { %vm3218_vm6 = vc.u32 %v9579_v15, %v9581_v34  ;;  %v3067_v45 = vadd.s32 1, %v6414_v47  ;;  %v3372_v23 = vand.u32 2139095040, %v9500_v1  ;;  %v9600_v40 = vadd.s32 3, %v2730_v46 }
 0x3de   : > { %v9602_v42 = vadd.s32 3, %v3042_v55  ;;  %vm6409_vm7 = vcmp.lt.s32.totalorder %v6408_v16, 0  ;;  %v3219_v29 = vadd.s32 1, %v9582_v27  ;;  %v2729_v22 = vsel %vm9528_vm15, %v9082_v48, %v2726_v17 }
 0x3df   : > { %v2920_v28 = vsel %vm6409_vm7, 0, %v6408_v16  ;;  %v3216_v39 = vmul.u32 %v3209_v5, %v3200_v51  ;;  %vm3068_vm1 = vcmp.gt.s32.totalorder %v3067_v45, 0  ;;  %v3037_v43 = vxor.u32 2147483648, %v3036_v60  ;;  %v9620_v16 = vpop.f32.mrb[14].mxu1 }
 0x3e0   : > { %12628 = vst [vmem:[#allocation32_spill] sm:$0xff] %v9602_v42  ;;  %v2925_v37 = vsub.s32 4294967266, %v2920_v28  ;;  %v2938_v0 = vsel %vm9563_vm5, 0, %v2936_v44  ;;  %v3220_v54 = vsel %vm3218_vm6, %v3219_v29, %v9582_v27  ;;  %v3064_v26 = vand.u32 8388607, %v12268_v41 }
 0x3e1   : > { %v3221_v4 = vadd.s32 %v3220_v54, %v3216_v39  ;;  %v3069_v33 = vsel %vm3068_vm1, %v3067_v45, 0  ;;  %v3373_v38 = vshrl.u32 %v3372_v23, 23  ;;  %7127 = vcosq.f32 %v2729_v22 }
 0x3e2   : > { %v2921_v36 = vsub.s32 32, %v2920_v28  ;;  %v2926_v3 = vadd.s32 127, %v2925_v37  ;;  %v3071_v18 = vand.u32 31, %v3069_v33  ;;  %7129 = vsinq.f32 %v2729_v22 }
 0x3e3   : > { %v2905_v5 = vadd.s32 %v9471_v58, %v9477_v59  ;;  %v9615_v13 = vadd.s32 3, %v2938_v0  ;;  %v3222_v17 = vadd.s32 536870912, %v3221_v4  ;;  %v3038_v27 = vsel %vm2955_vm2, %v3037_v43, %v3036_v60 }
 0x3e4   : > { %v2927_v46 = vshll.u32 %v2926_v3, 23  ;;  %v3072_v55 = vsub.s32 32, %v3071_v18  ;;  %v2922_v51 = vshll.u32 %v9545_v19, %v2920_v28  ;;  %v3065_v45 = vor.u32 8388608, %v3064_v26 }
 0x3e5   : > { %12629 = vst [vmem:[#allocation38_spill] sm:$0xff] %v9615_v13  ;;  %v9623_v44 = vshrl.u32 %v3222_v17, 30  ;;  %v6426_v23 = vadd.s32 4294967169, %v3373_v38  ;;  %v2923_v29 = vshrl.u32 %v2905_v5, %v2921_v36  ;;  %v3074_v58 = vshll.u32 %v12597_v24, %v3071_v18 }
 0x3e6   : > { %v3075_v59 = vshrl.u32 %v12598_v21, %v3072_v55  ;;  %v3077_v22 = vshll.u32 %v12598_v21, %v3071_v18  ;;  %v3078_v39 = vshrl.u32 %v12599_v50, %v3072_v55  ;;  %v3080_v43 = vshll.u32 %v12599_v50, %v3071_v18 }
 0x3e7   : > { %v3224_v60 = vshll.u32 %v9623_v44, 30  ;;  %v3081_v37 = vshrl.u32 %v12600_v49, %v3072_v55  ;;  %v2928_v19 = vor.u32 4788187, %v2927_v46  ;;  %v3070_v28 = vshrl.u32 %v3069_v33, 5 }
 0x3e8   : > { %v3083_v0 = vshll.u32 %v12600_v49, %v3071_v18  ;;  %v3084_v54 = vshrl.u32 %v12601_v6, %v3072_v55  ;;  %v3076_v38 = vor.u32 %v3075_v59, %v3074_v58  ;;  %v3079_v36 = vor.u32 %v3078_v39, %v3077_v22 }
 0x3e9   : > { %v9634_v26 = vsub.s32 %v3221_v4, %v3224_v60  ;;  %v3082_v3 = vor.u32 %v3081_v37, %v3080_v43  ;;  %v2924_v5 = vor.u32 %v2923_v29, %v2922_v51  ;;  %v3086_v41 = vshll.u32 %v12601_v6, %v3071_v18 }
 0x3ea   : > { %v3085_v17 = vor.u32 %v3084_v54, %v3083_v0  ;;  %v3087_v47 = vshrl.u32 %v12602_v7, %v3072_v55  ;;  %v9641_v46 = vsel %vm9534_vm8, %v9244_v25, %v3038_v27  ;;  %v3105_v42 = vshll.u32 %v3065_v45, 8 }
 0x3eb   : > { %v3227_v33 = vsub.s32 0, %v9634_v26  ;;  %v12630_v4 = vand.u32 2147483647, %v9500_v1  ;;  %v9648_v58 = vpop.eup %7127  ;;  %vm3089_vm13 = vcmp.lt.s32.totalorder %v3070_v28, 1  ;;  %vm3092_vm9 = vcmp.lt.s32.totalorder %v3070_v28, 4 }
 0x3ec   : > { %v3088_v51 = vor.u32 %v3087_v47, %v3086_v41  ;;  %v3379_v18 = vadd.s32 1, %v6426_v23  ;;  %v9650_v29 = vpop.eup %7129  ;;  %v2929_v59 = vand.u32 2147483647, %v2928_v19  ;;  %v3094_v27 = vsel %vm3092_vm9, %v3082_v3, 2102212464 }
 0x3ed   : > { %v9646_v60 = vand.u32 8388607, %v12630_v4  ;;  %v6419_v57 = vmin.u32 %v3227_v33, %v9634_v26  ;;  %v3097_v22 = vsel %vm3089_vm13, %v3076_v38, %v3079_v36  ;;  %v2931_v45 = vcvt.s32.f32 %v2924_v5 }
 0x3ee   : > { %v3073_v39 = vshrl.u32 %v12597_v24, %v3072_v55  ;;  %vm3091_vm3 = vcmp.lt.s32.totalorder %v3070_v28, 3  ;;  %v3098_v43 = vsel %vm3092_vm9, %v3085_v17, 920167782  ;;  %vm3090_vm2 = vcmp.lt.s32.totalorder %v3070_v28, 2  ;;  %v9670_v28 = vld [vmem:[%s12123_s4] ss:$0 sm:$0xff] }
 0x3ef   : > { %v3229_v37 = vclz %v6419_v57  ;;  %v3099_v41 = vsel %vm3091_vm3, %v3082_v3, %v3098_v43  ;;  %v3101_v47 = vsel %vm3089_vm13, %v3079_v36, %v3082_v3  ;;  %v3095_v19 = vsel %vm3091_vm3, %v3079_v36, %v3094_v27 }
 0x3f0   : > { %v3093_v23 = vsel %vm3089_vm13, %v3073_v39, %v3076_v38  ;;  %v3100_v0 = vsel %vm3090_vm2, %v3097_v22, %v3099_v41  ;;  %v3102_v54 = vsel %vm3092_vm9, %v3088_v51, 1326507024  ;;  %v2932_v33 = vmul.f32 %v2931_v45, %v2929_v59 }
 0x3f1   : > { %v6420_v4 = vadd.s32 4294967294, %v3229_v37  ;;  %v3103_v25 = vsel %vm3091_vm3, %v3085_v17, %v3102_v54  ;;  %vm3380_vm10 = vcmp.gt.s32.totalorder %v3379_v18, 0  ;;  %v3096_v43 = vsel %vm3090_vm2, %v3093_v23, %v3095_v19  ;;  %v9684_v37 = vpop.f32.mrb[15].mxu1 }
 0x3f2   : > { %v3104_v5 = vsel %vm3090_vm2, %v3101_v47, %v3103_v25  ;;  %v9660_v55 = vmul.u32.u64.low %v3105_v42, %v3100_v0  ;;  %v9661_v13 = vmul.u32.u64.high %v3105_v42, %v3100_v0, %v9660_v55  ;;  %v3381_v57 = vsel %vm3380_vm10, %v3379_v18, 0 }
 0x3f3   : > { %vm6421_vm15 = vcmp.lt.s32.totalorder %v6420_v4, 0  ;;  %v9664_v35 = vmul.u32.u64.low %v3105_v42, %v3104_v5  ;;  %v9665_v3 = vmul.u32.u64.high %v3105_v42, %v3104_v5, %v9664_v35  ;;  %v3383_v36 = vand.u32 31, %v3381_v57 }
 0x3f4   : > { %v3232_v38 = vsel %vm6421_vm15, 0, %v6420_v4  ;;  %v9674_v25 = vadd.f32 %v9670_v28, %v9174_v52  ;;  %v9678_v17 = vadd.f32 %v9670_v28, %v9261_v56  ;;  %v3217_v51 = vadd.s32 %v9581_v34, %v9579_v15 }
 0x3f5   : > { %v3233_v18 = vsub.s32 32, %v3232_v38  ;;  %v3237_v35 = vsub.s32 4294967266, %v3232_v38  ;;  %v3377_v59 = vor.u32 8388608, %v9646_v60  ;;  %v2933_v27 = vxor.u32 2147483648, %v2932_v33 }
 0x3f6   : > { %12631 = vst [vmem:[#allocation37_spill] sm:$0xff] %v9674_v25  ;;  %12632 = vst [vmem:[#allocation30_spill] sm:$0xff] %v9678_v17  ;;  %v3112_v22 = vmul.u32 %v3105_v42, %v3096_v43  ;;  %v3115_v45 = vadd.s32 1, %v9661_v13  ;;  %v3384_v39 = vsub.s32 32, %v3383_v36  ;;  %v3234_v52 = vshll.u32 %v9634_v26, %v3232_v38 }
 0x3f7   : > { %v3235_v41 = vshrl.u32 %v3217_v51, %v3233_v18  ;;  %v3238_v47 = vadd.s32 127, %v3237_v35  ;;  %vm3114_vm8 = vc.u32 %v9665_v3, %v9660_v55  ;;  %v3386_v15 = vshll.u32 %v12597_v24, %v3383_v36 }
 0x3f8   : > { %v3116_v56 = vsel %vm3114_vm8, %v3115_v45, %v9661_v13  ;;  %v3387_v34 = vshrl.u32 %v12598_v21, %v3384_v39  ;;  %v3390_v42 = vshrl.u32 %v12599_v50, %v3384_v39  ;;  %vm3163_vm4 = vcmp.lt.s32.totalorder %v9397_v31, 0 }
 0x3f9   : > { %v3239_v60 = vshll.u32 %v3238_v47, 23  ;;  %v3117_v23 = vadd.s32 %v3116_v56, %v3112_v22  ;;  %v3382_v19 = vshrl.u32 %v3381_v57, 5  ;;  %v3389_v26 = vshll.u32 %v12598_v21, %v3383_v36 }
 0x3fa   : > { %v3236_v0 = vor.u32 %v3235_v41, %v3234_v52  ;;  %v3388_v54 = vor.u32 %v3387_v34, %v3386_v15  ;;  %v3392_v4 = vshll.u32 %v12599_v50, %v3383_v36  ;;  %v3393_v5 = vshrl.u32 %v12600_v49, %v3384_v39 }
 0x3fb   : > { %v3240_v13 = vor.u32 4788187, %v3239_v60  ;;  %v3118_v43 = vadd.s32 536870912, %v3117_v23  ;;  %v3395_v38 = vshll.u32 %v12600_v49, %v3383_v36  ;;  %v3396_v51 = vshrl.u32 %v12601_v6, %v3384_v39 }
 0x3fc   : > { %v3391_v18 = vor.u32 %v3390_v42, %v3389_v26  ;;  %v3394_v35 = vor.u32 %v3393_v5, %v3392_v4  ;;  %v3398_v45 = vshll.u32 %v12601_v6, %v3383_v36  ;;  %v3399_v57 = vshrl.u32 %v12602_v7, %v3384_v39 }
 0x3fd   : > { %v3241_v22 = vand.u32 2147483647, %v3240_v13  ;;  %v9701_v47 = vshrl.u32 %v3118_v43, 30  ;;  %v3397_v52 = vor.u32 %v3396_v51, %v3395_v38  ;;  %v3417_v41 = vshll.u32 %v3377_v59, 8 }
 0x3fe   : > { %v2934_v56 = vsel %vm2851_vm14, %v2933_v27, %v2932_v33  ;;  %v12633_v15 = vand.u32 2147483647, %v9397_v31  ;;  %v3247_v42 = vsub.s32 4, %v9623_v44  ;;  %v3400_v60 = vor.u32 %v3399_v57, %v3398_v45 }
 0x3ff   : > { %vm3401_vm11 = vcmp.lt.s32.totalorder %v3382_v19, 1  ;;  %v3243_v36 = vcvt.s32.f32 %v3236_v0  ;;  %v3120_v26 = vshll.u32 %v9701_v47, 30  ;;  %v3385_v4 = vshrl.u32 %v12597_v24, %v3384_v39 }
 0x400   : > { %vm9707_vm0 = vcmp.le.f32.partialorder %v12633_v15, 0.7853982  ;;  %vm3404_vm12 = vcmp.lt.s32.totalorder %v3382_v19, 4  ;;  %v3409_v5 = vsel %vm3401_vm11, %v3388_v54, %v3391_v18  ;;  %vm3403_vm14 = vcmp.lt.s32.totalorder %v3382_v19, 3 }
 0x401   : > { %v3406_v59 = vsel %vm3404_vm12, %v3394_v35, 2102212464  ;;  %v3410_v33 = vsel %vm3404_vm12, %v3397_v52, 920167782  ;;  %v3414_v27 = vsel %vm3404_vm12, %v3400_v60, 1326507024  ;;  %v3244_v13 = vmul.f32 %v3243_v36, %v3241_v22 }
 0x402   : > { %v9715_v43 = vsub.s32 %v3117_v23, %v3120_v26  ;;  %v3413_v38 = vsel %vm3401_vm11, %v3391_v18, %v3394_v35  ;;  %v3248_v0 = vsel %vm3163_vm4, %v3247_v42, %v9623_v44  ;;  %vm3402_vm6 = vcmp.lt.s32.totalorder %v3382_v19, 2 }
 0x403   : > { %v3411_v51 = vsel %vm3403_vm14, %v3394_v35, %v3410_v33  ;;  %v3415_v45 = vsel %vm3403_vm14, %v3397_v52, %v3414_v27  ;;  %vm3059_vm7 = vcmp.lt.s32.totalorder %v9492_v12, 0  ;;  %v3405_v57 = vsel %vm3401_vm11, %v3385_v4, %v3388_v54 }
 0x404   : > { %v3123_v39 = vsub.s32 0, %v9715_v43  ;;  %v3407_v15 = vsel %vm3403_vm14, %v3391_v18, %v3406_v59  ;;  %v3412_v22 = vsel %vm3402_vm6, %v3409_v5, %v3411_v51  ;;  %v2937_v23 = vsel %vm9563_vm5, %v9337_v2, %v2934_v56 }
 0x405   : > { %v3416_v60 = vsel %vm3402_vm6, %v3413_v38, %v3415_v45  ;;  %v9727_v36 = vmul.u32.u64.low %v3417_v41, %v3412_v22  ;;  %v9728_v26 = vmul.u32.u64.high %v3417_v41, %v3412_v22, %v9727_v36  ;;  %v3245_v44 = vxor.u32 2147483648, %v3244_v13 }
 0x406   : > { %v6415_v35 = vmin.u32 %v3123_v39, %v9715_v43  ;;  %v9731_v52 = vmul.u32.u64.low %v3417_v41, %v3416_v60  ;;  %v9732_v42 = vmul.u32.u64.high %v3417_v41, %v3416_v60, %v9731_v52  ;;  %7131 = vcosq.f32 %v9641_v46 }
 0x407   : > { %v3408_v19 = vsel %vm3402_vm6, %v3405_v57, %v3407_v15  ;;  %v12272_v54 = vand.u32 2147483647, %v9674_v25  ;;  %v3268_v18 = vand.u32 2139095040, %v9674_v25  ;;  %7133 = vsinq.f32 %v9641_v46 }
 0x408   : > { %v3250_v11 = vsel %vm9707_vm0, 0, %v3248_v0  ;;  %v12636_v56 = vand.u32 2147483647, %v9492_v12  ;;  %v3125_v59 = vclz %v6415_v35  ;;  %v3580_v5 = vand.u32 2139095040, %v9678_v17 }
 0x409   : > { %7135 = vcosq.f32 %v2937_v23  ;;  %v3143_v33 = vsub.s32 4, %v9701_v47  ;;  %v3427_v27 = vadd.s32 1, %v9728_v26  ;;  %v3269_v38 = vshrl.u32 %v3268_v18, 23 }
 0x40a   : > { %vm9742_vm5 = vcmp.le.f32.partialorder %v12636_v56, 0.7853982  ;;  %v3246_v46 = vsel %vm3163_vm4, %v3245_v44, %v3244_v13  ;;  %v6416_v51 = vadd.s32 4294967294, %v3125_v59  ;;  %v3424_v0 = vmul.u32 %v3417_v41, %v3408_v19 }
 0x40b   : > { %vm3426_vm1 = vc.u32 %v9732_v42, %v9727_v36  ;;  %v6422_v39 = vadd.s32 4294967169, %v3269_v38  ;;  %v3272_v57 = vand.u32 8388607, %v12272_v54  ;;  %v3581_v15 = vshrl.u32 %v3580_v5, 23 }
 0x40c   : > { %v3428_v45 = vsel %vm3426_vm1, %v3427_v27, %v9728_v26  ;;  %7137 = vsinq.f32 %v2937_v23  ;;  %v9755_v22 = vadd.s32 3, %v3250_v11  ;;  %vm6417_vm13 = vcmp.lt.s32.totalorder %v6416_v51, 0 }
 0x40d   : > { %v3429_v60 = vadd.s32 %v3428_v45, %v3424_v0  ;;  %v3113_v35 = vadd.s32 %v9660_v55, %v9665_v3  ;;  %v3128_v13 = vsel %vm6417_vm13, 0, %v6416_v51  ;;  %v9762_v41 = vsel %vm3059_vm7, %v3143_v33, %v9701_v47 }
 0x40e   : > { %12639 = vst [vmem:[#allocation34_spill] sm:$0xff] %v9755_v22  ;;  %v3275_v26 = vadd.s32 1, %v6422_v39  ;;  %v9767_v44 = vsel %vm9707_vm0, %v9397_v31, %v3246_v46  ;;  %v3129_v23 = vsub.s32 32, %v3128_v13  ;;  %v3133_v52 = vsub.s32 4294967266, %v3128_v13 }
 0x40f   : > { %v3430_v19 = vadd.s32 536870912, %v3429_v60  ;;  %v3130_v18 = vshll.u32 %v9715_v43, %v3128_v13  ;;  %v3273_v11 = vor.u32 8388608, %v3272_v57  ;;  %v6434_v55 = vadd.s32 4294967169, %v3581_v15 }
 0x410   : > { %vm3276_vm9 = vcmp.gt.s32.totalorder %v3275_v26, 0  ;;  %v3131_v3 = vshrl.u32 %v3113_v35, %v3129_v23  ;;  %v3134_v56 = vadd.s32 127, %v3133_v52  ;;  %v9772_v5 = vpop.eup %7131  ;;  %7139 = vcosq.f32 %v9767_v44 }
 0x411   : > { %v9770_v59 = vshrl.u32 %v3430_v19, 30  ;;  %v3277_v47 = vsel %vm3276_vm9, %v3275_v26, 0  ;;  %12640 = vst [vmem:[#allocation31_spill] sm:$0xff] %v9772_v5  ;;  %v12276_v27 = vand.u32 2147483647, %v9678_v17  ;;  %v9779_v43 = vpop.eup %7133  ;;  %v9784_v0 = vadd.f32 %v9670_v28, %v9332_v32 }
 0x412   : > { %v3279_v33 = vand.u32 31, %v3277_v47  ;;  %12641 = vst [vmem:[#allocation29_spill] sm:$0xff] %v9779_v43  ;;  %v3132_v38 = vor.u32 %v3131_v3, %v3130_v18  ;;  %v3135_v46 = vshll.u32 %v3134_v56, 23  ;;  %v9789_v39 = vadd.s32 %v9727_v36, %v9732_v42 }
 0x413   : > { %v3432_v51 = vshll.u32 %v9770_v59, 30  ;;  %12642 = vst [vmem:[#allocation41_spill] sm:$0xff] %v9784_v0  ;;  %v9786_v45 = vpop.eup %7135  ;;  %v9791_v15 = vshll.u32 %v3273_v11, 8  ;;  %v3587_v35 = vadd.s32 1, %v6434_v55  ;;  %v9795_v23 = vshrl.u32 %v3277_v47, 5 }
 0x414   : > { %12643 = vst [vmem:[#allocation40_spill] sm:$0xff] %v9786_v45  ;;  %v3280_v57 = vsub.s32 32, %v3279_v33  ;;  %v3136_v13 = vor.u32 4788187, %v3135_v46  ;;  %v3282_v52 = vshll.u32 %v12597_v24, %v3279_v33  ;;  %vm3371_vm3 = vcmp.lt.s32.totalorder %v9500_v1, 0 }
 0x415   : > { %v9793_v26 = vsub.s32 %v3429_v60, %v3432_v51  ;;  %v3285_v19 = vshll.u32 %v12598_v21, %v3279_v33  ;;  %v3288_v42 = vshll.u32 %v12599_v50, %v3279_v33  ;;  %v3139_v55 = vcvt.s32.f32 %v3132_v38 }
 0x416   : > { %v3283_v32 = vshrl.u32 %v12598_v21, %v3280_v57  ;;  %v3286_v36 = vshrl.u32 %v12599_v50, %v3280_v57  ;;  %v9803_v18 = vpop.eup %7137  ;;  %v3137_v11 = vand.u32 2147483647, %v3136_v13  ;;  %v3289_v3 = vshrl.u32 %v12600_v49, %v3280_v57 }
 0x417   : > { %v3435_v60 = vsub.s32 0, %v9793_v26  ;;  %v3291_v46 = vshll.u32 %v12600_v49, %v3279_v33  ;;  %v3292_v51 = vshrl.u32 %v12601_v6, %v3280_v57  ;;  %v9812_v31 = vand.u32 8388607, %v12276_v27 }
 0x418   : > { %v3284_v56 = vor.u32 %v3283_v32, %v3282_v52  ;;  %v3287_v47 = vor.u32 %v3286_v36, %v3285_v19  ;;  %v3140_v54 = vmul.f32 %v3139_v55, %v3137_v11  ;;  %vm3588_vm2 = vcmp.gt.s32.totalorder %v3587_v35, 0 }
 0x419   : > { %v6427_v34 = vmin.u32 %v3435_v60, %v9793_v26  ;;  %v3290_v13 = vor.u32 %v3289_v3, %v3288_v42  ;;  %v3293_v38 = vor.u32 %v3292_v51, %v3291_v46  ;;  %v3294_v22 = vshll.u32 %v12601_v6, %v3279_v33 }
 0x41a   : > { %v3295_v5 = vshrl.u32 %v12602_v7, %v3280_v57  ;;  %v3455_v32 = vsub.s32 4, %v9770_v59  ;;  %vm3297_vm10 = vcmp.lt.s32.totalorder %v9795_v23, 1  ;;  %v3476_v19 = vand.u32 2139095040, %v9784_v0  ;;  %v9819_v36 = vpop.eup %7139 }
 0x41b   : > { %v3437_v52 = vclz %v6427_v34  ;;  %12644 = vst [vmem:[#allocation39_spill] sm:$0xff] %v9819_v36  ;;  %v3141_v11 = vxor.u32 2147483648, %v3140_v54  ;;  %v12645_v55 = vand.u32 2147483647, %v9500_v1  ;;  %vm3300_vm8 = vcmp.lt.s32.totalorder %v9795_v23, 4 }
 0x41c   : > { %v3296_v42 = vor.u32 %v3295_v5, %v3294_v22  ;;  %v3305_v34 = vsel %vm3297_vm10, %v3284_v56, %v3287_v47  ;;  %v3281_v3 = vshrl.u32 %v12597_v24, %v3280_v57  ;;  %vm3299_vm4 = vcmp.lt.s32.totalorder %v9795_v23, 3 }
 0x41d   : > { %vm9823_vm15 = vcmp.le.f32.partialorder %v12645_v55, 0.7853982  ;;  %v6428_v33 = vadd.s32 4294967294, %v3437_v52  ;;  %v3306_v46 = vsel %vm3300_vm8, %v3293_v38, 920167782  ;;  %vm3298_vm0 = vcmp.lt.s32.totalorder %v9795_v23, 2 }
 0x41e   : > { %v3302_v51 = vsel %vm3300_vm8, %v3290_v13, 2102212464  ;;  %v3307_v55 = vsel %vm3299_vm4, %v3290_v13, %v3306_v46  ;;  %v3309_v22 = vsel %vm3297_vm10, %v3287_v47, %v3290_v13  ;;  %v3456_v5 = vsel %vm3371_vm3, %v3455_v32, %v9770_v59 }
 0x41f   : > { %vm6429_vm11 = vcmp.lt.s32.totalorder %v6428_v33, 0  ;;  %v3308_v57 = vsel %vm3298_vm0, %v3305_v34, %v3307_v55  ;;  %v3310_v52 = vsel %vm3300_vm8, %v3296_v42, 1326507024  ;;  %v3142_v27 = vsel %vm3059_vm7, %v3141_v11, %v3140_v54 }
 0x420   : > { %v3440_v36 = vsel %vm6429_vm11, 0, %v6428_v33  ;;  %v3301_v43 = vsel %vm3297_vm10, %v3281_v3, %v3284_v56  ;;  %v3311_v46 = vsel %vm3299_vm4, %v3293_v38, %v3310_v52  ;;  %v3303_v2 = vsel %vm3299_vm4, %v3287_v47, %v3302_v51 }
 0x421   : > { %v3441_v13 = vsub.s32 32, %v3440_v36  ;;  %v3445_v45 = vsub.s32 4294967266, %v3440_v36  ;;  %v3312_v59 = vsel %vm3298_vm0, %v3309_v22, %v3311_v46  ;;  %v3442_v56 = vshll.u32 %v9793_v26, %v3440_v36 }
 0x422   : > { %v9853_v32 = vmul.u32.u64.low %v9791_v15, %v3312_v59  ;;  %v9854_v42 = vmul.u32.u64.high %v9791_v15, %v3312_v59, %v9853_v32  ;;  %v9857_v54 = vmul.u32.u64.low %v9791_v15, %v3308_v57  ;;  %v9858_v11 = vmul.u32.u64.high %v9791_v15, %v3308_v57, %v9857_v54 }
 0x423   : > { %v3443_v38 = vshrl.u32 %v9789_v39, %v3441_v13  ;;  %v3446_v34 = vadd.s32 127, %v3445_v45  ;;  %v3589_v33 = vsel %vm3588_vm2, %v3587_v35, 0  ;;  %7141 = vsinq.f32 %v9767_v44 }
 0x424   : > { %v12648_v47 = vsel %vm9742_vm5, 0, %v9762_v41  ;;  %v3304_v51 = vsel %vm3298_vm0, %v3301_v43, %v3303_v2  ;;  %v3591_v55 = vand.u32 31, %v3589_v33  ;;  %v3458_v39 = vsel %vm9823_vm15, 0, %v3456_v5 }
 0x425   : > { %v9869_v3 = vadd.s32 3, %v12648_v47  ;;  %v3444_v22 = vor.u32 %v3443_v38, %v3442_v56  ;;  %v3447_v57 = vshll.u32 %v3446_v34, 23  ;;  %v3585_v45 = vor.u32 8388608, %v9812_v31 }
 0x426   : > { %v9879_v44 = vsel %vm9742_vm5, %v9492_v12, %v3142_v27  ;;  %vm3322_vm12 = vc.u32 %v9854_v42, %v9857_v54  ;;  %v3323_v41 = vadd.s32 1, %v9858_v11  ;;  %v3592_v35 = vsub.s32 32, %v3591_v55 }
 0x427   : > { %v3448_v2 = vor.u32 4788187, %v3447_v57  ;;  %v3451_v43 = vcvt.s32.f32 %v3444_v22  ;;  %v3320_v26 = vmul.u32 %v9791_v15, %v3304_v51  ;;  %v3477_v23 = vshrl.u32 %v3476_v19, 23 }
 0x428   : > { %v3324_v36 = vsel %vm3322_vm12, %v3323_v41, %v9858_v11  ;;  %v3594_v31 = vshll.u32 %v12597_v24, %v3591_v55  ;;  %v3595_v5 = vshrl.u32 %v12598_v21, %v3592_v35  ;;  %v3598_v4 = vshrl.u32 %v12599_v50, %v3592_v35 }
 0x429   : > { %v3449_v27 = vand.u32 2147483647, %v3448_v2  ;;  %v3325_v52 = vadd.s32 %v3324_v36, %v3320_v26  ;;  %v3597_v46 = vshll.u32 %v12598_v21, %v3591_v55  ;;  %v3601_v13 = vshrl.u32 %v12600_v49, %v3592_v35 }
 0x42a   : > { %v3590_v59 = vshrl.u32 %v3589_v33, 5  ;;  %v3600_v32 = vshll.u32 %v12599_v50, %v3591_v55  ;;  %v3603_v15 = vshll.u32 %v12600_v49, %v3591_v55  ;;  %v3604_v19 = vshrl.u32 %v12601_v6, %v3592_v35 }
 0x42b   : > { %v3452_v11 = vmul.f32 %v3451_v43, %v3449_v27  ;;  %v3326_v56 = vadd.s32 536870912, %v3325_v52  ;;  %v3596_v38 = vor.u32 %v3595_v5, %v3594_v31  ;;  %v3599_v34 = vor.u32 %v3598_v4, %v3597_v46 }
 0x42c   : > { %v3602_v47 = vor.u32 %v3601_v13, %v3600_v32  ;;  %v3605_v51 = vor.u32 %v3604_v19, %v3603_v15  ;;  %v3606_v22 = vshll.u32 %v12601_v6, %v3591_v55  ;;  %v3607_v57 = vshrl.u32 %v12602_v7, %v3592_v35 }
 0x42d   : > { %v9896_v41 = vadd.s32 3, %v3458_v39  ;;  %v3327_v2 = vshrl.u32 %v3326_v56, 30  ;;  %v3625_v33 = vshll.u32 %v3585_v45, 8  ;;  %v12283_v26 = vand.u32 2147483647, %v9784_v0  ;;  %v9899_v36 = vpop.eup %7141 }
 0x42e   : > { %12650 = vst [vmem:[#allocation33_spill] sm:$0xff] %v9899_v36  ;;  %7143 = vcosq.f32 %v9879_v44  ;;  %v3608_v43 = vor.u32 %v3607_v57, %v3606_v22  ;;  %vm3609_vm14 = vcmp.lt.s32.totalorder %v3590_v59, 1  ;;  %v6430_v31 = vadd.s32 4294967169, %v3477_v23 }
 0x42f   : > { %12649 = vst [vmem:[#allocation36_spill] sm:$0xff] %v9896_v41  ;;  %v3453_v5 = vxor.u32 2147483648, %v3452_v11  ;;  %v3328_v4 = vshll.u32 %v3327_v2, 30  ;;  %vm3612_vm6 = vcmp.lt.s32.totalorder %v3590_v59, 4  ;;  %v3617_v27 = vsel %vm3609_vm14, %v3596_v38, %v3599_v34 }
 0x430   : > { %v3593_v55 = vshrl.u32 %v12597_v24, %v3592_v35  ;;  %vm3611_vm7 = vcmp.lt.s32.totalorder %v3590_v59, 3  ;;  %v3614_v39 = vsel %vm3612_vm6, %v3602_v47, 2102212464  ;;  %v3618_v46 = vsel %vm3612_vm6, %v3605_v51, 920167782 }
 0x431   : > { %vm3267_vm5 = vcmp.lt.s32.totalorder %v9674_v25, 0  ;;  %v9904_v45 = vsub.s32 %v3325_v52, %v3328_v4  ;;  %vm3610_vm1 = vcmp.lt.s32.totalorder %v3590_v59, 2  ;;  %v3619_v13 = vsel %vm3611_vm7, %v3602_v47, %v3618_v46 }
 0x432   : > { %v3621_v32 = vsel %vm3609_vm14, %v3599_v34, %v3602_v47  ;;  %v3613_v15 = vsel %vm3609_vm14, %v3593_v55, %v3596_v38  ;;  %v3620_v19 = vsel %vm3610_vm1, %v3617_v27, %v3619_v13  ;;  %v3622_v23 = vsel %vm3612_vm6, %v3608_v43, 1326507024 }
 0x433   : > { %v3480_v56 = vand.u32 8388607, %v12283_v26  ;;  %v3454_v35 = vsel %vm3371_vm3, %v3453_v5, %v3452_v11  ;;  %v3331_v22 = vsub.s32 0, %v9904_v45  ;;  %v3615_v57 = vsel %vm3611_vm7, %v3599_v34, %v3614_v39 }
 0x434   : > { %v3623_v41 = vsel %vm3611_vm7, %v3605_v51, %v3622_v23  ;;  %v9913_v4 = vmul.u32.u64.low %v3625_v33, %v3620_v19  ;;  %v9914_v36 = vmul.u32.u64.high %v3625_v33, %v3620_v19, %v9913_v4  ;;  %v9919_v38 = vadd.f32 %v9670_v28, %v9433_v62 }
 0x435   : > { %v3624_v52 = vsel %vm3610_vm1, %v3621_v32, %v3623_v41  ;;  %v6423_v47 = vmin.u32 %v3331_v22, %v9904_v45  ;;  %v3483_v11 = vadd.s32 1, %v6430_v31  ;;  %7145 = vsinq.f32 %v9879_v44 }
 0x436   : > { %v9922_v43 = vmul.u32.u64.low %v3625_v33, %v3624_v52  ;;  %v9923_v27 = vmul.u32.u64.high %v3625_v33, %v3624_v52, %v9922_v43  ;;  %v3457_v34 = vsel %vm9823_vm15, %v9500_v1, %v3454_v35  ;;  %v3351_v51 = vsub.s32 4, %v3327_v2 }
 0x437   : > { %v3616_v41 = vsel %vm3610_vm1, %v3613_v15, %v3615_v57  ;;  %v3333_v5 = vclz %v6423_v47  ;;  %v3481_v55 = vor.u32 8388608, %v3480_v56  ;;  %vm3484_vm13 = vcmp.gt.s32.totalorder %v3483_v11, 0 }
 0x438   : > { %v9932_v62 = vadd.f32 %v9670_v28, %v9494_v14  ;;  %v9934_v39 = vpop.eup %7143  ;;  %v3321_v31 = vadd.s32 %v9857_v54, %v9854_v42  ;;  %v3635_v44 = vadd.s32 1, %v9914_v36  ;;  %v3485_v46 = vsel %vm3484_vm13, %v3483_v11, 0 }
 0x439   : > { %12651 = vst [vmem:[#allocation21_spill] sm:$0xff] %v9934_v39  ;;  %v3788_v60 = vand.u32 2139095040, %v9919_v38  ;;  %7147 = vcosq.f32 %v3457_v34  ;;  %v6424_v59 = vadd.s32 4294967294, %v3333_v5  ;;  %v3632_v13 = vmul.u32 %v3625_v33, %v3616_v41 }
 0x43a   : > { %vm3634_vm9 = vc.u32 %v9923_v27, %v9913_v4  ;;  %7149 = vsinq.f32 %v3457_v34  ;;  %v9944_v14 = vsel %vm3267_vm5, %v3351_v51, %v3327_v2  ;;  %v3487_v15 = vand.u32 31, %v3485_v46 }
 0x43b   : > { %v3636_v32 = vsel %vm3634_vm9, %v3635_v44, %v9914_v36  ;;  %vm6425_vm3 = vcmp.lt.s32.totalorder %v6424_v59, 0  ;;  %v9947_v54 = vshll.u32 %v3481_v55, 8  ;;  %v9950_v56 = vshrl.u32 %v3485_v46, 5 }
 0x43c   : > { %v3637_v42 = vadd.s32 %v3636_v32, %v3632_v13  ;;  %v3336_v23 = vsel %vm6425_vm3, 0, %v6424_v59  ;;  %v3488_v33 = vsub.s32 32, %v3487_v15  ;;  %v3789_v35 = vshrl.u32 %v3788_v60, 23 }
 0x43d   : > { %v3337_v22 = vsub.s32 32, %v3336_v23  ;;  %v3341_v57 = vsub.s32 4294967266, %v3336_v23  ;;  %v3490_v2 = vshll.u32 %v12597_v24, %v3487_v15  ;;  %v3338_v47 = vshll.u32 %v9904_v45, %v3336_v23 }
 0x43e   : > { %v3638_v52 = vadd.s32 536870912, %v3637_v42  ;;  %v3491_v36 = vshrl.u32 %v12598_v21, %v3488_v33  ;;  %v3493_v43 = vshll.u32 %v12598_v21, %v3487_v15  ;;  %v3494_v11 = vshrl.u32 %v12599_v50, %v3488_v33 }
 0x43f   : > { %v3339_v34 = vshrl.u32 %v3321_v31, %v3337_v22  ;;  %v3342_v51 = vadd.s32 127, %v3341_v57  ;;  %v3497_v5 = vshrl.u32 %v12600_v49, %v3488_v33  ;;  %v9958_v55 = vpop.eup %7145  ;;  %v3496_v46 = vshll.u32 %v12599_v50, %v3487_v15 }
 0x440   : > { %v3639_v41 = vshrl.u32 %v3638_v52, 30  ;;  %12652 = vst [vmem:[#allocation43_spill] sm:$0xff] %v9958_v55  ;;  %v3492_v44 = vor.u32 %v3491_v36, %v3490_v2  ;;  %v3499_v60 = vshll.u32 %v12600_v49, %v3487_v15  ;;  %v3500_v45 = vshrl.u32 %v12601_v6, %v3488_v33 }
 0x441   : > { %v3340_v59 = vor.u32 %v3339_v34, %v3338_v47  ;;  %v3343_v13 = vshll.u32 %v3342_v51, 23  ;;  %v3495_v23 = vor.u32 %v3494_v11, %v3493_v43  ;;  %v12653_v26 = vand.u32 2147483647, %v9674_v25 }
 0x442   : > { %v3640_v32 = vshll.u32 %v3639_v41, 30  ;;  %v3498_v22 = vor.u32 %v3497_v5, %v3496_v46  ;;  %v3501_v57 = vor.u32 %v3500_v45, %v3499_v60  ;;  %v3502_v52 = vshll.u32 %v12601_v6, %v3487_v15 }
 0x443   : > { %vm9965_vm2 = vcmp.le.f32.partialorder %v12653_v26, 0.7853982  ;;  %v3503_v2 = vshrl.u32 %v12602_v7, %v3488_v33  ;;  %v9971_v36 = vpop.eup %7147  ;;  %v3344_v19 = vor.u32 4788187, %v3343_v13  ;;  %vm3579_vm10 = vcmp.lt.s32.totalorder %v9678_v17, 0 }
 0x444   : > { %12656 = vst [vmem:[#allocation42_spill] sm:$0xff] %v9971_v36  ;;  %v9974_v47 = vsub.s32 %v3637_v42, %v3640_v32  ;;  %v6442_v43 = vadd.s32 4294967169, %v3789_v35  ;;  %v12657_v11 = vand.u32 2147483647, %v9919_v38  ;;  %v9978_v34 = vpop.eup %7149  ;;  %v3489_v51 = vshrl.u32 %v12597_v24, %v3488_v33 }
 0x445   : > { %12658 = vst [vmem:[#allocation13_spill] sm:$0xff] %v9978_v34  ;;  %v3504_v5 = vor.u32 %v3503_v2, %v3502_v52  ;;  %vm3505_vm15 = vcmp.lt.s32.totalorder %v9950_v56, 1  ;;  %vm3506_vm8 = vcmp.lt.s32.totalorder %v9950_v56, 2  ;;  %v3345_v15 = vand.u32 2147483647, %v3344_v19 }
 0x446   : > { %v3792_v26 = vand.u32 8388607, %v12657_v11  ;;  %v3347_v46 = vcvt.s32.f32 %v3340_v59  ;;  %v3643_v60 = vsub.s32 0, %v9974_v47  ;;  %vm3508_vm4 = vcmp.lt.s32.totalorder %v9950_v56, 4 }
 0x447   : > { %v12659_v42 = vand.u32 2147483647, %v9678_v17  ;;  %vm3507_vm11 = vcmp.lt.s32.totalorder %v9950_v56, 3  ;;  %v3510_v33 = vsel %vm3508_vm4, %v3498_v22, 2102212464  ;;  %v3513_v45 = vsel %vm3505_vm15, %v3492_v44, %v3495_v23 }
 0x448   : > { %v3514_v13 = vsel %vm3508_vm4, %v3501_v57, 920167782  ;;  %v3348_v32 = vmul.f32 %v3347_v46, %v3345_v15  ;;  %v6435_v19 = vmin.u32 %v3643_v60, %v9974_v47  ;;  %v3517_v52 = vsel %vm3505_vm15, %v3495_v23, %v3498_v22 }
 0x449   : > { %vm9987_vm0 = vcmp.le.f32.partialorder %v12659_v42, 0.7853982  ;;  %v3515_v59 = vsel %vm3507_vm11, %v3498_v22, %v3514_v13  ;;  %v3663_v2 = vsub.s32 4, %v3639_v41  ;;  %v3509_v11 = vsel %vm3505_vm15, %v3489_v51, %v3492_v44 }
 0x44a   : > { %v3516_v42 = vsel %vm3506_vm8, %v3513_v45, %v3515_v59  ;;  %v3518_v36 = vsel %vm3508_vm4, %v3504_v5, 1326507024  ;;  %v3349_v34 = vxor.u32 2147483648, %v3348_v32  ;;  %v3645_v1 = vclz %v6435_v19 }
 0x44b   : > { %v3511_v39 = vsel %vm3507_vm11, %v3495_v23, %v3510_v33  ;;  %v3519_v12 = vsel %vm3507_vm11, %v3501_v57, %v3518_v36  ;;  %v10004_v46 = vmul.u32.u64.low %v9947_v54, %v3516_v42  ;;  %v10005_v60 = vmul.u32.u64.high %v9947_v54, %v3516_v42, %v10004_v46 }
 0x44c   : > { %v3520_v15 = vsel %vm3506_vm8, %v3517_v52, %v3519_v12  ;;  %v3795_v22 = vadd.s32 1, %v6442_v43  ;;  %v6436_v51 = vadd.s32 4294967294, %v3645_v1  ;;  %v10017_v23 = vsel %vm3579_vm10, %v3663_v2, %v3639_v41 }
 0x44d   : > { %v10012_v5 = vmul.u32.u64.low %v9947_v54, %v3520_v15  ;;  %v10013_v45 = vmul.u32.u64.high %v9947_v54, %v3520_v15, %v10012_v5  ;;  %v3512_v12 = vsel %vm3506_vm8, %v3509_v11, %v3511_v39  ;;  %v3793_v57 = vor.u32 8388608, %v3792_v26 }
 0x44e   : > { %vm3796_vm12 = vcmp.gt.s32.totalorder %v3795_v22, 0  ;;  %v3350_v36 = vsel %vm3267_vm5, %v3349_v34, %v3348_v32  ;;  %vm6437_vm14 = vcmp.lt.s32.totalorder %v6436_v51, 0  ;;  %v3633_v33 = vadd.s32 %v9913_v4, %v9923_v27 }
 0x44f   : > { %v3797_v43 = vsel %vm3796_vm12, %v3795_v22, 0  ;;  %v3648_v13 = vsel %vm6437_vm14, 0, %v6436_v51  ;;  %v3531_v19 = vadd.s32 1, %v10005_v60  ;;  %v3666_v39 = vsel %vm9987_vm0, 0, %v10017_v23 }
 0x450   : > { %v10027_v41 = vshrl.u32 %v3797_v43, 5  ;;  %v3649_v59 = vsub.s32 32, %v3648_v13  ;;  %v3653_v56 = vsub.s32 4294967266, %v3648_v13  ;;  %v3528_v26 = vmul.u32 %v9947_v54, %v3512_v12 }
 0x451   : > { %v10036_v34 = vsel %vm9965_vm2, %v9674_v25, %v3350_v36  ;;  %vm3530_vm6 = vc.u32 %v10013_v45, %v10004_v46  ;;  %v3799_v4 = vand.u32 31, %v3797_v43  ;;  %v10040_v27 = vshll.u32 %v3793_v57, 8 }
 0x452   : > { %v3650_v32 = vshll.u32 %v9974_v47, %v3648_v13  ;;  %v3651_v52 = vshrl.u32 %v3633_v33, %v3649_v59  ;;  %v3654_v2 = vadd.s32 127, %v3653_v56  ;;  %v3532_v11 = vsel %vm3530_vm6, %v3531_v19, %v10005_v60 }
 0x453   : > { %vm3475_vm7 = vcmp.lt.s32.totalorder %v9784_v0, 0  ;;  %v3533_v54 = vadd.s32 %v3532_v11, %v3528_v26  ;;  %v3800_v42 = vsub.s32 32, %v3799_v4  ;;  %v3802_v15 = vshll.u32 %v12597_v24, %v3799_v4 }
 0x454   : > { %vm3817_vm5 = vcmp.lt.s32.totalorder %v10027_v41, 1  ;;  %v3652_v22 = vor.u32 %v3651_v52, %v3650_v32  ;;  %v3655_v51 = vshll.u32 %v3654_v2, 23  ;;  %v3805_v5 = vshll.u32 %v12598_v21, %v3799_v4 }
 0x455   : > { %v3808_v23 = vshll.u32 %v12599_v50, %v3799_v4  ;;  %v3534_v12 = vadd.s32 536870912, %v3533_v54  ;;  %v3803_v47 = vshrl.u32 %v12598_v21, %v3800_v42  ;;  %v3806_v57 = vshrl.u32 %v12599_v50, %v3800_v42 }
 0x456   : > { %v3811_v60 = vshll.u32 %v12600_v49, %v3799_v4  ;;  %v3656_v36 = vor.u32 4788187, %v3655_v51  ;;  %v3659_v43 = vcvt.s32.f32 %v3652_v22  ;;  %v3809_v33 = vshrl.u32 %v12600_v49, %v3800_v42 }
 0x457   : > { %v3812_v13 = vshrl.u32 %v12601_v6, %v3800_v42  ;;  %v12662_v19 = vand.u32 2147483647, %v9784_v0  ;;  %v3535_v56 = vshrl.u32 %v3534_v12, 30  ;;  %v3804_v26 = vor.u32 %v3803_v47, %v3802_v15 }
 0x458   : > { %v3807_v32 = vor.u32 %v3806_v57, %v3805_v5  ;;  %v3814_v52 = vshll.u32 %v12601_v6, %v3799_v4  ;;  %v3657_v2 = vand.u32 2147483647, %v3656_v36  ;;  %v3810_v11 = vor.u32 %v3809_v33, %v3808_v23 }
 0x459   : > { %vm10056_vm1 = vcmp.le.f32.partialorder %v12662_v19, 0.7853982  ;;  %v3813_v1 = vor.u32 %v3812_v13, %v3811_v60  ;;  %v3815_v22 = vshrl.u32 %v12602_v7, %v3800_v42  ;;  %v3536_v51 = vshll.u32 %v3535_v56, 30 }
 0x45a   : > { %v3559_v44 = vsub.s32 4, %v3535_v56  ;;  %v3801_v25 = vshrl.u32 %v12597_v24, %v3800_v42  ;;  %vm3820_vm13 = vcmp.lt.s32.totalorder %v10027_v41, 4  ;;  %v3660_v19 = vmul.f32 %v3659_v43, %v3657_v2 }
 0x45b   : > { %v3816_v55 = vor.u32 %v3815_v22, %v3814_v52  ;;  %v3822_v12 = vsel %vm3820_vm13, %v3810_v11, 2102212464  ;;  %v3825_v15 = vsel %vm3817_vm5, %v3804_v26, %v3807_v32  ;;  %v10068_v4 = vsub.s32 %v3533_v54, %v3536_v51  ;;  %v4116_v22 = vld [vmem:[%s12124_s5 + $0x18] sm:$0xff] }
 0x45c   : > { %vm3819_vm9 = vcmp.lt.s32.totalorder %v10027_v41, 3  ;;  %v3826_v5 = vsel %vm3820_vm13, %v3813_v1, 920167782  ;;  %v3684_v23 = vand.u32 2139095040, %v9932_v62  ;;  %v3560_v42 = vsel %vm3475_vm7, %v3559_v44, %v3535_v56 }
 0x45d   : > { %vm3818_vm3 = vcmp.lt.s32.totalorder %v10027_v41, 2  ;;  %v3821_v47 = vsel %vm3817_vm5, %v3801_v25, %v3804_v26  ;;  %v3827_v57 = vsel %vm3819_vm9, %v3810_v11, %v3826_v5  ;;  %v3539_v54 = vsub.s32 0, %v10068_v4 }
 0x45e   : > { %v3823_v60 = vsel %vm3819_vm9, %v3807_v32, %v3822_v12  ;;  %v3828_v36 = vsel %vm3818_vm3, %v3825_v15, %v3827_v57  ;;  %v3829_v43 = vsel %vm3817_vm5, %v3807_v32, %v3810_v11  ;;  %v3661_v44 = vxor.u32 2147483648, %v3660_v19 }
 0x45f   : > { %v3830_v33 = vsel %vm3820_vm13, %v3816_v55, 1326507024  ;;  %v10091_v25 = vmul.u32.u64.low %v10040_v27, %v3828_v36  ;;  %v10092_v13 = vmul.u32.u64.high %v10040_v27, %v3828_v36, %v10091_v25  ;;  %v12665_v56 = vsel %vm9965_vm2, 0, %v9944_v14  ;;  %v4113_v55 = vld [vmem:[%s12124_s5] sm:$0xff] }
 0x460   : > { %v10098_v26 = vadd.s32 3, %v12665_v56  ;;  %v10100_v52 = vadd.s32 3, %v3666_v39  ;;  %v6431_v2 = vmin.u32 %v3539_v54, %v10068_v4  ;;  %v3831_v32 = vsel %vm3819_vm9, %v3813_v1, %v3830_v33  ;;  %v4114_v39 = vld [vmem:[%s12124_s5 + $0x8] sm:$0xff]  ;;  %v4115_v1 = vld [vmem:[%s12124_s5 + $0x10] sm:$0xff] }
 0x461   : > { %7151 = vcosq.f32 %v10036_v34  ;;  %v3562_v31 = vsel %vm10056_vm1, 0, %v3560_v42  ;;  %v3832_v14 = vsel %vm3818_vm3, %v3829_v43, %v3831_v32  ;;  %v3685_v11 = vshrl.u32 %v3684_v23, 23 }
 0x462   : > { %v3541_v51 = vclz %v6431_v2  ;;  %v3824_v12 = vsel %vm3818_vm3, %v3821_v47, %v3823_v60  ;;  %v10125_v15 = vmul.u32.u64.low %v10040_v27, %v3832_v14  ;;  %v10126_v5 = vmul.u32.u64.high %v10040_v27, %v3832_v14, %v10125_v15 }
 0x463   : > { %v3662_v23 = vsel %vm3579_vm10, %v3661_v44, %v3660_v19  ;;  %v3843_v42 = vadd.s32 1, %v10092_v13  ;;  %v6438_v57 = vadd.s32 4294967169, %v3685_v11  ;;  %v12666_v54 = vand.u32 2147483647, %v9932_v62 }
 0x464   : > { %v6432_v43 = vadd.s32 4294967294, %v3541_v51  ;;  %v10135_v33 = vadd.f32 %v9670_v28, %v9620_v16  ;;  %v6805_v41 = vpack.c.bf16 %v4114_v39, %v4113_v55  ;;  %v6809_v47 = vpack.c.bf16 %v4116_v22, %v4115_v1 }
 0x465   : > { %v3688_v36 = vand.u32 8388607, %v12666_v54  ;;  %7153 = vsinq.f32 %v10036_v34  ;;  %v3529_v60 = vadd.s32 %v10004_v46, %v10013_v45  ;;  %v10140_v56 = vadd.s32 3, %v3562_v31 }
 0x466   : > { %v3691_v19 = vadd.s32 1, %v6438_v57  ;;  %v3665_v44 = vsel %vm9987_vm0, %v9678_v17, %v3662_v23  ;;  %vm6433_vm2 = vcmp.lt.s32.totalorder %v6432_v43, 0  ;;  %v3840_v2 = vmul.u32 %v10040_v27, %v3824_v12  ;;  %6806 = vmatprep.subr.bf16.mxu0 %v6805_v41 }
 0x467   : > { %vm3842_vm10 = vc.u32 %v10126_v5, %v10091_v25  ;;  %v3544_v16 = vsel %vm6433_vm2, 0, %v6432_v43  ;;  %v3689_v34 = vor.u32 8388608, %v3688_v36  ;;  %6808 = vmatpush3.bf16.msra.mxu0 %v6805_v41  ;;  %vm3787_vm8 = vcmp.lt.s32.totalorder %v9919_v38, 0 }
 0x468   : > { %v3844_v32 = vsel %vm3842_vm10, %v3843_v42, %v10092_v13  ;;  %vm3692_vm15 = vcmp.gt.s32.totalorder %v3691_v19, 0  ;;  %v3545_v46 = vsub.s32 32, %v3544_v16  ;;  %v3549_v45 = vsub.s32 4294967266, %v3544_v16  ;;  %6810 = vmatprep.subr.bf16.mxu0 %v6809_v47 }
 0x469   : > { %v3845_v55 = vadd.s32 %v3844_v32, %v3840_v2  ;;  %v3996_v35 = vand.u32 2139095040, %v10135_v33  ;;  %7155 = vcosq.f32 %v3665_v44  ;;  %v3693_v31 = vsel %vm3692_vm15, %v3691_v19, 0 }
 0x46a   : > { %v12294_v27 = vand.u32 2147483647, %v10135_v33  ;;  %v10153_v14 = vadd.f32 %v9670_v28, %v9684_v37  ;;  %v3546_v13 = vshll.u32 %v10068_v4, %v3544_v16  ;;  %v3547_v11 = vshrl.u32 %v3529_v60, %v3545_v46 }
 0x46b   : > { %v3550_v39 = vadd.s32 127, %v3549_v45  ;;  %v3846_v1 = vadd.s32 536870912, %v3845_v55  ;;  %v10156_v22 = vpop.eup %7151  ;;  %7157 = vsinq.f32 %v3665_v44  ;;  %v10159_v51 = vadd.s32 %v10091_v25, %v10126_v5  ;;  %6812 = vmatpush3.bf16.msra.mxu0 %v6809_v47 }
 0x46c   : > { %v3695_v12 = vand.u32 31, %v3693_v31  ;;  %v10161_v15 = vshll.u32 %v3689_v34, 8  ;;  %v3548_v23 = vor.u32 %v3547_v11, %v3546_v13  ;;  %v12667_v28 = vand.u32 2147483647, %v9919_v38 }
 0x46d   : > { %v3551_v42 = vshll.u32 %v3550_v39, 23  ;;  %v3847_v4 = vshrl.u32 %v3846_v1, 30  ;;  %v3997_v57 = vshrl.u32 %v3996_v35, 23  ;;  %v10169_v54 = vshrl.u32 %v3693_v31, 5 }
 0x46e   : > { %vm10165_vm4 = vcmp.le.f32.partialorder %v12667_v28, 0.7853982  ;;  %v3696_v36 = vsub.s32 32, %v3695_v12  ;;  %v10173_v25 = vand.u32 8388607, %v12294_v27  ;;  %v3698_v60 = vshll.u32 %v12597_v24, %v3695_v12 }
 0x46f   : > { %v3552_v43 = vor.u32 4788187, %v3551_v42  ;;  %v3848_v41 = vshll.u32 %v3847_v4, 30  ;;  %v3871_v47 = vsub.s32 4, %v3847_v4  ;;  %v10177_v19 = vpop.eup %7153  ;;  %v3701_v2 = vshll.u32 %v12598_v21, %v3695_v12 }
 0x470   : > { %v3699_v44 = vshrl.u32 %v12598_v21, %v3696_v36  ;;  %v3702_v16 = vshrl.u32 %v12599_v50, %v3696_v36  ;;  %v3705_v32 = vshrl.u32 %v12600_v49, %v3696_v36  ;;  %v3555_v46 = vcvt.s32.f32 %v3548_v23 }
 0x471   : > { %v3553_v34 = vand.u32 2147483647, %v3552_v43  ;;  %v10183_v45 = vsub.s32 %v3845_v55, %v3848_v41  ;;  %v3704_v35 = vshll.u32 %v12599_v50, %v3695_v12  ;;  %v3872_v31 = vsel %vm3787_vm8, %v3871_v47, %v3847_v4 }
 0x472   : > { %v3700_v13 = vor.u32 %v3699_v44, %v3698_v60  ;;  %v3703_v11 = vor.u32 %v3702_v16, %v3701_v2  ;;  %v3707_v39 = vshll.u32 %v12600_v49, %v3695_v12  ;;  %v3708_v27 = vshrl.u32 %v12601_v6, %v3696_v36 }
 0x473   : > { %v3556_v1 = vmul.f32 %v3555_v46, %v3553_v34  ;;  %v3851_v42 = vsub.s32 0, %v10183_v45  ;;  %v3706_v28 = vor.u32 %v3705_v32, %v3704_v35  ;;  %v10191_v5 = vpop.eup %7155  ;;  %v3710_v55 = vshll.u32 %v12601_v6, %v3695_v12 }
 0x474   : > { %12670 = vst [vmem:[#allocation16_spill] sm:$0xff] %v10191_v5  ;;  %v3711_v23 = vshrl.u32 %v12602_v7, %v3696_v36  ;;  %vm3713_vm0 = vcmp.lt.s32.totalorder %v10169_v54, 1  ;;  %v6450_v43 = vadd.s32 4294967169, %v3997_v57  ;;  %v3697_v47 = vshrl.u32 %v12597_v24, %v3696_v36 }
 0x475   : > { %v3557_v4 = vxor.u32 2147483648, %v3556_v1  ;;  %v6443_v41 = vmin.u32 %v3851_v42, %v10183_v45  ;;  %v3709_v60 = vor.u32 %v3708_v27, %v3707_v39  ;;  %v10198_v44 = vpop.eup %7157  ;;  %v3874_v2 = vsel %vm10165_vm4, 0, %v3872_v31 }
 0x476   : > { %12671 = vst [vmem:[#allocation15_spill] sm:$0xff] %v10198_v44  ;;  %v3712_v16 = vor.u32 %v3711_v23, %v3710_v55  ;;  %vm3716_vm11 = vcmp.lt.s32.totalorder %v10169_v54, 4  ;;  %v3721_v12 = vsel %vm3713_vm0, %v3700_v13, %v3703_v11  ;;  %vm3715_vm12 = vcmp.lt.s32.totalorder %v10169_v54, 3 }
 0x477   : > { %v3853_v32 = vclz %v6443_v41  ;;  %v3718_v57 = vsel %vm3716_vm11, %v3706_v28, 2102212464  ;;  %v3722_v34 = vsel %vm3716_vm11, %v3709_v60, 920167782  ;;  %v3558_v36 = vsel %vm3475_vm7, %v3557_v4, %v3556_v1 }
 0x478   : > { %vm3714_vm14 = vcmp.lt.s32.totalorder %v10169_v54, 2  ;;  %v3723_v27 = vsel %vm3715_vm12, %v3706_v28, %v3722_v34  ;;  %v3725_v46 = vsel %vm3713_vm0, %v3703_v11, %v3706_v28  ;;  %v3717_v31 = vsel %vm3713_vm0, %v3697_v47, %v3700_v13 }
 0x479   : > { %v6444_v35 = vadd.s32 4294967294, %v3853_v32  ;;  %v3724_v39 = vsel %vm3714_vm14, %v3721_v12, %v3723_v27  ;;  %v3726_v42 = vsel %vm3716_vm11, %v3712_v16, 1326507024  ;;  %v3719_v55 = vsel %vm3715_vm12, %v3703_v11, %v3718_v57 }
 0x47a   : > { %v3727_v23 = vsel %vm3715_vm12, %v3709_v60, %v3726_v42  ;;  %v10216_v41 = vmul.u32.u64.low %v10161_v15, %v3724_v39  ;;  %v10217_v17 = vmul.u32.u64.high %v10161_v15, %v3724_v39, %v10216_v41  ;;  %v3561_v1 = vsel %vm10056_vm1, %v9784_v0, %v3558_v36 }
 0x47b   : > { %vm6445_vm6 = vcmp.lt.s32.totalorder %v6444_v35, 0  ;;  %v3728_v28 = vsel %vm3714_vm14, %v3725_v46, %v3727_v23  ;;  %v4003_v13 = vadd.s32 1, %v6450_v43  ;;  %v3720_v32 = vsel %vm3714_vm14, %v3717_v31, %v3719_v55 }
 0x47c   : > { %v3856_v4 = vsel %vm6445_vm6, 0, %v6444_v35  ;;  %v10226_v47 = vmul.u32.u64.low %v10161_v15, %v3728_v28  ;;  %v10227_v16 = vmul.u32.u64.high %v10161_v15, %v3728_v28, %v10226_v47  ;;  %7159 = vcosq.f32 %v3561_v1 }
 0x47d   : > { %v3857_v60 = vsub.s32 32, %v3856_v4  ;;  %v3861_v12 = vsub.s32 4294967266, %v3856_v4  ;;  %vm4004_vm7 = vcmp.gt.s32.totalorder %v4003_v13, 0  ;;  %v10232_v59 = vadd.s32 3, %v3874_v2 }
 0x47e   : > { %v3739_v57 = vadd.s32 1, %v10217_v17  ;;  %v4005_v34 = vsel %vm4004_vm7, %v4003_v13, 0  ;;  %v3858_v43 = vshll.u32 %v10183_v45, %v3856_v4  ;;  %7161 = vsinq.f32 %v3561_v1 }
 0x47f   : > { %12672 = vst [vmem:[#allocation8_spill] sm:$0xff] %v10232_v59  ;;  %v3859_v36 = vshrl.u32 %v10159_v51, %v3857_v60  ;;  %v3862_v27 = vadd.s32 127, %v3861_v12  ;;  %v4007_v46 = vand.u32 31, %v4005_v34  ;;  %v3736_v35 = vmul.u32 %v10161_v15, %v3720_v32 }
 0x480   : > { %vm3738_vm5 = vc.u32 %v10227_v16, %v10216_v41  ;;  %v3892_v54 = vand.u32 2139095040, %v10153_v14  ;;  %vm3683_vm1 = vcmp.lt.s32.totalorder %v9932_v62, 0  ;;  %v4006_v55 = vshrl.u32 %v4005_v34, 5 }
 0x481   : > { %v3860_v31 = vor.u32 %v3859_v36, %v3858_v43  ;;  %v3863_v2 = vshll.u32 %v3862_v27, 23  ;;  %v3740_v39 = vsel %vm3738_vm5, %v3739_v57, %v10217_v17  ;;  %v4008_v42 = vsub.s32 32, %v4007_v46 }
 0x482   : > { %v3741_v45 = vadd.s32 %v3740_v39, %v3736_v35  ;;  %v4010_v51 = vshll.u32 %v12597_v24, %v4007_v46  ;;  %v4013_v23 = vshll.u32 %v12598_v21, %v4007_v46  ;;  %v4016_v13 = vshll.u32 %v12599_v50, %v4007_v46 }
 0x483   : > { %v3864_v1 = vor.u32 4788187, %v3863_v2  ;;  %v3867_v15 = vcvt.s32.f32 %v3860_v31  ;;  %v4011_v28 = vshrl.u32 %v12598_v21, %v4008_v42  ;;  %v12673_v4 = vand.u32 2147483647, %v9932_v62 }
 0x484   : > { %v3742_v17 = vadd.s32 536870912, %v3741_v45  ;;  %v4014_v60 = vshrl.u32 %v12599_v50, %v4008_v42  ;;  %v4017_v12 = vshrl.u32 %v12600_v49, %v4008_v42  ;;  %v4019_v32 = vshll.u32 %v12600_v49, %v4007_v46 }
 0x485   : > { %vm10249_vm13 = vcmp.le.f32.partialorder %v12673_v4, 0.7853982  ;;  %v3865_v57 = vand.u32 2147483647, %v3864_v1  ;;  %v4012_v34 = vor.u32 %v4011_v28, %v4010_v51  ;;  %v4020_v43 = vshrl.u32 %v12601_v6, %v4008_v42 }
 0x486   : > { %v4022_v36 = vshll.u32 %v12601_v6, %v4007_v46  ;;  %v3743_v27 = vshrl.u32 %v3742_v17, 30  ;;  %v4015_v35 = vor.u32 %v4014_v60, %v4013_v23  ;;  %v4018_v31 = vor.u32 %v4017_v12, %v4016_v13  ;;  %v10260_v5 = vpop.eup %7159 }
 0x487   : > { %v4023_v2 = vshrl.u32 %v12602_v7, %v4008_v42  ;;  %v3868_v39 = vmul.f32 %v3867_v15, %v3865_v57  ;;  %v4009_v4 = vshrl.u32 %v12597_v24, %v4008_v42  ;;  %v4021_v11 = vor.u32 %v4020_v43, %v4019_v32 }
 0x488   : > { %v3893_v59 = vshrl.u32 %v3892_v54, 23  ;;  %v3744_v44 = vshll.u32 %v3743_v27, 30  ;;  %v3767_v0 = vsub.s32 4, %v3743_v27  ;;  %vm4025_vm9 = vcmp.lt.s32.totalorder %v4006_v55, 1  ;;  %v10263_v23 = vpop.eup %7161 }
 0x489   : > { %v4024_v1 = vor.u32 %v4023_v2, %v4022_v36  ;;  %v3869_v51 = vxor.u32 2147483648, %v3868_v39  ;;  %vm4027_vm3 = vcmp.lt.s32.totalorder %v4006_v55, 3  ;;  %vm4028_vm2 = vcmp.lt.s32.totalorder %v4006_v55, 4  ;;  %v4117_v2 = vld [vmem:[%s12124_s5 + $0x20] sm:$0xff] }
 0x48a   : > { %v4033_v46 = vsel %vm4025_vm9, %v4012_v34, %v4015_v35  ;;  %v10265_v28 = vsub.s32 %v3741_v45, %v3744_v44  ;;  %v3768_v42 = vsel %vm3683_vm1, %v3767_v0, %v3743_v27  ;;  %v4030_v54 = vsel %vm4028_vm2, %v4018_v31, 2102212464 }
 0x48b   : > { %v4034_v15 = vsel %vm4028_vm2, %v4021_v11, 920167782  ;;  %v3870_v13 = vsel %vm3787_vm8, %v3869_v51, %v3868_v39  ;;  %v4029_v17 = vsel %vm4025_vm9, %v4009_v4, %v4012_v34  ;;  %v4031_v60 = vsel %vm4027_vm3, %v4015_v35, %v4030_v54 }
 0x48c   : > { %v4035_v12 = vsel %vm4027_vm3, %v4018_v31, %v4034_v15  ;;  %v3747_v32 = vsub.s32 0, %v10265_v28  ;;  %vm4026_vm10 = vcmp.lt.s32.totalorder %v4006_v55, 2  ;;  %v12676_v44 = vor.u32 8388608, %v10173_v25 }
 0x48d   : > { %v12677_v0 = vand.u32 2147483647, %v10153_v14  ;;  %v3770_v43 = vsel %vm10249_vm13, 0, %v3768_v42  ;;  %v4036_v36 = vsel %vm4026_vm10, %v4033_v46, %v4035_v12  ;;  %v4037_v27 = vsel %vm4025_vm9, %v4015_v35, %v4018_v31  ;;  %v4118_v46 = vld [vmem:[%s12124_s5 + $0x28] sm:$0xff]  ;;  %v4119_v35 = vld [vmem:[%s12124_s5 + $0x30] sm:$0xff]  ;;  %v4120_v31 = vld [vmem:[%s12124_s5 + $0x38] sm:$0xff] }
 0x48e   : > { %v4041_v45 = vshll.u32 %v12676_v44, 8  ;;  %v4038_v34 = vsel %vm4028_vm2, %v4024_v1, 1326507024  ;;  %v3873_v25 = vsel %vm10165_vm4, %v9919_v38, %v3870_v13  ;;  %v6439_v39 = vmin.u32 %v3747_v32, %v10265_v28 }
 0x48f   : > { %v3896_v57 = vand.u32 8388607, %v12677_v0  ;;  %v4032_v4 = vsel %vm4026_vm10, %v4029_v17, %v4031_v60  ;;  %v4039_v51 = vsel %vm4027_vm3, %v4021_v11, %v4038_v34  ;;  %v6446_v54 = vadd.s32 4294967169, %v3893_v59 }
 0x490   : > { %v4040_v1 = vsel %vm4026_vm10, %v4037_v27, %v4039_v51  ;;  %v10302_v37 = vmul.u32.u64.low %v4041_v45, %v4036_v36  ;;  %v10303_v42 = vmul.u32.u64.high %v4041_v45, %v4036_v36, %v10302_v37  ;;  %v3749_v55 = vclz %v6439_v39 }
 0x491   : > { %v10306_v11 = vmul.u32.u64.low %v4041_v45, %v4040_v1  ;;  %v10307_v15 = vmul.u32.u64.high %v4041_v45, %v4040_v1, %v10306_v11  ;;  %v3897_v13 = vor.u32 8388608, %v3896_v57  ;;  %7163 = vcosq.f32 %v3873_v25 }
 0x492   : > { %v3899_v17 = vadd.s32 1, %v6446_v54  ;;  %v6813_v60 = vpack.c.bf16 %v4118_v46, %v4117_v2  ;;  %v6817_v12 = vpack.c.bf16 %v4120_v31, %v4119_v35  ;;  %7165 = vsinq.f32 %v3873_v25 }
 0x493   : > { %v3737_v32 = vadd.s32 %v10216_v41, %v10227_v16  ;;  %v6440_v44 = vadd.s32 4294967294, %v3749_v55  ;;  %v10311_v0 = vadd.s32 3, %v3770_v43  ;;  %v4048_v36 = vmul.u32 %v4041_v45, %v4032_v4 }
 0x494   : > { %v4051_v27 = vadd.s32 1, %v10303_v42  ;;  %vm3900_vm15 = vcmp.gt.s32.totalorder %v3899_v17, 0  ;;  %v10314_v59 = vshll.u32 %v3897_v13, 8  ;;  %6814 = vmatprep.subr.bf16.mxu0 %v6813_v60  ;;  %vm4050_vm4 = vc.u32 %v10307_v15, %v10302_v37 }
 0x495   : > { %vm6441_vm8 = vcmp.lt.s32.totalorder %v6440_v44, 0  ;;  %v3901_v57 = vsel %vm3900_vm15, %v3899_v17, 0  ;;  %6816 = vmatpush3.bf16.msra.mxu0 %v6813_v60  ;;  %v10319_v34 = vand.u32 3, %v9423_v20  ;;  %vm3995_vm0 = vcmp.lt.s32.totalorder %v10135_v33, 0 }
 0x496   : > { %v3752_v41 = vsel %vm6441_vm8, 0, %v6440_v44  ;;  %v4052_v16 = vsel %vm4050_vm4, %v4051_v27, %v10303_v42  ;;  %v3903_v45 = vand.u32 31, %v3901_v57  ;;  %6818 = vmatprep.subr.bf16.mxu0 %v6817_v12  ;;  %v10324_v4 = vshrl.u32 %v3901_v57, 5 }
 0x497   : > { %v3753_v2 = vsub.s32 32, %v3752_v41  ;;  %v3757_v25 = vsub.s32 4294967266, %v3752_v41  ;;  %v4053_v39 = vadd.s32 %v4052_v16, %v4048_v36  ;;  %v3754_v51 = vshll.u32 %v10265_v28, %v3752_v41 }
 0x498   : > { %v12678_v46 = vand.u32 2147483647, %v10135_v33  ;;  %v3904_v35 = vsub.s32 32, %v3903_v45  ;;  %v3906_v31 = vshll.u32 %v12597_v24, %v3903_v45  ;;  %v3909_v1 = vshll.u32 %v12598_v21, %v3903_v45 }
 0x499   : > { %v3755_v42 = vshrl.u32 %v3737_v32, %v3753_v2  ;;  %v3758_v54 = vadd.s32 127, %v3757_v25  ;;  %v4054_v55 = vadd.s32 536870912, %v4053_v39  ;;  %v3912_v11 = vshll.u32 %v12599_v50, %v3903_v45  ;;  %6820 = vmatpush3.bf16.msra.mxu0 %v6817_v12 }
 0x49a   : > { %vm10329_vm11 = vcmp.le.f32.partialorder %v12678_v46, 0.7853982  ;;  %v3907_v13 = vshrl.u32 %v12598_v21, %v3904_v35  ;;  %v3910_v28 = vshrl.u32 %v12599_v50, %v3904_v35  ;;  %v3913_v17 = vshrl.u32 %v12600_v49, %v3904_v35 }
 0x49b   : > { %v3915_v60 = vshll.u32 %v12600_v49, %v3903_v45  ;;  %v3756_v44 = vor.u32 %v3755_v42, %v3754_v51  ;;  %v3759_v36 = vshll.u32 %v3758_v54, 23  ;;  %v4055_v27 = vshrl.u32 %v4054_v55, 30  ;;  %v10341_v41 = vpop.eup %7163 }
 0x49c   : > { %v3916_v57 = vshrl.u32 %v12601_v6, %v3904_v35  ;;  %v3905_v32 = vshrl.u32 %v12597_v24, %v3904_v35  ;;  %v3908_v16 = vor.u32 %v3907_v13, %v3906_v31  ;;  %v3911_v2 = vor.u32 %v3910_v28, %v3909_v1  ;;  %v10344_v25 = vpop.eup %7165 }
 0x49d   : > { %v3914_v12 = vor.u32 %v3913_v17, %v3912_v11  ;;  %v3760_v46 = vor.u32 4788187, %v3759_v36  ;;  %v4056_v43 = vshll.u32 %v4055_v27, 30  ;;  %v4079_v50 = vsub.s32 4, %v4055_v27 }
 0x49e   : > { %v3918_v21 = vshll.u32 %v12601_v6, %v3903_v45  ;;  %v3763_v49 = vcvt.s32.f32 %v3756_v44  ;;  %v3917_v51 = vor.u32 %v3916_v57, %v3915_v60  ;;  %v3919_v42 = vshrl.u32 %v12602_v7, %v3904_v35 }
 0x49f   : > { %vm3921_vm12 = vcmp.lt.s32.totalorder %v10324_v4, 1  ;;  %v3761_v54 = vand.u32 2147483647, %v3760_v46  ;;  %v10349_v55 = vsub.s32 %v4053_v39, %v4056_v43  ;;  %v4080_v31 = vsel %vm3995_vm0, %v4079_v50, %v4055_v27 }
 0x4a0   : > { %vm3922_vm14 = vcmp.lt.s32.totalorder %v10324_v4, 2  ;;  %v3920_v1 = vor.u32 %v3919_v42, %v3918_v21  ;;  %vm3923_vm6 = vcmp.lt.s32.totalorder %v10324_v4, 3  ;;  %vm3924_vm7 = vcmp.lt.s32.totalorder %v10324_v4, 4 }
 0x4a1   : > { %v3925_v45 = vsel %vm3921_vm12, %v3905_v32, %v3908_v16  ;;  %v3764_v11 = vmul.f32 %v3763_v49, %v3761_v54  ;;  %v4059_v35 = vsub.s32 0, %v10349_v55  ;;  %v4082_v43 = vsel %vm10329_vm11, 0, %v4080_v31 }
 0x4a2   : > { %v3926_v39 = vsel %vm3924_vm7, %v3914_v12, 2102212464  ;;  %v3929_v21 = vsel %vm3921_vm12, %v3908_v16, %v3911_v2  ;;  %v3930_v13 = vsel %vm3924_vm7, %v3917_v51, 920167782  ;;  %v3933_v49 = vsel %vm3921_vm12, %v3911_v2, %v3914_v12 }
 0x4a3   : > { %v3927_v50 = vsel %vm3923_vm6, %v3911_v2, %v3926_v39  ;;  %v3765_v28 = vxor.u32 2147483648, %v3764_v11  ;;  %v6451_v17 = vmin.u32 %v4059_v35, %v10349_v55  ;;  %v3931_v44 = vsel %vm3923_vm6, %v3914_v12, %v3930_v13 }
 0x4a4   : > { %v3928_v60 = vsel %vm3922_vm14, %v3925_v45, %v3927_v50  ;;  %vm2525_vm5 = vweird.f32 %v9060_v63  ;;  %v4049_v36 = vadd.s32 %v10302_v37, %v10307_v15  ;;  %v3932_v27 = vsel %vm3922_vm14, %v3929_v21, %v3931_v44 }
 0x4a5   : > { %v3934_v57 = vsel %vm3924_vm7, %v3920_v1, 1326507024  ;;  %v2533_v32 = vxor.u32 2147483648, %v9457_v61  ;;  %v3766_v16 = vsel %vm3683_vm1, %v3765_v28, %v3764_v11  ;;  %v4061_v2 = vclz %v6451_v17 }
 0x4a6   : > { %v10386_v46 = vadd.s32 3, %v4082_v43  ;;  %v3935_v12 = vsel %vm3923_vm6, %v3917_v51, %v3934_v57  ;;  %v10393_v15 = vmul.u32.u64.low %v10314_v59, %v3932_v27  ;;  %v10394_v42 = vmul.u32.u64.high %v10314_v59, %v3932_v27, %v10393_v15 }
 0x4a7   : > { %v3936_v37 = vsel %vm3922_vm14, %v3933_v49, %v3935_v12  ;;  %v3944_v54 = vmul.u32 %v10314_v59, %v3928_v60  ;;  %v6452_v31 = vadd.s32 4294967294, %v4061_v2  ;;  %vm2529_vm1 = vcmp.eq.s32.totalorder %v10319_v34, 0  ;;  %v12684_v2 = vld [vmem:[#allocation28_spill] sm:$0xff] }
 0x4a8   : > { %v10399_v1 = vmul.u32.u64.low %v10314_v59, %v3936_v37  ;;  %v10400_v45 = vmul.u32.u64.high %v10314_v59, %v3936_v37, %v10399_v1  ;;  %vm2733_vm9 = vweird.f32 %v9082_v48  ;;  %v3769_v4 = vsel %vm10249_vm13, %v9932_v62, %v3766_v16 }
 0x4a9   : > { %v12681_v51 = vxor.u32 2147483648, %v9461_v53  ;;  %vm2532_vm3 = vcmp.eq.s32.totalorder %v10319_v34, 2  ;;  %v2735_v35 = vand.u32 3, %v9600_v40  ;;  %vm6453_vm2 = vcmp.lt.s32.totalorder %v6452_v31, 0 }
 0x4aa   : > { %vm2528_vm10 = vcmp.lt.s32.totalorder %v10319_v34, 2  ;;  %v2534_v59 = vsel %vm2532_vm3, %v2533_v32, %v9461_v53  ;;  %v2738_v43 = vxor.u32 2147483648, %v9650_v29  ;;  %v4064_v39 = vsel %vm6453_vm2, 0, %v6452_v31  ;;  %v12689_v31 = vld [vmem:[#allocation25_spill] sm:$0xff] }
 0x4ab   : > { %v2531_v11 = vsel %vm2529_vm1, %v9457_v61, %v12681_v51  ;;  %v3947_v50 = vadd.s32 1, %v10394_v42  ;;  %v2741_v21 = vxor.u32 2147483648, %v9648_v58  ;;  %7167 = vcosq.f32 %v3769_v4 }
 0x4ac   : > { %v2535_v47 = vsel %vm2528_vm10, %v2531_v11, %v2534_v59  ;;  %v4065_v13 = vsub.s32 32, %v4064_v39  ;;  %v4066_v61 = vshll.u32 %v10349_v55, %v4064_v39  ;;  %v4069_v49 = vsub.s32 4294967266, %v4064_v39  ;;  %v12691_v11 = vld [vmem:[#allocation38_spill] sm:$0xff] }
 0x4ad   : > { %vm3946_vm13 = vc.u32 %v10400_v45, %v10393_v15  ;;  %v2536_v40 = vsel %vm2525_vm5, nan, %v2535_v47  ;;  %vm2737_vm15 = vcmp.eq.s32.totalorder %v2735_v35, 0  ;;  %vm2740_vm8 = vcmp.eq.s32.totalorder %v2735_v35, 2 }
 0x4ae   : > { %v4067_v53 = vshrl.u32 %v4049_v36, %v4065_v13  ;;  %v4070_v34 = vadd.s32 127, %v4069_v49  ;;  %v3948_v28 = vsel %vm3946_vm13, %v3947_v50, %v10394_v42  ;;  %v4097_v17 = vadd.f32 %v2536_v40, %v8929_v8 }
 0x4af   : > { %vm3891_vm4 = vcmp.lt.s32.totalorder %v10153_v14, 0  ;;  %v3949_v60 = vadd.s32 %v3948_v28, %v3944_v54  ;;  %vm2736_vm12 = vcmp.lt.s32.totalorder %v2735_v35, 2  ;;  %v2739_v55 = vsel %vm2737_vm15, %v9648_v58, %v2738_v43 }
 0x4b0   : > { %v2742_v44 = vsel %vm2740_vm8, %v2741_v21, %v9650_v29  ;;  %v4068_v27 = vor.u32 %v4067_v53, %v4066_v61  ;;  %v4071_v57 = vshll.u32 %v4070_v34, 23  ;;  %vm12682_vm14 = vcmask 523264   ;;  %v12693_v53 = vld [vmem:[#allocation17_spill] sm:$0xff] }
 0x4b1   : > { %6725 = vmatprep.mubr.msk.f32.mxu0 %vm12682_vm14, %v4097_v17  ;;  %v2743_v63 = vsel %vm2736_vm12, %v2739_v55, %v2742_v44  ;;  %v2839_v36 = vand.u32 3, %v9425_v30  ;;  %v3950_v32 = vadd.s32 536870912, %v3949_v60  ;;  %vm12683_vm6 = vmmov %vm12682_vm14  ;;  %v2842_v16 = vxor.u32 2147483648, %v9519_v9  ;;  %v12688_v30 = vld [vmem:[#allocation3_spill] sm:$0xff] }
 0x4b2   : > { %6726 = vmatmul.mubr.msk.f32.vlgmr.msra.gmra.mrb[16].mxu0 %vm12683_vm6, %v9429_v10  ;;  %v2744_v8 = vsel %vm2733_vm9, nan, %v2743_v63  ;;  %v2845_v58 = vxor.u32 2147483648, %v12684_v2  ;;  %v4072_v12 = vor.u32 4788187, %v4071_v57  ;;  %v4075_v29 = vcvt.s32.f32 %v4068_v27  ;;  %vm12690_vm2 = vmmov %vm12683_vm6  ;;  %v12697_v57 = vld [vmem:[#allocation29_spill] sm:$0xff] }
 0x4b3   : > { %v12685_v37 = vand.u32 2147483647, %v10153_v14  ;;  %v4099_v54 = vadd.f32 %v2744_v8, %v12688_v30  ;;  %vm2837_vm5 = vweird.f32 %v12689_v31  ;;  %v3951_v10 = vshrl.u32 %v3950_v32, 30  ;;  %vm12695_vm15 = vmmov %vm12690_vm2 }
 0x4b4   : > { %vm2840_vm1 = vcmp.lt.s32.totalorder %v2839_v36, 2  ;;  %vm2841_vm3 = vcmp.eq.s32.totalorder %v2839_v36, 0  ;;  %vm2844_vm9 = vcmp.eq.s32.totalorder %v2839_v36, 2  ;;  %v4073_v48 = vand.u32 2147483647, %v4072_v12  ;;  %v12698_v36 = vld [vmem:[#allocation31_spill] sm:$0xff] }
 0x4b5   : > { %vm10437_vm7 = vcmp.le.f32.partialorder %v12685_v37, 0.7853982  ;;  %6728 = vmatprep.mubr.msk.f32.mxu0 %vm12690_vm2, %v4099_v54  ;;  %v2843_v1 = vsel %vm2841_vm3, %v12684_v2, %v2842_v16  ;;  %v2846_v51 = vsel %vm2844_vm9, %v2845_v58, %v9519_v9  ;;  %v2943_v35 = vand.u32 3, %v12691_v11  ;;  %v10448_v47 = vpop.eup %7167  ;;  %v12692_v9 = vld [vmem:[#allocation9_spill] sm:$0xff]  ;;  %v12700_v37 = vld [vmem:[#allocation18_spill] sm:$0xff] }
 0x4b6   : > { %v3952_v59 = vshll.u32 %v3951_v10, 30  ;;  %v3975_v43 = vsub.s32 4, %v3951_v10  ;;  %v2847_v39 = vsel %vm2840_vm1, %v2843_v1, %v2846_v51  ;;  %v2946_v50 = vxor.u32 2147483648, %v9803_v18  ;;  %v12703_v11 = vld [vmem:[#allocation10_spill] sm:$0xff] }
 0x4b7   : > { %7169 = vsinq.f32 %v3769_v4  ;;  %v4076_v21 = vmul.f32 %v4075_v29, %v4073_v48  ;;  %v3945_v13 = vadd.s32 %v10393_v15, %v10400_v45  ;;  %v2848_v61 = vsel %vm2837_vm5, nan, %v2847_v39  ;;  %v12694_v4 = vld [vmem:[#allocation40_spill] sm:$0xff]  ;;  %vm12702_vm5 = vmmov %vm12690_vm2 }
 0x4b8   : > { %v10454_v49 = vsub.s32 %v3949_v60, %v3952_v59  ;;  %v4100_v40 = vadd.f32 %v2848_v61, %v12692_v9  ;;  %vm2941_vm10 = vweird.f32 %v12693_v53  ;;  %vm2945_vm13 = vcmp.eq.s32.totalorder %v2943_v35, 0  ;;  %v12696_v45 = vld [vmem:[#allocation32_spill] sm:$0xff]  ;;  %v12706_v53 = vld [vmem:[#allocation34_spill] sm:$0xff] }
 0x4b9   : > { %v4077_v34 = vxor.u32 2147483648, %v4076_v21  ;;  %v10460_v28 = vsel %vm3891_vm4, %v3975_v43, %v3951_v10  ;;  %v2947_v17 = vsel %vm2945_vm13, %v12694_v4, %v2946_v50  ;;  %v2949_v55 = vxor.u32 2147483648, %v12694_v4  ;;  %v12701_v10 = vld [vmem:[#allocation43_spill] sm:$0xff]  ;;  %v12707_v4 = vld [vmem:[#allocation33_spill] sm:$0xff]  ;;  %vm12708_vm13 = vmmov %vm12702_vm5 }
 0x4ba   : > { %v3955_v15 = vsub.s32 0, %v10454_v49  ;;  %6729 = vmatmul.mubr.msk.f32.gmra.mrb[18].mxu0 %vm12695_vm15, %v4100_v40  ;;  %vm2944_vm8 = vcmp.lt.s32.totalorder %v2943_v35, 2  ;;  %vm2948_vm12 = vcmp.eq.s32.totalorder %v2943_v35, 2  ;;  %v3047_v60 = vand.u32 3, %v12696_v45  ;;  %v12704_v35 = vld [vmem:[#allocation21_spill] sm:$0xff] }
 0x4bb   : > { %v4078_v44 = vsel %vm3995_vm0, %v4077_v34, %v4076_v21  ;;  %v2950_v27 = vsel %vm2948_vm12, %v2949_v55, %v9803_v18  ;;  %v3050_v63 = vxor.u32 2147483648, %v12697_v57  ;;  %v3053_v32 = vxor.u32 2147483648, %v12698_v36  ;;  %v12699_v18 = vld [vmem:[#allocation22_spill] sm:$0xff] }
 0x4bc   : > { %v10475_v8 = vsel %vm10329_vm11, %v10135_v33, %v4078_v44  ;;  %v6447_v16 = vmin.u32 %v3955_v15, %v10454_v49  ;;  %v3978_v2 = vsel %vm10437_vm7, 0, %v10460_v28  ;;  %v2951_v58 = vsel %vm2944_vm8, %v2947_v17, %v2950_v27  ;;  %v12710_v27 = vld [vmem:[#allocation7_spill] sm:$0xff] }
 0x4bd   : > { %v2952_v12 = vsel %vm2941_vm10, nan, %v2951_v58  ;;  %vm3045_vm0 = vweird.f32 %v12699_v18  ;;  %vm3048_vm14 = vcmp.lt.s32.totalorder %v3047_v60, 2  ;;  %vm3049_vm6 = vcmp.eq.s32.totalorder %v3047_v60, 0 }
 0x4be   : > { %v3957_v29 = vclz %v6447_v16  ;;  %v4101_v30 = vadd.f32 %v2952_v12, %v12700_v37  ;;  %v3051_v20 = vsel %vm3049_vm6, %v12698_v36, %v3050_v63  ;;  %vm3052_vm11 = vcmp.eq.s32.totalorder %v3047_v60, 2  ;;  %v12709_v60 = vld [vmem:[#allocation12_spill] sm:$0xff] }
 0x4bf   : > { %7171 = vcosq.f32 %v10475_v8  ;;  %v3054_v54 = vsel %vm3052_vm11, %v3053_v32, %v12697_v57  ;;  %v3151_v31 = vand.u32 3, %v9869_v3  ;;  %v3154_v48 = vxor.u32 2147483648, %v12701_v10  ;;  %v12705_v3 = vld [vmem:[#allocation5_spill] sm:$0xff]  ;;  %v12711_v32 = vld [vmem:[#allocation39_spill] sm:$0xff] }
 0x4c0   : > { %v6448_v1 = vadd.s32 4294967294, %v3957_v29  ;;  %6731 = vmatprep.mubr.msk.f32.mxu0 %vm12702_vm5, %v4101_v30  ;;  %v3055_v51 = vsel %vm3048_vm14, %v3051_v20, %v3054_v54  ;;  %vm3149_vm1 = vweird.f32 %v12703_v11  ;;  %v3157_v59 = vxor.u32 2147483648, %v12704_v35  ;;  %v12713_v20 = vld [vmem:[#allocation37_spill] sm:$0xff] }
 0x4c1   : > { %v10493_v43 = vpop.eup %7169  ;;  %v3056_v39 = vsel %vm3045_vm0, nan, %v3055_v51  ;;  %vm3152_vm3 = vcmp.lt.s32.totalorder %v3151_v31, 2  ;;  %vm3153_vm9 = vcmp.eq.s32.totalorder %v3151_v31, 0  ;;  %vm3156_vm2 = vcmp.eq.s32.totalorder %v3151_v31, 2  ;;  %vm12712_vm0 = vmmov %vm12702_vm5  ;;  %v12714_v31 = vld [vmem:[#allocation35_spill] sm:$0xff] }
 0x4c2   : > { %vm6449_vm10 = vcmp.lt.s32.totalorder %v6448_v1, 0  ;;  %v4102_v50 = vadd.f32 %v3056_v39, %v12705_v3  ;;  %v3155_v21 = vsel %vm3153_vm9, %v12704_v35, %v3154_v48  ;;  %v3158_v61 = vsel %vm3156_vm2, %v3157_v59, %v12701_v10  ;;  %v12716_v35 = vld [vmem:[#allocation36_spill] sm:$0xff]  ;;  %v12717_v39 = vld [vmem:[#allocation13_spill] sm:$0xff]  ;;  %vm12719_vm9 = vmmov %vm12712_vm0 }
 0x4c3   : > { %v3960_v9 = vsel %vm6449_vm10, 0, %v6448_v1  ;;  %v3159_v40 = vsel %vm3152_vm3, %v3155_v21, %v3158_v61  ;;  %v3255_v34 = vand.u32 3, %v12706_v53  ;;  %v3258_v17 = vxor.u32 2147483648, %v12707_v4  ;;  %v12715_v1 = vld [vmem:[#allocation20_spill] sm:$0xff] }
 0x4c4   : > { %v3961_v55 = vsub.s32 32, %v3960_v9  ;;  %v3965_v15 = vsub.s32 4294967266, %v3960_v9  ;;  %6732 = vmatmul.mubr.msk.f32.gmra.mrb[20].mxu0 %vm12708_vm13, %v4102_v50  ;;  %v3160_v45 = vsel %vm3149_vm1, nan, %v3159_v40  ;;  %vm3253_vm15 = vweird.f32 %v12709_v60 }
 0x4c5   : > { %v3962_v44 = vshll.u32 %v10454_v49, %v3960_v9  ;;  %v4103_v57 = vadd.f32 %v3160_v45, %v12710_v27  ;;  %vm3256_vm8 = vcmp.lt.s32.totalorder %v3255_v34, 2  ;;  %vm3257_vm12 = vcmp.eq.s32.totalorder %v3255_v34, 0  ;;  %v12718_v9 = vld [vmem:[#allocation42_spill] sm:$0xff] }
 0x4c6   : > { %v3963_v63 = vshrl.u32 %v3945_v13, %v3961_v55  ;;  %v3966_v36 = vadd.s32 127, %v3965_v15  ;;  %v3259_v16 = vsel %vm3257_vm12, %v12711_v32, %v3258_v17  ;;  %v3261_v58 = vxor.u32 2147483648, %v12711_v32  ;;  %v12723_v32 = vld [vmem:[#allocation41_spill] sm:$0xff] }
 0x4c7   : > { %6734 = vmatprep.mubr.msk.f32.mxu0 %vm12712_vm0, %v4103_v57  ;;  %vm3260_vm14 = vcmp.eq.s32.totalorder %v3255_v34, 2  ;;  %v3359_v12 = vand.u32 3, %v10098_v26  ;;  %v3362_v18 = vxor.u32 2147483648, %v10177_v19  ;;  %v3365_v29 = vxor.u32 2147483648, %v10156_v22  ;;  %v12720_v34 = vld [vmem:[#allocation4_spill] sm:$0xff] }
 0x4c8   : > { %v3964_v49 = vor.u32 %v3963_v63, %v3962_v44  ;;  %v3967_v37 = vshll.u32 %v3966_v36, 23  ;;  %v3262_v30 = vsel %vm3260_vm14, %v3261_v58, %v12707_v4  ;;  %vm3357_vm6 = vweird.f32 %v12713_v20  ;;  %v12722_v63 = vld [vmem:[#allocation19_spill] sm:$0xff] }
 0x4c9   : > { %v10516_v13 = vpop.eup %7171  ;;  %v3263_v54 = vsel %vm3256_vm8, %v3259_v16, %v3262_v30  ;;  %vm3360_vm11 = vcmp.lt.s32.totalorder %v3359_v12, 2  ;;  %vm3361_vm5 = vcmp.eq.s32.totalorder %v3359_v12, 0  ;;  %vm3461_vm1 = vweird.f32 %v12714_v31  ;;  %v12727_v30 = vld [vmem:[#allocation24_spill] sm:$0xff] }
 0x4ca   : > { %v3968_v10 = vor.u32 4788187, %v3967_v37  ;;  %v3264_v26 = vsel %vm3253_vm15, nan, %v3263_v54  ;;  %v3363_v48 = vsel %vm3361_vm5, %v10156_v22, %v3362_v18  ;;  %vm3364_vm3 = vcmp.eq.s32.totalorder %v3359_v12, 2  ;;  %vm12721_vm15 = vmmov %vm12712_vm0  ;;  %v12725_v12 = vld [vmem:[#allocation15_spill] sm:$0xff] }
 0x4cb   : > { %v4104_v51 = vadd.f32 %v3264_v26, %v12715_v1  ;;  %v3366_v11 = vsel %vm3364_vm3, %v3365_v29, %v10177_v19  ;;  %v3463_v59 = vand.u32 3, %v12716_v35  ;;  %v3466_v3 = vxor.u32 2147483648, %v12717_v39  ;;  %v12729_v26 = vld [vmem:[#allocation30_spill] sm:$0xff]  ;;  %v12730_v1 = vld [vmem:[#allocation8_spill] sm:$0xff] }
 0x4cc   : > { %v3969_v50 = vand.u32 2147483647, %v3968_v10  ;;  %v3971_v21 = vcvt.s32.f32 %v3964_v49  ;;  %v3367_v61 = vsel %vm3360_vm11, %v3363_v48, %v3366_v11  ;;  %v3469_v40 = vxor.u32 2147483648, %v12718_v9  ;;  %v12726_v49 = vld [vmem:[#allocation16_spill] sm:$0xff] }
 0x4cd   : > { %6735 = vmatmul.mubr.msk.f32.gmra.mrb[22].mxu0 %vm12719_vm9, %v4104_v51  ;;  %v3368_v53 = vsel %vm3357_vm6, nan, %v3367_v61  ;;  %vm3464_vm2 = vcmp.lt.s32.totalorder %v3463_v59, 2  ;;  %vm3465_vm10 = vcmp.eq.s32.totalorder %v3463_v59, 0  ;;  %vm3468_vm13 = vcmp.eq.s32.totalorder %v3463_v59, 2  ;;  %vm12724_vm6 = vmmov %vm12719_vm9  ;;  %v12731_v59 = vld [vmem:[#allocation27_spill] sm:$0xff] }
 0x4ce   : > { %v3972_v22 = vmul.f32 %v3971_v21, %v3969_v50  ;;  %v4105_v19 = vadd.f32 %v3368_v53, %v12720_v34  ;;  %v3467_v4 = vsel %vm3465_vm10, %v12718_v9, %v3466_v3  ;;  %v3470_v17 = vsel %vm3468_vm13, %v3469_v40, %v12717_v39  ;;  %v12733_v9 = vld [vmem:[#allocation23_spill] sm:$0xff] }
 0x4cf   : > { %v3471_v55 = vsel %vm3464_vm2, %v3467_v4, %v3470_v17  ;;  %v3567_v15 = vand.u32 3, %v10140_v56  ;;  %v3570_v45 = vxor.u32 2147483648, %v10263_v23  ;;  %v3573_v60 = vxor.u32 2147483648, %v10260_v5  ;;  %v12735_v17 = vld [vmem:[#allocation11_spill] sm:$0xff] }
 0x4d0   : > { %7173 = vsinq.f32 %v10475_v8  ;;  %v3973_v44 = vxor.u32 2147483648, %v3972_v22  ;;  %6737 = vmatprep.mubr.msk.f32.mxu0 %vm12721_vm15, %v4105_v19  ;;  %v3472_v27 = vsel %vm3461_vm1, nan, %v3471_v55  ;;  %v3671_v57 = vand.u32 3, %v10100_v52  ;;  %vm12728_vm1 = vmmov %vm12724_vm6 }
 0x4d1   : > { %v4106_v36 = vadd.f32 %v3472_v27, %v12722_v63  ;;  %vm3565_vm8 = vweird.f32 %v12723_v32  ;;  %vm3569_vm12 = vcmp.eq.s32.totalorder %v3567_v15, 0  ;;  %vm3572_vm0 = vcmp.eq.s32.totalorder %v3567_v15, 2 }
 0x4d2   : > { %v3974_v56 = vsel %vm3891_vm4, %v3973_v44, %v3972_v22  ;;  %vm3568_vm14 = vcmp.lt.s32.totalorder %v3567_v15, 2  ;;  %v3571_v8 = vsel %vm3569_vm12, %v10260_v5, %v3570_v45  ;;  %v3574_v16 = vsel %vm3572_vm0, %v3573_v60, %v10263_v23 }
 0x4d3   : > { %v3977_v58 = vsel %vm10437_vm7, %v10153_v14, %v3974_v56  ;;  %6738 = vmatmul.mubr.msk.f32.gmra.mrb[24].mxu0 %vm12724_vm6, %v4106_v36  ;;  %v3575_v52 = vsel %vm3568_vm14, %v3571_v8, %v3574_v16  ;;  %vm3672_vm11 = vcmp.lt.s32.totalorder %v3671_v57, 2  ;;  %v3674_v18 = vxor.u32 2147483648, %v12725_v12  ;;  %vm12734_vm14 = vmmov %vm12728_vm1  ;;  %v12737_v36 = vld [vmem:[#allocation14_spill] sm:$0xff] }
 0x4d4   : > { %7175 = vcosq.f32 %v3977_v58  ;;  %v3576_v29 = vsel %vm3565_vm8, nan, %v3575_v52  ;;  %vm3673_vm5 = vcmp.eq.s32.totalorder %v3671_v57, 0  ;;  %v3677_v37 = vxor.u32 2147483648, %v12726_v49  ;;  %vm12732_vm8 = vmmov %vm12728_vm1  ;;  %v10594_v8 = vld [vmem:[%s12125_s6] ss:$0 sm:$0xff] }
 0x4d5   : > { %7177 = vsinq.f32 %v3977_v58  ;;  %v4107_v5 = vadd.f32 %v3576_v29, %v12727_v30  ;;  %v3675_v23 = vsel %vm3673_vm5, %v12726_v49, %v3674_v18  ;;  %vm3676_vm4 = vcmp.eq.s32.totalorder %v3671_v57, 2 }
 0x4d6   : > { %v3678_v20 = vsel %vm3676_vm4, %v3677_v37, %v12725_v12  ;;  %v3775_v54 = vand.u32 3, %v10311_v0  ;;  %v3778_v31 = vxor.u32 2147483648, %v10493_v43  ;;  %v3781_v10 = vxor.u32 2147483648, %v10448_v47  ;;  %vm12736_vm4 = vmmov %vm12728_vm1 }
 0x4d7   : > { %6740 = vmatprep.mubr.msk.f32.mxu0 %vm12728_vm1, %v4107_v5  ;;  %vm3669_vm3 = vweird.f32 %v12729_v26  ;;  %v3679_v48 = vsel %vm3672_vm11, %v3675_v23, %v3678_v20  ;;  %v3879_v51 = vand.u32 3, %v12730_v1  ;;  %v3882_v11 = vxor.u32 2147483648, %v10344_v25 }
 0x4d8   : > { %v3982_v35 = vadd.s32 3, %v3978_v2  ;;  %v3680_v0 = vsel %vm3669_vm3, nan, %v3679_v48  ;;  %vm3777_vm9 = vcmp.eq.s32.totalorder %v3775_v54, 0  ;;  %vm3780_vm2 = vcmp.eq.s32.totalorder %v3775_v54, 2 }
 0x4d9   : > { %v4108_v39 = vadd.f32 %v3680_v0, %v12731_v59  ;;  %vm3776_vm10 = vcmp.lt.s32.totalorder %v3775_v54, 2  ;;  %v3779_v3 = vsel %vm3777_vm9, %v10448_v47, %v3778_v31  ;;  %v3782_v50 = vsel %vm3780_vm2, %v3781_v10, %v10493_v43 }
 0x4da   : > { %v7174_v21 = vpop.eup %7173  ;;  %vm3773_vm13 = vweird.f32 %v9932_v62  ;;  %v3783_v61 = vsel %vm3776_vm10, %v3779_v3, %v3782_v50  ;;  %vm3881_vm15 = vcmp.eq.s32.totalorder %v3879_v51, 0  ;;  %v3885_v42 = vxor.u32 2147483648, %v10341_v41 }
 0x4db   : > { %6741 = vmatmul.mubr.msk.f32.gmra.mrb[26].mxu0 %vm12732_vm8, %v4108_v39  ;;  %v3784_v28 = vsel %vm3773_vm13, nan, %v3783_v61  ;;  %vm3880_vm7 = vcmp.lt.s32.totalorder %v3879_v51, 2  ;;  %v3883_v2 = vsel %vm3881_vm15, %v10341_v41, %v3882_v11  ;;  %vm3884_vm12 = vcmp.eq.s32.totalorder %v3879_v51, 2  ;;  %vm12739_vm13 = vmmov %vm12736_vm4 }
 0x4dc   : > { %v4109_v40 = vadd.f32 %v3784_v28, %v12733_v9  ;;  %v3886_v47 = vsel %vm3884_vm12, %v3885_v42, %v10344_v25  ;;  %v3983_v53 = vand.u32 3, %v3982_v35  ;;  %v4087_v43 = vand.u32 3, %v10386_v46  ;;  %vm12740_vm15 = vmmov %vm12736_vm4 }
 0x4dd   : > { %vm3877_vm0 = vweird.f32 %v9919_v38  ;;  %v3887_v62 = vsel %vm3880_vm7, %v3883_v2, %v3886_v47  ;;  %v4090_v19 = vxor.u32 2147483648, %v7174_v21  ;;  %v4093_v15 = vxor.u32 2147483648, %v10516_v13 }
 0x4de   : > { %v7176_v22 = vpop.eup %7175  ;;  %6743 = vmatprep.mubr.msk.f32.mxu0 %vm12734_vm14, %v4109_v40  ;;  %v3888_v34 = vsel %vm3877_vm0, nan, %v3887_v62  ;;  %vm4089_vm6 = vcmp.eq.s32.totalorder %v4087_v43, 0  ;;  %vm3988_vm11 = vcmp.eq.s32.totalorder %v3983_v53, 2  ;;  %vm4092_vm5 = vcmp.eq.s32.totalorder %v4087_v43, 2 }
 0x4df   : > { %v7178_v4 = vpop.eup %7177  ;;  %v4110_v55 = vadd.f32 %v3888_v34, %v12735_v17  ;;  %v3989_v41 = vxor.u32 2147483648, %v7176_v22  ;;  %v4091_v25 = vsel %vm4089_vm6, %v10516_v13, %v4090_v19  ;;  %vm3985_vm1 = vcmp.eq.s32.totalorder %v3983_v53, 0  ;;  %v12738_v13 = vld [vmem:[#allocation26_spill] sm:$0xff] }
 0x4e0   : > { %v3986_v45 = vxor.u32 2147483648, %v7178_v4  ;;  %vm4088_vm3 = vcmp.lt.s32.totalorder %v4087_v43, 2  ;;  %v4094_v46 = vsel %vm4092_vm5, %v4093_v15, %v7174_v21  ;;  %vm3984_vm9 = vcmp.lt.s32.totalorder %v3983_v53, 2 }
 0x4e1   : > { %6744 = vmatmul.mubr.msk.f32.gmra.mrb[28].mxu0 %vm12736_vm4, %v4110_v55  ;;  %v3990_v38 = vsel %vm3988_vm11, %v3989_v41, %v7178_v4  ;;  %vm4085_vm2 = vweird.f32 %v10135_v33  ;;  %v4095_v44 = vsel %vm4088_vm3, %v4091_v25, %v4094_v46  ;;  %vm3981_vm10 = vweird.f32 %v10153_v14 }
 0x4e2   : > { %v3987_v60 = vsel %vm3985_vm1, %v7176_v22, %v3986_v45  ;;  %v4096_v57 = vsel %vm4085_vm2, nan, %v4095_v44  ;;  %v12743_v40 = vmov 2475754826   ;;  %v12744_v53 = vmov 2131351028  }
 0x4e3   : > { %v3991_v27 = vsel %vm3984_vm9, %v3987_v60, %v3990_v38  ;;  %v4112_v56 = vadd.f32 %v4096_v57, %v12738_v13  ;;  %v12745_v62 = vmov 2102212464  }
 0x4e4   : > { %v3992_v63 = vsel %vm3981_vm10, nan, %v3991_v27 }
 0x4e5   : > { %v4111_v32 = vadd.f32 %v3992_v63, %v12737_v36 }
 0x4e7   : > { %6746 = vmatprep.mubr.msk.f32.mxu0 %vm12739_vm13, %v4111_v32 }
 0x4e8   : > { %6747 = vmatmul.mubr.msk.f32.gmra.mrb[30].mxu0 %vm12740_vm15, %v4112_v56 }
 0x585   : > { %v6727_v33 = vpop.f32.mrb[16].mxu0 }
 0x586   : > { %v10597_v16 = vadd.f32 %v6727_v33, %v10594_v8  ;;  %v4242_v14 = vpop.f32.mrb[17].mxu0 }
 0x587   : > { %v10600_v58 = vadd.f32 %v10594_v8, %v4242_v14 }
 0x588   : > { %12741 = vst [vmem:[#allocation6_spill] sm:$0xff] %v10597_v16  ;;  %v4425_v52 = vand.u32 2147483647, %v10597_v16  ;;  %v4428_v12 = vand.u32 2139095040, %v10597_v16 }
 0x589   : > { %v4321_v18 = vand.u32 2147483647, %v10600_v58  ;;  %v4324_v29 = vand.u32 2139095040, %v10600_v58 }
 0x58a   : > { %v4429_v49 = vshrl.u32 %v4428_v12, 23  ;;  %v4432_v37 = vand.u32 8388607, %v4425_v52 }
 0x58b   : > { %v4325_v30 = vshrl.u32 %v4324_v29, 23  ;;  %v4328_v5 = vand.u32 8388607, %v4321_v18 }
 0x58c   : > { %v6475_v23 = vadd.s32 4294967169, %v4429_v49  ;;  %v4433_v48 = vor.u32 8388608, %v4432_v37 }
 0x58d   : > { %v6471_v20 = vadd.s32 4294967169, %v4325_v30  ;;  %v6730_v54 = vpop.f32.mrb[18].mxu0  ;;  %v4329_v1 = vor.u32 8388608, %v4328_v5 }
 0x58e   : > { %v4435_v31 = vadd.s32 1, %v6475_v23  ;;  %v10611_v10 = vadd.f32 %v6730_v54, %v10594_v8  ;;  %v10613_v26 = vpop.f32.mrb[19].mxu0  ;;  %v10616_v3 = vshll.u32 %v4433_v48, 8 }
 0x58f   : > { %v4331_v51 = vadd.s32 1, %v6471_v20  ;;  %v10620_v21 = vshll.u32 %v4329_v1, 8 }
 0x590   : > { %12742 = vst [vmem:[#allocation28_spill] sm:$0xff] %v10611_v10  ;;  %vm4436_vm8 = vcmp.gt.s32.totalorder %v4435_v31, 0  ;;  %v4636_v11 = vand.u32 2139095040, %v10611_v10  ;;  %v12306_v61 = vand.u32 2147483647, %v10611_v10 }
 0x591   : > { %v4437_v35 = vsel %vm4436_vm8, %v4435_v31, 0  ;;  %vm4332_vm7 = vcmp.gt.s32.totalorder %v4331_v51, 0 }
 0x592   : > { %v4438_v0 = vshrl.u32 %v4437_v35, 5  ;;  %v4439_v59 = vand.u32 31, %v4437_v35  ;;  %v4333_v39 = vsel %vm4332_vm7, %v4331_v51, 0  ;;  %v10624_v9 = vshrl.u32 %v4636_v11, 23 }
 0x593   : > { %v10618_v50 = vshrl.u32 %v4333_v39, 5  ;;  %v4335_v2 = vand.u32 31, %v4333_v39 }
 0x594   : > { %v4440_v42 = vsub.s32 32, %v4439_v59  ;;  %v4442_v28 = vshll.u32 %v12597_v24, %v4439_v59  ;;  %v4445_v47 = vshll.u32 %v12743_v40, %v4439_v59  ;;  %v4448_v43 = vshll.u32 %v12744_v53, %v4439_v59 }
 0x595   : > { %v4451_v22 = vshll.u32 %v12745_v62, %v4439_v59  ;;  %v4454_v34 = vshll.u32 %v12601_v6, %v4439_v59  ;;  %vm4457_vm12 = vcmp.lt.s32.totalorder %v4438_v0, 1  ;;  %vm4458_vm0 = vcmp.lt.s32.totalorder %v4438_v0, 2 }
 0x596   : > { %v4443_v19 = vshrl.u32 %v12743_v40, %v4440_v42  ;;  %v4446_v4 = vshrl.u32 %v12744_v53, %v4440_v42  ;;  %v4449_v17 = vshrl.u32 %v12745_v62, %v4440_v42  ;;  %v4441_v55 = vshrl.u32 %v12597_v24, %v4440_v42 }
 0x597   : > { %v4452_v41 = vshrl.u32 %v12601_v6, %v4440_v42  ;;  %v4455_v15 = vshrl.u32 %v12602_v7, %v4440_v42  ;;  %v10636_v45 = vpop.f32.mrb[20].mxu0  ;;  %v4336_v60 = vsub.s32 32, %v4335_v2  ;;  %vm4459_vm14 = vcmp.lt.s32.totalorder %v4438_v0, 3 }
 0x598   : > { %v4444_v25 = vor.u32 %v4443_v19, %v4442_v28  ;;  %v4447_v38 = vor.u32 %v4446_v4, %v4445_v47  ;;  %v4450_v46 = vor.u32 %v4449_v17, %v4448_v43  ;;  %v10638_v44 = vpop.f32.mrb[21].mxu0  ;;  %vm4460_vm6 = vcmp.lt.s32.totalorder %v4438_v0, 4 }
 0x599   : > { %v4453_v27 = vor.u32 %v4452_v41, %v4451_v22  ;;  %v4456_v57 = vor.u32 %v4455_v15, %v4454_v34  ;;  %v4338_v12 = vshll.u32 %v12597_v24, %v4335_v2  ;;  %v4339_v37 = vshrl.u32 %v12743_v40, %v4336_v60 }
 0x59a   : > { %v4461_v63 = vsel %vm4457_vm12, %v4441_v55, %v4444_v25  ;;  %v4462_v36 = vsel %vm4460_vm6, %v4450_v46, 2102212464  ;;  %v4465_v32 = vsel %vm4457_vm12, %v4444_v25, %v4447_v38  ;;  %v4469_v13 = vsel %vm4457_vm12, %v4447_v38, %v4450_v46 }
 0x59b   : > { %v4463_v56 = vsel %vm4459_vm14, %v4447_v38, %v4462_v36  ;;  %v4466_v33 = vsel %vm4460_vm6, %v4453_v27, 920167782  ;;  %v4470_v14 = vsel %vm4460_vm6, %v4456_v57, 1326507024  ;;  %v4341_v30 = vshll.u32 %v12743_v40, %v4335_v2 }
 0x59c   : > { %v4467_v29 = vsel %vm4459_vm14, %v4450_v46, %v4466_v33  ;;  %v4471_v49 = vsel %vm4459_vm14, %v4453_v27, %v4470_v14  ;;  %v4464_v5 = vsel %vm4458_vm0, %v4461_v63, %v4463_v56  ;;  %v4342_v54 = vshrl.u32 %v12744_v53, %v4336_v60 }
 0x59d   : > { %v4468_v23 = vsel %vm4458_vm0, %v4465_v32, %v4467_v29  ;;  %v4472_v20 = vsel %vm4458_vm0, %v4469_v13, %v4471_v49  ;;  %v4340_v11 = vor.u32 %v4339_v37, %v4338_v12  ;;  %v4344_v59 = vshll.u32 %v12744_v53, %v4335_v2 }
 0x59e   : > { %v10651_v31 = vmul.u32.u64.low %v10616_v3, %v4472_v20  ;;  %v10652_v48 = vmul.u32.u64.high %v10616_v3, %v4472_v20, %v10651_v31  ;;  %v10655_v1 = vmul.u32.u64.low %v10616_v3, %v4468_v23  ;;  %v10656_v51 = vmul.u32.u64.high %v10616_v3, %v4468_v23, %v10655_v1 }
 0x59f   : > { %v4343_v35 = vor.u32 %v4342_v54, %v4341_v30  ;;  %v4345_v39 = vshrl.u32 %v12745_v62, %v4336_v60  ;;  %v4337_v0 = vshrl.u32 %v12597_v24, %v4336_v60  ;;  %v4347_v42 = vshll.u32 %v12745_v62, %v4335_v2 }
 0x5a0   : > { %v4348_v28 = vshrl.u32 %v12601_v6, %v4336_v60  ;;  %v4351_v47 = vshrl.u32 %v12602_v7, %v4336_v60  ;;  %v10665_v43 = vpop.f32.mrb[22].mxu0  ;;  %v4480_v22 = vmul.u32 %v10616_v3, %v4464_v5  ;;  %v4350_v19 = vshll.u32 %v12601_v6, %v4335_v2 }
 0x5a1   : > { %v4346_v34 = vor.u32 %v4345_v39, %v4344_v59  ;;  %vm4353_vm11 = vcmp.lt.s32.totalorder %v10618_v50, 1  ;;  %v10670_v4 = vpop.f32.mrb[23].mxu0  ;;  %vm4482_vm5 = vc.u32 %v10652_v48, %v10655_v1  ;;  %v4483_v17 = vadd.s32 1, %v10656_v51 }
 0x5a2   : > { %v4349_v55 = vor.u32 %v4348_v28, %v4347_v42  ;;  %vm4354_vm4 = vcmp.lt.s32.totalorder %v10618_v50, 2  ;;  %v4352_v41 = vor.u32 %v4351_v47, %v4350_v19  ;;  %vm4355_vm1 = vcmp.lt.s32.totalorder %v10618_v50, 3 }
 0x5a3   : > { %vm4356_vm3 = vcmp.lt.s32.totalorder %v10618_v50, 4  ;;  %v4361_v3 = vsel %vm4353_vm11, %v4340_v11, %v4343_v35  ;;  %v4484_v2 = vsel %vm4482_vm5, %v4483_v17, %v10656_v51  ;;  %v4365_v38 = vsel %vm4353_vm11, %v4343_v35, %v4346_v34 }
 0x5a4   : > { %v4358_v15 = vsel %vm4356_vm3, %v4346_v34, 2102212464  ;;  %v4362_v25 = vsel %vm4356_vm3, %v4349_v55, 920167782  ;;  %v4485_v46 = vadd.s32 %v4484_v2, %v4480_v22  ;;  %v4357_v60 = vsel %vm4353_vm11, %v4337_v0, %v4340_v11 }
 0x5a5   : > { %v4363_v27 = vsel %vm4355_vm1, %v4346_v34, %v4362_v25  ;;  %v4366_v57 = vsel %vm4356_vm3, %v4352_v41, 1326507024  ;;  %v4359_v63 = vsel %vm4355_vm1, %v4343_v35, %v4358_v15  ;;  %v6483_v13 = vadd.s32 4294967169, %v10624_v9 }
 0x5a6   : > { %v4364_v36 = vsel %vm4354_vm4, %v4361_v3, %v4363_v27  ;;  %v4367_v32 = vsel %vm4355_vm1, %v4349_v55, %v4366_v57  ;;  %v10682_v56 = vpop.f32.mrb[24].mxu0  ;;  %v4486_v33 = vadd.s32 536870912, %v4485_v46  ;;  %v4640_v30 = vand.u32 8388607, %v12306_v61 }
 0x5a7   : > { %v4368_v14 = vsel %vm4354_vm4, %v4365_v38, %v4367_v32  ;;  %v10687_v12 = vmul.u32.u64.low %v10620_v21, %v4364_v36  ;;  %v10688_v29 = vmul.u32.u64.high %v10620_v21, %v4364_v36, %v10687_v12  ;;  %v10697_v5 = vpop.f32.mrb[25].mxu0  ;;  %v4360_v23 = vsel %vm4354_vm4, %v4357_v60, %v4359_v63 }
 0x5a8   : > { %v10692_v49 = vmul.u32.u64.low %v10620_v21, %v4368_v14  ;;  %v10693_v37 = vmul.u32.u64.high %v10620_v21, %v4368_v14, %v10692_v49  ;;  %v10699_v9 = vshrl.u32 %v4486_v33, 30  ;;  %v4643_v20 = vadd.s32 1, %v6483_v13 }
 0x5a9   : > { %v4379_v31 = vadd.s32 1, %v10688_v29  ;;  %v10707_v51 = vadd.f32 %v10594_v8, %v10613_v26  ;;  %v4376_v11 = vmul.u32 %v10620_v21, %v4360_v23  ;;  %v4641_v35 = vor.u32 8388608, %v4640_v30 }
 0x5aa   : > { %v4488_v54 = vshll.u32 %v10699_v9, 30  ;;  %vm4644_vm9 = vcmp.gt.s32.totalorder %v4643_v20, 0  ;;  %vm4378_vm2 = vc.u32 %v10693_v37, %v10687_v12  ;;  %vm4427_vm3 = vcmp.lt.s32.totalorder %v10597_v16, 0 }
 0x5ab   : > { %12746 = vst [vmem:[#allocation3_spill] sm:$0xff] %v10707_v51  ;;  %v4645_v59 = vsel %vm4644_vm9, %v4643_v20, 0  ;;  %v4380_v50 = vsel %vm4378_vm2, %v4379_v31, %v10688_v29  ;;  %v12305_v47 = vand.u32 2147483647, %v10707_v51  ;;  %v4532_v26 = vand.u32 2139095040, %v10707_v51 }
 0x5ac   : > { %v10712_v39 = vsub.s32 %v4485_v46, %v4488_v54  ;;  %v4381_v0 = vadd.s32 %v4380_v50, %v4376_v11  ;;  %v4647_v42 = vand.u32 31, %v4645_v59  ;;  %v4646_v34 = vshrl.u32 %v4645_v59, 5 }
 0x5ad   : > { %v10718_v19 = vshll.u32 %v4641_v35, 8  ;;  %v4533_v49 = vshrl.u32 %v4532_v26, 23 }
 0x5ae   : > { %v4491_v28 = vsub.s32 0, %v10712_v39  ;;  %v4382_v22 = vadd.s32 536870912, %v4381_v0  ;;  %v4648_v21 = vsub.s32 32, %v4647_v42  ;;  %v4650_v55 = vshll.u32 %v12597_v24, %v4647_v42 }
 0x5af   : > { %v4653_v41 = vshll.u32 %v12743_v40, %v4647_v42  ;;  %v4656_v3 = vshll.u32 %v12744_v53, %v4647_v42  ;;  %v4659_v38 = vshll.u32 %v12745_v62, %v4647_v42  ;;  %v4662_v13 = vshll.u32 %v12601_v6, %v4647_v42 }
 0x5b0   : > { %v6476_v17 = vmin.u32 %v4491_v28, %v10712_v39  ;;  %v10724_v2 = vshrl.u32 %v4382_v22, 30  ;;  %v4651_v15 = vshrl.u32 %v12743_v40, %v4648_v21  ;;  %v4654_v25 = vshrl.u32 %v12744_v53, %v4648_v21 }
 0x5b1   : > { %v4657_v60 = vshrl.u32 %v12745_v62, %v4648_v21  ;;  %v4660_v27 = vshrl.u32 %v12601_v6, %v4648_v21  ;;  %v4663_v57 = vshrl.u32 %v12602_v7, %v4648_v21  ;;  %vm4665_vm10 = vcmp.lt.s32.totalorder %v4646_v34, 1 }
 0x5b2   : > { %v4493_v46 = vclz %v6476_v17  ;;  %v4384_v63 = vshll.u32 %v10724_v2, 30  ;;  %v4652_v36 = vor.u32 %v4651_v15, %v4650_v55  ;;  %v4655_v32 = vor.u32 %v4654_v25, %v4653_v41 }
 0x5b3   : > { %v4658_v14 = vor.u32 %v4657_v60, %v4656_v3  ;;  %v4661_v29 = vor.u32 %v4660_v27, %v4659_v38  ;;  %v4664_v23 = vor.u32 %v4663_v57, %v4662_v13  ;;  %vm4668_vm13 = vcmp.lt.s32.totalorder %v4646_v34, 4 }
 0x5b4   : > { %v6477_v33 = vadd.s32 4294967294, %v4493_v46  ;;  %v10734_v30 = vsub.s32 %v4381_v0, %v4384_v63  ;;  %vm4667_vm8 = vcmp.lt.s32.totalorder %v4646_v34, 3  ;;  %v4673_v20 = vsel %vm4665_vm10, %v4652_v36, %v4655_v32 }
 0x5b5   : > { %v4674_v54 = vsel %vm4668_vm13, %v4661_v29, 920167782  ;;  %v4670_v35 = vsel %vm4668_vm13, %v4658_v14, 2102212464  ;;  %v4649_v42 = vshrl.u32 %v12597_v24, %v4648_v21  ;;  %vm4666_vm7 = vcmp.lt.s32.totalorder %v4646_v34, 2 }
 0x5b6   : > { %vm6478_vm15 = vcmp.lt.s32.totalorder %v6477_v33, 0  ;;  %v4387_v11 = vsub.s32 0, %v10734_v30  ;;  %v4675_v59 = vsel %vm4667_vm8, %v4658_v14, %v4674_v54  ;;  %v4677_v0 = vsel %vm4665_vm10, %v4655_v32, %v4658_v14 }
 0x5b7   : > { %v4496_v31 = vsel %vm6478_vm15, 0, %v6477_v33  ;;  %v4676_v26 = vsel %vm4666_vm7, %v4673_v20, %v4675_v59  ;;  %v4678_v22 = vsel %vm4668_vm13, %v4664_v23, 1326507024  ;;  %v6479_v17 = vadd.s32 4294967169, %v4533_v49  ;;  %v10771_v59 = vpop.f32.mrb[26].mxu0 }
 0x5b8   : > { %v4501_v50 = vsub.s32 4294967266, %v4496_v31  ;;  %v6472_v28 = vmin.u32 %v4387_v11, %v10734_v30  ;;  %v4497_v55 = vsub.s32 32, %v4496_v31  ;;  %v4669_v41 = vsel %vm4665_vm10, %v4649_v42, %v4652_v36 }
 0x5b9   : > { %v4671_v3 = vsel %vm4667_vm8, %v4655_v32, %v4670_v35  ;;  %v4679_v15 = vsel %vm4667_vm8, %v4661_v29, %v4678_v22  ;;  %v10748_v21 = vmul.u32.u64.low %v10718_v19, %v4676_v26  ;;  %v10749_v46 = vmul.u32.u64.high %v10718_v19, %v4676_v26, %v10748_v21 }
 0x5ba   : > { %v4389_v25 = vclz %v6472_v28  ;;  %v4680_v38 = vsel %vm4666_vm7, %v4677_v0, %v4679_v15  ;;  %v4502_v60 = vadd.s32 127, %v4501_v50  ;;  %v4481_v63 = vadd.s32 %v10655_v1, %v10652_v48 }
 0x5bb   : > { %v10753_v27 = vmul.u32.u64.low %v10718_v19, %v4680_v38  ;;  %v10754_v57 = vmul.u32.u64.high %v10718_v19, %v4680_v38, %v10753_v27  ;;  %v4672_v32 = vsel %vm4666_vm7, %v4669_v41, %v4671_v3  ;;  %v4539_v13 = vadd.s32 1, %v6479_v17 }
 0x5bc   : > { %v6473_v36 = vadd.s32 4294967294, %v4389_v25  ;;  %v4536_v33 = vand.u32 8388607, %v12305_v47  ;;  %v4499_v14 = vshrl.u32 %v4481_v63, %v4497_v55  ;;  %v4691_v29 = vadd.s32 1, %v10749_v46 }
 0x5bd   : > { %vm4540_vm0 = vcmp.gt.s32.totalorder %v4539_v13, 0  ;;  %v4503_v49 = vshll.u32 %v4502_v60, 23  ;;  %v4688_v20 = vmul.u32 %v10718_v19, %v4672_v32  ;;  %vm4690_vm14 = vc.u32 %v10754_v57, %v10748_v21 }
 0x5be   : > { %vm6474_vm12 = vcmp.lt.s32.totalorder %v6473_v36, 0  ;;  %v4498_v48 = vshll.u32 %v10712_v39, %v4496_v31  ;;  %v4692_v34 = vsel %vm4690_vm14, %v4691_v29, %v10749_v46  ;;  %v4541_v11 = vsel %vm4540_vm0, %v4539_v13, 0 }
 0x5bf   : > { %v4392_v23 = vsel %vm6474_vm12, 0, %v6473_v36  ;;  %v4693_v54 = vadd.s32 %v4692_v34, %v4688_v20  ;;  %v10769_v35 = vadd.f32 %v10636_v45, %v10594_v8  ;;  %v4537_v0 = vor.u32 8388608, %v4536_v33 }
 0x5c0   : > { %v4397_v1 = vsub.s32 4294967266, %v4392_v23  ;;  %v4500_v50 = vor.u32 %v4499_v14, %v4498_v48  ;;  %v4393_v42 = vsub.s32 32, %v4392_v23  ;;  %v4543_v19 = vand.u32 31, %v4541_v11 }
 0x5c1   : > { %12747 = vst [vmem:[#allocation25_spill] sm:$0xff] %v10769_v35  ;;  %v4504_v28 = vor.u32 4788187, %v4503_v49  ;;  %v4694_v26 = vadd.s32 536870912, %v4693_v54  ;;  %v4377_v39 = vadd.s32 %v10687_v12, %v10693_v37  ;;  %v4511_v17 = vsub.s32 4, %v10699_v9 }
 0x5c2   : > { %v4398_v31 = vadd.s32 127, %v4397_v1  ;;  %v4544_v22 = vsub.s32 32, %v4543_v19  ;;  %v4844_v45 = vand.u32 2139095040, %v10769_v35  ;;  %v4507_v41 = vcvt.s32.f32 %v4500_v50 }
 0x5c3   : > { %v10776_v55 = vshrl.u32 %v4694_v26, 30  ;;  %v4395_v3 = vshrl.u32 %v4377_v39, %v4393_v42  ;;  %v10779_v15 = vshll.u32 %v4537_v0, 8  ;;  %v12304_v25 = vand.u32 2147483647, %v10769_v35 }
 0x5c4   : > { %v4505_v38 = vand.u32 2147483647, %v4504_v28  ;;  %v4394_v46 = vshll.u32 %v10734_v30, %v4392_v23  ;;  %v4547_v12 = vshrl.u32 %v12743_v40, %v4544_v22  ;;  %v4399_v37 = vshll.u32 %v4398_v31, 23 }
 0x5c5   : > { %v4696_v60 = vshll.u32 %v10776_v55, 30  ;;  %v4546_v27 = vshll.u32 %v12597_v24, %v4543_v19  ;;  %v4550_v63 = vshrl.u32 %v12744_v53, %v4544_v22  ;;  %v4553_v36 = vshrl.u32 %v12745_v62, %v4544_v22 }
 0x5c6   : > { %v4549_v13 = vshll.u32 %v12743_v40, %v4543_v19  ;;  %v4552_v33 = vshll.u32 %v12744_v53, %v4543_v19  ;;  %v4845_v14 = vshrl.u32 %v4844_v45, 23  ;;  %v4396_v29 = vor.u32 %v4395_v3, %v4394_v46 }
 0x5c7   : > { %v10788_v32 = vsub.s32 %v4693_v54, %v4696_v60  ;;  %v4542_v30 = vshrl.u32 %v4541_v11, 5  ;;  %v4548_v49 = vor.u32 %v4547_v12, %v4546_v27  ;;  %v4555_v23 = vshll.u32 %v12745_v62, %v4543_v19 }
 0x5c8   : > { %v4551_v48 = vor.u32 %v4550_v63, %v4549_v13  ;;  %v4554_v1 = vor.u32 %v4553_v36, %v4552_v33  ;;  %v4556_v34 = vshrl.u32 %v12601_v6, %v4544_v22  ;;  %v4508_v50 = vmul.f32 %v4507_v41, %v4505_v38 }
 0x5c9   : > { %v4699_v20 = vsub.s32 0, %v10788_v32  ;;  %v4400_v42 = vor.u32 4788187, %v4399_v37  ;;  %v4558_v54 = vshll.u32 %v12601_v6, %v4543_v19  ;;  %v4559_v0 = vshrl.u32 %v12602_v7, %v4544_v22  ;;  %v10801_v37 = vpop.f32.mrb[27].mxu0 }
 0x5ca   : > { %v4557_v26 = vor.u32 %v4556_v34, %v4555_v23  ;;  %v6491_v39 = vadd.s32 4294967169, %v4845_v14  ;;  %v4848_v11 = vand.u32 8388607, %v12304_v25  ;;  %v4403_v31 = vcvt.s32.f32 %v4396_v29 }
 0x5cb   : > { %v6484_v28 = vmin.u32 %v4699_v20, %v10788_v32  ;;  %v4560_v45 = vor.u32 %v4559_v0, %v4558_v54  ;;  %vm4561_vm6 = vcmp.lt.s32.totalorder %v4542_v30, 1  ;;  %vm4564_vm11 = vcmp.lt.s32.totalorder %v4542_v30, 4 }
 0x5cc   : > { %v4545_v46 = vshrl.u32 %v12597_v24, %v4544_v22  ;;  %v4566_v41 = vsel %vm4564_vm11, %v4554_v1, 2102212464  ;;  %v4569_v38 = vsel %vm4561_vm6, %v4548_v49, %v4551_v48  ;;  %v4401_v60 = vand.u32 2147483647, %v4400_v42 }
 0x5cd   : > { %v4701_v3 = vclz %v6484_v28  ;;  %vm4563_vm5 = vcmp.lt.s32.totalorder %v4542_v30, 3  ;;  %v4570_v19 = vsel %vm4564_vm11, %v4557_v26, 920167782  ;;  %v4573_v12 = vsel %vm4561_vm6, %v4551_v48, %v4554_v1 }
 0x5ce   : > { %vm4562_vm4 = vcmp.lt.s32.totalorder %v4542_v30, 2  ;;  %v4571_v63 = vsel %vm4563_vm5, %v4554_v1, %v4570_v19  ;;  %v4574_v36 = vsel %vm4564_vm11, %v4560_v45, 1326507024  ;;  %v4565_v13 = vsel %vm4561_vm6, %v4545_v46, %v4548_v49 }
 0x5cf   : > { %v6485_v27 = vadd.s32 4294967294, %v4701_v3  ;;  %v4567_v33 = vsel %vm4563_vm5, %v4551_v48, %v4566_v41  ;;  %v4572_v14 = vsel %vm4562_vm4, %v4569_v38, %v4571_v63  ;;  %v4575_v29 = vsel %vm4563_vm5, %v4557_v26, %v4574_v36 }
 0x5d0   : > { %v4576_v22 = vsel %vm4562_vm4, %v4573_v12, %v4575_v29  ;;  %v10806_v23 = vmul.u32.u64.low %v10779_v15, %v4572_v14  ;;  %v10807_v20 = vmul.u32.u64.high %v10779_v15, %v4572_v14, %v10806_v23  ;;  %v4851_v1 = vadd.s32 1, %v6491_v39 }
 0x5d1   : > { %vm6486_vm1 = vcmp.lt.s32.totalorder %v6485_v27, 0  ;;  %v10813_v42 = vmul.u32.u64.low %v10779_v15, %v4576_v22  ;;  %v10814_v54 = vmul.u32.u64.high %v10779_v15, %v4576_v22, %v10813_v42  ;;  %v4509_v49 = vxor.u32 2147483648, %v4508_v50 }
 0x5d2   : > { %v10810_v34 = vsel %vm6486_vm1, 0, %v6485_v27  ;;  %v10816_v48 = vmul.f32 %v4403_v31, %v4401_v60  ;;  %v4568_v28 = vsel %vm4562_vm4, %v4565_v13, %v4567_v33  ;;  %v4849_v26 = vor.u32 8388608, %v4848_v11 }
 0x5d3   : > { %v4709_v0 = vsub.s32 4294967266, %v10810_v34  ;;  %vm4852_vm9 = vcmp.gt.s32.totalorder %v4851_v1, 0  ;;  %v10823_v45 = vadd.f32 %v10594_v8, %v10638_v44  ;;  %v10828_v3 = vsel %vm4427_vm3, %v4511_v17, %v10699_v9 }
 0x5d4   : > { %v4587_v31 = vadd.s32 1, %v10807_v20  ;;  %v4853_v46 = vsel %vm4852_vm9, %v4851_v1, 0  ;;  %v4689_v30 = vadd.s32 %v10748_v21, %v10754_v57  ;;  %v4584_v41 = vmul.u32 %v10779_v15, %v4568_v28 }
 0x5d5   : > { %v4710_v39 = vadd.s32 127, %v4709_v0  ;;  %vm4586_vm2 = vc.u32 %v10814_v54, %v10806_v23  ;;  %v4855_v11 = vand.u32 31, %v4853_v46  ;;  %v4510_v44 = vsel %vm4427_vm3, %v4509_v49, %v4508_v50 }
 0x5d6   : > { %v4405_v38 = vxor.u32 2147483648, %v10816_v48  ;;  %v4705_v60 = vsub.s32 32, %v10810_v34  ;;  %v4588_v9 = vsel %vm4586_vm2, %v4587_v31, %v10807_v20  ;;  %v4706_v17 = vshll.u32 %v10788_v32, %v10810_v34 }
 0x5d7   : > { %v4589_v19 = vadd.s32 %v4588_v9, %v4584_v41  ;;  %v4856_v12 = vsub.s32 32, %v4855_v11  ;;  %v10841_v27 = vshll.u32 %v4849_v26, 8  ;;  %v4711_v21 = vshll.u32 %v4710_v39, 23 }
 0x5d8   : > { %v4854_v57 = vshrl.u32 %v4853_v46, 5  ;;  %v4858_v15 = vshll.u32 %v12597_v24, %v4855_v11  ;;  %v4861_v63 = vshll.u32 %v12743_v40, %v4855_v11  ;;  %v4864_v33 = vshll.u32 %v12744_v53, %v4855_v11 }
 0x5d9   : > { %v4590_v50 = vadd.s32 536870912, %v4589_v19  ;;  %v4859_v36 = vshrl.u32 %v12743_v40, %v4856_v12  ;;  %v4862_v13 = vshrl.u32 %v12744_v53, %v4856_v12  ;;  %vm10850_vm10 = vcmp.le.f32.partialorder %v4425_v52, 0.7853982 }
 0x5da   : > { %vm12366_vm13 = vcmp.lt.s32.totalorder %v10600_v58, 0  ;;  %v4865_v14 = vshrl.u32 %v12745_v62, %v4856_v12  ;;  %v4867_v29 = vshll.u32 %v12745_v62, %v4855_v11  ;;  %v4868_v22 = vshrl.u32 %v12601_v6, %v4856_v12 }
 0x5db   : > { %v4870_v20 = vshll.u32 %v12601_v6, %v4855_v11  ;;  %v10859_v34 = vshrl.u32 %v4590_v50, 30  ;;  %v4860_v42 = vor.u32 %v4859_v36, %v4858_v15  ;;  %v4863_v1 = vor.u32 %v4862_v13, %v4861_v63 }
 0x5dc   : > { %v4871_v49 = vshrl.u32 %v12602_v7, %v4856_v12  ;;  %v4866_v52 = vor.u32 %v4865_v14, %v4864_v33  ;;  %v4869_v0 = vor.u32 %v4868_v22, %v4867_v29  ;;  %v12303_v28 = vand.u32 2147483647, %v10823_v45 }
 0x5dd   : > { %12750 = vst [vmem:[#allocation38_spill] sm:$0xff] %v10859_v34  ;;  %v4740_v26 = vand.u32 2139095040, %v10823_v45  ;;  %v4707_v39 = vshrl.u32 %v4689_v30, %v4705_v60  ;;  %v4592_v31 = vshll.u32 %v10859_v34, 30  ;;  %vm4873_vm15 = vcmp.lt.s32.totalorder %v4854_v57, 1 }
 0x5de   : > { %v4872_v46 = vor.u32 %v4871_v49, %v4870_v20  ;;  %vm10867_vm8 = vcmp.le.f32.partialorder %v4321_v18, 0.7853982  ;;  %v4712_v11 = vor.u32 4788187, %v4711_v21  ;;  %v4857_v9 = vshrl.u32 %v12597_v24, %v4856_v12 }
 0x5df   : > { %vm4876_vm7 = vcmp.lt.s32.totalorder %v4854_v57, 4  ;;  %v4881_v15 = vsel %vm4873_vm15, %v4860_v42, %v4863_v1  ;;  %v10873_v63 = vsub.s32 %v4589_v19, %v4592_v31  ;;  %vm4875_vm12 = vcmp.lt.s32.totalorder %v4854_v57, 3 }
 0x5e0   : > { %v4878_v30 = vsel %vm4876_vm7, %v4866_v52, 2102212464  ;;  %v4882_v60 = vsel %vm4876_vm7, %v4869_v0, 920167782  ;;  %vm4874_vm0 = vcmp.lt.s32.totalorder %v4854_v57, 2  ;;  %v4885_v36 = vsel %vm4873_vm15, %v4863_v1, %v4866_v52 }
 0x5e1   : > { %v4883_v50 = vsel %vm4875_vm12, %v4866_v52, %v4882_v60  ;;  %v4886_v13 = vsel %vm4876_vm7, %v4872_v46, 1326507024  ;;  %v4708_v18 = vor.u32 %v4707_v39, %v4706_v17  ;;  %v4595_v33 = vsub.s32 0, %v10873_v63 }
 0x5e2   : > { %v4877_v21 = vsel %vm4873_vm15, %v4857_v9, %v4860_v42  ;;  %v4884_v12 = vsel %vm4874_vm0, %v4881_v15, %v4883_v50  ;;  %v4879_v14 = vsel %vm4875_vm12, %v4863_v1, %v4878_v30  ;;  %v4887_v29 = vsel %vm4875_vm12, %v4869_v0, %v4886_v13  ;;  %v10907_v30 = vpop.f32.mrb[28].mxu0 }
 0x5e3   : > { %v10880_v19 = vmul.u32.u64.low %v10841_v27, %v4884_v12  ;;  %v10881_v22 = vmul.u32.u64.high %v10841_v27, %v4884_v12, %v10880_v19  ;;  %v4513_v20 = vsel %vm10850_vm10, %v10597_v16, %v4510_v44  ;;  %v4406_v17 = vsel %vm12366_vm13, %v4405_v38, %v10816_v48 }
 0x5e4   : > { %v6480_v49 = vmin.u32 %v4595_v33, %v10873_v63  ;;  %v4888_v42 = vsel %vm4874_vm0, %v4885_v36, %v4887_v29  ;;  %v4713_v52 = vand.u32 2147483647, %v4712_v11  ;;  %v4741_v39 = vshrl.u32 %v4740_v26, 23 }
 0x5e5   : > { %v10893_v1 = vmul.u32.u64.low %v10841_v27, %v4888_v42  ;;  %v10894_v0 = vmul.u32.u64.high %v10841_v27, %v4888_v42, %v10893_v1  ;;  %v4880_v46 = vsel %vm4874_vm0, %v4877_v21, %v4879_v14  ;;  %v4744_v44 = vand.u32 8388607, %v12303_v28 }
 0x5e6   : > { %v4597_v31 = vclz %v6480_v49  ;;  %v10901_v9 = vadd.f32 %v10665_v43, %v10594_v8  ;;  %v4715_v38 = vcvt.s32.f32 %v4708_v18  ;;  %v4899_v11 = vadd.s32 1, %v10881_v22 }
 0x5e7   : > { %v6487_v15 = vadd.s32 4294967169, %v4741_v39  ;;  %7179 = vcosq.f32 %v4513_v20  ;;  %v10912_v57 = vsel %vm10867_vm8, %v10600_v58, %v4406_v17  ;;  %v4896_v50 = vmul.u32 %v10841_v27, %v4880_v46 }
 0x5e8   : > { %12753 = vst [vmem:[#allocation9_spill] sm:$0xff] %v10901_v9  ;;  %v6481_v43 = vadd.s32 4294967294, %v4597_v31  ;;  %v10915_v60 = vmul.f32 %v4715_v38, %v4713_v52  ;;  %vm4898_vm14 = vc.u32 %v10894_v0, %v10880_v19  ;;  %v4745_v18 = vor.u32 8388608, %v4744_v44 }
 0x5e9   : > { %v4747_v36 = vadd.s32 1, %v6487_v15  ;;  %v4900_v13 = vsel %vm4898_vm14, %v4899_v11, %v10881_v22  ;;  %v5052_v33 = vand.u32 2139095040, %v10901_v9  ;;  %v12302_v14 = vand.u32 2147483647, %v10901_v9 }
 0x5ea   : > { %vm6482_vm6 = vcmp.lt.s32.totalorder %v6481_v43, 0  ;;  %v4901_v12 = vadd.s32 %v4900_v13, %v4896_v50  ;;  %7181 = vsinq.f32 %v4513_v20  ;;  %v4585_v27 = vadd.s32 %v10806_v23, %v10814_v54 }
 0x5eb   : > { %v4600_v21 = vsel %vm6482_vm6, 0, %v6481_v43  ;;  %vm4748_vm11 = vcmp.gt.s32.totalorder %v4747_v36, 0  ;;  %7183 = vcosq.f32 %v10912_v57  ;;  %v4717_v22 = vxor.u32 2147483648, %v10915_v60 }
 0x5ec   : > { %v4601_v29 = vsub.s32 32, %v4600_v21  ;;  %v4605_v17 = vsub.s32 4294967266, %v4600_v21  ;;  %v4749_v49 = vsel %vm4748_vm11, %v4747_v36, 0  ;;  %v4902_v42 = vadd.s32 536870912, %v4901_v12 }
 0x5ed   : > { %v4751_v52 = vand.u32 31, %v4749_v49  ;;  %v10927_v39 = vshll.u32 %v4745_v18, 8  ;;  %v5053_v31 = vshrl.u32 %v5052_v33, 23  ;;  %v4602_v46 = vshll.u32 %v10873_v63, %v4600_v21 }
 0x5ee   : > { %v4606_v1 = vadd.s32 127, %v4605_v17  ;;  %v10930_v44 = vshrl.u32 %v4902_v42, 30  ;;  %v10934_v38 = vand.u32 8388607, %v12302_v14  ;;  %v4603_v11 = vshrl.u32 %v4585_v27, %v4601_v29 }
 0x5ef   : > { %v4752_v20 = vsub.s32 32, %v4751_v52  ;;  %v4750_v23 = vshrl.u32 %v4749_v49, 5  ;;  %v4754_v54 = vshll.u32 %v12597_v24, %v4751_v52  ;;  %v4757_v36 = vshll.u32 %v12743_v40, %v4751_v52 }
 0x5f0   : > { %12754 = vst [vmem:[#allocation17_spill] sm:$0xff] %v10930_v44  ;;  %v4607_v15 = vshll.u32 %v4606_v1, 23  ;;  %v4904_v43 = vshll.u32 %v10930_v44, 30  ;;  %vm4635_vm5 = vcmp.lt.s32.totalorder %v10611_v10, 0  ;;  %v4760_v18 = vshll.u32 %v12744_v53, %v4751_v52 }
 0x5f1   : > { %v4755_v50 = vshrl.u32 %v12743_v40, %v4752_v20  ;;  %v4758_v63 = vshrl.u32 %v12744_v53, %v4752_v20  ;;  %v10941_v13 = vpop.eup %7179  ;;  %v4761_v33 = vshrl.u32 %v12745_v62, %v4752_v20  ;;  %v4763_v21 = vshll.u32 %v12745_v62, %v4751_v52 }
 0x5f2   : > { %12755 = vst [vmem:[#allocation40_spill] sm:$0xff] %v10941_v13  ;;  %v4764_v29 = vshrl.u32 %v12601_v6, %v4752_v20  ;;  %v4608_v17 = vor.u32 4788187, %v4607_v15  ;;  %v10948_v49 = vsub.s32 %v4901_v12, %v4904_v43  ;;  %v4766_v14 = vshll.u32 %v12601_v6, %v4751_v52 }
 0x5f3   : > { %v4756_v27 = vor.u32 %v4755_v50, %v4754_v54  ;;  %v4759_v42 = vor.u32 %v4758_v63, %v4757_v36  ;;  %v4762_v1 = vor.u32 %v4761_v33, %v4760_v18  ;;  %v4767_v28 = vshrl.u32 %v12602_v7, %v4752_v20 }
 0x5f4   : > { %v4765_v48 = vor.u32 %v4764_v29, %v4763_v21  ;;  %v4604_v25 = vor.u32 %v4603_v11, %v4602_v46  ;;  %v4907_v26 = vsub.s32 0, %v10948_v49  ;;  %v4753_v47 = vshrl.u32 %v12597_v24, %v4752_v20  ;;  %v10954_v44 = vpop.eup %7181 }
 0x5f5   : > { %v6499_v61 = vadd.s32 4294967169, %v5053_v31  ;;  %12756 = vst [vmem:[#allocation32_spill] sm:$0xff] %v10954_v44  ;;  %v4768_v34 = vor.u32 %v4767_v28, %v4766_v14  ;;  %vm4769_vm4 = vcmp.lt.s32.totalorder %v4750_v23, 1  ;;  %vm4771_vm1 = vcmp.lt.s32.totalorder %v4750_v23, 3  ;;  %v10956_v12 = vpop.eup %7183 }
 0x5f6   : > { %vm4772_vm3 = vcmp.lt.s32.totalorder %v4750_v23, 4  ;;  %v6492_v15 = vmin.u32 %v4907_v26, %v10948_v49  ;;  %v4777_v52 = vsel %vm4769_vm4, %v4756_v27, %v4759_v42  ;;  %v4609_v50 = vand.u32 2147483647, %v4608_v17  ;;  %v10974_v17 = vpop.f32.mrb[29].mxu0 }
 0x5f7   : > { %v4774_v54 = vsel %vm4772_vm3, %v4762_v1, 2102212464  ;;  %v4778_v43 = vsel %vm4772_vm3, %v4765_v48, 920167782  ;;  %vm4770_vm9 = vcmp.lt.s32.totalorder %v4750_v23, 2  ;;  %v4781_v11 = vsel %vm4769_vm4, %v4759_v42, %v4762_v1 }
 0x5f8   : > { %v4779_v46 = vsel %vm4771_vm1, %v4762_v1, %v4778_v43  ;;  %v4909_v20 = vclz %v6492_v15  ;;  %v4773_v31 = vsel %vm4769_vm4, %v4753_v47, %v4756_v27  ;;  %v4782_v28 = vsel %vm4772_vm3, %v4768_v34, 1326507024 }
 0x5f9   : > { %v4780_v36 = vsel %vm4770_vm9, %v4777_v52, %v4779_v46  ;;  %v4775_v14 = vsel %vm4771_vm1, %v4759_v42, %v4774_v54  ;;  %v4783_v63 = vsel %vm4771_vm1, %v4765_v48, %v4782_v28  ;;  %v10971_v33 = vsel %vm4635_vm5, %v4717_v22, %v10915_v60 }
 0x5fa   : > { %v10964_v18 = vmul.u32.u64.low %v10927_v39, %v4780_v36  ;;  %v10965_v26 = vmul.u32.u64.high %v10927_v39, %v4780_v36, %v10964_v18  ;;  %v4611_v21 = vcvt.s32.f32 %v4604_v25  ;;  %v6493_v29 = vadd.s32 4294967294, %v4909_v20 }
 0x5fb   : > { %v4784_v47 = vsel %vm4770_vm9, %v4781_v11, %v4783_v63  ;;  %v5059_v48 = vadd.s32 1, %v6499_v61  ;;  %v10982_v42 = vadd.f32 %v10594_v8, %v10670_v4  ;;  %v4776_v60 = vsel %vm4770_vm9, %v4773_v31, %v4775_v14 }
 0x5fc   : > { %v10977_v34 = vmul.u32.u64.low %v10927_v39, %v4784_v47  ;;  %v10978_v27 = vmul.u32.u64.high %v10927_v39, %v4784_v47, %v10977_v34  ;;  %v10984_v1 = vmul.f32 %v4611_v21, %v4609_v50  ;;  %vm6494_vm2 = vcmp.lt.s32.totalorder %v6493_v29, 0 }
 0x5fd   : > { %12757 = vst [vmem:[#allocation29_spill] sm:$0xff] %v10982_v42  ;;  %v10989_v25 = vadd.f32 %v10682_v56, %v10594_v8  ;;  %v4912_v22 = vsel %vm6494_vm2, 0, %v6493_v29  ;;  %v4795_v15 = vadd.s32 1, %v10965_v26  ;;  %v5057_v54 = vor.u32 8388608, %v10934_v38 }
 0x5fe   : > { %vm5060_vm15 = vcmp.gt.s32.totalorder %v5059_v48, 0  ;;  %v4897_v61 = vadd.s32 %v10880_v19, %v10894_v0  ;;  %v4913_v4 = vsub.s32 32, %v4912_v22  ;;  %v4917_v52 = vsub.s32 4294967266, %v4912_v22 }
 0x5ff   : > { %12758 = vst [vmem:[#allocation31_spill] sm:$0xff] %v10989_v25  ;;  %v5061_v43 = vsel %vm5060_vm15, %v5059_v48, 0  ;;  %v4792_v50 = vmul.u32 %v10927_v39, %v4776_v60  ;;  %vm4794_vm7 = vc.u32 %v10978_v27, %v10964_v18  ;;  %v4613_v56 = vxor.u32 2147483648, %v10984_v1 }
 0x600   : > { %v5063_v23 = vand.u32 31, %v5061_v43  ;;  %v4915_v46 = vshrl.u32 %v4897_v61, %v4913_v4  ;;  %v4918_v11 = vadd.s32 127, %v4917_v52  ;;  %v4796_v38 = vsel %vm4794_vm7, %v4795_v15, %v10965_v26 }
 0x601   : > { %v4914_v20 = vshll.u32 %v10948_v49, %v4912_v22  ;;  %v4797_v19 = vadd.s32 %v4796_v38, %v4792_v50  ;;  %v11002_v31 = vshll.u32 %v5057_v54, 8  ;;  %v5062_v39 = vshrl.u32 %v5061_v43, 5 }
 0x602   : > { %v5064_v0 = vsub.s32 32, %v5063_v23  ;;  %v4919_v36 = vshll.u32 %v4918_v11, 23  ;;  %v5066_v28 = vshll.u32 %v12597_v24, %v5063_v23  ;;  %v5069_v14 = vshll.u32 %v12743_v40, %v5063_v23 }
 0x603   : > { %v4916_v63 = vor.u32 %v4915_v46, %v4914_v20  ;;  %v4798_v21 = vadd.s32 536870912, %v4797_v19  ;;  %v12759_v26 = vand.u32 2147483647, %v10611_v10  ;;  %vm12341_vm0 = vcmp.lt.s32.totalorder %v10707_v51, 0 }
 0x604   : > { %v5067_v29 = vshrl.u32 %v12743_v40, %v5064_v0  ;;  %v5070_v47 = vshrl.u32 %v12744_v53, %v5064_v0  ;;  %v5072_v34 = vshll.u32 %v12744_v53, %v5063_v23  ;;  %v5073_v48 = vshrl.u32 %v12745_v62, %v5064_v0 }
 0x605   : > { %vm11010_vm12 = vcmp.le.f32.partialorder %v12759_v26, 0.7853982  ;;  %v5075_v60 = vshll.u32 %v12745_v62, %v5063_v23  ;;  %v5076_v22 = vshrl.u32 %v12601_v6, %v5064_v0  ;;  %v4920_v15 = vor.u32 4788187, %v4919_v36 }
 0x606   : > { %v11019_v54 = vshrl.u32 %v4798_v21, 30  ;;  %v5068_v61 = vor.u32 %v5067_v29, %v5066_v28  ;;  %v5071_v4 = vor.u32 %v5070_v47, %v5069_v14  ;;  %v5074_v52 = vor.u32 %v5073_v48, %v5072_v34 }
 0x607   : > { %v5077_v43 = vor.u32 %v5076_v22, %v5075_v60  ;;  %v5078_v50 = vshll.u32 %v12601_v6, %v5063_v23  ;;  %v5079_v46 = vshrl.u32 %v12602_v7, %v5064_v0  ;;  %v4923_v11 = vcvt.s32.f32 %v4916_v63 }
 0x608   : > { %12762 = vst [vmem:[#allocation22_spill] sm:$0xff] %v11019_v54  ;;  %v4800_v38 = vshll.u32 %v11019_v54, 30  ;;  %v5065_v20 = vshrl.u32 %v12597_v24, %v5064_v0  ;;  %v4948_v26 = vand.u32 2139095040, %v10982_v42  ;;  %v12763_v8 = vand.u32 2147483647, %v10707_v51 }
 0x609   : > { %v12764_v36 = vmov 0  ;;  %v5080_v28 = vor.u32 %v5079_v46, %v5078_v50  ;;  %vm5081_vm6 = vcmp.lt.s32.totalorder %v5062_v39, 1  ;;  %vm5083_vm11 = vcmp.lt.s32.totalorder %v5062_v39, 3 }
 0x60a   : > { %vm11028_vm14 = vcmp.le.f32.partialorder %v12763_v8, 0.7853982  ;;  %vm5084_vm4 = vcmp.lt.s32.totalorder %v5062_v39, 4  ;;  %v11032_v23 = vsub.s32 %v4797_v19, %v4800_v38  ;;  %v5089_v63 = vsel %vm5081_vm6, %v5068_v61, %v5071_v4 }
 0x60b   : > { %v12765_v36 = vsel %vm11028_vm14, 4294967295, %v12764_v36  ;;  %v5086_v14 = vsel %vm5084_vm4, %v5074_v52, 2102212464  ;;  %v5090_v21 = vsel %vm5084_vm4, %v5077_v43, 920167782  ;;  %vm5082_vm1 = vcmp.lt.s32.totalorder %v5062_v39, 2 }
 0x60c   : > { %12766 = vst [vmem:[#allocation18_spill] sm:$0xff] %v12765_v36  ;;  %v4921_v29 = vand.u32 2147483647, %v4920_v15  ;;  %v5091_v0 = vsel %vm5083_vm11, %v5074_v52, %v5090_v21  ;;  %v5093_v47 = vsel %vm5081_vm6, %v5071_v4, %v5074_v52  ;;  %v4803_v34 = vsub.s32 0, %v11032_v23 }
 0x60d   : > { %v5085_v48 = vsel %vm5081_vm6, %v5065_v20, %v5068_v61  ;;  %v5092_v8 = vsel %vm5082_vm1, %v5089_v63, %v5091_v0  ;;  %v5094_v60 = vsel %vm5084_vm4, %v5080_v28, 1326507024  ;;  %v5087_v22 = vsel %vm5083_vm11, %v5071_v4, %v5086_v14 }
 0x60e   : > { %v5095_v50 = vsel %vm5083_vm11, %v5077_v43, %v5094_v60  ;;  %v11037_v46 = vmul.u32.u64.low %v11002_v31, %v5092_v8  ;;  %v11038_v54 = vmul.u32.u64.high %v11002_v31, %v5092_v8, %v11037_v46  ;;  %v4721_v19 = vsel %vm11010_vm12, %v10611_v10, %v10971_v33 }
 0x60f   : > { %v4614_v15 = vsel %vm12341_vm0, %v4613_v56, %v10984_v1  ;;  %v6488_v61 = vmin.u32 %v4803_v34, %v11032_v23  ;;  %v5096_v52 = vsel %vm5082_vm1, %v5093_v47, %v5095_v50  ;;  %vm12338_vm3 = vcmp.lt.s32.totalorder %v10769_v35, 0  ;;  %v11059_v56 = vpop.f32.mrb[30].mxu0 }
 0x610   : > { %v4924_v4 = vmul.f32 %v4923_v11, %v4921_v29  ;;  %v11052_v43 = vmul.u32.u64.low %v11002_v31, %v5096_v52  ;;  %v11053_v38 = vmul.u32.u64.high %v11002_v31, %v5096_v52, %v11052_v43  ;;  %v4949_v20 = vshrl.u32 %v4948_v26, 23 }
 0x611   : > { %7185 = vsinq.f32 %v10912_v57  ;;  %v4805_v28 = vclz %v6488_v61  ;;  %v5088_v33 = vsel %vm5082_vm1, %v5085_v48, %v5087_v22  ;;  %v12767_v14 = vand.u32 2147483647, %v10982_v42 }
 0x612   : > { %7187 = vcosq.f32 %v4721_v19  ;;  %v5107_v63 = vadd.s32 1, %v11038_v54  ;;  %v6495_v21 = vadd.s32 4294967169, %v4949_v20  ;;  %v5260_v11 = vand.u32 2139095040, %v10989_v25 }
 0x613   : > { %v4952_v1 = vand.u32 8388607, %v12767_v14  ;;  %v12768_v29 = vsub.s32 4, %v10776_v55  ;;  %7189 = vsinq.f32 %v4721_v19  ;;  %v11073_v39 = vsel %vm11028_vm14, %v10707_v51, %v4614_v15 }
 0x614   : > { %v6489_v26 = vadd.s32 4294967294, %v4805_v28  ;;  %v4925_v0 = vxor.u32 2147483648, %v4924_v4  ;;  %v5104_v47 = vmul.u32 %v11002_v31, %v5088_v33  ;;  %vm5106_vm9 = vc.u32 %v11053_v38, %v11037_v46  ;;  %v11083_v31 = vld [vmem:[%s12125_s6] ss:$0 sm:$0xff] }
 0x615   : > { %v11068_v57 = vsel %vm4635_vm5, %v12768_v29, %v10776_v55  ;;  %v4955_v34 = vadd.s32 1, %v6495_v21  ;;  %v5108_v48 = vsel %vm5106_vm9, %v5107_v63, %v11038_v54  ;;  %v4953_v8 = vor.u32 8388608, %v4952_v1 }
 0x616   : > { %vm6490_vm2 = vcmp.lt.s32.totalorder %v6489_v26, 0  ;;  %v12313_v55 = vand.u32 2147483647, %v10989_v25  ;;  %v5109_v22 = vadd.s32 %v5108_v48, %v5104_v47  ;;  %v5261_v50 = vshrl.u32 %v5260_v11, 23 }
 0x617   : > { %v4808_v60 = vsel %vm6490_vm2, 0, %v6489_v26  ;;  %vm4956_vm5 = vcmp.gt.s32.totalorder %v4955_v34, 0  ;;  %v11087_v52 = vadd.f32 %v11083_v31, %v10697_v5  ;;  %7191 = vcosq.f32 %v11073_v39 }
 0x618   : > { %v4809_v19 = vsub.s32 32, %v4808_v60  ;;  %v4813_v15 = vsub.s32 4294967266, %v4808_v60  ;;  %v4957_v61 = vsel %vm4956_vm5, %v4955_v34, 0  ;;  %v4793_v54 = vadd.s32 %v10964_v18, %v10978_v27 }
 0x619   : > { %v5110_v43 = vadd.s32 536870912, %v5109_v22  ;;  %v4959_v20 = vand.u32 31, %v4957_v61  ;;  %v4926_v28 = vsel %vm12338_vm3, %v4925_v0, %v4924_v4  ;;  %v11094_v14 = vshll.u32 %v4953_v8, 8 }
 0x61a   : > { %v4814_v33 = vadd.s32 127, %v4813_v15  ;;  %v11098_v1 = vand.u32 8388607, %v12313_v55  ;;  %v4810_v5 = vshll.u32 %v11032_v23, %v4808_v60  ;;  %v6507_v11 = vadd.s32 4294967169, %v5261_v50 }
 0x61b   : > { %v11101_v63 = vshrl.u32 %v5110_v43, 30  ;;  %v4960_v21 = vsub.s32 32, %v4959_v20  ;;  %v11103_v29 = vpop.eup %7185  ;;  %v4811_v18 = vshrl.u32 %v4793_v54, %v4809_v19  ;;  %v4958_v27 = vshrl.u32 %v4957_v61, 5 }
 0x61c   : > { %v4962_v26 = vshll.u32 %v12597_v24, %v4959_v20  ;;  %v4965_v4 = vshll.u32 %v12743_v40, %v4959_v20  ;;  %v11107_v0 = vpop.eup %7187  ;;  %v4815_v47 = vshll.u32 %v4814_v33, 23  ;;  %v12772_v60 = vand.u32 2147483647, %v10769_v35 }
 0x61d   : > { %12769 = vst [vmem:[#allocation43_spill] sm:$0xff] %v11101_v63  ;;  %12770 = vst [vmem:[#allocation10_spill] sm:$0xff] %v11107_v0  ;;  %v5112_v34 = vshll.u32 %v11101_v63, 30  ;;  %v4963_v48 = vshrl.u32 %v12743_v40, %v4960_v21  ;;  %v4966_v23 = vshrl.u32 %v12744_v53, %v4960_v21  ;;  %v11112_v8 = vpop.eup %7189  ;;  %v12773_v50 = vmov 0 }
 0x61e   : > { %12771 = vst [vmem:[#allocation21_spill] sm:$0xff] %v11112_v8  ;;  %vm11116_vm15 = vcmp.le.f32.partialorder %v12772_v60, 0.7853982  ;;  %v4968_v19 = vshll.u32 %v12744_v53, %v4959_v20  ;;  %v4969_v15 = vshrl.u32 %v12745_v62, %v4960_v21  ;;  %v4971_v61 = vshll.u32 %v12745_v62, %v4959_v20 }
 0x61f   : > { %v12774_v50 = vsel %vm11116_vm15, 4294967295, %v12773_v50  ;;  %v4972_v54 = vshrl.u32 %v12601_v6, %v4960_v21  ;;  %v11124_v43 = vsub.s32 %v5109_v22, %v5112_v34  ;;  %v4964_v33 = vor.u32 %v4963_v48, %v4962_v26 }
 0x620   : > { %12775 = vst [vmem:[#allocation5_spill] sm:$0xff] %v12774_v50  ;;  %v4967_v55 = vor.u32 %v4966_v23, %v4965_v4  ;;  %v5267_v63 = vadd.s32 1, %v6507_v11  ;;  %v4970_v10 = vor.u32 %v4969_v15, %v4968_v19  ;;  %v4974_v60 = vshll.u32 %v12601_v6, %v4959_v20 }
 0x621   : > { %v4973_v0 = vor.u32 %v4972_v54, %v4971_v61  ;;  %v4975_v8 = vshrl.u32 %v12602_v7, %v4960_v21  ;;  %v4812_v36 = vor.u32 %v4811_v18, %v4810_v5  ;;  %v4816_v51 = vor.u32 4788187, %v4815_v47  ;;  %v11130_v22 = vpop.eup %7191  ;;  %v11140_v61 = vpop.f32.mrb[31].mxu0 }
 0x622   : > { %v5115_v13 = vsub.s32 0, %v11124_v43  ;;  %v4961_v44 = vshrl.u32 %v12597_v24, %v4960_v21  ;;  %vm4977_vm7 = vcmp.lt.s32.totalorder %v4958_v27, 1  ;;  %vm4979_vm6 = vcmp.lt.s32.totalorder %v4958_v27, 3 }
 0x623   : > { %v4976_v16 = vor.u32 %v4975_v8, %v4974_v60  ;;  %vm4980_vm11 = vcmp.lt.s32.totalorder %v4958_v27, 4  ;;  %v4985_v4 = vsel %vm4977_vm7, %v4964_v33, %v4967_v55  ;;  %vm4978_vm4 = vcmp.lt.s32.totalorder %v4958_v27, 2 }
 0x624   : > { %v6500_v11 = vmin.u32 %v5115_v13, %v11124_v43  ;;  %v4982_v26 = vsel %vm4980_vm11, %v4970_v10, 2102212464  ;;  %v4986_v34 = vsel %vm4980_vm11, %v4973_v0, 920167782  ;;  %v4981_v20 = vsel %vm4977_vm7, %v4961_v44, %v4964_v33 }
 0x625   : > { %v4987_v48 = vsel %vm4979_vm6, %v4970_v10, %v4986_v34  ;;  %v4989_v5 = vsel %vm4977_vm7, %v4967_v55, %v4970_v10  ;;  %v4983_v47 = vsel %vm4979_vm6, %v4967_v55, %v4982_v26  ;;  %v4990_v21 = vsel %vm4980_vm11, %v4976_v16, 1326507024 }
 0x626   : > { %v5117_v18 = vclz %v6500_v11  ;;  %v4988_v23 = vsel %vm4978_vm4, %v4985_v4, %v4987_v48  ;;  %v4991_v8 = vsel %vm4979_vm6, %v4973_v0, %v4990_v21  ;;  %v5265_v13 = vor.u32 8388608, %v11098_v1 }
 0x627   : > { %v11135_v19 = vmul.u32.u64.low %v11094_v14, %v4988_v23  ;;  %v11136_v15 = vmul.u32.u64.high %v11094_v14, %v4988_v23, %v11135_v19  ;;  %v11145_v44 = vsel %vm11116_vm15, %v10769_v35, %v4926_v28  ;;  %v4817_v10 = vand.u32 2147483647, %v4816_v51 }
 0x628   : > { %v6501_v55 = vadd.s32 4294967294, %v5117_v18  ;;  %v4992_v54 = vsel %vm4978_vm4, %v4989_v5, %v4991_v8  ;;  %v4984_v16 = vsel %vm4978_vm4, %v4981_v20, %v4983_v47  ;;  %vm5268_vm1 = vcmp.gt.s32.totalorder %v5267_v63, 0 }
 0x629   : > { %v11150_v0 = vmul.u32.u64.low %v11094_v14, %v4992_v54  ;;  %v11151_v33 = vmul.u32.u64.high %v11094_v14, %v4992_v54, %v11150_v0  ;;  %v4819_v60 = vcvt.s32.f32 %v4812_v36  ;;  %v5105_v1 = vadd.s32 %v11037_v46, %v11053_v38 }
 0x62a   : > { %vm6502_vm9 = vcmp.lt.s32.totalorder %v6501_v55, 0  ;;  %v5269_v11 = vsel %vm5268_vm1, %v5267_v63, 0  ;;  %v5003_v28 = vadd.s32 1, %v11136_v15  ;;  %v11156_v4 = vshll.u32 %v5265_v13, 8 }
 0x62b   : > { %v5120_v26 = vsel %vm6502_vm9, 0, %v6501_v55  ;;  %v5271_v51 = vand.u32 31, %v5269_v11  ;;  %v4820_v34 = vmul.f32 %v4819_v60, %v4817_v10  ;;  %v5000_v48 = vmul.u32 %v11094_v14, %v4984_v16 }
 0x62c   : > { %v5121_v27 = vsub.s32 32, %v5120_v26  ;;  %v5125_v20 = vsub.s32 4294967266, %v5120_v26  ;;  %v5122_v5 = vshll.u32 %v11124_v43, %v5120_v26  ;;  %vm5002_vm2 = vc.u32 %v11151_v33, %v11135_v19 }
 0x62d   : > { %v11162_v36 = vshrl.u32 %v5269_v11, 5  ;;  %v5272_v46 = vsub.s32 32, %v5271_v51  ;;  %v5004_v18 = vsel %vm5002_vm2, %v5003_v28, %v11136_v15  ;;  %v5274_v47 = vshll.u32 %v12597_v24, %v5271_v51 }
 0x62e   : > { %v5123_v38 = vshrl.u32 %v5105_v1, %v5121_v27  ;;  %v5126_v63 = vadd.s32 127, %v5125_v20  ;;  %v5005_v23 = vadd.s32 %v5004_v18, %v5000_v48  ;;  %v5277_v8 = vshll.u32 %v12743_v40, %v5271_v51 }
 0x62f   : > { %v5275_v21 = vshrl.u32 %v12743_v40, %v5272_v46  ;;  %v5278_v14 = vshrl.u32 %v12744_v53, %v5272_v46  ;;  %v5280_v10 = vshll.u32 %v12744_v53, %v5271_v51  ;;  %v5281_v55 = vshrl.u32 %v12745_v62, %v5272_v46 }
 0x630   : > { %v5124_v43 = vor.u32 %v5123_v38, %v5122_v5  ;;  %v5127_v13 = vshll.u32 %v5126_v63, 23  ;;  %vm12339_vm5 = vcmp.lt.s32.totalorder %v10823_v45, 0  ;;  %v4821_v54 = vxor.u32 2147483648, %v4820_v34  ;;  %v12851_v38 = vld [vmem:[#allocation17_spill] sm:$0xff] }
 0x631   : > { %v5006_v16 = vadd.s32 536870912, %v5005_v23  ;;  %v5276_v15 = vor.u32 %v5275_v21, %v5274_v47  ;;  %v5279_v0 = vor.u32 %v5278_v14, %v5277_v8  ;;  %v5282_v1 = vor.u32 %v5281_v55, %v5280_v10 }
 0x632   : > { %v5128_v60 = vor.u32 4788187, %v5127_v13  ;;  %v5283_v11 = vshll.u32 %v12745_v62, %v5271_v51  ;;  %v5284_v26 = vshrl.u32 %v12601_v6, %v5272_v46  ;;  %v5273_v27 = vshrl.u32 %v12597_v24, %v5272_v46 }
 0x633   : > { %v11174_v28 = vshrl.u32 %v5006_v16, 30  ;;  %v5286_v20 = vshll.u32 %v12601_v6, %v5271_v51  ;;  %v5287_v48 = vshrl.u32 %v12602_v7, %v5272_v46  ;;  %v12777_v5 = vand.u32 2147483647, %v10823_v45 }
 0x634   : > { %v5129_v63 = vand.u32 2147483647, %v5128_v60  ;;  %v5131_v18 = vcvt.s32.f32 %v5124_v43  ;;  %v5285_v47 = vor.u32 %v5284_v26, %v5283_v11  ;;  %vm5289_vm6 = vcmp.lt.s32.totalorder %v11162_v36, 1 }
 0x635   : > { %12776 = vst [vmem:[#allocation34_spill] sm:$0xff] %v11174_v28  ;;  %vm11181_vm7 = vcmp.le.f32.partialorder %v12777_v5, 0.7853982  ;;  %v5008_v21 = vshll.u32 %v11174_v28, 30  ;;  %v5288_v8 = vor.u32 %v5287_v48, %v5286_v20  ;;  %vm5290_vm11 = vcmp.lt.s32.totalorder %v11162_v36, 2 }
 0x636   : > { %vm5292_vm4 = vcmp.lt.s32.totalorder %v11162_v36, 4  ;;  %vm5291_vm1 = vcmp.lt.s32.totalorder %v11162_v36, 3  ;;  %v5297_v46 = vsel %vm5289_vm6, %v5276_v15, %v5279_v0  ;;  %v5293_v10 = vsel %vm5289_vm6, %v5273_v27, %v5276_v15 }
 0x637   : > { %v5294_v51 = vsel %vm5292_vm4, %v5282_v1, 2102212464  ;;  %v5298_v14 = vsel %vm5292_vm4, %v5285_v47, 920167782  ;;  %v11190_v13 = vsub.s32 %v5005_v23, %v5008_v21  ;;  %v5301_v43 = vsel %vm5289_vm6, %v5279_v0, %v5282_v1 }
 0x638   : > { %v5299_v55 = vsel %vm5291_vm1, %v5282_v1, %v5298_v14  ;;  %vm12337_vm9 = vcmp.lt.s32.totalorder %v10901_v9, 0  ;;  %v5132_v16 = vmul.f32 %v5131_v18, %v5129_v63  ;;  %v5295_v60 = vsel %vm5291_vm1, %v5279_v0, %v5294_v51 }
 0x639   : > { %v5300_v11 = vsel %vm5290_vm11, %v5297_v46, %v5299_v55  ;;  %v5302_v26 = vsel %vm5292_vm4, %v5288_v8, 1326507024  ;;  %v5011_v20 = vsub.s32 0, %v11190_v13  ;;  %v4822_v23 = vsel %vm12339_vm5, %v4821_v54, %v4820_v34 }
 0x63a   : > { %v5303_v48 = vsel %vm5291_vm1, %v5285_v47, %v5302_v26  ;;  %v11197_v5 = vmul.u32.u64.low %v11156_v4, %v5300_v11  ;;  %v11198_v28 = vmul.u32.u64.high %v11156_v4, %v5300_v11, %v11197_v5  ;;  %v12329_v1 = vand.u32 2147483647, %v11087_v52 }
 0x63b   : > { %v5304_v15 = vsel %vm5290_vm11, %v5301_v43, %v5303_v48  ;;  %v5156_v0 = vand.u32 2139095040, %v11087_v52  ;;  %7193 = vsinq.f32 %v11073_v39  ;;  %v6496_v27 = vmin.u32 %v5011_v20, %v11190_v13 }
 0x63c   : > { %v11209_v63 = vmul.u32.u64.low %v11156_v4, %v5304_v15  ;;  %v11210_v18 = vmul.u32.u64.high %v11156_v4, %v5304_v15, %v11209_v63  ;;  %7195 = vcosq.f32 %v11145_v44  ;;  %v5296_v34 = vsel %vm5290_vm11, %v5293_v10, %v5295_v60 }
 0x63d   : > { %v5157_v54 = vshrl.u32 %v5156_v0, 23  ;;  %v11217_v47 = vadd.f32 %v11083_v31, %v10771_v59  ;;  %v4825_v39 = vsel %vm11181_vm7, %v10823_v45, %v4822_v23  ;;  %v5133_v21 = vxor.u32 2147483648, %v5132_v16 }
 0x63e   : > { %v5013_v8 = vclz %v6496_v27  ;;  %v5315_v51 = vadd.s32 1, %v11198_v28  ;;  %7197 = vsinq.f32 %v11145_v44  ;;  %v12781_v46 = vand.u32 2147483647, %v10901_v9 }
 0x63f   : > { %12780 = vst [vmem:[#allocation33_spill] sm:$0xff] %v11217_v47  ;;  %v12782_v36 = vmov 0  ;;  %v6503_v14 = vadd.s32 4294967169, %v5157_v54  ;;  %v5160_v59 = vand.u32 8388607, %v12329_v1  ;;  %v5312_v55 = vmul.u32 %v11156_v4, %v5296_v34 }
 0x640   : > { %vm11226_vm2 = vcmp.le.f32.partialorder %v12781_v46, 0.7853982  ;;  %v6497_v10 = vadd.s32 4294967294, %v5013_v8  ;;  %vm5314_vm6 = vc.u32 %v11210_v18, %v11197_v5  ;;  %v5468_v43 = vand.u32 2139095040, %v11217_v47 }
 0x641   : > { %v12783_v36 = vsel %vm11226_vm2, 4294967295, %v12782_v36  ;;  %7199 = vcosq.f32 %v4825_v39  ;;  %v5001_v44 = vadd.s32 %v11135_v19, %v11151_v33  ;;  %v5316_v60 = vsel %vm5314_vm6, %v5315_v51, %v11198_v28 }
 0x642   : > { %12784 = vst [vmem:[#allocation12_spill] sm:$0xff] %v12783_v36  ;;  %v5163_v11 = vadd.s32 1, %v6503_v14  ;;  %v5134_v26 = vsel %vm12337_vm9, %v5133_v21, %v5132_v16  ;;  %vm6498_vm11 = vcmp.lt.s32.totalorder %v6497_v10, 0  ;;  %v5317_v20 = vadd.s32 %v5316_v60, %v5312_v55 }
 0x643   : > { %v11242_v48 = vadd.f32 %v11083_v31, %v10801_v37  ;;  %v5016_v4 = vsel %vm6498_vm11, 0, %v6497_v10  ;;  %v5161_v23 = vor.u32 8388608, %v5160_v59  ;;  %v12328_v15 = vand.u32 2147483647, %v11217_v47 }
 0x644   : > { %vm5164_vm4 = vcmp.gt.s32.totalorder %v5163_v11, 0  ;;  %v5017_v0 = vsub.s32 32, %v5016_v4  ;;  %v5021_v27 = vsub.s32 4294967266, %v5016_v4  ;;  %v5318_v19 = vadd.s32 536870912, %v5317_v20 }
 0x645   : > { %12785 = vst [vmem:[#allocation7_spill] sm:$0xff] %v11242_v48  ;;  %v5469_v33 = vshrl.u32 %v5468_v43, 23  ;;  %7201 = vsinq.f32 %v4825_v39  ;;  %v11248_v28 = vsel %vm11226_vm2, %v10901_v9, %v5134_v26  ;;  %v11251_v16 = vadd.s32 %v11197_v5, %v11210_v18  ;;  %v11253_v63 = vpop.eup %7193 }
 0x646   : > { %v5165_v37 = vsel %vm5164_vm4, %v5163_v11, 0  ;;  %v5018_v34 = vshll.u32 %v11190_v13, %v5016_v4  ;;  %v5019_v54 = vshrl.u32 %v5001_v44, %v5017_v0  ;;  %v5022_v21 = vadd.s32 127, %v5021_v27  ;;  %v11258_v51 = vpop.eup %7195 }
 0x647   : > { %v11256_v8 = vshrl.u32 %v5318_v19, 30  ;;  %12787 = vst [vmem:[#allocation37_spill] sm:$0xff] %v11258_v51  ;;  %v5167_v39 = vand.u32 31, %v5165_v37  ;;  %v11260_v46 = vshll.u32 %v5161_v23, 8  ;;  %v11264_v14 = vand.u32 8388607, %v12328_v15 }
 0x648   : > { %v5020_v18 = vor.u32 %v5019_v54, %v5018_v34  ;;  %v5023_v59 = vshll.u32 %v5022_v21, 23  ;;  %v6515_v13 = vadd.s32 4294967169, %v5469_v33  ;;  %v11268_v55 = vpop.eup %7197  ;;  %v5166_v43 = vshrl.u32 %v5165_v37, 5 }
 0x649   : > { %12786 = vst [vmem:[#allocation39_spill] sm:$0xff] %v11256_v8  ;;  %v5320_v10 = vshll.u32 %v11256_v8, 30  ;;  %12788 = vst [vmem:[#allocation35_spill] sm:$0xff] %v11268_v55  ;;  %v5168_v44 = vsub.s32 32, %v5167_v39  ;;  %v5170_v60 = vshll.u32 %v12597_v24, %v5167_v39  ;;  %v5173_v11 = vshll.u32 %v12743_v40, %v5167_v39 }
 0x64a   : > { %v5024_v26 = vor.u32 4788187, %v5023_v59  ;;  %v5027_v4 = vcvt.s32.f32 %v5020_v18  ;;  %v5176_v0 = vshll.u32 %v12744_v53, %v5167_v39  ;;  %v5179_v37 = vshll.u32 %v12745_v62, %v5167_v39 }
 0x64b   : > { %v11272_v23 = vsub.s32 %v5317_v20, %v5320_v10  ;;  %v11275_v27 = vpop.eup %7199  ;;  %v5171_v19 = vshrl.u32 %v12743_v40, %v5168_v44  ;;  %v5174_v33 = vshrl.u32 %v12744_v53, %v5168_v44  ;;  %v5177_v34 = vshrl.u32 %v12745_v62, %v5168_v44 }
 0x64c   : > { %12789 = vst [vmem:[#allocation20_spill] sm:$0xff] %v11275_v27  ;;  %vm12362_vm1 = vcmp.lt.s32.totalorder %v10982_v42, 0  ;;  %v5025_v54 = vand.u32 2147483647, %v5024_v26  ;;  %v5180_v20 = vshrl.u32 %v12601_v6, %v5168_v44  ;;  %v5182_v18 = vshll.u32 %v12601_v6, %v5167_v39 }
 0x64d   : > { %v5323_v21 = vsub.s32 0, %v11272_v23  ;;  %v5172_v59 = vor.u32 %v5171_v19, %v5170_v60  ;;  %v5175_v10 = vor.u32 %v5174_v33, %v5173_v11  ;;  %v5178_v15 = vor.u32 %v5177_v34, %v5176_v0 }
 0x64e   : > { %v5183_v1 = vshrl.u32 %v12602_v7, %v5168_v44  ;;  %v5028_v5 = vmul.f32 %v5027_v4, %v5025_v54  ;;  %v5181_v36 = vor.u32 %v5180_v20, %v5179_v37  ;;  %v5475_v9 = vadd.s32 1, %v6515_v13 }
 0x64f   : > { %v6508_v8 = vmin.u32 %v5323_v21, %v11272_v23  ;;  %v11287_v51 = vpop.eup %7201  ;;  %v12791_v26 = vand.u32 2147483647, %v10982_v42  ;;  %v12792_v55 = vmov 0  ;;  %v5169_v39 = vshrl.u32 %v12597_v24, %v5168_v44 }
 0x650   : > { %12790 = vst [vmem:[#allocation36_spill] sm:$0xff] %v11287_v51  ;;  %v5184_v60 = vor.u32 %v5183_v1, %v5182_v18  ;;  %vm5185_vm11 = vcmp.lt.s32.totalorder %v5166_v43, 1  ;;  %vm5188_vm4 = vcmp.lt.s32.totalorder %v5166_v43, 4  ;;  %v5029_v11 = vxor.u32 2147483648, %v5028_v5 }
 0x651   : > { %vm11291_vm6 = vcmp.le.f32.partialorder %v12791_v26, 0.7853982  ;;  %v5325_v0 = vclz %v6508_v8  ;;  %vm5187_vm9 = vcmp.lt.s32.totalorder %v5166_v43, 3  ;;  %v5190_v4 = vsel %vm5188_vm4, %v5178_v15, 2102212464 }
 0x652   : > { %v12793_v55 = vsel %vm11291_vm6, 4294967295, %v12792_v55  ;;  %v5193_v19 = vsel %vm5185_vm11, %v5172_v59, %v5175_v10  ;;  %v5194_v33 = vsel %vm5188_vm4, %v5181_v36, 920167782  ;;  %v5197_v13 = vsel %vm5185_vm11, %v5175_v10, %v5178_v15 }
 0x653   : > { %12794 = vst [vmem:[#allocation13_spill] sm:$0xff] %v12793_v55  ;;  %v5198_v34 = vsel %vm5188_vm4, %v5184_v60, 1326507024  ;;  %v6509_v37 = vadd.s32 4294967294, %v5325_v0  ;;  %v5195_v54 = vsel %vm5187_vm9, %v5178_v15, %v5194_v33  ;;  %v5473_v21 = vor.u32 8388608, %v11264_v14 }
 0x654   : > { %v5364_v20 = vand.u32 2139095040, %v11242_v48  ;;  %vm5186_vm3 = vcmp.lt.s32.totalorder %v5166_v43, 2  ;;  %v5189_v26 = vsel %vm5185_vm11, %v5169_v39, %v5172_v59  ;;  %v5191_v44 = vsel %vm5187_vm9, %v5175_v10, %v5190_v4 }
 0x655   : > { %v5199_v1 = vsel %vm5187_vm9, %v5181_v36, %v5198_v34  ;;  %vm6510_vm5 = vcmp.lt.s32.totalorder %v6509_v37, 0  ;;  %v5196_v18 = vsel %vm5186_vm3, %v5193_v19, %v5195_v54  ;;  %vm5476_vm0 = vcmp.gt.s32.totalorder %v5475_v9, 0 }
 0x656   : > { %v5200_v50 = vsel %vm5186_vm3, %v5197_v13, %v5199_v1  ;;  %v5030_v8 = vsel %vm12362_vm1, %v5029_v11, %v5028_v5  ;;  %v5328_v35 = vsel %vm6510_vm5, 0, %v6509_v37  ;;  %v5192_v33 = vsel %vm5186_vm3, %v5189_v26, %v5191_v44 }
 0x657   : > { %v11301_v60 = vmul.u32.u64.low %v11260_v46, %v5200_v50  ;;  %v11302_v0 = vmul.u32.u64.high %v11260_v46, %v5200_v50, %v11301_v60  ;;  %v5329_v15 = vsub.s32 32, %v5328_v35  ;;  %v5333_v14 = vsub.s32 4294967266, %v5328_v35 }
 0x658   : > { %v5477_v27 = vsel %vm5476_vm0, %v5475_v9, 0  ;;  %v11305_v43 = vmul.u32.u64.low %v11260_v46, %v5196_v18  ;;  %v11306_v59 = vmul.u32.u64.high %v11260_v46, %v5196_v18, %v11305_v43  ;;  %v11309_v10 = vshll.u32 %v5473_v21, 8 }
 0x659   : > { %v5479_v36 = vand.u32 31, %v5477_v27  ;;  %v11314_v5 = vsel %vm11291_vm6, %v10982_v42, %v5030_v8  ;;  %v5330_v50 = vshll.u32 %v11272_v23, %v5328_v35  ;;  %v5331_v39 = vshrl.u32 %v11251_v16, %v5329_v15 }
 0x65a   : > { %v5334_v11 = vadd.s32 127, %v5333_v14  ;;  %v5208_v9 = vmul.u32 %v11260_v46, %v5192_v33  ;;  %v5478_v4 = vshrl.u32 %v5477_v27, 5  ;;  %v5365_v13 = vshrl.u32 %v5364_v20, 23 }
 0x65b   : > { %v5480_v19 = vsub.s32 32, %v5479_v36  ;;  %v5332_v34 = vor.u32 %v5331_v39, %v5330_v50  ;;  %vm5210_vm0 = vc.u32 %v11302_v0, %v11305_v43  ;;  %v5482_v54 = vshll.u32 %v12597_v24, %v5479_v36 }
 0x65c   : > { %v5335_v37 = vshll.u32 %v5334_v11, 23  ;;  %v5211_v21 = vadd.s32 1, %v11306_v59  ;;  %v5485_v35 = vshll.u32 %v12743_v40, %v5479_v36  ;;  %v5488_v46 = vshll.u32 %v12744_v53, %v5479_v36 }
 0x65d   : > { %v5483_v26 = vshrl.u32 %v12743_v40, %v5480_v19  ;;  %v5486_v16 = vshrl.u32 %v12744_v53, %v5480_v19  ;;  %v5489_v27 = vshrl.u32 %v12745_v62, %v5480_v19  ;;  %v5491_v20 = vshll.u32 %v12745_v62, %v5479_v36 }
 0x65e   : > { %v5336_v23 = vor.u32 4788187, %v5335_v37  ;;  %v5212_v44 = vsel %vm5210_vm0, %v5211_v21, %v11306_v59  ;;  %v5492_v8 = vshrl.u32 %v12601_v6, %v5480_v19  ;;  %v12795_v33 = vand.u32 2147483647, %v11242_v48 }
 0x65f   : > { %v5484_v1 = vor.u32 %v5483_v26, %v5482_v54  ;;  %v5487_v18 = vor.u32 %v5486_v16, %v5485_v35  ;;  %v5213_v15 = vadd.s32 %v5212_v44, %v5208_v9  ;;  %v5490_v14 = vor.u32 %v5489_v27, %v5488_v46 }
 0x660   : > { %v5337_v60 = vand.u32 2147483647, %v5336_v23  ;;  %v5368_v50 = vand.u32 8388607, %v12795_v33  ;;  %v5339_v39 = vcvt.s32.f32 %v5332_v34  ;;  %v5493_v11 = vor.u32 %v5492_v8, %v5491_v20 }
 0x661   : > { %v5494_v37 = vshll.u32 %v12601_v6, %v5479_v36  ;;  %v5495_v55 = vshrl.u32 %v12602_v7, %v5480_v19  ;;  %v5214_v42 = vadd.s32 536870912, %v5213_v15  ;;  %v5481_v51 = vshrl.u32 %v12597_v24, %v5480_v19 }
 0x662   : > { %vm5497_vm3 = vcmp.lt.s32.totalorder %v5478_v4, 1  ;;  %vm5500_vm5 = vcmp.lt.s32.totalorder %v5478_v4, 4  ;;  %v5340_v59 = vmul.f32 %v5339_v39, %v5337_v60  ;;  %vm5498_vm9 = vcmp.lt.s32.totalorder %v5478_v4, 2 }
 0x663   : > { %v5496_v54 = vor.u32 %v5495_v55, %v5494_v37  ;;  %v5502_v21 = vsel %vm5500_vm5, %v5490_v14, 2102212464  ;;  %v5505_v26 = vsel %vm5497_vm3, %v5484_v1, %v5487_v18  ;;  %v11336_v9 = vshrl.u32 %v5214_v42, 30 }
 0x664   : > { %vm5499_vm11 = vcmp.lt.s32.totalorder %v5478_v4, 3  ;;  %v5506_v35 = vsel %vm5500_vm5, %v5493_v11, 920167782  ;;  %v5501_v34 = vsel %vm5497_vm3, %v5481_v51, %v5484_v1  ;;  %v5509_v23 = vsel %vm5497_vm3, %v5487_v18, %v5490_v14 }
 0x665   : > { %v5507_v16 = vsel %vm5499_vm11, %v5490_v14, %v5506_v35  ;;  %v5510_v36 = vsel %vm5500_vm5, %v5496_v54, 1326507024  ;;  %v5216_v46 = vshll.u32 %v11336_v9, 30  ;;  %v5503_v27 = vsel %vm5499_vm11, %v5487_v18, %v5502_v21 }
 0x666   : > { %v5508_v19 = vsel %vm5498_vm9, %v5505_v26, %v5507_v16  ;;  %v5511_v20 = vsel %vm5499_vm11, %v5493_v11, %v5510_v36  ;;  %v5341_v44 = vxor.u32 2147483648, %v5340_v59  ;;  %7203 = vcosq.f32 %v11248_v28 }
 0x667   : > { %v5512_v55 = vsel %vm5498_vm9, %v5509_v23, %v5511_v20  ;;  %v11342_v8 = vmul.u32.u64.low %v11309_v10, %v5508_v19  ;;  %v11343_v42 = vmul.u32.u64.high %v11309_v10, %v5508_v19, %v11342_v8  ;;  %v11347_v51 = vsub.s32 %v5213_v15, %v5216_v46 }
 0x668   : > { %v11350_v1 = vmul.u32.u64.low %v11309_v10, %v5512_v55  ;;  %v11351_v60 = vmul.u32.u64.high %v11309_v10, %v5512_v55, %v11350_v1  ;;  %v12796_v18 = vsel %vm10850_vm10, 0, %v10828_v3  ;;  %7205 = vsinq.f32 %v11248_v28 }
 0x669   : > { %v11357_v14 = vadd.s32 3, %v12796_v18  ;;  %v5504_v33 = vsel %vm5498_vm9, %v5501_v34, %v5503_v27  ;;  %v6511_v39 = vadd.s32 4294967169, %v5365_v13  ;;  %7207 = vcosq.f32 %v11314_v5 }
 0x66a   : > { %vm12358_vm4 = vcmp.lt.s32.totalorder %v10989_v25, 0  ;;  %v5219_v11 = vsub.s32 0, %v11347_v51  ;;  %v5523_v32 = vadd.s32 1, %v11343_v42  ;;  %v5369_v37 = vor.u32 8388608, %v5368_v50 }
 0x66b   : > { %v5342_v3 = vsel %vm12358_vm4, %v5341_v44, %v5340_v59  ;;  %v5371_v28 = vadd.s32 1, %v6511_v39  ;;  %v5520_v13 = vmul.u32 %v11309_v10, %v5504_v33  ;;  %vm5522_vm10 = vc.u32 %v11351_v60, %v11342_v8 }
 0x66c   : > { %v6504_v4 = vmin.u32 %v5219_v11, %v11347_v51  ;;  %v11376_v54 = vadd.f32 %v11083_v31, %v10907_v30  ;;  %7209 = vsinq.f32 %v11314_v5  ;;  %v12797_v21 = vand.u32 2147483647, %v10989_v25 }
 0x66d   : > { %v12798_v59 = vmov 0  ;;  %v5524_v50 = vsel %vm5522_vm10, %v5523_v32, %v11343_v42  ;;  %vm5372_vm3 = vcmp.gt.s32.totalorder %v5371_v28, 0  ;;  %v5209_v10 = vadd.s32 %v11305_v43, %v11302_v0 }
 0x66e   : > { %vm11381_vm0 = vcmp.le.f32.partialorder %v12797_v21, 0.7853982  ;;  %v5221_v26 = vclz %v6504_v4  ;;  %v5525_v35 = vadd.s32 %v5524_v50, %v5520_v13  ;;  %v5373_v34 = vsel %vm5372_vm3, %v5371_v28, 0 }
 0x66f   : > { %v12799_v59 = vsel %vm11381_vm0, 4294967295, %v12798_v59  ;;  %v11391_v30 = vsel %vm11381_vm0, %v10989_v25, %v5342_v3  ;;  %v5375_v5 = vand.u32 31, %v5373_v34  ;;  %v11393_v16 = vshll.u32 %v5369_v37, 8 }
 0x670   : > { %12800 = vst [vmem:[#allocation42_spill] sm:$0xff] %v12799_v59  ;;  %v11397_v23 = vadd.f32 %v11083_v31, %v10974_v17  ;;  %v6505_v36 = vadd.s32 4294967294, %v5221_v26  ;;  %v5526_v46 = vadd.s32 536870912, %v5525_v35  ;;  %v5676_v0 = vand.u32 2139095040, %v11376_v54  ;;  %v11405_v55 = vpop.eup %7203 }
 0x671   : > { %v11401_v43 = vshrl.u32 %v5373_v34, 5  ;;  %v5376_v19 = vsub.s32 32, %v5375_v5  ;;  %v5378_v20 = vshll.u32 %v12597_v24, %v5375_v5  ;;  %v5381_v44 = vshll.u32 %v12743_v40, %v5375_v5 }
 0x672   : > { %vm6506_vm5 = vcmp.lt.s32.totalorder %v6505_v36, 0  ;;  %v11407_v42 = vshrl.u32 %v5526_v46, 30  ;;  %v5384_v17 = vshll.u32 %v12744_v53, %v5375_v5  ;;  %v5387_v1 = vshll.u32 %v12745_v62, %v5375_v5  ;;  %v11411_v18 = vpop.eup %7205 }
 0x673   : > { %v5224_v33 = vsel %vm6506_vm5, 0, %v6505_v36  ;;  %v5379_v39 = vshrl.u32 %v12743_v40, %v5376_v19  ;;  %v5382_v11 = vshrl.u32 %v12744_v53, %v5376_v19  ;;  %v5390_v3 = vshll.u32 %v12601_v6, %v5375_v5  ;;  %v11416_v32 = vpop.eup %7207 }
 0x674   : > { %12801 = vst [vmem:[#allocation4_spill] sm:$0xff] %v11407_v42  ;;  %v5225_v37 = vsub.s32 32, %v5224_v33  ;;  %v5226_v28 = vshll.u32 %v11347_v51, %v5224_v33  ;;  %v5229_v4 = vsub.s32 4294967266, %v5224_v33  ;;  %v5528_v13 = vshll.u32 %v11407_v42, 30 }
 0x675   : > { %v5380_v21 = vor.u32 %v5379_v39, %v5378_v20  ;;  %v5383_v50 = vor.u32 %v5382_v11, %v5381_v44  ;;  %v5385_v26 = vshrl.u32 %v12745_v62, %v5376_v19  ;;  %v5388_v34 = vshrl.u32 %v12601_v6, %v5376_v19 }
 0x676   : > { %v5227_v36 = vshrl.u32 %v5209_v10, %v5225_v37  ;;  %v5230_v46 = vadd.s32 127, %v5229_v4  ;;  %v11422_v15 = vsub.s32 %v5525_v35, %v5528_v13  ;;  %v5391_v5 = vshrl.u32 %v12602_v7, %v5376_v19  ;;  %v11425_v27 = vpop.eup %7209 }
 0x677   : > { %v5377_v59 = vshrl.u32 %v12597_v24, %v5376_v19  ;;  %v5386_v51 = vor.u32 %v5385_v26, %v5384_v17  ;;  %v5389_v33 = vor.u32 %v5388_v34, %v5387_v1  ;;  %v5677_v25 = vshrl.u32 %v5676_v0, 23 }
 0x678   : > { %v5228_v42 = vor.u32 %v5227_v36, %v5226_v28  ;;  %v5231_v20 = vshll.u32 %v5230_v46, 23  ;;  %v5531_v44 = vsub.s32 0, %v11422_v15  ;;  %v5392_v39 = vor.u32 %v5391_v5, %v5390_v3 }
 0x679   : > { %vm5393_vm9 = vcmp.lt.s32.totalorder %v11401_v43, 1  ;;  %vm5394_vm11 = vcmp.lt.s32.totalorder %v11401_v43, 2  ;;  %vm5395_vm10 = vcmp.lt.s32.totalorder %v11401_v43, 3  ;;  %vm5396_vm3 = vcmp.lt.s32.totalorder %v11401_v43, 4 }
 0x67a   : > { %v5232_v10 = vor.u32 4788187, %v5231_v20  ;;  %v6516_v35 = vmin.u32 %v5531_v44, %v11422_v15  ;;  %v5398_v19 = vsel %vm5396_vm3, %v5386_v51, 2102212464  ;;  %v5401_v17 = vsel %vm5393_vm9, %v5380_v21, %v5383_v50 }
 0x67b   : > { %v5397_v1 = vsel %vm5393_vm9, %v5377_v59, %v5380_v21  ;;  %v5402_v0 = vsel %vm5396_vm3, %v5389_v33, 920167782  ;;  %v5405_v11 = vsel %vm5393_vm9, %v5383_v50, %v5386_v51  ;;  %v5406_v37 = vsel %vm5396_vm3, %v5392_v39, 1326507024 }
 0x67c   : > { %vm12359_vm5 = vcmp.lt.s32.totalorder %v11087_v52, 0  ;;  %v5233_v3 = vand.u32 2147483647, %v5232_v10  ;;  %v5235_v28 = vcvt.s32.f32 %v5228_v42  ;;  %v5533_v4 = vclz %v6516_v35 }
 0x67d   : > { %v5403_v13 = vsel %vm5395_vm10, %v5386_v51, %v5402_v0  ;;  %v5399_v26 = vsel %vm5395_vm10, %v5383_v50, %v5398_v19  ;;  %v5407_v59 = vsel %vm5395_vm10, %v5389_v33, %v5406_v37  ;;  %v6523_v21 = vadd.s32 4294967169, %v5677_v25 }
 0x67e   : > { %v5404_v34 = vsel %vm5394_vm11, %v5401_v17, %v5403_v13  ;;  %v5236_v36 = vmul.f32 %v5235_v28, %v5233_v3  ;;  %v6517_v46 = vadd.s32 4294967294, %v5533_v4  ;;  %v5408_v5 = vsel %vm5394_vm11, %v5405_v11, %v5407_v59 }
 0x67f   : > { %v12802_v42 = vand.u32 2147483647, %v11376_v54  ;;  %v12803_v51 = vand.u32 2147483647, %v11087_v52  ;;  %v12804_v44 = vmov 0  ;;  %7211 = vcosq.f32 %v11391_v30 }
 0x680   : > { %v11454_v50 = vmul.u32.u64.low %v11393_v16, %v5408_v5  ;;  %v11455_v39 = vmul.u32.u64.high %v11393_v16, %v5408_v5, %v11454_v50  ;;  %v11458_v25 = vmul.u32.u64.low %v11393_v16, %v5404_v34  ;;  %v11459_v33 = vmul.u32.u64.high %v11393_v16, %v5404_v34, %v11458_v25 }
 0x681   : > { %v5680_v20 = vand.u32 8388607, %v12802_v42  ;;  %vm11449_vm9 = vcmp.le.f32.partialorder %v12803_v51, 0.7853982  ;;  %vm6518_vm10 = vcmp.lt.s32.totalorder %v6517_v46, 0  ;;  %v5400_v10 = vsel %vm5394_vm11, %v5397_v1, %v5399_v26 }
 0x682   : > { %v12805_v44 = vsel %vm11449_vm9, 4294967295, %v12804_v44  ;;  %v5683_v35 = vadd.s32 1, %v6523_v21  ;;  %7213 = vsinq.f32 %v11391_v30  ;;  %v5237_v19 = vxor.u32 2147483648, %v5236_v36 }
 0x683   : > { %12806 = vst [vmem:[#allocation19_spill] sm:$0xff] %v12805_v44  ;;  %v5536_v17 = vsel %vm6518_vm10, 0, %v6517_v46  ;;  %v5572_v0 = vand.u32 2139095040, %v11397_v23  ;;  %v5521_v11 = vadd.s32 %v11342_v8, %v11351_v60  ;;  %v12354_v28 = vand.u32 2147483647, %v11397_v23 }
 0x684   : > { %v5537_v37 = vsub.s32 32, %v5536_v17  ;;  %v5541_v3 = vsub.s32 4294967266, %v5536_v17  ;;  %v5416_v4 = vmul.u32 %v11393_v16, %v5400_v10  ;;  %vm5418_vm3 = vc.u32 %v11455_v39, %v11458_v25 }
 0x685   : > { %v5419_v43 = vadd.s32 1, %v11459_v33  ;;  %v5681_v1 = vor.u32 8388608, %v5680_v20  ;;  %v5538_v30 = vshll.u32 %v11422_v15, %v5536_v17  ;;  %vm5684_vm11 = vcmp.gt.s32.totalorder %v5683_v35, 0 }
 0x686   : > { %v5539_v13 = vshrl.u32 %v5521_v11, %v5537_v37  ;;  %v5542_v26 = vadd.s32 127, %v5541_v3  ;;  %v5238_v8 = vsel %vm12359_vm5, %v5237_v19, %v5236_v36  ;;  %v5685_v34 = vsel %vm5684_vm11, %v5683_v35, 0 }
 0x687   : > { %v5420_v60 = vsel %vm5418_vm3, %v5419_v43, %v11459_v33  ;;  %v5573_v59 = vshrl.u32 %v5572_v0, 23  ;;  %v11480_v5 = vadd.f32 %v11083_v31, %v11059_v56  ;;  %v5687_v42 = vand.u32 31, %v5685_v34 }
 0x688   : > { %v5540_v21 = vor.u32 %v5539_v13, %v5538_v30  ;;  %v5543_v16 = vshll.u32 %v5542_v26, 23  ;;  %v5421_v46 = vadd.s32 %v5420_v60, %v5416_v4  ;;  %v11482_v20 = vshll.u32 %v5681_v1, 8 }
 0x689   : > { %v11486_v15 = vand.u32 8388607, %v12354_v28  ;;  %v11490_v36 = vadd.f32 %v11083_v31, %v11140_v61  ;;  %v5241_v51 = vsel %vm11449_vm9, %v11087_v52, %v5238_v8  ;;  %vm12365_vm10 = vcmp.lt.s32.totalorder %v11217_v47, 0  ;;  %v11497_v0 = vpop.eup %7211 }
 0x68a   : > { %v5544_v50 = vor.u32 4788187, %v5543_v16  ;;  %v5422_v56 = vadd.s32 536870912, %v5421_v46  ;;  %v5686_v33 = vshrl.u32 %v5685_v34, 5  ;;  %v5547_v10 = vcvt.s32.f32 %v5540_v21  ;;  %12807 = vst [vmem:[#allocation41_spill] sm:$0xff] %v11497_v0 }
 0x68b   : > { %v5688_v35 = vsub.s32 32, %v5687_v42  ;;  %v5690_v19 = vshll.u32 %v12597_v24, %v5687_v42  ;;  %v6519_v17 = vadd.s32 4294967169, %v5573_v59  ;;  %v5693_v31 = vshll.u32 %v12743_v40, %v5687_v42 }
 0x68c   : > { %v5545_v11 = vand.u32 2147483647, %v5544_v50  ;;  %v11499_v37 = vshrl.u32 %v5422_v56, 30  ;;  %v5696_v61 = vshll.u32 %v12744_v53, %v5687_v42  ;;  %v11503_v3 = vpop.eup %7213  ;;  %v5699_v30 = vshll.u32 %v12745_v62, %v5687_v42 }
 0x68d   : > { %12809 = vst [vmem:[#allocation16_spill] sm:$0xff] %v11503_v3  ;;  %v5691_v4 = vshrl.u32 %v12743_v40, %v5688_v35  ;;  %v5694_v43 = vshrl.u32 %v12744_v53, %v5688_v35  ;;  %v5697_v1 = vshrl.u32 %v12745_v62, %v5688_v35  ;;  %v12810_v13 = vand.u32 2147483647, %v11217_v47 }
 0x68e   : > { %12808 = vst [vmem:[#allocation15_spill] sm:$0xff] %v11499_v37  ;;  %v12811_v26 = vmov 0  ;;  %v5548_v8 = vmul.f32 %v5547_v10, %v5545_v11  ;;  %v5424_v60 = vshll.u32 %v11499_v37, 30  ;;  %v5700_v34 = vshrl.u32 %v12601_v6, %v5688_v35 }
 0x68f   : > { %vm11511_vm3 = vcmp.le.f32.partialorder %v12810_v13, 0.7853982  ;;  %v5703_v59 = vshrl.u32 %v12602_v7, %v5688_v35  ;;  %v5692_v21 = vor.u32 %v5691_v4, %v5690_v19  ;;  %v5695_v16 = vor.u32 %v5694_v43, %v5693_v31 }
 0x690   : > { %v12812_v26 = vsel %vm11511_vm3, 4294967295, %v12811_v26  ;;  %v5698_v50 = vor.u32 %v5697_v1, %v5696_v61  ;;  %v5702_v56 = vshll.u32 %v12601_v6, %v5687_v42  ;;  %v5549_v28 = vxor.u32 2147483648, %v5548_v8 }
 0x691   : > { %12813 = vst [vmem:[#allocation24_spill] sm:$0xff] %v12812_v26  ;;  %v11519_v0 = vsub.s32 %v5421_v46, %v5424_v60  ;;  %v5701_v3 = vor.u32 %v5700_v34, %v5699_v30  ;;  %vm5705_vm11 = vcmp.lt.s32.totalorder %v5686_v33, 1  ;;  %v5689_v13 = vshrl.u32 %v12597_v24, %v5688_v35 }
 0x692   : > { %v5704_v44 = vor.u32 %v5703_v59, %v5702_v56  ;;  %vm5708_vm4 = vcmp.lt.s32.totalorder %v5686_v33, 4  ;;  %v5713_v10 = vsel %vm5705_vm11, %v5692_v21, %v5695_v16  ;;  %vm5707_vm5 = vcmp.lt.s32.totalorder %v5686_v33, 3 }
 0x693   : > { %v5427_v11 = vsub.s32 0, %v11519_v0  ;;  %v5710_v37 = vsel %vm5708_vm4, %v5698_v50, 2102212464  ;;  %v5714_v19 = vsel %vm5708_vm4, %v5701_v3, 920167782  ;;  %v5550_v31 = vsel %vm12365_vm10, %v5549_v28, %v5548_v8 }
 0x694   : > { %vm5706_vm1 = vcmp.lt.s32.totalorder %v5686_v33, 2  ;;  %v5709_v46 = vsel %vm5705_vm11, %v5689_v13, %v5692_v21  ;;  %v5715_v42 = vsel %vm5707_vm5, %v5698_v50, %v5714_v19  ;;  %v5711_v4 = vsel %vm5707_vm5, %v5695_v16, %v5710_v37 }
 0x695   : > { %v6512_v61 = vmin.u32 %v5427_v11, %v11519_v0  ;;  %v5716_v35 = vsel %vm5706_vm1, %v5713_v10, %v5715_v42  ;;  %v5717_v43 = vsel %vm5705_vm11, %v5695_v16, %v5698_v50  ;;  %7215 = vcosq.f32 %v5241_v51 }
 0x696   : > { %v5718_v1 = vsel %vm5708_vm4, %v5704_v44, 1326507024  ;;  %v11531_v30 = vmul.u32.u64.low %v11482_v20, %v5716_v35  ;;  %v11532_v60 = vmul.u32.u64.high %v11482_v20, %v5716_v35, %v11531_v30  ;;  %v5577_v8 = vor.u32 8388608, %v11486_v15 }
 0x697   : > { %v5429_v34 = vclz %v6512_v61  ;;  %v5719_v28 = vsel %vm5707_vm5, %v5701_v3, %v5718_v1  ;;  %v5579_v59 = vadd.s32 1, %v6519_v17  ;;  %v11539_v37 = vsel %vm11511_vm3, %v11217_v47, %v5550_v31 }
 0x698   : > { %v5712_v21 = vsel %vm5706_vm1, %v5709_v46, %v5711_v4  ;;  %v5720_v16 = vsel %vm5706_vm1, %v5717_v43, %v5719_v28  ;;  %v12363_v44 = vand.u32 2147483647, %v11480_v5  ;;  %7217 = vsinq.f32 %v5241_v51 }
 0x699   : > { %v6513_v50 = vadd.s32 4294967294, %v5429_v34  ;;  %v11545_v56 = vmul.u32.u64.low %v11482_v20, %v5720_v16  ;;  %v11546_v13 = vmul.u32.u64.high %v11482_v20, %v5720_v16, %v11545_v56  ;;  %vm5580_vm4 = vcmp.gt.s32.totalorder %v5579_v59, 0 }
 0x69a   : > { %v5417_v15 = vadd.s32 %v11458_v25, %v11455_v39  ;;  %v5581_v17 = vsel %vm5580_vm4, %v5579_v59, 0  ;;  %v5884_v3 = vand.u32 2139095040, %v11480_v5  ;;  %7219 = vcosq.f32 %v11539_v37 }
 0x69b   : > { %vm6514_vm5 = vcmp.lt.s32.totalorder %v6513_v50, 0  ;;  %v5731_v33 = vadd.s32 1, %v11532_v60  ;;  %v5583_v10 = vand.u32 31, %v5581_v17  ;;  %v5728_v19 = vmul.u32 %v11482_v20, %v5712_v21 }
 0x69c   : > { %v5432_v11 = vsel %vm6514_vm5, 0, %v6513_v50  ;;  %v11554_v31 = vshll.u32 %v5577_v8, 8  ;;  %v11558_v51 = vand.u32 8388607, %v12363_v44  ;;  %v5582_v25 = vshrl.u32 %v5581_v17, 5 }
 0x69d   : > { %v5433_v46 = vsub.s32 32, %v5432_v11  ;;  %v5437_v39 = vsub.s32 4294967266, %v5432_v11  ;;  %v5885_v42 = vshrl.u32 %v5884_v3, 23  ;;  %v5434_v61 = vshll.u32 %v11519_v0, %v5432_v11 }
 0x69e   : > { %vm5730_vm1 = vc.u32 %v11546_v13, %v11531_v30  ;;  %v5584_v4 = vsub.s32 32, %v5583_v10  ;;  %v5586_v35 = vshll.u32 %v12597_v24, %v5583_v10  ;;  %v5589_v34 = vshll.u32 %v12743_v40, %v5583_v10 }
 0x69f   : > { %v5435_v43 = vshrl.u32 %v5417_v15, %v5433_v46  ;;  %v5438_v20 = vadd.s32 127, %v5437_v39  ;;  %v5732_v1 = vsel %vm5730_vm1, %v5731_v33, %v11532_v60  ;;  %v11566_v28 = vpop.eup %7215  ;;  %v5592_v0 = vshll.u32 %v12744_v53, %v5583_v10 }
 0x6a0   : > { %v5733_v8 = vadd.s32 %v5732_v1, %v5728_v19  ;;  %v5587_v59 = vshrl.u32 %v12743_v40, %v5584_v4  ;;  %v5590_v21 = vshrl.u32 %v12744_v53, %v5584_v4  ;;  %v5585_v56 = vshrl.u32 %v12597_v24, %v5584_v4 }
 0x6a1   : > { %v5436_v16 = vor.u32 %v5435_v43, %v5434_v61  ;;  %v5439_v50 = vshll.u32 %v5438_v20, 23  ;;  %v5593_v15 = vshrl.u32 %v12745_v62, %v5584_v4  ;;  %vm12377_vm11 = vcmp.lt.s32.totalorder %v11242_v48, 0 }
 0x6a2   : > { %v5734_v60 = vadd.s32 536870912, %v5733_v8  ;;  %v5588_v17 = vor.u32 %v5587_v59, %v5586_v35  ;;  %v5595_v3 = vshll.u32 %v12745_v62, %v5583_v10  ;;  %v5596_v33 = vshrl.u32 %v12601_v6, %v5584_v4  ;;  %v11576_v1 = vpop.eup %7217 }
 0x6a3   : > { %v5440_v11 = vor.u32 4788187, %v5439_v50  ;;  %v5443_v19 = vcvt.s32.f32 %v5436_v16  ;;  %v5591_v46 = vor.u32 %v5590_v21, %v5589_v34  ;;  %v5594_v39 = vor.u32 %v5593_v15, %v5592_v0 }
 0x6a4   : > { %v11578_v61 = vshrl.u32 %v5734_v60, 30  ;;  %v5597_v43 = vor.u32 %v5596_v33, %v5595_v3  ;;  %v5598_v20 = vshll.u32 %v12601_v6, %v5583_v10  ;;  %v5599_v44 = vshrl.u32 %v12602_v7, %v5584_v4  ;;  %v11582_v26 = vpop.eup %7219 }
 0x6a5   : > { %12815 = vst [vmem:[#allocation8_spill] sm:$0xff] %v11582_v26  ;;  %v12816_v35 = vand.u32 2147483647, %v11242_v48  ;;  %v12817_v59 = vmov 0  ;;  %v5441_v16 = vand.u32 2147483647, %v5440_v11  ;;  %7221 = vsinq.f32 %v11539_v37 }
 0x6a6   : > { %12814 = vst [vmem:[#allocation30_spill] sm:$0xff] %v11578_v61  ;;  %vm5601_vm5 = vcmp.lt.s32.totalorder %v5582_v25, 1  ;;  %vm5602_vm1 = vcmp.lt.s32.totalorder %v5582_v25, 2  ;;  %vm5604_vm10 = vcmp.lt.s32.totalorder %v5582_v25, 4  ;;  %v5736_v34 = vshll.u32 %v11578_v61, 30 }
 0x6a7   : > { %vm11586_vm4 = vcmp.le.f32.partialorder %v12816_v35, 0.7853982  ;;  %v5600_v21 = vor.u32 %v5599_v44, %v5598_v20  ;;  %vm5603_vm13 = vcmp.lt.s32.totalorder %v5582_v25, 3  ;;  %v5606_v10 = vsel %vm5604_vm10, %v5594_v39, 2102212464  ;;  %v5987_v25 = vld [vmem:[%s12126_s7 + $0x10] sm:$0xff] }
 0x6a8   : > { %v12818_v59 = vsel %vm11586_vm4, 4294967295, %v12817_v59  ;;  %v5444_v0 = vmul.f32 %v5443_v19, %v5441_v16  ;;  %v5605_v4 = vsel %vm5601_vm5, %v5585_v56, %v5588_v17  ;;  %v5609_v50 = vsel %vm5601_vm5, %v5588_v17, %v5591_v46 }
 0x6a9   : > { %12819 = vst [vmem:[#allocation27_spill] sm:$0xff] %v12818_v59  ;;  %v5610_v15 = vsel %vm5604_vm10, %v5597_v43, 920167782  ;;  %v11593_v60 = vsub.s32 %v5733_v8, %v5736_v34  ;;  %v5607_v3 = vsel %vm5603_vm13, %v5591_v46, %v5606_v10  ;;  %v5613_v35 = vsel %vm5601_vm5, %v5591_v46, %v5594_v39 }
 0x6aa   : > { %v5611_v33 = vsel %vm5603_vm13, %v5594_v39, %v5610_v15  ;;  %v5445_v11 = vxor.u32 2147483648, %v5444_v0  ;;  %v5614_v44 = vsel %vm5604_vm10, %v5600_v21, 1326507024  ;;  %v5608_v19 = vsel %vm5602_vm1, %v5605_v4, %v5607_v3  ;;  %v5985_v39 = vld [vmem:[%s12126_s7] sm:$0xff]  ;;  %v5986_v21 = vld [vmem:[%s12126_s7 + $0x8] sm:$0xff] }
 0x6ab   : > { %v5612_v26 = vsel %vm5602_vm1, %v5609_v50, %v5611_v33  ;;  %v5739_v20 = vsub.s32 0, %v11593_v60  ;;  %v5615_v61 = vsel %vm5603_vm13, %v5597_v43, %v5614_v44  ;;  %v6531_v46 = vadd.s32 4294967169, %v5885_v42  ;;  %v5988_v42 = vld [vmem:[%s12126_s7 + $0x18] sm:$0xff] }
 0x6ac   : > { %v11600_v56 = vmul.u32.u64.low %v11554_v31, %v5612_v26  ;;  %v11601_v17 = vmul.u32.u64.high %v11554_v31, %v5612_v26, %v11600_v56  ;;  %v5446_v8 = vsel %vm12377_vm11, %v5445_v11, %v5444_v0  ;;  %v5616_v37 = vsel %vm5602_vm1, %v5613_v35, %v5615_v61 }
 0x6ad   : > { %v6524_v16 = vmin.u32 %v5739_v20, %v11593_v60  ;;  %v11613_v43 = vmul.u32.u64.low %v11554_v31, %v5616_v37  ;;  %v11614_v34 = vmul.u32.u64.high %v11554_v31, %v5616_v37, %v11613_v43  ;;  %v5889_v26 = vor.u32 8388608, %v11558_v51  ;;  %v5989_v20 = vld [vmem:[%s12126_s7 + $0x20] sm:$0xff] }
 0x6ae   : > { %v5729_v61 = vadd.s32 %v11531_v30, %v11546_v13  ;;  %v5891_v10 = vadd.s32 1, %v6531_v46  ;;  %v12370_v0 = vand.u32 2147483647, %v11490_v36  ;;  %v5780_v51 = vand.u32 2139095040, %v11490_v36 }
 0x6af   : > { %v11633_v4 = vsel %vm11586_vm4, %v11242_v48, %v5446_v8  ;;  %v5741_v50 = vclz %v6524_v16  ;;  %v5624_v15 = vmul.u32 %v11554_v31, %v5608_v19  ;;  %v5627_v3 = vadd.s32 1, %v11601_v17  ;;  %v5990_v31 = vld [vmem:[%s12126_s7 + $0x28] sm:$0xff]  ;;  %v11657_v43 = vpop.eup %7221 }
 0x6b0   : > { %vm5892_vm13 = vcmp.gt.s32.totalorder %v5891_v10, 0  ;;  %v5781_v33 = vshrl.u32 %v5780_v51, 23  ;;  %v6821_v35 = vpack.c.bf16 %v5986_v21, %v5985_v39  ;;  %v6825_v11 = vpack.c.bf16 %v5988_v42, %v5987_v25  ;;  %12820 = vst [vmem:[#allocation23_spill] sm:$0xff] %v11657_v43 }
 0x6b1   : > { %v6525_v30 = vadd.s32 4294967294, %v5741_v50  ;;  %vm5626_vm10 = vc.u32 %v11614_v34, %v11600_v56  ;;  %v5893_v13 = vsel %vm5892_vm13, %v5891_v10, 0  ;;  %v11639_v44 = vshll.u32 %v5889_v26, 8 }
 0x6b2   : > { %7223 = vcosq.f32 %v11633_v4  ;;  %v5628_v8 = vsel %vm5626_vm10, %v5627_v3, %v11601_v17  ;;  %v5895_v19 = vand.u32 31, %v5893_v13  ;;  %v11651_v37 = vand.u32 8388607, %v12370_v0  ;;  %6837 = vmatprep.subr.bf16.mxu1 %v6821_v35  ;;  %6822 = vmatprep.subr.bf16.mxu0 %v6821_v35 }
 0x6b3   : > { %vm6526_vm5 = vcmp.lt.s32.totalorder %v6525_v30, 0  ;;  %v5629_v46 = vadd.s32 %v5628_v8, %v5624_v15  ;;  %v11653_v39 = vshrl.u32 %v5893_v13, 5  ;;  %v11655_v16 = vadd.s32 4294967169, %v5781_v33  ;;  %6841 = vmatpush3.bf16.msra.mxu1 %v6821_v35  ;;  %6824 = vmatpush3.bf16.msra.mxu0 %v6821_v35 }
 0x6b4   : > { %v5744_v26 = vsel %vm6526_vm5, 0, %v6525_v30  ;;  %v5896_v21 = vsub.s32 32, %v5895_v19  ;;  %v5898_v17 = vshll.u32 %v12597_v24, %v5895_v19  ;;  %6838 = vmatprep.subr.bf16.mxu1 %v6825_v11  ;;  %v6829_v25 = vpack.c.bf16 %v5990_v31, %v5989_v20  ;;  %6826 = vmatprep.subr.bf16.mxu0 %v6825_v11 }
 0x6b5   : > { %v5745_v42 = vsub.s32 32, %v5744_v26  ;;  %v5749_v10 = vsub.s32 4294967266, %v5744_v26  ;;  %v5630_v51 = vadd.s32 536870912, %v5629_v46  ;;  %v5901_v50 = vshll.u32 %v12743_v40, %v5895_v19 }
 0x6b6   : > { %v5746_v15 = vshll.u32 %v11593_v60, %v5744_v26  ;;  %v5899_v3 = vshrl.u32 %v12743_v40, %v5896_v21  ;;  %v5902_v33 = vshrl.u32 %v12744_v53, %v5896_v21  ;;  %v5904_v35 = vshll.u32 %v12744_v53, %v5895_v19 }
 0x6b7   : > { %v5747_v30 = vshrl.u32 %v5729_v61, %v5745_v42  ;;  %v5750_v13 = vadd.s32 127, %v5749_v10  ;;  %v11665_v8 = vshrl.u32 %v5630_v51, 30  ;;  %v5905_v20 = vshrl.u32 %v12745_v62, %v5896_v21  ;;  %6842 = vmatpush3.bf16.msra.mxu1 %v6825_v11  ;;  %6828 = vmatpush3.bf16.msra.mxu0 %v6825_v11 }
 0x6b8   : > { %v5900_v31 = vor.u32 %v5899_v3, %v5898_v17  ;;  %v5903_v0 = vor.u32 %v5902_v33, %v5901_v50  ;;  %v5907_v43 = vshll.u32 %v12745_v62, %v5895_v19  ;;  %v5908_v60 = vshrl.u32 %v12601_v6, %v5896_v21  ;;  %6839 = vmatprep.subr.bf16.mxu1 %v6829_v25 }
 0x6b9   : > { %v5748_v26 = vor.u32 %v5747_v30, %v5746_v15  ;;  %v5751_v47 = vshll.u32 %v5750_v13, 23  ;;  %v5632_v59 = vshll.u32 %v11665_v8, 30  ;;  %v5906_v48 = vor.u32 %v5905_v20, %v5904_v35  ;;  %6830 = vmatprep.subr.bf16.mxu0 %v6829_v25 }
 0x6ba   : > { %vm12378_vm1 = vcmp.lt.s32.totalorder %v11376_v54, 0  ;;  %v5897_v61 = vshrl.u32 %v12597_v24, %v5896_v21  ;;  %v5909_v42 = vor.u32 %v5908_v60, %v5907_v43  ;;  %v5910_v11 = vshll.u32 %v12601_v6, %v5895_v19 }
 0x6bb   : > { %v5911_v17 = vshrl.u32 %v12602_v7, %v5896_v21  ;;  %v5752_v10 = vor.u32 4788187, %v5751_v47  ;;  %v5755_v51 = vcvt.s32.f32 %v5748_v26  ;;  %v11675_v50 = vsub.s32 %v5629_v46, %v5632_v59  ;;  %6843 = vmatpush3.bf16.msra.mxu1 %v6829_v25  ;;  %6832 = vmatpush3.bf16.msra.mxu0 %v6829_v25 }
 0x6bc   : > { %vm5913_vm13 = vcmp.lt.s32.totalorder %v11653_v39, 1  ;;  %v11678_v15 = vpop.eup %7223  ;;  %vm5915_vm10 = vcmp.lt.s32.totalorder %v11653_v39, 3  ;;  %vm5916_vm5 = vcmp.lt.s32.totalorder %v11653_v39, 4  ;;  %vm5914_vm11 = vcmp.lt.s32.totalorder %v11653_v39, 2 }
 0x6bd   : > { %v5912_v3 = vor.u32 %v5911_v17, %v5910_v11  ;;  %v5917_v43 = vsel %vm5913_vm13, %v5897_v61, %v5900_v31  ;;  %v5753_v33 = vand.u32 2147483647, %v5752_v10  ;;  %v5635_v19 = vsub.s32 0, %v11675_v50  ;;  %v5992_v11 = vld [vmem:[%s12126_s7 + $0x38] sm:$0xff] }
 0x6be   : > { %v5918_v21 = vsel %vm5916_vm5, %v5906_v48, 2102212464  ;;  %v5921_v47 = vsel %vm5913_vm13, %v5900_v31, %v5903_v0  ;;  %v5922_v46 = vsel %vm5916_vm5, %v5909_v42, 920167782  ;;  %v5925_v35 = vsel %vm5913_vm13, %v5903_v0, %v5906_v48 }
 0x6bf   : > { %v5919_v59 = vsel %vm5915_vm10, %v5903_v0, %v5918_v21  ;;  %v5926_v30 = vsel %vm5916_vm5, %v5912_v3, 1326507024  ;;  %v5756_v25 = vmul.f32 %v5755_v51, %v5753_v33  ;;  %v6520_v13 = vmin.u32 %v5635_v19, %v11675_v50  ;;  %v5991_v0 = vld [vmem:[%s12126_s7 + $0x30] sm:$0xff] }
 0x6c0   : > { %v5923_v20 = vsel %vm5915_vm10, %v5906_v48, %v5922_v46  ;;  %v5927_v26 = vsel %vm5915_vm10, %v5909_v42, %v5926_v30  ;;  %v5785_v31 = vor.u32 8388608, %v11651_v37  ;;  %v5787_v61 = vadd.s32 1, %v11655_v16 }
 0x6c1   : > { %v5924_v60 = vsel %vm5914_vm11, %v5921_v47, %v5923_v20  ;;  %v5757_v17 = vxor.u32 2147483648, %v5756_v25  ;;  %v5637_v10 = vclz %v6520_v13  ;;  %v5920_v51 = vsel %vm5914_vm11, %v5917_v43, %v5919_v59 }
 0x6c2   : > { %v5928_v48 = vsel %vm5914_vm11, %v5925_v35, %v5927_v26  ;;  %v11704_v37 = vmul.u32.u64.low %v11639_v44, %v5924_v60  ;;  %v11705_v42 = vmul.u32.u64.high %v11639_v44, %v5924_v60, %v11704_v37  ;;  %vm5788_vm13 = vcmp.gt.s32.totalorder %v5787_v61, 0 }
 0x6c3   : > { %v11700_v3 = vmul.u32.u64.low %v11639_v44, %v5928_v48  ;;  %v11701_v39 = vmul.u32.u64.high %v11639_v44, %v5928_v48, %v11700_v3  ;;  %v5758_v16 = vsel %vm12378_vm1, %v5757_v17, %v5756_v25  ;;  %v6521_v33 = vadd.s32 4294967294, %v5637_v10 }
 0x6c4   : > { %v6833_v19 = vpack.c.bf16 %v5992_v11, %v5991_v0  ;;  %v12821_v43 = vsel %vm11010_vm12, 0, %v11068_v57  ;;  %7225 = vsinq.f32 %v11633_v4  ;;  %v12822_v47 = vand.u32 2147483647, %v11376_v54 }
 0x6c5   : > { %v11714_v21 = vadd.s32 3, %v12821_v43  ;;  %v12823_v59 = vmov 0  ;;  %v5789_v46 = vsel %vm5788_vm13, %v5787_v61, 0  ;;  %v5625_v35 = vadd.s32 %v11600_v56, %v11614_v34 }
 0x6c6   : > { %vm11719_vm11 = vcmp.le.f32.partialorder %v12822_v47, 0.7853982  ;;  %vm6522_vm10 = vcmp.lt.s32.totalorder %v6521_v33, 0  ;;  %v5936_v30 = vmul.u32 %v11639_v44, %v5920_v51  ;;  %v5791_v49 = vand.u32 31, %v5789_v46  ;;  %6840 = vmatprep.subr.bf16.mxu1 %v6833_v19  ;;  %6834 = vmatprep.subr.bf16.mxu0 %v6833_v19 }
 0x6c7   : > { %v12824_v59 = vsel %vm11719_vm11, 4294967295, %v12823_v59  ;;  %v11729_v57 = vsel %vm11719_vm11, %v11376_v54, %v5758_v16  ;;  %v5640_v4 = vsel %vm6522_vm10, 0, %v6521_v33  ;;  %vm5938_vm12 = vc.u32 %v11701_v39, %v11704_v37  ;;  %6844 = vmatpush3.bf16.msra.mxu1 %v6833_v19  ;;  %6836 = vmatpush3.bf16.msra.mxu0 %v6833_v19 }
 0x6c8   : > { %v11733_v25 = vshll.u32 %v5785_v31, 8  ;;  %v5641_v56 = vsub.s32 32, %v5640_v4  ;;  %v5645_v34 = vsub.s32 4294967266, %v5640_v4  ;;  %v5939_v44 = vadd.s32 1, %v11705_v42 }
 0x6c9   : > { %v11736_v13 = vshrl.u32 %v5789_v46, 5  ;;  %v5642_v20 = vshll.u32 %v11675_v50, %v5640_v4  ;;  %v5792_v60 = vsub.s32 32, %v5791_v49  ;;  %v5794_v26 = vshll.u32 %v12597_v24, %v5791_v49 }
 0x6ca   : > { %v5797_v61 = vshll.u32 %v12743_v40, %v5791_v49  ;;  %v5643_v0 = vshrl.u32 %v5625_v35, %v5641_v56  ;;  %v5646_v11 = vadd.s32 127, %v5645_v34  ;;  %v5940_v31 = vsel %vm5938_vm12, %v5939_v44, %v11705_v42 }
 0x6cb   : > { %v5800_v17 = vshll.u32 %v12744_v53, %v5791_v49  ;;  %v5941_v10 = vadd.s32 %v5940_v31, %v5936_v30  ;;  %v5795_v51 = vshrl.u32 %v12743_v40, %v5792_v60  ;;  %v5798_v48 = vshrl.u32 %v12744_v53, %v5792_v60 }
 0x6cc   : > { %v5803_v3 = vshll.u32 %v12745_v62, %v5791_v49  ;;  %v5644_v16 = vor.u32 %v5643_v0, %v5642_v20  ;;  %v5647_v50 = vshll.u32 %v5646_v11, 23  ;;  %v5801_v33 = vshrl.u32 %v12745_v62, %v5792_v60 }
 0x6cd   : > { %v5804_v19 = vshrl.u32 %v12601_v6, %v5792_v60  ;;  %v5942_v43 = vadd.s32 536870912, %v5941_v10  ;;  %v5796_v47 = vor.u32 %v5795_v51, %v5794_v26  ;;  %v5799_v46 = vor.u32 %v5798_v48, %v5797_v61 }
 0x6ce   : > { %v4407_v42 = vsub.s32 4, %v10724_v2  ;;  %v5648_v35 = vor.u32 4788187, %v5647_v50  ;;  %v5793_v40 = vshrl.u32 %v12597_v24, %v5792_v60  ;;  %v5802_v30 = vor.u32 %v5801_v33, %v5800_v17  ;;  %v11751_v4 = vpop.eup %7225 }
 0x6cf   : > { %v5805_v53 = vor.u32 %v5804_v19, %v5803_v3  ;;  %v5651_v56 = vcvt.s32.f32 %v5644_v16  ;;  %v11753_v34 = vshrl.u32 %v5942_v43, 30  ;;  %v5806_v62 = vshll.u32 %v12601_v6, %v5791_v49 }
 0x6d0   : > { %v5807_v44 = vshrl.u32 %v12602_v7, %v5792_v60  ;;  %v5649_v20 = vand.u32 2147483647, %v5648_v35  ;;  %vm5809_vm13 = vcmp.lt.s32.totalorder %v11736_v13, 1  ;;  %vm5810_vm10 = vcmp.lt.s32.totalorder %v11736_v13, 2 }
 0x6d1   : > { %vm5812_vm12 = vcmp.lt.s32.totalorder %v11736_v13, 4  ;;  %v12825_v24 = vand.u32 2147483647, %v11397_v23  ;;  %v12826_v26 = vmov 0  ;;  %v5944_v61 = vshll.u32 %v11753_v34, 30 }
 0x6d2   : > { %v5808_v0 = vor.u32 %v5807_v44, %v5806_v62  ;;  %v5814_v11 = vsel %vm5812_vm12, %v5802_v30, 2102212464  ;;  %v5817_v6 = vsel %vm5809_vm13, %v5796_v47, %v5799_v46  ;;  %v5652_v49 = vmul.f32 %v5651_v56, %v5649_v20 }
 0x6d3   : > { %vm11762_vm1 = vcmp.le.f32.partialorder %v12825_v24, 0.7853982  ;;  %vm5811_vm5 = vcmp.lt.s32.totalorder %v11736_v13, 3  ;;  %v5818_v7 = vsel %vm5812_vm12, %v5805_v53, 920167782  ;;  %v5821_v60 = vsel %vm5809_vm13, %v5799_v46, %v5802_v30 }
 0x6d4   : > { %v12827_v26 = vsel %vm11762_vm1, 4294967295, %v12826_v26  ;;  %v11768_v31 = vsub.s32 %v5941_v10, %v5944_v61  ;;  %v5813_v17 = vsel %vm5809_vm13, %v5793_v40, %v5796_v47  ;;  %v5819_v51 = vsel %vm5811_vm5, %v5802_v30, %v5818_v7 }
 0x6d5   : > { %v5822_v48 = vsel %vm5812_vm12, %v5808_v0, 1326507024  ;;  %v5653_v3 = vxor.u32 2147483648, %v5652_v49  ;;  %v5815_v16 = vsel %vm5811_vm5, %v5799_v46, %v5814_v11  ;;  %v5820_v50 = vsel %vm5810_vm10, %v5817_v6, %v5819_v51  ;;  %v12830_v11 = vld [vmem:[#allocation6_spill] sm:$0xff]  ;;  %v12831_v6 = vld [vmem:[#allocation32_spill] sm:$0xff] }
 0x6d6   : > { %v5823_v33 = vsel %vm5811_vm5, %v5805_v53, %v5822_v48  ;;  %v5947_v19 = vsub.s32 0, %v11768_v31  ;;  %v11776_v35 = vmul.u32.u64.low %v11733_v25, %v5820_v50  ;;  %v11777_v56 = vmul.u32.u64.high %v11733_v25, %v5820_v50, %v11776_v35  ;;  %v12833_v50 = vld [vmem:[#allocation40_spill] sm:$0xff] }
 0x6d7   : > { %v5824_v43 = vsel %vm5810_vm10, %v5821_v60, %v5823_v33  ;;  %7227 = vcosq.f32 %v11729_v57  ;;  %vm12828_vm13 = vcmp.lt.s32.totalorder %v10600_v58, 0  ;;  %vm12829_vm12 = vcmp.lt.s32.totalorder %v11397_v23, 0 }
 0x6d8   : > { %v11782_v10 = vmul.u32.u64.low %v11733_v25, %v5824_v43  ;;  %v11783_v47 = vmul.u32.u64.high %v11733_v25, %v5824_v43, %v11782_v10  ;;  %v4408_v46 = vsel %vm12828_vm13, %v4407_v42, %v10724_v2  ;;  %v5654_v40 = vsel %vm12829_vm12, %v5653_v3, %v5652_v49 }
 0x6d9   : > { %v6532_v30 = vmin.u32 %v5947_v19, %v11768_v31  ;;  %v5816_v53 = vsel %vm5810_vm10, %v5813_v17, %v5815_v16  ;;  %v4410_v62 = vsel %vm10867_vm8, 0, %v4408_v46  ;;  %7229 = vsinq.f32 %v11729_v57 }
 0x6da   : > { %v5937_v44 = vadd.s32 %v11704_v37, %v11701_v39  ;;  %v4414_v20 = vadd.s32 3, %v4410_v62  ;;  %v4418_v2 = vxor.u32 2147483648, %v11103_v29  ;;  %v5835_v24 = vadd.s32 1, %v11777_v56 }
 0x6db   : > { %v5949_v42 = vclz %v6532_v30  ;;  %v4421_v61 = vxor.u32 2147483648, %v10956_v12  ;;  %v4519_v0 = vand.u32 3, %v11357_v14  ;;  %v11806_v41 = vsel %vm11762_vm1, %v11397_v23, %v5654_v40 }
 0x6dc   : > { %v5832_v57 = vmul.u32 %v11733_v25, %v5816_v53  ;;  %vm5834_vm8 = vc.u32 %v11783_v47, %v11776_v35  ;;  %v4415_v39 = vand.u32 3, %v4414_v20  ;;  %v4522_v49 = vxor.u32 2147483648, %v12831_v6  ;;  %v12836_v20 = vld [vmem:[#allocation3_spill] sm:$0xff] }
 0x6dd   : > { %v6533_v37 = vadd.s32 4294967294, %v5949_v42  ;;  %v5836_v13 = vsel %vm5834_vm8, %v5835_v24, %v11777_v56  ;;  %vm4520_vm5 = vcmp.lt.s32.totalorder %v4519_v0, 2  ;;  %vm4521_vm3 = vcmp.eq.s32.totalorder %v4519_v0, 0 }
 0x6de   : > { %v5837_v7 = vadd.s32 %v5836_v13, %v5832_v57  ;;  %vm4417_vm13 = vcmp.eq.s32.totalorder %v4415_v39, 0  ;;  %vm4420_vm12 = vcmp.eq.s32.totalorder %v4415_v39, 2  ;;  %vm4416_vm1 = vcmp.lt.s32.totalorder %v4415_v39, 2 }
 0x6df   : > { %vm6534_vm11 = vcmp.lt.s32.totalorder %v6533_v37, 0  ;;  %v4419_v14 = vsel %vm4417_vm13, %v10956_v12, %v4418_v2  ;;  %v4422_v25 = vsel %vm4420_vm12, %v4421_v61, %v11103_v29  ;;  %vm12832_vm8 = vweird.f32 %v10600_v58  ;;  %v12835_v29 = vld [vmem:[#allocation38_spill] sm:$0xff] }
 0x6e0   : > { %v5952_v60 = vsel %vm6534_vm11, 0, %v6533_v37  ;;  %v5838_v17 = vadd.s32 536870912, %v5837_v7  ;;  %v4423_v51 = vsel %vm4416_vm1, %v4419_v14, %v4422_v25  ;;  %v4523_v33 = vsel %vm4521_vm3, %v12833_v50, %v4522_v49  ;;  %v12841_v25 = vld [vmem:[#allocation21_spill] sm:$0xff] }
 0x6e1   : > { %v5953_v48 = vsub.s32 32, %v5952_v60  ;;  %v5957_v3 = vsub.s32 4294967266, %v5952_v60  ;;  %v4424_v16 = vsel %vm12832_vm8, nan, %v4423_v51  ;;  %v11819_v19 = vpop.eup %7227  ;;  %vm12834_vm10 = vcmask 523264  }
 0x6e2   : > { %v11821_v43 = vshrl.u32 %v5838_v17, 30  ;;  %6765 = vmatprep.mubr.msk.f32.mxu0 %vm12834_vm10, %v4424_v16  ;;  %vm4524_vm13 = vcmp.eq.s32.totalorder %v4519_v0, 2  ;;  %v4525_v12 = vxor.u32 2147483648, %v12833_v50  ;;  %v4615_v56 = vsub.s32 4, %v12835_v29 }
 0x6e3   : > { %v5954_v10 = vshll.u32 %v11768_v31, %v5952_v60  ;;  %v5955_v46 = vshrl.u32 %v5937_v44, %v5953_v48  ;;  %v5958_v40 = vadd.s32 127, %v5957_v3  ;;  %v4626_v58 = vxor.u32 2147483648, %v11253_v63  ;;  %v11828_v30 = vpop.eup %7229  ;;  %v12842_v60 = vld [vmem:[#allocation10_spill] sm:$0xff] }
 0x6e4   : > { %v5840_v53 = vshll.u32 %v11821_v43, 30  ;;  %v4526_v62 = vsel %vm4524_vm13, %v4525_v12, %v12831_v6  ;;  %vm12837_vm3 = vcmp.lt.s32.totalorder %v12836_v20, 0  ;;  %vm4621_vm1 = vweird.f32 %v12836_v20  ;;  %v12843_v3 = vld [vmem:[#allocation22_spill] sm:$0xff] }
 0x6e5   : > { %v4616_v2 = vsel %vm12837_vm3, %v4615_v56, %v12835_v29  ;;  %v4629_v42 = vxor.u32 2147483648, %v11130_v22  ;;  %v5956_v24 = vor.u32 %v5955_v46, %v5954_v10  ;;  %v5959_v31 = vshll.u32 %v5958_v40, 23 }
 0x6e6   : > { %v4527_v44 = vsel %vm4520_vm5, %v4523_v33, %v4526_v62  ;;  %v4618_v57 = vsel %vm11028_vm14, 0, %v4616_v2  ;;  %vm5883_vm11 = vcmp.lt.s32.totalorder %v11480_v5, 0  ;;  %v11841_v39 = vsub.s32 %v5837_v7, %v5840_v53  ;;  %v12845_v2 = vld [vmem:[#allocation28_spill] sm:$0xff] }
 0x6e7   : > { %vm12839_vm10 = vweird.f32 %v12830_v11  ;;  %v4622_v13 = vadd.s32 3, %v4618_v57  ;;  %v4727_v6 = vand.u32 3, %v11714_v21  ;;  %v5960_v49 = vor.u32 4788187, %v5959_v31  ;;  %v12852_v57 = vld [vmem:[#allocation36_spill] sm:$0xff] }
 0x6e8   : > { %v4528_v37 = vsel %vm12839_vm10, nan, %v4527_v44  ;;  %v5963_v14 = vcvt.s32.f32 %v5956_v24  ;;  %vm12840_vm12 = vcmask 523264   ;;  %v4730_v0 = vxor.u32 2147483648, %v12841_v25 }
 0x6e9   : > { %6766 = vmatmul.mubr.msk.f32.vlgmr.msra.gmra.mrb[32].mxu0 %vm12840_vm12, %v4528_v37  ;;  %v4733_v17 = vxor.u32 2147483648, %v12842_v60  ;;  %v5843_v51 = vsub.s32 0, %v11841_v39  ;;  %v4623_v48 = vand.u32 3, %v4622_v13  ;;  %vm4728_vm14 = vcmp.lt.s32.totalorder %v4727_v6, 2  ;;  %v12853_v13 = vld [vmem:[#allocation20_spill] sm:$0xff] }
 0x6ea   : > { %vm4729_vm5 = vcmp.eq.s32.totalorder %v4727_v6, 0  ;;  %v5961_v7 = vand.u32 2147483647, %v5960_v49  ;;  %vm4732_vm8 = vcmp.eq.s32.totalorder %v4727_v6, 2  ;;  %v4823_v16 = vsub.s32 4, %v12843_v3 }
 0x6eb   : > { %v4731_v11 = vsel %vm4729_vm5, %v12842_v60, %v4730_v0  ;;  %v6528_v21 = vmin.u32 %v5843_v51, %v11841_v39  ;;  %vm4624_vm13 = vcmp.lt.s32.totalorder %v4623_v48, 2  ;;  %vm4625_vm3 = vcmp.eq.s32.totalorder %v4623_v48, 0 }
 0x6ec   : > { %vm4628_vm10 = vcmp.eq.s32.totalorder %v4623_v48, 2  ;;  %v5964_v50 = vmul.f32 %v5963_v14, %v5961_v7  ;;  %v4627_v33 = vsel %vm4625_vm3, %v11130_v22, %v4626_v58  ;;  %v4734_v29 = vsel %vm4732_vm8, %v4733_v17, %v12841_v25  ;;  %v12854_v14 = vld [vmem:[#allocation25_spill] sm:$0xff] }
 0x6ed   : > { %v4630_v12 = vsel %vm4628_vm10, %v4629_v42, %v11253_v63  ;;  %v5845_v56 = vclz %v6528_v21  ;;  %v4735_v46 = vsel %vm4728_vm14, %v4731_v11, %v4734_v29  ;;  %vm12844_vm12 = vcmp.lt.s32.totalorder %v10823_v45, 0 }
 0x6ee   : > { %v4631_v10 = vsel %vm4624_vm13, %v4627_v33, %v4630_v12  ;;  %v4824_v40 = vsel %vm12844_vm12, %v4823_v16, %v12843_v3  ;;  %v5965_v53 = vxor.u32 2147483648, %v5964_v50  ;;  %vm4725_vm5 = vweird.f32 %v12845_v2 }
 0x6ef   : > { %v4632_v62 = vsel %vm4621_vm1, nan, %v4631_v10  ;;  %v4826_v22 = vsel %vm11181_vm7, 0, %v4824_v40  ;;  %7231 = vcosq.f32 %v11806_v41  ;;  %v6529_v63 = vadd.s32 4294967294, %v5845_v56 }
 0x6f0   : > { %vm12846_vm8 = vcmask 523264   ;;  %v4736_v58 = vsel %vm4725_vm5, nan, %v4735_v46  ;;  %v4830_v42 = vadd.s32 3, %v4826_v22  ;;  %7233 = vsinq.f32 %v11806_v41  ;;  %v12859_v46 = vld [vmem:[#allocation37_spill] sm:$0xff] }
 0x6f1   : > { %6768 = vmatprep.mubr.msk.f32.mxu1 %vm12846_vm8, %v4632_v62  ;;  %v12847_v24 = vand.u32 2147483647, %v11480_v5  ;;  %v5966_v20 = vsel %vm5883_vm11, %v5965_v53, %v5964_v50  ;;  %vm12850_vm1 = vmmov %vm12846_vm8  ;;  %v4927_v44 = vsub.s32 4, %v12851_v38  ;;  %vm6530_vm7 = vcmp.lt.s32.totalorder %v6529_v63, 0  ;;  %v12857_v50 = vld [vmem:[#allocation35_spill] sm:$0xff]  ;;  %v12860_v62 = vld [vmem:[#allocation29_spill] sm:$0xff] }
 0x6f2   : > { %6769 = vmatmul.mubr.msk.f32.vlgmr.msra.gmra.mrb[16].mxu1 %vm12850_vm1, %v4736_v58  ;;  %v4831_v61 = vand.u32 3, %v4830_v42  ;;  %v4834_v37 = vxor.u32 2147483648, %v12852_v57  ;;  %v4837_v6 = vxor.u32 2147483648, %v12853_v13  ;;  %v5833_v41 = vadd.s32 %v11776_v35, %v11783_v47  ;;  %v12883_v35 = vld [vmem:[#allocation41_spill] sm:$0xff] }
 0x6f3   : > { %vm11870_vm14 = vcmp.le.f32.partialorder %v12847_v24, 0.7853982  ;;  %v5848_v49 = vsel %vm6530_vm7, 0, %v6529_v63  ;;  %vm4829_vm13 = vweird.f32 %v10823_v45  ;;  %vm12855_vm3 = vcmp.lt.s32.totalorder %v12854_v14, 0  ;;  %v12862_v63 = vld [vmem:[#allocation43_spill] sm:$0xff] }
 0x6f4   : > { %v4928_v25 = vsel %vm12855_vm3, %v4927_v44, %v12851_v38  ;;  %v11889_v0 = vsel %vm11870_vm14, %v11480_v5, %v5966_v20  ;;  %v5849_v60 = vsub.s32 32, %v5848_v49  ;;  %v5850_v17 = vshll.u32 %v11841_v39, %v5848_v49  ;;  %v12858_v39 = vld [vmem:[#allocation34_spill] sm:$0xff] }
 0x6f5   : > { %v5853_v51 = vsub.s32 4294967266, %v5848_v49  ;;  %vm4832_vm10 = vcmp.lt.s32.totalorder %v4831_v61, 2  ;;  %vm4833_vm12 = vcmp.eq.s32.totalorder %v4831_v61, 0  ;;  %vm4836_vm5 = vcmp.eq.s32.totalorder %v4831_v61, 2 }
 0x6f6   : > { %v4930_v47 = vsel %vm11116_vm15, 0, %v4928_v25  ;;  %vm4933_vm8 = vweird.f32 %v12854_v14  ;;  %v5851_v48 = vshrl.u32 %v5833_v41, %v5849_v60  ;;  %v4835_v11 = vsel %vm4833_vm12, %v12853_v13, %v4834_v37  ;;  %v12867_v25 = vld [vmem:[#allocation9_spill] sm:$0xff] }
 0x6f7   : > { %v5854_v7 = vadd.s32 127, %v5853_v51  ;;  %v4838_v3 = vsel %vm4836_vm5, %v4837_v6, %v12852_v57  ;;  %v4934_v21 = vadd.s32 3, %v4930_v47  ;;  %v4938_v33 = vxor.u32 2147483648, %v12857_v50 }
 0x6f8   : > { %v4839_v16 = vsel %vm4832_vm10, %v4835_v11, %v4838_v3  ;;  %v5031_v12 = vsub.s32 4, %v12858_v39  ;;  %v5852_v29 = vor.u32 %v5851_v48, %v5850_v17  ;;  %v4941_v40 = vxor.u32 2147483648, %v12859_v46 }
 0x6f9   : > { %v5855_v56 = vshll.u32 %v5854_v7, 23  ;;  %v4840_v10 = vsel %vm4829_vm13, nan, %v4839_v16  ;;  %vm5779_vm15 = vcmp.lt.s32.totalorder %v11490_v36, 0  ;;  %v4935_v53 = vand.u32 3, %v4934_v21  ;;  %v11909_v42 = vpop.eup %7231 }
 0x6fa   : > { %6771 = vmatprep.mubr.msk.f32.mxu1 %vm12850_vm1, %v4840_v10  ;;  %vm12861_vm7 = vcmp.lt.s32.totalorder %v12860_v62, 0  ;;  %v5042_v22 = vxor.u32 2147483648, %v11425_v27  ;;  %v5135_v58 = vsub.s32 4, %v12862_v63  ;;  %v12863_v45 = vand.u32 2147483647, %v11490_v36  ;;  %v11920_v37 = vpop.eup %7233 }
 0x6fb   : > { %v5032_v2 = vsel %vm12861_vm7, %v5031_v12, %v12858_v39  ;;  %v5856_v20 = vor.u32 4788187, %v5855_v56  ;;  %v5859_v38 = vcvt.s32.f32 %v5852_v29  ;;  %v5045_v57 = vxor.u32 2147483648, %v11416_v32 }
 0x6fc   : > { %vm11913_vm13 = vcmp.le.f32.partialorder %v12863_v45, 0.7853982  ;;  %v5034_v61 = vsel %vm11291_vm6, 0, %v5032_v2  ;;  %vm4936_vm3 = vcmp.lt.s32.totalorder %v4935_v53, 2  ;;  %vm4937_vm10 = vcmp.eq.s32.totalorder %v4935_v53, 0  ;;  %vm12870_vm6 = vmmov %vm12850_vm1 }
 0x6fd   : > { %vm4940_vm12 = vcmp.eq.s32.totalorder %v4935_v53, 2  ;;  %v5038_v13 = vadd.s32 3, %v5034_v61  ;;  %v5857_v6 = vand.u32 2147483647, %v5856_v20  ;;  %v4939_v41 = vsel %vm4937_vm10, %v12859_v46, %v4938_v33  ;;  %v12879_v61 = vld [vmem:[#allocation15_spill] sm:$0xff] }
 0x6fe   : > { %v4942_v49 = vsel %vm4940_vm12, %v4941_v40, %v12857_v50  ;;  %vm12868_vm5 = vcmp.lt.s32.totalorder %v12867_v25, 0  ;;  %v5146_v48 = vxor.u32 2147483648, %v11411_v18  ;;  %v5149_v16 = vxor.u32 2147483648, %v11405_v55 }
 0x6ff   : > { %v5136_v60 = vsel %vm12868_vm5, %v5135_v58, %v12862_v63  ;;  %v4943_v17 = vsel %vm4936_vm3, %v4939_v41, %v4942_v49  ;;  %v5039_v51 = vand.u32 3, %v5038_v13  ;;  %v5860_v7 = vmul.f32 %v5859_v38, %v5857_v6  ;;  %vm12872_vm5 = vmmov %vm12870_vm6  ;;  %v12874_v63 = vld [vmem:[#allocation39_spill] sm:$0xff]  ;;  %v12878_v38 = vld [vmem:[#allocation16_spill] sm:$0xff] }
 0x700   : > { %v5138_v47 = vsel %vm11226_vm2, 0, %v5136_v60  ;;  %v4944_v11 = vsel %vm4933_vm8, nan, %v4943_v17  ;;  %v5239_v21 = vsub.s32 4, %v11336_v9  ;;  %7235 = vcosq.f32 %v11889_v0  ;;  %v12881_v60 = vld [vmem:[#allocation7_spill] sm:$0xff] }
 0x701   : > { %v5142_v3 = vadd.s32 3, %v5138_v47  ;;  %6772 = vmatmul.mubr.msk.f32.gmra.mrb[18].mxu1 %vm12870_vm6, %v4944_v11  ;;  %vm5040_vm1 = vcmp.lt.s32.totalorder %v5039_v51, 2  ;;  %vm5041_vm7 = vcmp.eq.s32.totalorder %v5039_v51, 0  ;;  %vm5044_vm10 = vcmp.eq.s32.totalorder %v5039_v51, 2  ;;  %v12885_v11 = vld [vmem:[#allocation4_spill] sm:$0xff] }
 0x702   : > { %v5861_v50 = vxor.u32 2147483648, %v5860_v7  ;;  %v5043_v33 = vsel %vm5041_vm7, %v11416_v32, %v5042_v22  ;;  %v5046_v39 = vsel %vm5044_vm10, %v5045_v57, %v11425_v27  ;;  %vm5037_vm2 = vweird.f32 %v12860_v62 }
 0x703   : > { %v5143_v12 = vand.u32 3, %v5142_v3  ;;  %v5047_v14 = vsel %vm5040_vm1, %v5043_v33, %v5046_v39  ;;  %vm12871_vm8 = vcmp.lt.s32.totalorder %v11087_v52, 0  ;;  %vm5141_vm3 = vweird.f32 %v12867_v25  ;;  %v12887_v39 = vld [vmem:[#allocation33_spill] sm:$0xff] }
 0x704   : > { %v5240_v29 = vsel %vm12871_vm8, %v5239_v21, %v11336_v9  ;;  %v5862_v56 = vsel %vm5779_vm15, %v5861_v50, %v5860_v7  ;;  %v5048_v10 = vsel %vm5037_vm2, nan, %v5047_v14  ;;  %v5250_v62 = vxor.u32 2147483648, %v11576_v1 }
 0x705   : > { %vm5145_vm12 = vcmp.eq.s32.totalorder %v5143_v12, 0  ;;  %v5865_v27 = vsel %vm11913_vm13, %v11490_v36, %v5862_v56  ;;  %6774 = vmatprep.mubr.msk.f32.mxu1 %vm12872_vm5, %v5048_v10  ;;  %vm5148_vm6 = vcmp.eq.s32.totalorder %v5143_v12, 2  ;;  %v5242_v40 = vsel %vm11449_vm9, 0, %v5240_v29  ;;  %vm12875_vm9 = vmmov %vm12872_vm5  ;;  %v12889_v10 = vld [vmem:[#allocation24_spill] sm:$0xff] }
 0x706   : > { %v5147_v32 = vsel %vm5145_vm12, %v11405_v55, %v5146_v48  ;;  %vm5144_vm1 = vcmp.lt.s32.totalorder %v5143_v12, 2  ;;  %v5150_v9 = vsel %vm5148_vm6, %v5149_v16, %v11411_v18  ;;  %v5246_v53 = vadd.s32 3, %v5242_v40  ;;  %v12876_v18 = vld [vmem:[#allocation31_spill] sm:$0xff]  ;;  %vm12886_vm6 = vmmov %vm12875_vm9 }
 0x707   : > { %7237 = vcosq.f32 %v5865_v27  ;;  %v5151_v2 = vsel %vm5144_vm1, %v5147_v32, %v5150_v9  ;;  %v5253_v22 = vxor.u32 2147483648, %v11566_v28  ;;  %v5343_v58 = vsub.s32 4, %v12874_v63 }
 0x708   : > { %7239 = vsinq.f32 %v5865_v27  ;;  %v5152_v55 = vsel %vm5141_vm3, nan, %v5151_v2  ;;  %vm5245_vm7 = vweird.f32 %v11087_v52  ;;  %v5247_v45 = vand.u32 3, %v5246_v53 }
 0x709   : > { %6775 = vmatmul.mubr.msk.f32.gmra.mrb[20].mxu1 %vm12875_vm9, %v5152_v55  ;;  %vm12877_vm10 = vcmp.lt.s32.totalorder %v12876_v18, 0  ;;  %vm5349_vm2 = vweird.f32 %v12876_v18  ;;  %v5354_v44 = vxor.u32 2147483648, %v12878_v38  ;;  %v5447_v57 = vsub.s32 4, %v12879_v61  ;;  %v12893_v55 = vld [vmem:[#allocation8_spill] sm:$0xff] }
 0x70a   : > { %v5344_v20 = vsel %vm12877_vm10, %v5343_v58, %v12874_v63  ;;  %vm5248_vm8 = vcmp.lt.s32.totalorder %v5247_v45, 2  ;;  %vm5249_vm12 = vcmp.eq.s32.totalorder %v5247_v45, 0  ;;  %vm5252_vm5 = vcmp.eq.s32.totalorder %v5247_v45, 2  ;;  %v11977_v16 = vpop.eup %7235 }
 0x70b   : > { %v5346_v6 = vsel %vm11381_vm0, 0, %v5344_v20  ;;  %v5251_v41 = vsel %vm5249_vm12, %v11566_v28, %v5250_v62  ;;  %v5254_v49 = vsel %vm5252_vm5, %v5253_v22, %v11576_v1  ;;  %vm12882_vm3 = vcmp.lt.s32.totalorder %v12881_v60, 0 }
 0x70c   : > { %v5350_v25 = vadd.s32 3, %v5346_v6  ;;  %v5448_v17 = vsel %vm12882_vm3, %v5447_v57, %v12879_v61  ;;  %v5255_v51 = vsel %vm5248_vm8, %v5251_v41, %v5254_v49  ;;  %v5357_v47 = vxor.u32 2147483648, %v12883_v35  ;;  %v12896_v61 = vld [vmem:[#allocation30_spill] sm:$0xff] }
 0x70d   : > { %v5450_v7 = vsel %vm11586_vm4, 0, %v5448_v17  ;;  %v5551_v3 = vsub.s32 4, %v12885_v11  ;;  %v5256_v28 = vsel %vm5245_vm7, nan, %v5255_v51  ;;  %vm5453_vm0 = vweird.f32 %v12881_v60 }
 0x70e   : > { %v5351_v21 = vand.u32 3, %v5350_v25  ;;  %v5454_v1 = vadd.s32 3, %v5450_v7  ;;  %6777 = vmatprep.mubr.msk.f32.mxu1 %vm12886_vm6, %v5256_v28  ;;  %v5458_v50 = vxor.u32 2147483648, %v11751_v4  ;;  %v5461_v33 = vxor.u32 2147483648, %v11678_v15 }
 0x70f   : > { %vm12888_vm4 = vcmp.lt.s32.totalorder %v12887_v39, 0  ;;  %v5655_v14 = vsub.s32 4, %v11665_v8  ;;  %vm12890_vm7 = vnez %v12889_v10  ;;  %vm12891_vm8 = vcmp.lt.s32.totalorder %v11397_v23, 0 }
 0x710   : > { %v5552_v12 = vsel %vm12888_vm4, %v5551_v3, %v12885_v11  ;;  %vm5352_vm1 = vcmp.lt.s32.totalorder %v5351_v21, 2  ;;  %vm5353_vm9 = vcmp.eq.s32.totalorder %v5351_v21, 0  ;;  %vm5356_vm10 = vcmp.eq.s32.totalorder %v5351_v21, 2 }
 0x711   : > { %v5455_v52 = vand.u32 3, %v5454_v1  ;;  %v5355_v29 = vsel %vm5353_vm9, %v12883_v35, %v5354_v44  ;;  %v5358_v56 = vsel %vm5356_vm10, %v5357_v47, %v12878_v38  ;;  %v5554_v27 = vsel %vm12890_vm7, 0, %v5552_v12  ;;  %v11996_v46 = vpop.eup %7237 }
 0x712   : > { %v5656_v32 = vsel %vm12891_vm8, %v5655_v14, %v11665_v8  ;;  %v5359_v40 = vsel %vm5352_vm1, %v5355_v29, %v5358_v56  ;;  %v11998_v9 = vpop.eup %7239  ;;  %v5558_v22 = vadd.s32 3, %v5554_v27  ;;  %v12892_v8 = vld [vmem:[#allocation23_spill] sm:$0xff]  ;;  %v5565_v45 = vxor.u32 2147483648, %v12893_v55 }
 0x713   : > { %vm5456_vm12 = vcmp.lt.s32.totalorder %v5455_v52, 2  ;;  %vm5457_vm5 = vcmp.eq.s32.totalorder %v5455_v52, 0  ;;  %vm5460_vm3 = vcmp.eq.s32.totalorder %v5455_v52, 2  ;;  %v5360_v53 = vsel %vm5349_vm2, nan, %v5359_v40  ;;  %vm12895_vm2 = vmmov %vm12886_vm6 }
 0x714   : > { %v5459_v62 = vsel %vm5457_vm5, %v11678_v15, %v5458_v50  ;;  %v5462_v2 = vsel %vm5460_vm3, %v5461_v33, %v11751_v4  ;;  %6778 = vmatmul.mubr.msk.f32.gmra.mrb[22].mxu1 %vm12886_vm6, %v5360_v53  ;;  %v5562_v58 = vxor.u32 2147483648, %v12892_v8  ;;  %vm12894_vm4 = vnez %v12827_v26  ;;  %vm12899_vm6 = vmmov %vm12895_vm2 }
 0x715   : > { %v5463_v63 = vsel %vm5456_vm12, %v5459_v62, %v5462_v2  ;;  %v5658_v20 = vsel %vm12894_vm4, 0, %v5656_v32  ;;  %7241 = vsinq.f32 %v11889_v0  ;;  %v5559_v38 = vand.u32 3, %v5558_v22 }
 0x716   : > { %v5464_v18 = vsel %vm5453_vm0, nan, %v5463_v63  ;;  %v5662_v15 = vadd.s32 3, %v5658_v20  ;;  %vm5557_vm1 = vweird.f32 %v12887_v39  ;;  %v5666_v4 = vxor.u32 2147483648, %v11920_v37 }
 0x717   : > { %6780 = vmatprep.mubr.msk.f32.mxu1 %vm12895_vm2, %v5464_v18  ;;  %v5669_v44 = vxor.u32 2147483648, %v11909_v42  ;;  %v5759_v57 = vsub.s32 4, %v12896_v61  ;;  %vm5560_vm9 = vcmp.lt.s32.totalorder %v5559_v38, 2  ;;  %vm5561_vm10 = vcmp.eq.s32.totalorder %v5559_v38, 0 }
 0x718   : > { %vm5564_vm7 = vcmp.eq.s32.totalorder %v5559_v38, 2  ;;  %v5663_v26 = vand.u32 3, %v5662_v15  ;;  %v5563_v0 = vsel %vm5561_vm10, %v12893_v55, %v5562_v58  ;;  %vm12897_vm0 = vcmp.lt.s32.totalorder %v11376_v54, 0 }
 0x719   : > { %v5566_v13 = vsel %vm5564_vm7, %v5565_v45, %v12892_v8  ;;  %v5760_v6 = vsel %vm12897_vm0, %v5759_v57, %v12896_v61  ;;  %v5863_v41 = vsub.s32 4, %v11821_v43  ;;  %vm12898_vm3 = vnez %v12824_v59 }
 0x71a   : > { %v5567_v49 = vsel %vm5560_vm9, %v5563_v0, %v5566_v13  ;;  %vm5664_vm8 = vcmp.lt.s32.totalorder %v5663_v26, 2  ;;  %vm5665_vm12 = vcmp.eq.s32.totalorder %v5663_v26, 0  ;;  %vm5668_vm5 = vcmp.eq.s32.totalorder %v5663_v26, 2 }
 0x71b   : > { %v5568_v25 = vsel %vm5557_vm1, nan, %v5567_v49  ;;  %v5667_v60 = vsel %vm5665_vm12, %v11909_v42, %v5666_v4  ;;  %v5670_v17 = vsel %vm5668_vm5, %v5669_v44, %v11920_v37  ;;  %v5762_v51 = vsel %vm12898_vm3, 0, %v5760_v6 }
 0x71c   : > { %6781 = vmatmul.mubr.msk.f32.gmra.mrb[24].mxu1 %vm12899_vm6, %v5568_v25  ;;  %vm5661_vm4 = vweird.f32 %v11397_v23  ;;  %v5671_v35 = vsel %vm5664_vm8, %v5667_v60, %v5670_v17  ;;  %v5766_v47 = vadd.s32 3, %v5762_v51  ;;  %v5864_v48 = vsel %vm5779_vm15, %v5863_v41, %v11821_v43  ;;  %vm12900_vm8 = vmmov %vm12895_vm2 }
 0x71d   : > { %v5672_v7 = vsel %vm5661_vm4, nan, %v5671_v35  ;;  %v5770_v11 = vxor.u32 2147483648, %v11828_v30  ;;  %v5773_v42 = vxor.u32 2147483648, %v11819_v19  ;;  %v5866_v37 = vsel %vm11913_vm13, 0, %v5864_v48  ;;  %vm12902_vm4 = vmmov %vm12895_vm2 }
 0x71e   : > { %6783 = vmatprep.mubr.msk.f32.mxu1 %vm12895_vm2, %v5672_v7  ;;  %v5767_v59 = vand.u32 3, %v5766_v47  ;;  %v5870_v3 = vadd.s32 3, %v5866_v37  ;;  %v5967_v23 = vsub.s32 4, %v11753_v34  ;;  %v5874_v28 = vxor.u32 2147483648, %v11998_v9 }
 0x71f   : > { %v5877_v21 = vxor.u32 2147483648, %v11996_v46  ;;  %v7242_v1 = vpop.eup %7241  ;;  %vm5765_vm15 = vweird.f32 %v11376_v54  ;;  %vm5869_vm12 = vweird.f32 %v11490_v36  ;;  %v5981_v56 = vxor.u32 2147483648, %v11977_v16 }
 0x720   : > { %vm5769_vm1 = vcmp.eq.s32.totalorder %v5767_v59, 0  ;;  %vm5772_vm9 = vcmp.eq.s32.totalorder %v5767_v59, 2  ;;  %v5871_v43 = vand.u32 3, %v5870_v3  ;;  %vm5768_vm10 = vcmp.lt.s32.totalorder %v5767_v59, 2 }
 0x721   : > { %v5771_v24 = vsel %vm5769_vm1, %v11819_v19, %v5770_v11  ;;  %v5774_v50 = vsel %vm5772_vm9, %v5773_v42, %v11828_v30  ;;  %v5968_v33 = vsel %vm5883_vm11, %v5967_v23, %v11753_v34  ;;  %v5978_v34 = vxor.u32 2147483648, %v7242_v1  ;;  %vm12901_vm11 = vmmov %vm12895_vm2 }
 0x722   : > { %v5775_v39 = vsel %vm5768_vm10, %v5771_v24, %v5774_v50  ;;  %vm5872_vm13 = vcmp.lt.s32.totalorder %v5871_v43, 2  ;;  %vm5873_vm7 = vcmp.eq.s32.totalorder %v5871_v43, 0  ;;  %vm5876_vm0 = vcmp.eq.s32.totalorder %v5871_v43, 2 }
 0x723   : > { %v5776_v12 = vsel %vm5765_vm15, nan, %v5775_v39  ;;  %v5875_v14 = vsel %vm5873_vm7, %v11996_v46, %v5874_v28  ;;  %v5878_v54 = vsel %vm5876_vm0, %v5877_v21, %v11998_v9  ;;  %v5970_v52 = vsel %vm11870_vm14, 0, %v5968_v33  ;;  %v12059_v46 = vld [vmem:[#allocation2] ss:$0 sm:$0xff] }
 0x724   : > { %6784 = vmatmul.mubr.msk.f32.gmra.mrb[26].mxu1 %vm12900_vm8, %v5776_v12  ;;  %v5879_v19 = vsel %vm5872_vm13, %v5875_v14, %v5878_v54  ;;  %v5974_v30 = vadd.s32 3, %v5970_v52  ;;  %vm5973_vm14 = vweird.f32 %v11480_v5  ;;  %vm6209_vm2 = vcmask 7168  }
 0x725   : > { %v5880_v29 = vsel %vm5869_vm12, nan, %v5879_v19 }
 0x726   : > { %6786 = vmatprep.mubr.msk.f32.mxu1 %vm12901_vm11, %v5880_v29  ;;  %v5975_v10 = vand.u32 3, %v5974_v30 }
 0x728   : > { %vm5977_vm5 = vcmp.eq.s32.totalorder %v5975_v10, 0  ;;  %vm5980_vm3 = vcmp.eq.s32.totalorder %v5975_v10, 2  ;;  %vm5976_vm6 = vcmp.lt.s32.totalorder %v5975_v10, 2 }
 0x729   : > { %v5979_v27 = vsel %vm5977_vm5, %v11977_v16, %v5978_v34  ;;  %v5982_v31 = vsel %vm5980_vm3, %v5981_v56, %v7242_v1 }
 0x72a   : > { %v5983_v32 = vsel %vm5976_vm6, %v5979_v27, %v5982_v31 }
 0x72b   : > { %v5984_v36 = vsel %vm5973_vm14, nan, %v5983_v32 }
 0x72c   : > { %6787 = vmatmul.mubr.msk.f32.gmra.mrb[28].mxu1 %vm12902_vm4, %v5984_v36 }
 0x7bc   : > { %v6767_v40 = vpop.f32.mrb[32].mxu0 }
 0x7bd   : > { %v6120_v9 = vadd.f32 %v6767_v40, %v12059_v46  ;;  %v6114_v53 = vpop.f32.mrb[33].mxu0 }
 0x7be   : > { %v6115_v62 = vadd.f32 %v12059_v46, %v6114_v53 }
 0x7bf   : > { %7243 = vtanh.f32 %v6120_v9 }
 0x7c0   : > { %7245 = vtanh.f32 %v6115_v62 }
 0x7c5   : > { %v6770_v2 = vpop.f32.mrb[16].mxu1 }
 0x7c6   : > { %v6130_v16 = vadd.f32 %v6770_v2, %v12059_v46  ;;  %v6124_v22 = vpop.f32.mrb[17].mxu1 }
 0x7c7   : > { %v6125_v5 = vadd.f32 %v12059_v46, %v6124_v22 }
 0x7c8   : > { %7247 = vtanh.f32 %v6130_v16 }
 0x7c9   : > { %7249 = vtanh.f32 %v6125_v5  ;;  %v7244_v63 = vpop.eup %7243 }
 0x7ca   : > { %v7246_v8 = vpop.eup %7245  ;;  %6211 = vst.msk [vmem:[%s12070_s26 + $0x8] sm:$0xff] %vm6209_vm2, %v7244_v63 }
 0x7cb   : > { %6210 = vst.msk [vmem:[%s12070_s26] sm:$0xff] %vm6209_vm2, %v7246_v8 }
 0x7d2   : > { %v7248_v58 = vpop.eup %7247 }
 0x7d3   : > { %v7250_v55 = vpop.eup %7249  ;;  %6213 = vst.msk [vmem:[%s12070_s26 + $0x18] sm:$0xff] %vm6209_vm2, %v7248_v58 }
 0x7d4   : > { %v6773_v45 = vpop.f32.mrb[18].mxu1  ;;  %6212 = vst.msk [vmem:[%s12070_s26 + $0x10] sm:$0xff] %vm6209_vm2, %v7250_v55 }
 0x7d5   : > { %v6140_v20 = vadd.f32 %v6773_v45, %v12059_v46  ;;  %v6134_v18 = vpop.f32.mrb[19].mxu1 }
 0x7d6   : > { %v6135_v38 = vadd.f32 %v12059_v46, %v6134_v18 }
 0x7d7   : > { %7251 = vtanh.f32 %v6140_v20 }
 0x7d8   : > { %7253 = vtanh.f32 %v6135_v38 }
 0x7dc   : > { %v6776_v15 = vpop.f32.mrb[20].mxu1 }
 0x7dd   : > { %v6150_v4 = vadd.f32 %v6776_v15, %v12059_v46  ;;  %v6144_v44 = vpop.f32.mrb[21].mxu1 }
 0x7de   : > { %v6145_v61 = vadd.f32 %v12059_v46, %v6144_v44 }
 0x7df   : > { %7255 = vtanh.f32 %v6150_v4 }
 0x7e0   : > { %7257 = vtanh.f32 %v6145_v61 }
 0x7e1   : > { %v7252_v57 = vpop.eup %7251 }
 0x7e2   : > { %v7254_v26 = vpop.eup %7253  ;;  %6215 = vst.msk [vmem:[%s12070_s26 + $0x28] sm:$0xff] %vm6209_vm2, %v7252_v57 }
 0x7e3   : > { %6214 = vst.msk [vmem:[%s12070_s26 + $0x20] sm:$0xff] %vm6209_vm2, %v7254_v26 }
 0x7e7   : > { %v6779_v0 = vpop.f32.mrb[22].mxu1 }
 0x7e8   : > { %v6160_v13 = vadd.f32 %v6779_v0, %v12059_v46  ;;  %v6154_v6 = vpop.f32.mrb[23].mxu1 }
 0x7e9   : > { %v6155_v41 = vadd.f32 %v12059_v46, %v6154_v6  ;;  %v7256_v49 = vpop.eup %7255 }
 0x7ea   : > { %7259 = vtanh.f32 %v6160_v13  ;;  %v7258_v25 = vpop.eup %7257  ;;  %6217 = vst.msk [vmem:[%s12070_s26 + $0x38] sm:$0xff] %vm6209_vm2, %v7256_v49 }
 0x7eb   : > { %7261 = vtanh.f32 %v6155_v41  ;;  %6216 = vst.msk [vmem:[%s12070_s26 + $0x30] sm:$0xff] %vm6209_vm2, %v7258_v25 }
 0x7ef   : > { %v6782_v60 = vpop.f32.mrb[24].mxu1 }
 0x7f0   : > { %v6170_v17 = vadd.f32 %v6782_v60, %v12059_v46  ;;  %v6164_v51 = vpop.f32.mrb[25].mxu1 }
 0x7f1   : > { %v6165_v35 = vadd.f32 %v12059_v46, %v6164_v51 }
 0x7f2   : > { %7263 = vtanh.f32 %v6170_v17 }
 0x7f3   : > { %7265 = vtanh.f32 %v6165_v35 }
 0x7f4   : > { %v7260_v47 = vpop.eup %7259 }
 0x7f5   : > { %v7262_v48 = vpop.eup %7261  ;;  %6219 = vst.msk [vmem:[%s12070_s26 + $0x48] sm:$0xff] %vm6209_vm2, %v7260_v47 }
 0x7f6   : > { %6218 = vst.msk [vmem:[%s12070_s26 + $0x40] sm:$0xff] %vm6209_vm2, %v7262_v48 }
 0x7f7   : > { %v6785_v7 = vpop.f32.mrb[26].mxu1 }
 0x7f8   : > { %v6180_v11 = vadd.f32 %v6785_v7, %v12059_v46  ;;  %v6174_v42 = vpop.f32.mrb[27].mxu1 }
 0x7f9   : > { %v6175_v37 = vadd.f32 %v12059_v46, %v6174_v42 }
 0x7fa   : > { %7267 = vtanh.f32 %v6180_v11 }
 0x7fb   : > { %7269 = vtanh.f32 %v6175_v37 }
 0x7fc   : > { %v7264_v59 = vpop.eup %7263 }
 0x7fd   : > { %v7266_v3 = vpop.eup %7265  ;;  %6221 = vst.msk [vmem:[%s12070_s26 + $0x58] sm:$0xff] %vm6209_vm2, %v7264_v59 }
 0x7fe   : > { %6220 = vst.msk [vmem:[%s12070_s26 + $0x50] sm:$0xff] %vm6209_vm2, %v7266_v3 }
 0x7ff   : > { %v6788_v23 = vpop.f32.mrb[28].mxu1 }
 0x800   : > { %v6190_v28 = vadd.f32 %v6788_v23, %v12059_v46  ;;  %v6184_v21 = vpop.f32.mrb[29].mxu1 }
 0x801   : > { %v6185_v1 = vadd.f32 %v12059_v46, %v6184_v21 }
 0x802   : > { %7271 = vtanh.f32 %v6190_v28 }
 0x803   : > { %7273 = vtanh.f32 %v6185_v1 }
 0x804   : > { %v7268_v43 = vpop.eup %7267 }
 0x805   : > { %v7270_v24 = vpop.eup %7269  ;;  %6223 = vst.msk [vmem:[%s12070_s26 + $0x68] sm:$0xff] %vm6209_vm2, %v7268_v43 }
 0x806   : > { %6222 = vst.msk [vmem:[%s12070_s26 + $0x60] sm:$0xff] %vm6209_vm2, %v7270_v24 }
 0x80c   : > { %v7272_v50 = vpop.eup %7271 }
 0x80d   : > { %v7274_v33 = vpop.eup %7273  ;;  %6225 = vst.msk [vmem:[%s12070_s26 + $0x78] sm:$0xff] %vm6209_vm2, %v7272_v50 }
 0x80e   : > { %6224 = vst.msk [vmem:[%s12070_s26 + $0x70] sm:$0xff] %vm6209_vm2, %v7274_v33 }
 0x80f PF: > { %s21_s11 = sadd.s32 1, %s7285_s11  }
 0x810   : > { %p18_p4 = scmp.ge.s32.totalorder %s21_s11, 4  }
 0x812   :  { %20 = sbr.rel (!%p18_p4) target bundleno = 3 (0x3), region = 86 }

</bundles_post_ra>
